<compile_context>
chip_gen: v6e
topology: v6e:2x2x1
jax: 0.10.0
libtpu: 0.0.40
codegen_flags: <defaults>
</compile_context>

<pallas_src>
import functools

import jax
import jax.numpy as jnp
from jax.experimental import pallas as pl
from jax.experimental.pallas import tpu as pltpu


N_HIDDEN = 45        # CNN1d channel width == ConvEncoder embedding size
C_PAD = 64           # channels padded to 64 -> every conv tap weight is a compact (64, 64)
COMB_DIM = 10
LSTM_HIDDEN = 3
LSTM_PROJ = 1        # kernel recurrence assumes proj_size == 1 (rank-1 recurrent update)
GATE_PAD = 128       # each LSTM gate gets its own 128-lane block
CONV_DEPTH = 5
_EPS = 1e-5


# ----------------------------------------------------------------------------
# Fused Pallas kernel
# ----------------------------------------------------------------------------
def _armodel_kernel(x0_ref, feats_ref, w1_ref, convw_ref, convb_ref,
                    a_ref, bmat_ref, c_ref, wih_ref, bl_ref, whh_ref, whr_ref,
                    out_ref, *, n_samples, seq_len, batch, t_first, depth):
    n = n_samples
    c = C_PAD
    rows = t_first * n                                        # time-major: row = t*n + sample

    # ---- conv layer 1: wrapper-side im2col -> one (rows, 3*C_in) x (3*C_in, 64) matmul.
    y = jnp.dot(x0_ref[...].astype(jnp.bfloat16), w1_ref[...],
                preferred_element_type=jnp.float32)
    h = jnp.maximum(y + convb_ref[0:1, :], 0.0)               # f32 epilogue (v5e-safe)
    hb = h.astype(jnp.bfloat16)

    # ---- conv layers 2..depth, dilated ("a trous") at the layer-1 resolution: per-tap
    #      (64,64) bf16 matmuls; tap shifts are zero-concats of whole (n, 64) time slabs,
    #      which in the time-major layout is exactly the causal zero padding for every
    #      sample (no per-sample masks, no strided gathers, no value reshapes).
    for i in range(depth - 1):
        sh = (1 << i) * n                                     # dilation, in rows
        zpad = jnp.zeros((sh, c), jnp.bfloat16)
        x_m = jnp.concatenate([zpad, hb[:rows - sh]], axis=0)    # A[r - d]   (left tap)
        x_p = jnp.concatenate([hb[sh:], zpad], axis=0)           # A[r + d]   (right tap)
        w_l = convw_ref[3 * i + 0]
        w_c = convw_ref[3 * i + 1]
        w_r = convw_ref[3 * i + 2]
        y = (jnp.dot(x_m, w_l, preferred_element_type=jnp.float32)
             + jnp.dot(hb, w_c, preferred_element_type=jnp.float32)
             + jnp.dot(x_p, w_r, preferred_element_type=jnp.float32))
        h = jnp.maximum(y + convb_ref[i + 1:i + 2, :], 0.0)
        hb = h.astype(jnp.bfloat16)

    # ---- global mean-pool over the valid output slabs (slab stride 2**(depth-1));
    #      the 1/T factor is folded into a_ref.
    slab = 1 << (depth - 1)
    t_final = t_first // slab
    pooled = h[0:n, :]
    for j in range(1, t_final):
        pooled = pooled + h[j * slab * n:(j * slab + 1) * n, :]   # (n, 64) f32

    # ---- feat_encoder(BN+Linear) + combiner(Linear+BN) folded into (a, bmat, c) + SiLU.
    z = (jnp.dot(pooled, a_ref[...], preferred_element_type=jnp.float32)
         + jnp.dot(feats_ref[...], bmat_ref[...], preferred_element_type=jnp.float32)
         + c_ref[...])                                        # (n, 10)
    comb = z * jax.nn.sigmoid(z)                              # SiLU

    # ---- LSTM input projection hoisted out of the serial loop; gates lane-aligned to
    #      their own 128-lane blocks so the extracts below are aligned full-vreg slices.
    gx = (jnp.dot(comb, wih_ref[...], preferred_element_type=jnp.float32)
          + bl_ref[...])                                      # (n, 4*128)
    gi = gx[:, 0 * GATE_PAD:1 * GATE_PAD]
    gf = gx[:, 1 * GATE_PAD:2 * GATE_PAD]
    gg = gx[:, 2 * GATE_PAD:3 * GATE_PAD]
    go = gx[:, 3 * GATE_PAD:4 * GATE_PAD]

    whh = whh_ref[...]                                        # (4, 128), lanes >=3 are zero
    whh_i, whh_f, whh_g, whh_o = whh[0:1], whh[1:2], whh[2:3], whh[3:4]
    whr = whr_ref[...]                                        # (1, 128), lanes >=3 are zero

    # ---- serial recurrence (proj_size=1): rank-1 VPU broadcast-multiplies + EUP
    #      transcendentals + one lane reduce per step; statically unrolled.
    h_t = jnp.zeros((batch, LSTM_PROJ), jnp.float32)
    c_t = jnp.zeros((batch, GATE_PAD), jnp.float32)
    outs = []
    for s in range(seq_len):
        r = s * batch
        i_g = jax.nn.sigmoid(gi[r:r + batch] + h_t * whh_i)
        f_g = jax.nn.sigmoid(gf[r:r + batch] + h_t * whh_f)
        g_g = jnp.tanh(gg[r:r + batch] + h_t * whh_g)
        o_g = jax.nn.sigmoid(go[r:r + batch] + h_t * whh_o)
        c_t = f_g * c_t + i_g * g_g
        h_t = jnp.sum(o_g * jnp.tanh(c_t) * whr, axis=1, keepdims=True)   # (batch, 1)
        outs.append(h_t)

    # single consolidated store after the latency-critical recurrence
    out_ref[...] = jnp.concatenate(outs, axis=0)


# ----------------------------------------------------------------------------
# Parameter preparation (one-time, plain JAX): compact per-tap weights + layer folding
# ----------------------------------------------------------------------------
def init_raw_params(key, n_channels, n_feats):
    keys = iter(jax.random.split(key, 32))

    def rnd(shape, scale=0.1):
        return jax.random.normal(next(keys), shape, jnp.float32) * scale

    conv = []
    cin = n_channels
    for _ in range(CONV_DEPTH):
        conv.append(dict(w=rnd((N_HIDDEN, cin, 3)), b=rnd((N_HIDDEN,))))
        cin = N_HIDDEN

    return dict(
        conv=conv,
        # feat_encoder = BatchNorm1d(n_feats) -> Linear(n_feats, 5)
        bnF_g=jnp.ones((n_feats,)), bnF_b=jnp.zeros((n_feats,)),
        bnF_m=jnp.zeros((n_feats,)), bnF_v=jnp.ones((n_feats,)),
        feat_w=rnd((5, n_feats)), feat_b=rnd((5,)),
        # combiner = Linear(50, 10) -> BatchNorm1d(10) -> SiLU
        comb_w=rnd((COMB_DIM, N_HIDDEN + 5)), comb_b=rnd((COMB_DIM,)),
        bnC_g=jnp.ones((COMB_DIM,)), bnC_b=jnp.zeros((COMB_DIM,)),
        bnC_m=jnp.zeros((COMB_DIM,)), bnC_v=jnp.ones((COMB_DIM,)),
        # LSTM(10, 3, proj_size=1)
        lstm_wih=rnd((4 * LSTM_HIDDEN, COMB_DIM)),
        lstm_whh=rnd((4 * LSTM_HIDDEN, LSTM_PROJ)),
        lstm_bih=rnd((4 * LSTM_HIDDEN,)), lstm_bhh=rnd((4 * LSTM_HIDDEN,)),
        lstm_whr=rnd((LSTM_PROJ, LSTM_HIDDEN)),
    )


def prepare_params(raw, signal_len):
    assert signal_len % (1 << CONV_DEPTH) == 0, "signal_len must be divisible by 2**depth"
    t_final = signal_len >> CONV_DEPTH

    # conv layer 1: compact tap-stacked (3*C_in, 64) weight (pairs with the wrapper im2col)
    w1 = raw["conv"][0]["w"]                                      # (45, c_in, 3)
    w1_cat = jnp.concatenate([w1[:, :, k].T for k in range(3)], axis=0)
    w1_cat = jnp.pad(w1_cat, ((0, 0), (0, C_PAD - N_HIDDEN))).astype(jnp.bfloat16)

    # conv layers 2..depth: per-tap (64, 64) weights, stacked to (3*(depth-1), 64, 64) bf16
    taps = []
    for layer in raw["conv"][1:]:
        w = layer["w"]                                            # (45, 45, 3)
        for k in range(3):                                        # k=0 left, 1 center, 2 right
            taps.append(jnp.pad(w[:, :, k].T,
                                ((0, C_PAD - N_HIDDEN), (0, C_PAD - N_HIDDEN))))
    convw = jnp.stack(taps, axis=0).astype(jnp.bfloat16)          # ~96 KiB total

    convb = jnp.stack([jnp.pad(l["b"], (0, C_PAD - N_HIDDEN)) for l in raw["conv"]],
                      axis=0).astype(jnp.float32)                 # (depth, 64)

    # fold mean-pool (1/t_final), feat_encoder (eval BN + Linear) and combiner BN into
    # (a, bmat, c):  z = pooled @ a + feats @ bmat + c ; comb = SiLU(z)
    s10 = raw["bnC_g"] / jnp.sqrt(raw["bnC_v"] + _EPS)
    t10 = raw["bnC_b"] - raw["bnC_m"] * s10
    s_f = raw["bnF_g"] / jnp.sqrt(raw["bnF_v"] + _EPS)
    t_f = raw["bnF_b"] - raw["bnF_m"] * s_f
    wc_conv = raw["comb_w"][:, :N_HIDDEN]                         # (10, 45)
    wc_feat = raw["comb_w"][:, N_HIDDEN:]                         # (10, 5)
    a_mat = (jnp.pad(wc_conv.T, ((0, C_PAD - N_HIDDEN), (0, 0)))
             * s10[None, :] / t_final)                            # (64, 10)
    b_mat = (s_f[:, None] * raw["feat_w"].T) @ wc_feat.T * s10[None, :]
    c_vec = (((t_f @ raw["feat_w"].T + raw["feat_b"]) @ wc_feat.T + raw["comb_b"])
             * s10 + t10).reshape(1, COMB_DIM)

    # LSTM: lane-align each gate to its own 128-lane block; fold b_ih + b_hh.
    wih = jnp.zeros((COMB_DIM, 4 * GATE_PAD), jnp.float32)
    bl = jnp.zeros((1, 4 * GATE_PAD), jnp.float32)
    whh = jnp.zeros((4, GATE_PAD), jnp.float32)
    for g in range(4):                                            # PyTorch gate order i,f,g,o
        rsel = slice(g * LSTM_HIDDEN, (g + 1) * LSTM_HIDDEN)
        lsel = slice(g * GATE_PAD, g * GATE_PAD + LSTM_HIDDEN)
        wih = wih.at[:, lsel].set(raw["lstm_wih"][rsel, :].T)
        bl = bl.at[0, lsel].set(raw["lstm_bih"][rsel] + raw["lstm_bhh"][rsel])
        whh = whh.at[g, :LSTM_HIDDEN].set(raw["lstm_whh"][rsel, 0])
    whr = jnp.zeros((1, GATE_PAD), jnp.float32).at[0, :LSTM_HIDDEN].set(raw["lstm_whr"][0])

    return dict(w1=w1_cat, convw=convw, convb=convb,
                a=a_mat.astype(jnp.float32), bmat=b_mat.astype(jnp.float32), c=c_vec,
                wih=wih, bl=bl, whh=whh, whr=whr)


# ----------------------------------------------------------------------------
# Forward: one pallas_call for the whole model
# ----------------------------------------------------------------------------
def armodel_forward(signals, feats, params):
    """signals: (S, B, C, L)  feats: (S, B, n_feats)  ->  (S, B)."""
    s, b, c_in, l = signals.shape
    n = s * b
    t1 = l // 2

    # first-layer im2col in plain XLA (time-major): row = t*n + sample,
    # columns = [x[2t-1] chans, x[2t] chans, x[2t+1] chans]  (24 KiB at demo sizes)
    x = jnp.transpose(signals.reshape(n, c_in, l), (2, 0, 1)).astype(jnp.float32)
    x_pad = jnp.concatenate([jnp.zeros((1, n, c_in), jnp.float32), x], axis=0)
    x0 = jnp.concatenate([x_pad[0:l:2], x_pad[1:l + 1:2], x_pad[2:l + 2:2]], axis=-1)
    x0 = x0.reshape(t1 * n, 3 * c_in)
    feats_flat = feats.reshape(n, -1).astype(jnp.float32)

    inputs = (x0, feats_flat, params["w1"], params["convw"], params["convb"],
              params["a"], params["bmat"], params["c"], params["wih"], params["bl"],
              params["whh"], params["whr"])

    out = pl.pallas_call(
        functools.partial(_armodel_kernel, n_samples=n, seq_len=s, batch=b,
                          t_first=t1, depth=CONV_DEPTH),
        out_shape=jax.ShapeDtypeStruct((n, LSTM_PROJ), jnp.float32),
        in_specs=[pl.BlockSpec(memory_space=pltpu.MemorySpace.VMEM)] * len(inputs),
        out_specs=pl.BlockSpec(memory_space=pltpu.MemorySpace.VMEM),
        cost_estimate=pl.CostEstimate(flops=101_000_000, transcendentals=21_000,
                                      bytes_accessed=160_000),
    )(*inputs)

    # PyTorch returns out.squeeze(); for S>1, B>1 that is (S, B).
    return out.reshape(s, b)


if __name__ == "__main__":
    key = jax.random.PRNGKey(0)
    k_sig, k_feat, k_par = jax.random.split(key, 3)

    S, B, C, L, F = 8, 4, 2, 64, 6          # seq, batch, channels, signal len, n_feats
    signals = jax.random.normal(k_sig, (S, B, C, L), jnp.float32)
    feats = jax.random.normal(k_feat, (S, B, F), jnp.float32)

    raw = init_raw_params(k_par, n_channels=C, n_feats=F)
    params = prepare_params(raw, signal_len=L)

    out = jax.jit(armodel_forward)(signals, feats, params)
    out = jax.block_until_ready(out)
    assert out.shape == (S, B), out.shape
    assert bool(jnp.all(jnp.isfinite(out)))
    print("KERNEL_OK")
</pallas_src>

<mosaic_0001>
module attributes {stable_mosaic.version = 11 : i64} {
  func.func @_armodel_kernel(%arg0: memref<1024x6xf32, #tpu.memory_space<vmem>>, %arg1: memref<32x6xf32, #tpu.memory_space<vmem>>, %arg2: memref<6x64xbf16, #tpu.memory_space<vmem>>, %arg3: memref<12x64x64xbf16, #tpu.memory_space<vmem>>, %arg4: memref<5x64xf32, #tpu.memory_space<vmem>>, %arg5: memref<64x10xf32, #tpu.memory_space<vmem>>, %arg6: memref<6x10xf32, #tpu.memory_space<vmem>>, %arg7: memref<1x10xf32, #tpu.memory_space<vmem>>, %arg8: memref<10x512xf32, #tpu.memory_space<vmem>>, %arg9: memref<1x512xf32, #tpu.memory_space<vmem>>, %arg10: memref<4x128xf32, #tpu.memory_space<vmem>>, %arg11: memref<1x128xf32, #tpu.memory_space<vmem>>, %arg12: memref<32x1xf32, #tpu.memory_space<vmem>>) attributes {dimension_semantics = [], scalar_prefetch = 0 : i64, scratch_operands = 0 : i64, tpu.core_type = #tpu.core_type<tc>} {
    %c0 = arith.constant 0 : index
    %c0_0 = arith.constant 0 : index
    %0 = vector.load %arg0[%c0, %c0_0] : memref<1024x6xf32, #tpu.memory_space<vmem>>, vector<1024x6xf32>
    %1 = arith.truncf %0 : vector<1024x6xf32> to vector<1024x6xbf16>
    %c0_1 = arith.constant 0 : index
    %c0_2 = arith.constant 0 : index
    %2 = vector.load %arg2[%c0_1, %c0_2] : memref<6x64xbf16, #tpu.memory_space<vmem>>, vector<6x64xbf16>
    %cst = arith.constant dense<0.000000e+00> : vector<1024x64xf32>
    %3 = tpu.matmul %1, %2, %cst {dimension_numbers = #tpu.dot_dimension_numbers<[1], [0], [0], [1], [0, 0, 1, 1], [], []>} : vector<1024x6xbf16>, vector<6x64xbf16>, vector<1024x64xf32> -> vector<1024x64xf32>
    %c0_3 = arith.constant 0 : index
    %c0_4 = arith.constant 0 : index
    %4 = vector.load %arg4[%c0_3, %c0_4] : memref<5x64xf32, #tpu.memory_space<vmem>>, vector<1x64xf32>
    %5 = vector.broadcast %4 : vector<1x64xf32> to vector<1024x64xf32>
    %6 = arith.addf %3, %5 : vector<1024x64xf32>
    %cst_5 = arith.constant 0.000000e+00 : f32
    %7 = vector.broadcast %cst_5 : f32 to vector<1024x64xf32>
    %8 = arith.maximumf %6, %7 : vector<1024x64xf32>
    %9 = arith.truncf %8 : vector<1024x64xf32> to vector<1024x64xbf16>
    %cst_6 = arith.constant 0.000000e+00 : bf16
    %10 = vector.broadcast %cst_6 : bf16 to vector<32x64xbf16>
    %11 = vector.extract_strided_slice %9 {offsets = [0, 0], sizes = [992, 64], strides = [1, 1]} : vector<1024x64xbf16> to vector<992x64xbf16>
    %12 = tpu.concatenate %10, %11 in 0 : vector<32x64xbf16>, vector<992x64xbf16> -> vector<1024x64xbf16>
    %13 = vector.extract_strided_slice %9 {offsets = [32, 0], sizes = [992, 64], strides = [1, 1]} : vector<1024x64xbf16> to vector<992x64xbf16>
    %14 = tpu.concatenate %13, %10 in 0 : vector<992x64xbf16>, vector<32x64xbf16> -> vector<1024x64xbf16>
    %c0_7 = arith.constant 0 : index
    %c0_8 = arith.constant 0 : index
    %c0_9 = arith.constant 0 : index
    %15 = vector.load %arg3[%c0_7, %c0_8, %c0_9] : memref<12x64x64xbf16, #tpu.memory_space<vmem>>, vector<1x64x64xbf16>
    %16 = vector.shape_cast %15 : vector<1x64x64xbf16> to vector<64x64xbf16>
    %c1 = arith.constant 1 : index
    %c0_10 = arith.constant 0 : index
    %c0_11 = arith.constant 0 : index
    %17 = vector.load %arg3[%c1, %c0_10, %c0_11] : memref<12x64x64xbf16, #tpu.memory_space<vmem>>, vector<1x64x64xbf16>
    %18 = vector.shape_cast %17 : vector<1x64x64xbf16> to vector<64x64xbf16>
    %c2 = arith.constant 2 : index
    %c0_12 = arith.constant 0 : index
    %c0_13 = arith.constant 0 : index
    %19 = vector.load %arg3[%c2, %c0_12, %c0_13] : memref<12x64x64xbf16, #tpu.memory_space<vmem>>, vector<1x64x64xbf16>
    %20 = vector.shape_cast %19 : vector<1x64x64xbf16> to vector<64x64xbf16>
    %cst_14 = arith.constant dense<0.000000e+00> : vector<1024x64xf32>
    %21 = tpu.matmul %12, %16, %cst_14 {dimension_numbers = #tpu.dot_dimension_numbers<[1], [0], [0], [1], [0, 0, 1, 1], [], []>} : vector<1024x64xbf16>, vector<64x64xbf16>, vector<1024x64xf32> -> vector<1024x64xf32>
    %cst_15 = arith.constant dense<0.000000e+00> : vector<1024x64xf32>
    %22 = tpu.matmul %9, %18, %cst_15 {dimension_numbers = #tpu.dot_dimension_numbers<[1], [0], [0], [1], [0, 0, 1, 1], [], []>} : vector<1024x64xbf16>, vector<64x64xbf16>, vector<1024x64xf32> -> vector<1024x64xf32>
    %23 = arith.addf %21, %22 : vector<1024x64xf32>
    %cst_16 = arith.constant dense<0.000000e+00> : vector<1024x64xf32>
    %24 = tpu.matmul %14, %20, %cst_16 {dimension_numbers = #tpu.dot_dimension_numbers<[1], [0], [0], [1], [0, 0, 1, 1], [], []>} : vector<1024x64xbf16>, vector<64x64xbf16>, vector<1024x64xf32> -> vector<1024x64xf32>
    %25 = arith.addf %23, %24 : vector<1024x64xf32>
    %c1_17 = arith.constant 1 : index
    %c0_18 = arith.constant 0 : index
    %26 = vector.load %arg4[%c1_17, %c0_18] : memref<5x64xf32, #tpu.memory_space<vmem>>, vector<1x64xf32>
    %27 = vector.broadcast %26 : vector<1x64xf32> to vector<1024x64xf32>
    %28 = arith.addf %25, %27 : vector<1024x64xf32>
    %cst_19 = arith.constant 0.000000e+00 : f32
    %29 = vector.broadcast %cst_19 : f32 to vector<1024x64xf32>
    %30 = arith.maximumf %28, %29 : vector<1024x64xf32>
    %31 = arith.truncf %30 : vector<1024x64xf32> to vector<1024x64xbf16>
    %cst_20 = arith.constant 0.000000e+00 : bf16
    %32 = vector.broadcast %cst_20 : bf16 to vector<64x64xbf16>
    %33 = vector.extract_strided_slice %31 {offsets = [0, 0], sizes = [960, 64], strides = [1, 1]} : vector<1024x64xbf16> to vector<960x64xbf16>
    %34 = tpu.concatenate %32, %33 in 0 : vector<64x64xbf16>, vector<960x64xbf16> -> vector<1024x64xbf16>
    %35 = vector.extract_strided_slice %31 {offsets = [64, 0], sizes = [960, 64], strides = [1, 1]} : vector<1024x64xbf16> to vector<960x64xbf16>
    %36 = tpu.concatenate %35, %32 in 0 : vector<960x64xbf16>, vector<64x64xbf16> -> vector<1024x64xbf16>
    %c3 = arith.constant 3 : index
    %c0_21 = arith.constant 0 : index
    %c0_22 = arith.constant 0 : index
    %37 = vector.load %arg3[%c3, %c0_21, %c0_22] : memref<12x64x64xbf16, #tpu.memory_space<vmem>>, vector<1x64x64xbf16>
    %38 = vector.shape_cast %37 : vector<1x64x64xbf16> to vector<64x64xbf16>
    %c4 = arith.constant 4 : index
    %c0_23 = arith.constant 0 : index
    %c0_24 = arith.constant 0 : index
    %39 = vector.load %arg3[%c4, %c0_23, %c0_24] : memref<12x64x64xbf16, #tpu.memory_space<vmem>>, vector<1x64x64xbf16>
    %40 = vector.shape_cast %39 : vector<1x64x64xbf16> to vector<64x64xbf16>
    %c5 = arith.constant 5 : index
    %c0_25 = arith.constant 0 : index
    %c0_26 = arith.constant 0 : index
    %41 = vector.load %arg3[%c5, %c0_25, %c0_26] : memref<12x64x64xbf16, #tpu.memory_space<vmem>>, vector<1x64x64xbf16>
    %42 = vector.shape_cast %41 : vector<1x64x64xbf16> to vector<64x64xbf16>
    %cst_27 = arith.constant dense<0.000000e+00> : vector<1024x64xf32>
    %43 = tpu.matmul %34, %38, %cst_27 {dimension_numbers = #tpu.dot_dimension_numbers<[1], [0], [0], [1], [0, 0, 1, 1], [], []>} : vector<1024x64xbf16>, vector<64x64xbf16>, vector<1024x64xf32> -> vector<1024x64xf32>
    %cst_28 = arith.constant dense<0.000000e+00> : vector<1024x64xf32>
    %44 = tpu.matmul %31, %40, %cst_28 {dimension_numbers = #tpu.dot_dimension_numbers<[1], [0], [0], [1], [0, 0, 1, 1], [], []>} : vector<1024x64xbf16>, vector<64x64xbf16>, vector<1024x64xf32> -> vector<1024x64xf32>
    %45 = arith.addf %43, %44 : vector<1024x64xf32>
    %cst_29 = arith.constant dense<0.000000e+00> : vector<1024x64xf32>
    %46 = tpu.matmul %36, %42, %cst_29 {dimension_numbers = #tpu.dot_dimension_numbers<[1], [0], [0], [1], [0, 0, 1, 1], [], []>} : vector<1024x64xbf16>, vector<64x64xbf16>, vector<1024x64xf32> -> vector<1024x64xf32>
    %47 = arith.addf %45, %46 : vector<1024x64xf32>
    %c2_30 = arith.constant 2 : index
    %c0_31 = arith.constant 0 : index
    %48 = vector.load %arg4[%c2_30, %c0_31] : memref<5x64xf32, #tpu.memory_space<vmem>>, vector<1x64xf32>
    %49 = vector.broadcast %48 : vector<1x64xf32> to vector<1024x64xf32>
    %50 = arith.addf %47, %49 : vector<1024x64xf32>
    %cst_32 = arith.constant 0.000000e+00 : f32
    %51 = vector.broadcast %cst_32 : f32 to vector<1024x64xf32>
    %52 = arith.maximumf %50, %51 : vector<1024x64xf32>
    %53 = arith.truncf %52 : vector<1024x64xf32> to vector<1024x64xbf16>
    %cst_33 = arith.constant 0.000000e+00 : bf16
    %54 = vector.broadcast %cst_33 : bf16 to vector<128x64xbf16>
    %55 = vector.extract_strided_slice %53 {offsets = [0, 0], sizes = [896, 64], strides = [1, 1]} : vector<1024x64xbf16> to vector<896x64xbf16>
    %56 = tpu.concatenate %54, %55 in 0 : vector<128x64xbf16>, vector<896x64xbf16> -> vector<1024x64xbf16>
    %57 = vector.extract_strided_slice %53 {offsets = [128, 0], sizes = [896, 64], strides = [1, 1]} : vector<1024x64xbf16> to vector<896x64xbf16>
    %58 = tpu.concatenate %57, %54 in 0 : vector<896x64xbf16>, vector<128x64xbf16> -> vector<1024x64xbf16>
    %c6 = arith.constant 6 : index
    %c0_34 = arith.constant 0 : index
    %c0_35 = arith.constant 0 : index
    %59 = vector.load %arg3[%c6, %c0_34, %c0_35] : memref<12x64x64xbf16, #tpu.memory_space<vmem>>, vector<1x64x64xbf16>
    %60 = vector.shape_cast %59 : vector<1x64x64xbf16> to vector<64x64xbf16>
    %c7 = arith.constant 7 : index
    %c0_36 = arith.constant 0 : index
    %c0_37 = arith.constant 0 : index
    %61 = vector.load %arg3[%c7, %c0_36, %c0_37] : memref<12x64x64xbf16, #tpu.memory_space<vmem>>, vector<1x64x64xbf16>
    %62 = vector.shape_cast %61 : vector<1x64x64xbf16> to vector<64x64xbf16>
    %c8 = arith.constant 8 : index
    %c0_38 = arith.constant 0 : index
    %c0_39 = arith.constant 0 : index
    %63 = vector.load %arg3[%c8, %c0_38, %c0_39] : memref<12x64x64xbf16, #tpu.memory_space<vmem>>, vector<1x64x64xbf16>
    %64 = vector.shape_cast %63 : vector<1x64x64xbf16> to vector<64x64xbf16>
    %cst_40 = arith.constant dense<0.000000e+00> : vector<1024x64xf32>
    %65 = tpu.matmul %56, %60, %cst_40 {dimension_numbers = #tpu.dot_dimension_numbers<[1], [0], [0], [1], [0, 0, 1, 1], [], []>} : vector<1024x64xbf16>, vector<64x64xbf16>, vector<1024x64xf32> -> vector<1024x64xf32>
    %cst_41 = arith.constant dense<0.000000e+00> : vector<1024x64xf32>
    %66 = tpu.matmul %53, %62, %cst_41 {dimension_numbers = #tpu.dot_dimension_numbers<[1], [0], [0], [1], [0, 0, 1, 1], [], []>} : vector<1024x64xbf16>, vector<64x64xbf16>, vector<1024x64xf32> -> vector<1024x64xf32>
    %67 = arith.addf %65, %66 : vector<1024x64xf32>
    %cst_42 = arith.constant dense<0.000000e+00> : vector<1024x64xf32>
    %68 = tpu.matmul %58, %64, %cst_42 {dimension_numbers = #tpu.dot_dimension_numbers<[1], [0], [0], [1], [0, 0, 1, 1], [], []>} : vector<1024x64xbf16>, vector<64x64xbf16>, vector<1024x64xf32> -> vector<1024x64xf32>
    %69 = arith.addf %67, %68 : vector<1024x64xf32>
    %c3_43 = arith.constant 3 : index
    %c0_44 = arith.constant 0 : index
    %70 = vector.load %arg4[%c3_43, %c0_44] : memref<5x64xf32, #tpu.memory_space<vmem>>, vector<1x64xf32>
    %71 = vector.broadcast %70 : vector<1x64xf32> to vector<1024x64xf32>
    %72 = arith.addf %69, %71 : vector<1024x64xf32>
    %cst_45 = arith.constant 0.000000e+00 : f32
    %73 = vector.broadcast %cst_45 : f32 to vector<1024x64xf32>
    %74 = arith.maximumf %72, %73 : vector<1024x64xf32>
    %75 = arith.truncf %74 : vector<1024x64xf32> to vector<1024x64xbf16>
    %cst_46 = arith.constant 0.000000e+00 : bf16
    %76 = vector.broadcast %cst_46 : bf16 to vector<256x64xbf16>
    %77 = vector.extract_strided_slice %75 {offsets = [0, 0], sizes = [768, 64], strides = [1, 1]} : vector<1024x64xbf16> to vector<768x64xbf16>
    %78 = tpu.concatenate %76, %77 in 0 : vector<256x64xbf16>, vector<768x64xbf16> -> vector<1024x64xbf16>
    %79 = vector.extract_strided_slice %75 {offsets = [256, 0], sizes = [768, 64], strides = [1, 1]} : vector<1024x64xbf16> to vector<768x64xbf16>
    %80 = tpu.concatenate %79, %76 in 0 : vector<768x64xbf16>, vector<256x64xbf16> -> vector<1024x64xbf16>
    %c9 = arith.constant 9 : index
    %c0_47 = arith.constant 0 : index
    %c0_48 = arith.constant 0 : index
    %81 = vector.load %arg3[%c9, %c0_47, %c0_48] : memref<12x64x64xbf16, #tpu.memory_space<vmem>>, vector<1x64x64xbf16>
    %82 = vector.shape_cast %81 : vector<1x64x64xbf16> to vector<64x64xbf16>
    %c10 = arith.constant 10 : index
    %c0_49 = arith.constant 0 : index
    %c0_50 = arith.constant 0 : index
    %83 = vector.load %arg3[%c10, %c0_49, %c0_50] : memref<12x64x64xbf16, #tpu.memory_space<vmem>>, vector<1x64x64xbf16>
    %84 = vector.shape_cast %83 : vector<1x64x64xbf16> to vector<64x64xbf16>
    %c11 = arith.constant 11 : index
    %c0_51 = arith.constant 0 : index
    %c0_52 = arith.constant 0 : index
    %85 = vector.load %arg3[%c11, %c0_51, %c0_52] : memref<12x64x64xbf16, #tpu.memory_space<vmem>>, vector<1x64x64xbf16>
    %86 = vector.shape_cast %85 : vector<1x64x64xbf16> to vector<64x64xbf16>
    %cst_53 = arith.constant dense<0.000000e+00> : vector<1024x64xf32>
    %87 = tpu.matmul %78, %82, %cst_53 {dimension_numbers = #tpu.dot_dimension_numbers<[1], [0], [0], [1], [0, 0, 1, 1], [], []>} : vector<1024x64xbf16>, vector<64x64xbf16>, vector<1024x64xf32> -> vector<1024x64xf32>
    %cst_54 = arith.constant dense<0.000000e+00> : vector<1024x64xf32>
    %88 = tpu.matmul %75, %84, %cst_54 {dimension_numbers = #tpu.dot_dimension_numbers<[1], [0], [0], [1], [0, 0, 1, 1], [], []>} : vector<1024x64xbf16>, vector<64x64xbf16>, vector<1024x64xf32> -> vector<1024x64xf32>
    %89 = arith.addf %87, %88 : vector<1024x64xf32>
    %cst_55 = arith.constant dense<0.000000e+00> : vector<1024x64xf32>
    %90 = tpu.matmul %80, %86, %cst_55 {dimension_numbers = #tpu.dot_dimension_numbers<[1], [0], [0], [1], [0, 0, 1, 1], [], []>} : vector<1024x64xbf16>, vector<64x64xbf16>, vector<1024x64xf32> -> vector<1024x64xf32>
    %91 = arith.addf %89, %90 : vector<1024x64xf32>
    %c4_56 = arith.constant 4 : index
    %c0_57 = arith.constant 0 : index
    %92 = vector.load %arg4[%c4_56, %c0_57] : memref<5x64xf32, #tpu.memory_space<vmem>>, vector<1x64xf32>
    %93 = vector.broadcast %92 : vector<1x64xf32> to vector<1024x64xf32>
    %94 = arith.addf %91, %93 : vector<1024x64xf32>
    %cst_58 = arith.constant 0.000000e+00 : f32
    %95 = vector.broadcast %cst_58 : f32 to vector<1024x64xf32>
    %96 = arith.maximumf %94, %95 : vector<1024x64xf32>
    %97 = vector.extract_strided_slice %96 {offsets = [0, 0], sizes = [32, 64], strides = [1, 1]} : vector<1024x64xf32> to vector<32x64xf32>
    %98 = vector.extract_strided_slice %96 {offsets = [512, 0], sizes = [32, 64], strides = [1, 1]} : vector<1024x64xf32> to vector<32x64xf32>
    %99 = arith.addf %97, %98 : vector<32x64xf32>
    %c0_59 = arith.constant 0 : index
    %c0_60 = arith.constant 0 : index
    %100 = vector.load %arg5[%c0_59, %c0_60] : memref<64x10xf32, #tpu.memory_space<vmem>>, vector<64x10xf32>
    %cst_61 = arith.constant dense<0.000000e+00> : vector<32x10xf32>
    %101 = tpu.matmul %99, %100, %cst_61 {dimension_numbers = #tpu.dot_dimension_numbers<[1], [0], [0], [1], [0, 0, 1, 1], [], []>} : vector<32x64xf32>, vector<64x10xf32>, vector<32x10xf32> -> vector<32x10xf32>
    %c0_62 = arith.constant 0 : index
    %c0_63 = arith.constant 0 : index
    %102 = vector.load %arg1[%c0_62, %c0_63] : memref<32x6xf32, #tpu.memory_space<vmem>>, vector<32x6xf32>
    %c0_64 = arith.constant 0 : index
    %c0_65 = arith.constant 0 : index
    %103 = vector.load %arg6[%c0_64, %c0_65] : memref<6x10xf32, #tpu.memory_space<vmem>>, vector<6x10xf32>
    %cst_66 = arith.constant dense<0.000000e+00> : vector<32x10xf32>
    %104 = tpu.matmul %102, %103, %cst_66 {dimension_numbers = #tpu.dot_dimension_numbers<[1], [0], [0], [1], [0, 0, 1, 1], [], []>} : vector<32x6xf32>, vector<6x10xf32>, vector<32x10xf32> -> vector<32x10xf32>
    %105 = arith.addf %101, %104 : vector<32x10xf32>
    %c0_67 = arith.constant 0 : index
    %c0_68 = arith.constant 0 : index
    %106 = vector.load %arg7[%c0_67, %c0_68] : memref<1x10xf32, #tpu.memory_space<vmem>>, vector<1x10xf32>
    %107 = vector.broadcast %106 : vector<1x10xf32> to vector<32x10xf32>
    %108 = arith.addf %105, %107 : vector<32x10xf32>
    %109 = arith.negf %108 : vector<32x10xf32>
    %110 = math.exp %109 : vector<32x10xf32>
    %cst_69 = arith.constant 1.000000e+00 : f32
    %111 = vector.broadcast %cst_69 : f32 to vector<32x10xf32>
    %112 = arith.addf %111, %110 : vector<32x10xf32>
    %113 = arith.divf %111, %112 : vector<32x10xf32>
    %114 = arith.mulf %108, %113 : vector<32x10xf32>
    %c0_70 = arith.constant 0 : index
    %c0_71 = arith.constant 0 : index
    %115 = vector.load %arg8[%c0_70, %c0_71] : memref<10x512xf32, #tpu.memory_space<vmem>>, vector<10x512xf32>
    %cst_72 = arith.constant dense<0.000000e+00> : vector<32x512xf32>
    %116 = tpu.matmul %114, %115, %cst_72 {dimension_numbers = #tpu.dot_dimension_numbers<[1], [0], [0], [1], [0, 0, 1, 1], [], []>} : vector<32x10xf32>, vector<10x512xf32>, vector<32x512xf32> -> vector<32x512xf32>
    %c0_73 = arith.constant 0 : index
    %c0_74 = arith.constant 0 : index
    %117 = vector.load %arg9[%c0_73, %c0_74] : memref<1x512xf32, #tpu.memory_space<vmem>>, vector<1x512xf32>
    %118 = vector.broadcast %117 : vector<1x512xf32> to vector<32x512xf32>
    %119 = arith.addf %116, %118 : vector<32x512xf32>
    %120 = vector.extract_strided_slice %119 {offsets = [0, 0], sizes = [32, 128], strides = [1, 1]} : vector<32x512xf32> to vector<32x128xf32>
    %121 = vector.extract_strided_slice %119 {offsets = [0, 128], sizes = [32, 128], strides = [1, 1]} : vector<32x512xf32> to vector<32x128xf32>
    %122 = vector.extract_strided_slice %119 {offsets = [0, 256], sizes = [32, 128], strides = [1, 1]} : vector<32x512xf32> to vector<32x128xf32>
    %123 = vector.extract_strided_slice %119 {offsets = [0, 384], sizes = [32, 128], strides = [1, 1]} : vector<32x512xf32> to vector<32x128xf32>
    %c0_75 = arith.constant 0 : index
    %c0_76 = arith.constant 0 : index
    %124 = vector.load %arg10[%c0_75, %c0_76] : memref<4x128xf32, #tpu.memory_space<vmem>>, vector<4x128xf32>
    %125 = vector.extract_strided_slice %124 {offsets = [0, 0], sizes = [1, 128], strides = [1, 1]} : vector<4x128xf32> to vector<1x128xf32>
    %126 = vector.extract_strided_slice %124 {offsets = [1, 0], sizes = [1, 128], strides = [1, 1]} : vector<4x128xf32> to vector<1x128xf32>
    %127 = vector.extract_strided_slice %124 {offsets = [2, 0], sizes = [1, 128], strides = [1, 1]} : vector<4x128xf32> to vector<1x128xf32>
    %128 = vector.extract_strided_slice %124 {offsets = [3, 0], sizes = [1, 128], strides = [1, 1]} : vector<4x128xf32> to vector<1x128xf32>
    %c0_77 = arith.constant 0 : index
    %c0_78 = arith.constant 0 : index
    %129 = vector.load %arg11[%c0_77, %c0_78] : memref<1x128xf32, #tpu.memory_space<vmem>>, vector<1x128xf32>
    %cst_79 = arith.constant 0.000000e+00 : f32
    %130 = vector.broadcast %cst_79 : f32 to vector<4x1xf32>
    %cst_80 = arith.constant 0.000000e+00 : f32
    %131 = vector.broadcast %cst_80 : f32 to vector<4x128xf32>
    %132 = vector.extract_strided_slice %120 {offsets = [0, 0], sizes = [4, 128], strides = [1, 1]} : vector<32x128xf32> to vector<4x128xf32>
    %133 = vector.broadcast %130 : vector<4x1xf32> to vector<4x128xf32>
    %134 = vector.broadcast %125 : vector<1x128xf32> to vector<4x128xf32>
    %135 = arith.mulf %133, %134 : vector<4x128xf32>
    %136 = arith.addf %132, %135 : vector<4x128xf32>
    %137 = arith.negf %136 : vector<4x128xf32>
    %138 = math.exp %137 : vector<4x128xf32>
    %cst_81 = arith.constant 1.000000e+00 : f32
    %139 = vector.broadcast %cst_81 : f32 to vector<4x128xf32>
    %140 = arith.addf %139, %138 : vector<4x128xf32>
    %141 = arith.divf %139, %140 : vector<4x128xf32>
    %142 = vector.extract_strided_slice %121 {offsets = [0, 0], sizes = [4, 128], strides = [1, 1]} : vector<32x128xf32> to vector<4x128xf32>
    %143 = vector.broadcast %130 : vector<4x1xf32> to vector<4x128xf32>
    %144 = vector.broadcast %126 : vector<1x128xf32> to vector<4x128xf32>
    %145 = arith.mulf %143, %144 : vector<4x128xf32>
    %146 = arith.addf %142, %145 : vector<4x128xf32>
    %147 = arith.negf %146 : vector<4x128xf32>
    %148 = math.exp %147 : vector<4x128xf32>
    %cst_82 = arith.constant 1.000000e+00 : f32
    %149 = vector.broadcast %cst_82 : f32 to vector<4x128xf32>
    %150 = arith.addf %149, %148 : vector<4x128xf32>
    %151 = arith.divf %149, %150 : vector<4x128xf32>
    %152 = vector.extract_strided_slice %122 {offsets = [0, 0], sizes = [4, 128], strides = [1, 1]} : vector<32x128xf32> to vector<4x128xf32>
    %153 = vector.broadcast %130 : vector<4x1xf32> to vector<4x128xf32>
    %154 = vector.broadcast %127 : vector<1x128xf32> to vector<4x128xf32>
    %155 = arith.mulf %153, %154 : vector<4x128xf32>
    %156 = arith.addf %152, %155 : vector<4x128xf32>
    %157 = math.tanh %156 : vector<4x128xf32>
    %158 = vector.extract_strided_slice %123 {offsets = [0, 0], sizes = [4, 128], strides = [1, 1]} : vector<32x128xf32> to vector<4x128xf32>
    %159 = vector.broadcast %130 : vector<4x1xf32> to vector<4x128xf32>
    %160 = vector.broadcast %128 : vector<1x128xf32> to vector<4x128xf32>
    %161 = arith.mulf %159, %160 : vector<4x128xf32>
    %162 = arith.addf %158, %161 : vector<4x128xf32>
    %163 = arith.negf %162 : vector<4x128xf32>
    %164 = math.exp %163 : vector<4x128xf32>
    %cst_83 = arith.constant 1.000000e+00 : f32
    %165 = vector.broadcast %cst_83 : f32 to vector<4x128xf32>
    %166 = arith.addf %165, %164 : vector<4x128xf32>
    %167 = arith.divf %165, %166 : vector<4x128xf32>
    %168 = arith.mulf %151, %131 : vector<4x128xf32>
    %169 = arith.mulf %141, %157 : vector<4x128xf32>
    %170 = arith.addf %168, %169 : vector<4x128xf32>
    %171 = math.tanh %170 : vector<4x128xf32>
    %172 = arith.mulf %167, %171 : vector<4x128xf32>
    %173 = vector.broadcast %129 : vector<1x128xf32> to vector<4x128xf32>
    %174 = arith.mulf %172, %173 : vector<4x128xf32>
    %cst_84 = arith.constant dense<0.000000e+00> : vector<4xf32>
    %175 = vector.multi_reduction <add>, %174, %cst_84 [1] : vector<4x128xf32> to vector<4xf32>
    %176 = vector.shape_cast %175 : vector<4xf32> to vector<4x1xf32>
    %177 = vector.extract_strided_slice %120 {offsets = [4, 0], sizes = [4, 128], strides = [1, 1]} : vector<32x128xf32> to vector<4x128xf32>
    %178 = vector.broadcast %176 : vector<4x1xf32> to vector<4x128xf32>
    %179 = vector.broadcast %125 : vector<1x128xf32> to vector<4x128xf32>
    %180 = arith.mulf %178, %179 : vector<4x128xf32>
    %181 = arith.addf %177, %180 : vector<4x128xf32>
    %182 = arith.negf %181 : vector<4x128xf32>
    %183 = math.exp %182 : vector<4x128xf32>
    %cst_85 = arith.constant 1.000000e+00 : f32
    %184 = vector.broadcast %cst_85 : f32 to vector<4x128xf32>
    %185 = arith.addf %184, %183 : vector<4x128xf32>
    %186 = arith.divf %184, %185 : vector<4x128xf32>
    %187 = vector.extract_strided_slice %121 {offsets = [4, 0], sizes = [4, 128], strides = [1, 1]} : vector<32x128xf32> to vector<4x128xf32>
    %188 = vector.broadcast %176 : vector<4x1xf32> to vector<4x128xf32>
    %189 = vector.broadcast %126 : vector<1x128xf32> to vector<4x128xf32>
    %190 = arith.mulf %188, %189 : vector<4x128xf32>
    %191 = arith.addf %187, %190 : vector<4x128xf32>
    %192 = arith.negf %191 : vector<4x128xf32>
    %193 = math.exp %192 : vector<4x128xf32>
    %cst_86 = arith.constant 1.000000e+00 : f32
    %194 = vector.broadcast %cst_86 : f32 to vector<4x128xf32>
    %195 = arith.addf %194, %193 : vector<4x128xf32>
    %196 = arith.divf %194, %195 : vector<4x128xf32>
    %197 = vector.extract_strided_slice %122 {offsets = [4, 0], sizes = [4, 128], strides = [1, 1]} : vector<32x128xf32> to vector<4x128xf32>
    %198 = vector.broadcast %176 : vector<4x1xf32> to vector<4x128xf32>
    %199 = vector.broadcast %127 : vector<1x128xf32> to vector<4x128xf32>
    %200 = arith.mulf %198, %199 : vector<4x128xf32>
    %201 = arith.addf %197, %200 : vector<4x128xf32>
    %202 = math.tanh %201 : vector<4x128xf32>
    %203 = vector.extract_strided_slice %123 {offsets = [4, 0], sizes = [4, 128], strides = [1, 1]} : vector<32x128xf32> to vector<4x128xf32>
    %204 = vector.broadcast %176 : vector<4x1xf32> to vector<4x128xf32>
    %205 = vector.broadcast %128 : vector<1x128xf32> to vector<4x128xf32>
    %206 = arith.mulf %204, %205 : vector<4x128xf32>
    %207 = arith.addf %203, %206 : vector<4x128xf32>
    %208 = arith.negf %207 : vector<4x128xf32>
    %209 = math.exp %208 : vector<4x128xf32>
    %cst_87 = arith.constant 1.000000e+00 : f32
    %210 = vector.broadcast %cst_87 : f32 to vector<4x128xf32>
    %211 = arith.addf %210, %209 : vector<4x128xf32>
    %212 = arith.divf %210, %211 : vector<4x128xf32>
    %213 = arith.mulf %196, %170 : vector<4x128xf32>
    %214 = arith.mulf %186, %202 : vector<4x128xf32>
    %215 = arith.addf %213, %214 : vector<4x128xf32>
    %216 = math.tanh %215 : vector<4x128xf32>
    %217 = arith.mulf %212, %216 : vector<4x128xf32>
    %218 = vector.broadcast %129 : vector<1x128xf32> to vector<4x128xf32>
    %219 = arith.mulf %217, %218 : vector<4x128xf32>
    %cst_88 = arith.constant dense<0.000000e+00> : vector<4xf32>
    %220 = vector.multi_reduction <add>, %219, %cst_88 [1] : vector<4x128xf32> to vector<4xf32>
    %221 = vector.shape_cast %220 : vector<4xf32> to vector<4x1xf32>
    %222 = vector.extract_strided_slice %120 {offsets = [8, 0], sizes = [4, 128], strides = [1, 1]} : vector<32x128xf32> to vector<4x128xf32>
    %223 = vector.broadcast %221 : vector<4x1xf32> to vector<4x128xf32>
    %224 = vector.broadcast %125 : vector<1x128xf32> to vector<4x128xf32>
    %225 = arith.mulf %223, %224 : vector<4x128xf32>
    %226 = arith.addf %222, %225 : vector<4x128xf32>
    %227 = arith.negf %226 : vector<4x128xf32>
    %228 = math.exp %227 : vector<4x128xf32>
    %cst_89 = arith.constant 1.000000e+00 : f32
    %229 = vector.broadcast %cst_89 : f32 to vector<4x128xf32>
    %230 = arith.addf %229, %228 : vector<4x128xf32>
    %231 = arith.divf %229, %230 : vector<4x128xf32>
    %232 = vector.extract_strided_slice %121 {offsets = [8, 0], sizes = [4, 128], strides = [1, 1]} : vector<32x128xf32> to vector<4x128xf32>
    %233 = vector.broadcast %221 : vector<4x1xf32> to vector<4x128xf32>
    %234 = vector.broadcast %126 : vector<1x128xf32> to vector<4x128xf32>
    %235 = arith.mulf %233, %234 : vector<4x128xf32>
    %236 = arith.addf %232, %235 : vector<4x128xf32>
    %237 = arith.negf %236 : vector<4x128xf32>
    %238 = math.exp %237 : vector<4x128xf32>
    %cst_90 = arith.constant 1.000000e+00 : f32
    %239 = vector.broadcast %cst_90 : f32 to vector<4x128xf32>
    %240 = arith.addf %239, %238 : vector<4x128xf32>
    %241 = arith.divf %239, %240 : vector<4x128xf32>
    %242 = vector.extract_strided_slice %122 {offsets = [8, 0], sizes = [4, 128], strides = [1, 1]} : vector<32x128xf32> to vector<4x128xf32>
    %243 = vector.broadcast %221 : vector<4x1xf32> to vector<4x128xf32>
    %244 = vector.broadcast %127 : vector<1x128xf32> to vector<4x128xf32>
    %245 = arith.mulf %243, %244 : vector<4x128xf32>
    %246 = arith.addf %242, %245 : vector<4x128xf32>
    %247 = math.tanh %246 : vector<4x128xf32>
    %248 = vector.extract_strided_slice %123 {offsets = [8, 0], sizes = [4, 128], strides = [1, 1]} : vector<32x128xf32> to vector<4x128xf32>
    %249 = vector.broadcast %221 : vector<4x1xf32> to vector<4x128xf32>
    %250 = vector.broadcast %128 : vector<1x128xf32> to vector<4x128xf32>
    %251 = arith.mulf %249, %250 : vector<4x128xf32>
    %252 = arith.addf %248, %251 : vector<4x128xf32>
    %253 = arith.negf %252 : vector<4x128xf32>
    %254 = math.exp %253 : vector<4x128xf32>
    %cst_91 = arith.constant 1.000000e+00 : f32
    %255 = vector.broadcast %cst_91 : f32 to vector<4x128xf32>
    %256 = arith.addf %255, %254 : vector<4x128xf32>
    %257 = arith.divf %255, %256 : vector<4x128xf32>
    %258 = arith.mulf %241, %215 : vector<4x128xf32>
    %259 = arith.mulf %231, %247 : vector<4x128xf32>
    %260 = arith.addf %258, %259 : vector<4x128xf32>
    %261 = math.tanh %260 : vector<4x128xf32>
    %262 = arith.mulf %257, %261 : vector<4x128xf32>
    %263 = vector.broadcast %129 : vector<1x128xf32> to vector<4x128xf32>
    %264 = arith.mulf %262, %263 : vector<4x128xf32>
    %cst_92 = arith.constant dense<0.000000e+00> : vector<4xf32>
    %265 = vector.multi_reduction <add>, %264, %cst_92 [1] : vector<4x128xf32> to vector<4xf32>
    %266 = vector.shape_cast %265 : vector<4xf32> to vector<4x1xf32>
    %267 = vector.extract_strided_slice %120 {offsets = [12, 0], sizes = [4, 128], strides = [1, 1]} : vector<32x128xf32> to vector<4x128xf32>
    %268 = vector.broadcast %266 : vector<4x1xf32> to vector<4x128xf32>
    %269 = vector.broadcast %125 : vector<1x128xf32> to vector<4x128xf32>
    %270 = arith.mulf %268, %269 : vector<4x128xf32>
    %271 = arith.addf %267, %270 : vector<4x128xf32>
    %272 = arith.negf %271 : vector<4x128xf32>
    %273 = math.exp %272 : vector<4x128xf32>
    %cst_93 = arith.constant 1.000000e+00 : f32
    %274 = vector.broadcast %cst_93 : f32 to vector<4x128xf32>
    %275 = arith.addf %274, %273 : vector<4x128xf32>
    %276 = arith.divf %274, %275 : vector<4x128xf32>
    %277 = vector.extract_strided_slice %121 {offsets = [12, 0], sizes = [4, 128], strides = [1, 1]} : vector<32x128xf32> to vector<4x128xf32>
    %278 = vector.broadcast %266 : vector<4x1xf32> to vector<4x128xf32>
    %279 = vector.broadcast %126 : vector<1x128xf32> to vector<4x128xf32>
    %280 = arith.mulf %278, %279 : vector<4x128xf32>
    %281 = arith.addf %277, %280 : vector<4x128xf32>
    %282 = arith.negf %281 : vector<4x128xf32>
    %283 = math.exp %282 : vector<4x128xf32>
    %cst_94 = arith.constant 1.000000e+00 : f32
    %284 = vector.broadcast %cst_94 : f32 to vector<4x128xf32>
    %285 = arith.addf %284, %283 : vector<4x128xf32>
    %286 = arith.divf %284, %285 : vector<4x128xf32>
    %287 = vector.extract_strided_slice %122 {offsets = [12, 0], sizes = [4, 128], strides = [1, 1]} : vector<32x128xf32> to vector<4x128xf32>
    %288 = vector.broadcast %266 : vector<4x1xf32> to vector<4x128xf32>
    %289 = vector.broadcast %127 : vector<1x128xf32> to vector<4x128xf32>
    %290 = arith.mulf %288, %289 : vector<4x128xf32>
    %291 = arith.addf %287, %290 : vector<4x128xf32>
    %292 = math.tanh %291 : vector<4x128xf32>
    %293 = vector.extract_strided_slice %123 {offsets = [12, 0], sizes = [4, 128], strides = [1, 1]} : vector<32x128xf32> to vector<4x128xf32>
    %294 = vector.broadcast %266 : vector<4x1xf32> to vector<4x128xf32>
    %295 = vector.broadcast %128 : vector<1x128xf32> to vector<4x128xf32>
    %296 = arith.mulf %294, %295 : vector<4x128xf32>
    %297 = arith.addf %293, %296 : vector<4x128xf32>
    %298 = arith.negf %297 : vector<4x128xf32>
    %299 = math.exp %298 : vector<4x128xf32>
    %cst_95 = arith.constant 1.000000e+00 : f32
    %300 = vector.broadcast %cst_95 : f32 to vector<4x128xf32>
    %301 = arith.addf %300, %299 : vector<4x128xf32>
    %302 = arith.divf %300, %301 : vector<4x128xf32>
    %303 = arith.mulf %286, %260 : vector<4x128xf32>
    %304 = arith.mulf %276, %292 : vector<4x128xf32>
    %305 = arith.addf %303, %304 : vector<4x128xf32>
    %306 = math.tanh %305 : vector<4x128xf32>
    %307 = arith.mulf %302, %306 : vector<4x128xf32>
    %308 = vector.broadcast %129 : vector<1x128xf32> to vector<4x128xf32>
    %309 = arith.mulf %307, %308 : vector<4x128xf32>
    %cst_96 = arith.constant dense<0.000000e+00> : vector<4xf32>
    %310 = vector.multi_reduction <add>, %309, %cst_96 [1] : vector<4x128xf32> to vector<4xf32>
    %311 = vector.shape_cast %310 : vector<4xf32> to vector<4x1xf32>
    %312 = vector.extract_strided_slice %120 {offsets = [16, 0], sizes = [4, 128], strides = [1, 1]} : vector<32x128xf32> to vector<4x128xf32>
    %313 = vector.broadcast %311 : vector<4x1xf32> to vector<4x128xf32>
    %314 = vector.broadcast %125 : vector<1x128xf32> to vector<4x128xf32>
    %315 = arith.mulf %313, %314 : vector<4x128xf32>
    %316 = arith.addf %312, %315 : vector<4x128xf32>
    %317 = arith.negf %316 : vector<4x128xf32>
    %318 = math.exp %317 : vector<4x128xf32>
    %cst_97 = arith.constant 1.000000e+00 : f32
    %319 = vector.broadcast %cst_97 : f32 to vector<4x128xf32>
    %320 = arith.addf %319, %318 : vector<4x128xf32>
    %321 = arith.divf %319, %320 : vector<4x128xf32>
    %322 = vector.extract_strided_slice %121 {offsets = [16, 0], sizes = [4, 128], strides = [1, 1]} : vector<32x128xf32> to vector<4x128xf32>
    %323 = vector.broadcast %311 : vector<4x1xf32> to vector<4x128xf32>
    %324 = vector.broadcast %126 : vector<1x128xf32> to vector<4x128xf32>
    %325 = arith.mulf %323, %324 : vector<4x128xf32>
    %326 = arith.addf %322, %325 : vector<4x128xf32>
    %327 = arith.negf %326 : vector<4x128xf32>
    %328 = math.exp %327 : vector<4x128xf32>
    %cst_98 = arith.constant 1.000000e+00 : f32
    %329 = vector.broadcast %cst_98 : f32 to vector<4x128xf32>
    %330 = arith.addf %329, %328 : vector<4x128xf32>
    %331 = arith.divf %329, %330 : vector<4x128xf32>
    %332 = vector.extract_strided_slice %122 {offsets = [16, 0], sizes = [4, 128], strides = [1, 1]} : vector<32x128xf32> to vector<4x128xf32>
    %333 = vector.broadcast %311 : vector<4x1xf32> to vector<4x128xf32>
    %334 = vector.broadcast %127 : vector<1x128xf32> to vector<4x128xf32>
    %335 = arith.mulf %333, %334 : vector<4x128xf32>
    %336 = arith.addf %332, %335 : vector<4x128xf32>
    %337 = math.tanh %336 : vector<4x128xf32>
    %338 = vector.extract_strided_slice %123 {offsets = [16, 0], sizes = [4, 128], strides = [1, 1]} : vector<32x128xf32> to vector<4x128xf32>
    %339 = vector.broadcast %311 : vector<4x1xf32> to vector<4x128xf32>
    %340 = vector.broadcast %128 : vector<1x128xf32> to vector<4x128xf32>
    %341 = arith.mulf %339, %340 : vector<4x128xf32>
    %342 = arith.addf %338, %341 : vector<4x128xf32>
    %343 = arith.negf %342 : vector<4x128xf32>
    %344 = math.exp %343 : vector<4x128xf32>
    %cst_99 = arith.constant 1.000000e+00 : f32
    %345 = vector.broadcast %cst_99 : f32 to vector<4x128xf32>
    %346 = arith.addf %345, %344 : vector<4x128xf32>
    %347 = arith.divf %345, %346 : vector<4x128xf32>
    %348 = arith.mulf %331, %305 : vector<4x128xf32>
    %349 = arith.mulf %321, %337 : vector<4x128xf32>
    %350 = arith.addf %348, %349 : vector<4x128xf32>
    %351 = math.tanh %350 : vector<4x128xf32>
    %352 = arith.mulf %347, %351 : vector<4x128xf32>
    %353 = vector.broadcast %129 : vector<1x128xf32> to vector<4x128xf32>
    %354 = arith.mulf %352, %353 : vector<4x128xf32>
    %cst_100 = arith.constant dense<0.000000e+00> : vector<4xf32>
    %355 = vector.multi_reduction <add>, %354, %cst_100 [1] : vector<4x128xf32> to vector<4xf32>
    %356 = vector.shape_cast %355 : vector<4xf32> to vector<4x1xf32>
    %357 = vector.extract_strided_slice %120 {offsets = [20, 0], sizes = [4, 128], strides = [1, 1]} : vector<32x128xf32> to vector<4x128xf32>
    %358 = vector.broadcast %356 : vector<4x1xf32> to vector<4x128xf32>
    %359 = vector.broadcast %125 : vector<1x128xf32> to vector<4x128xf32>
    %360 = arith.mulf %358, %359 : vector<4x128xf32>
    %361 = arith.addf %357, %360 : vector<4x128xf32>
    %362 = arith.negf %361 : vector<4x128xf32>
    %363 = math.exp %362 : vector<4x128xf32>
    %cst_101 = arith.constant 1.000000e+00 : f32
    %364 = vector.broadcast %cst_101 : f32 to vector<4x128xf32>
    %365 = arith.addf %364, %363 : vector<4x128xf32>
    %366 = arith.divf %364, %365 : vector<4x128xf32>
    %367 = vector.extract_strided_slice %121 {offsets = [20, 0], sizes = [4, 128], strides = [1, 1]} : vector<32x128xf32> to vector<4x128xf32>
    %368 = vector.broadcast %356 : vector<4x1xf32> to vector<4x128xf32>
    %369 = vector.broadcast %126 : vector<1x128xf32> to vector<4x128xf32>
    %370 = arith.mulf %368, %369 : vector<4x128xf32>
    %371 = arith.addf %367, %370 : vector<4x128xf32>
    %372 = arith.negf %371 : vector<4x128xf32>
    %373 = math.exp %372 : vector<4x128xf32>
    %cst_102 = arith.constant 1.000000e+00 : f32
    %374 = vector.broadcast %cst_102 : f32 to vector<4x128xf32>
    %375 = arith.addf %374, %373 : vector<4x128xf32>
    %376 = arith.divf %374, %375 : vector<4x128xf32>
    %377 = vector.extract_strided_slice %122 {offsets = [20, 0], sizes = [4, 128], strides = [1, 1]} : vector<32x128xf32> to vector<4x128xf32>
    %378 = vector.broadcast %356 : vector<4x1xf32> to vector<4x128xf32>
    %379 = vector.broadcast %127 : vector<1x128xf32> to vector<4x128xf32>
    %380 = arith.mulf %378, %379 : vector<4x128xf32>
    %381 = arith.addf %377, %380 : vector<4x128xf32>
    %382 = math.tanh %381 : vector<4x128xf32>
    %383 = vector.extract_strided_slice %123 {offsets = [20, 0], sizes = [4, 128], strides = [1, 1]} : vector<32x128xf32> to vector<4x128xf32>
    %384 = vector.broadcast %356 : vector<4x1xf32> to vector<4x128xf32>
    %385 = vector.broadcast %128 : vector<1x128xf32> to vector<4x128xf32>
    %386 = arith.mulf %384, %385 : vector<4x128xf32>
    %387 = arith.addf %383, %386 : vector<4x128xf32>
    %388 = arith.negf %387 : vector<4x128xf32>
    %389 = math.exp %388 : vector<4x128xf32>
    %cst_103 = arith.constant 1.000000e+00 : f32
    %390 = vector.broadcast %cst_103 : f32 to vector<4x128xf32>
    %391 = arith.addf %390, %389 : vector<4x128xf32>
    %392 = arith.divf %390, %391 : vector<4x128xf32>
    %393 = arith.mulf %376, %350 : vector<4x128xf32>
    %394 = arith.mulf %366, %382 : vector<4x128xf32>
    %395 = arith.addf %393, %394 : vector<4x128xf32>
    %396 = math.tanh %395 : vector<4x128xf32>
    %397 = arith.mulf %392, %396 : vector<4x128xf32>
    %398 = vector.broadcast %129 : vector<1x128xf32> to vector<4x128xf32>
    %399 = arith.mulf %397, %398 : vector<4x128xf32>
    %cst_104 = arith.constant dense<0.000000e+00> : vector<4xf32>
    %400 = vector.multi_reduction <add>, %399, %cst_104 [1] : vector<4x128xf32> to vector<4xf32>
    %401 = vector.shape_cast %400 : vector<4xf32> to vector<4x1xf32>
    %402 = vector.extract_strided_slice %120 {offsets = [24, 0], sizes = [4, 128], strides = [1, 1]} : vector<32x128xf32> to vector<4x128xf32>
    %403 = vector.broadcast %401 : vector<4x1xf32> to vector<4x128xf32>
    %404 = vector.broadcast %125 : vector<1x128xf32> to vector<4x128xf32>
    %405 = arith.mulf %403, %404 : vector<4x128xf32>
    %406 = arith.addf %402, %405 : vector<4x128xf32>
    %407 = arith.negf %406 : vector<4x128xf32>
    %408 = math.exp %407 : vector<4x128xf32>
    %cst_105 = arith.constant 1.000000e+00 : f32
    %409 = vector.broadcast %cst_105 : f32 to vector<4x128xf32>
    %410 = arith.addf %409, %408 : vector<4x128xf32>
    %411 = arith.divf %409, %410 : vector<4x128xf32>
    %412 = vector.extract_strided_slice %121 {offsets = [24, 0], sizes = [4, 128], strides = [1, 1]} : vector<32x128xf32> to vector<4x128xf32>
    %413 = vector.broadcast %401 : vector<4x1xf32> to vector<4x128xf32>
    %414 = vector.broadcast %126 : vector<1x128xf32> to vector<4x128xf32>
    %415 = arith.mulf %413, %414 : vector<4x128xf32>
    %416 = arith.addf %412, %415 : vector<4x128xf32>
    %417 = arith.negf %416 : vector<4x128xf32>
    %418 = math.exp %417 : vector<4x128xf32>
    %cst_106 = arith.constant 1.000000e+00 : f32
    %419 = vector.broadcast %cst_106 : f32 to vector<4x128xf32>
    %420 = arith.addf %419, %418 : vector<4x128xf32>
    %421 = arith.divf %419, %420 : vector<4x128xf32>
    %422 = vector.extract_strided_slice %122 {offsets = [24, 0], sizes = [4, 128], strides = [1, 1]} : vector<32x128xf32> to vector<4x128xf32>
    %423 = vector.broadcast %401 : vector<4x1xf32> to vector<4x128xf32>
    %424 = vector.broadcast %127 : vector<1x128xf32> to vector<4x128xf32>
    %425 = arith.mulf %423, %424 : vector<4x128xf32>
    %426 = arith.addf %422, %425 : vector<4x128xf32>
    %427 = math.tanh %426 : vector<4x128xf32>
    %428 = vector.extract_strided_slice %123 {offsets = [24, 0], sizes = [4, 128], strides = [1, 1]} : vector<32x128xf32> to vector<4x128xf32>
    %429 = vector.broadcast %401 : vector<4x1xf32> to vector<4x128xf32>
    %430 = vector.broadcast %128 : vector<1x128xf32> to vector<4x128xf32>
    %431 = arith.mulf %429, %430 : vector<4x128xf32>
    %432 = arith.addf %428, %431 : vector<4x128xf32>
    %433 = arith.negf %432 : vector<4x128xf32>
    %434 = math.exp %433 : vector<4x128xf32>
    %cst_107 = arith.constant 1.000000e+00 : f32
    %435 = vector.broadcast %cst_107 : f32 to vector<4x128xf32>
    %436 = arith.addf %435, %434 : vector<4x128xf32>
    %437 = arith.divf %435, %436 : vector<4x128xf32>
    %438 = arith.mulf %421, %395 : vector<4x128xf32>
    %439 = arith.mulf %411, %427 : vector<4x128xf32>
    %440 = arith.addf %438, %439 : vector<4x128xf32>
    %441 = math.tanh %440 : vector<4x128xf32>
    %442 = arith.mulf %437, %441 : vector<4x128xf32>
    %443 = vector.broadcast %129 : vector<1x128xf32> to vector<4x128xf32>
    %444 = arith.mulf %442, %443 : vector<4x128xf32>
    %cst_108 = arith.constant dense<0.000000e+00> : vector<4xf32>
    %445 = vector.multi_reduction <add>, %444, %cst_108 [1] : vector<4x128xf32> to vector<4xf32>
    %446 = vector.shape_cast %445 : vector<4xf32> to vector<4x1xf32>
    %447 = vector.extract_strided_slice %120 {offsets = [28, 0], sizes = [4, 128], strides = [1, 1]} : vector<32x128xf32> to vector<4x128xf32>
    %448 = vector.broadcast %446 : vector<4x1xf32> to vector<4x128xf32>
    %449 = vector.broadcast %125 : vector<1x128xf32> to vector<4x128xf32>
    %450 = arith.mulf %448, %449 : vector<4x128xf32>
    %451 = arith.addf %447, %450 : vector<4x128xf32>
    %452 = arith.negf %451 : vector<4x128xf32>
    %453 = math.exp %452 : vector<4x128xf32>
    %cst_109 = arith.constant 1.000000e+00 : f32
    %454 = vector.broadcast %cst_109 : f32 to vector<4x128xf32>
    %455 = arith.addf %454, %453 : vector<4x128xf32>
    %456 = arith.divf %454, %455 : vector<4x128xf32>
    %457 = vector.extract_strided_slice %121 {offsets = [28, 0], sizes = [4, 128], strides = [1, 1]} : vector<32x128xf32> to vector<4x128xf32>
    %458 = vector.broadcast %446 : vector<4x1xf32> to vector<4x128xf32>
    %459 = vector.broadcast %126 : vector<1x128xf32> to vector<4x128xf32>
    %460 = arith.mulf %458, %459 : vector<4x128xf32>
    %461 = arith.addf %457, %460 : vector<4x128xf32>
    %462 = arith.negf %461 : vector<4x128xf32>
    %463 = math.exp %462 : vector<4x128xf32>
    %cst_110 = arith.constant 1.000000e+00 : f32
    %464 = vector.broadcast %cst_110 : f32 to vector<4x128xf32>
    %465 = arith.addf %464, %463 : vector<4x128xf32>
    %466 = arith.divf %464, %465 : vector<4x128xf32>
    %467 = vector.extract_strided_slice %122 {offsets = [28, 0], sizes = [4, 128], strides = [1, 1]} : vector<32x128xf32> to vector<4x128xf32>
    %468 = vector.broadcast %446 : vector<4x1xf32> to vector<4x128xf32>
    %469 = vector.broadcast %127 : vector<1x128xf32> to vector<4x128xf32>
    %470 = arith.mulf %468, %469 : vector<4x128xf32>
    %471 = arith.addf %467, %470 : vector<4x128xf32>
    %472 = math.tanh %471 : vector<4x128xf32>
    %473 = vector.extract_strided_slice %123 {offsets = [28, 0], sizes = [4, 128], strides = [1, 1]} : vector<32x128xf32> to vector<4x128xf32>
    %474 = vector.broadcast %446 : vector<4x1xf32> to vector<4x128xf32>
    %475 = vector.broadcast %128 : vector<1x128xf32> to vector<4x128xf32>
    %476 = arith.mulf %474, %475 : vector<4x128xf32>
    %477 = arith.addf %473, %476 : vector<4x128xf32>
    %478 = arith.negf %477 : vector<4x128xf32>
    %479 = math.exp %478 : vector<4x128xf32>
    %cst_111 = arith.constant 1.000000e+00 : f32
    %480 = vector.broadcast %cst_111 : f32 to vector<4x128xf32>
    %481 = arith.addf %480, %479 : vector<4x128xf32>
    %482 = arith.divf %480, %481 : vector<4x128xf32>
    %483 = arith.mulf %466, %440 : vector<4x128xf32>
    %484 = arith.mulf %456, %472 : vector<4x128xf32>
    %485 = arith.addf %483, %484 : vector<4x128xf32>
    %486 = math.tanh %485 : vector<4x128xf32>
    %487 = arith.mulf %482, %486 : vector<4x128xf32>
    %488 = vector.broadcast %129 : vector<1x128xf32> to vector<4x128xf32>
    %489 = arith.mulf %487, %488 : vector<4x128xf32>
    %cst_112 = arith.constant dense<0.000000e+00> : vector<4xf32>
    %490 = vector.multi_reduction <add>, %489, %cst_112 [1] : vector<4x128xf32> to vector<4xf32>
    %491 = vector.shape_cast %490 : vector<4xf32> to vector<4x1xf32>
    %492 = tpu.concatenate %176, %221, %266, %311, %356, %401, %446, %491 in 0 : vector<4x1xf32>, vector<4x1xf32>, vector<4x1xf32>, vector<4x1xf32>, vector<4x1xf32>, vector<4x1xf32>, vector<4x1xf32>, vector<4x1xf32> -> vector<32x1xf32>
    %c0_113 = arith.constant 0 : index
    %c0_114 = arith.constant 0 : index
    %493 = vector.load %arg12[%c0_113, %c0_114] : memref<32x1xf32, #tpu.memory_space<vmem>>, vector<32x1xf32>
    tpu.vector_store %arg12[%c0_113, %c0_114], %492 {strides = array<i32>} : memref<32x1xf32, #tpu.memory_space<vmem>>, vector<32x1xf32>,
    return
  }
}

</mosaic_0001>

<bundles_post_ra>
// kernel: armodel_forward.1
= control target key start
LH: loop header
LB: loop body
LE: loop exit
PB: predicated region body
PF: predicated region fallthrough
CT: control target
= control target key end

     0   :  { %vm433_vm0 = vcmask 1042432   ;;  %vm240_vm1 = vcmask 48128   ;;  %vm1224_vm2 = vcmask 523264   ;;  %vm9938_vm3 = vcmask 1045504   ;;  %s20585_s2 = inlined_call_operand.vmem [shape: bf16[6,64], index: 2, kind: input, shape index: {}]   ;;  %s20586_s0 = inlined_call_operand.vmem [shape: f32[1024,6], index: 0, kind: input, shape index: {}]   ;;  %s20587_s3 = inlined_call_operand.vmem [shape: bf16[12,64,64], index: 3, kind: input, shape index: {}]   ;;  %s20588_s4 = inlined_call_operand.vmem [shape: f32[5,64], index: 4, kind: input, shape index: {}]   ;;  %s20589_s6 = inlined_call_operand.vmem [shape: f32[6,10], index: 6, kind: input, shape index: {}]   ;;  %s20590_s1 = inlined_call_operand.vmem [shape: f32[32,6], index: 1, kind: input, shape index: {}]   ;;  %s20591_s5 = inlined_call_operand.vmem [shape: f32[64,10], index: 5, kind: input, shape index: {}]   ;;  %s20592_s8 = inlined_call_operand.vmem [shape: f32[10,512], index: 8, kind: input, shape index: {}]   ;;  %s20593_s7 = inlined_call_operand.vmem [shape: f32[1,10], index: 7, kind: input, shape index: {}]   ;;  %s20594_s10 = inlined_call_operand.vmem [shape: f32[4,128], index: 10, kind: input, shape index: {}]   ;;  %s20595_s9 = inlined_call_operand.vmem [shape: f32[1,512], index: 9, kind: input, shape index: {}]   ;;  %s20596_s11 = inlined_call_operand.vmem [shape: f32[1,128], index: 11, kind: input, shape index: {}]   ;;  %s20597_s12 = inlined_call_operand.vmem [shape: f32[32,1], index: 12, kind: output, shape index: {}]  }
   0x1   :  { %v234_v0 = vld [vmem:[%s20585_s2] sm:$0x7]  ;;  %v43_v2 = vld [vmem:[%s20586_s0 + $0x8] sm:$0xff]  ;;  %v44_v5 = vld [vmem:[%s20586_s0 + $0x10] sm:$0xff]  ;;  %vm10206_vm4 = vcmask 1041408   ;;  %vm10193_vm5 = vcmask 80896  }
   0x2   :  { %v42_v1 = vld [vmem:[%s20586_s0] sm:$0xff]  ;;  %14485 = vmatprep.subr.msk.bf16.mxu0 %vm433_vm0, %v234_v0  ;;  %v435_v3 = vsel %vm433_vm0, %v234_v0, 0  ;;  %v45_v6 = vld [vmem:[%s20586_s0 + $0x18] sm:$0xff]  ;;  %14486 = vmatprep.subr.msk.bf16.mxu1 %vm433_vm0, %v234_v0  ;;  %v47_v9 = vld [vmem:[%s20586_s0 + $0x28] sm:$0xff]  ;;  %vm10454_vm6 = vcmask 1043456   ;;  %vm10506_vm7 = vcmask 1047556  }
   0x3   :  { %v170_v4 = vpack.c.bf16 %v43_v2, %v42_v1  ;;  %v46_v7 = vld [vmem:[%s20586_s0 + $0x20] sm:$0xff]  ;;  %12692 = vmatpush3.bf16.msra.mxu0 %v435_v3  ;;  %v171_v8 = vpack.c.bf16 %v45_v6, %v44_v5  ;;  %14484 = vmatpush3.bf16.msra.mxu1 %v435_v3  ;;  %v48_v11 = vld [vmem:[%s20586_s0 + $0x30] sm:$0xff]  ;;  %v49_v12 = vld [vmem:[%s20586_s0 + $0x38] sm:$0xff]  ;;  %vm10820_vm8 = vcmask 7168  }
   0x4   :  { %v172_v10 = vpack.c.bf16 %v47_v9, %v46_v7  ;;  %v50_v13 = vld [vmem:[%s20586_s0 + $0x40] sm:$0xff]  ;;  %v51_v14 = vld [vmem:[%s20586_s0 + $0x48] sm:$0xff]  ;;  %v173_v15 = vpack.c.bf16 %v49_v12, %v48_v11  ;;  %v52_v17 = vld [vmem:[%s20586_s0 + $0x50] sm:$0xff] }
   0x5   :  { %12693 = vmatprep.mubr.msk.bf16.mxu0 %vm240_vm1, %v170_v4  ;;  %v174_v16 = vpack.c.bf16 %v51_v14, %v50_v13  ;;  %v53_v18 = vld [vmem:[%s20586_s0 + $0x58] sm:$0xff]  ;;  %v54_v19 = vld [vmem:[%s20586_s0 + $0x60] sm:$0xff]  ;;  %v55_v20 = vld [vmem:[%s20586_s0 + $0x68] sm:$0xff] }
   0x6   :  { %12694 = vmatmul.mubr.msk.bf16.vlgmr.msra.gmra.mxu0 %vm240_vm1, %v171_v8  ;;  %v175_v21 = vpack.c.bf16 %v53_v18, %v52_v17  ;;  %v176_v22 = vpack.c.bf16 %v55_v20, %v54_v19  ;;  %v122_v23 = vld [vmem:[%s20586_s0 + $0x280] sm:$0xff]  ;;  %v123_v24 = vld [vmem:[%s20586_s0 + $0x288] sm:$0xff]  ;;  %v124_v26 = vld [vmem:[%s20586_s0 + $0x290] sm:$0xff] }
   0x7   :  { %12697 = vmatprep.mubr.msk.bf16.mxu0 %vm240_vm1, %v172_v10  ;;  %v210_v25 = vpack.c.bf16 %v123_v24, %v122_v23  ;;  %v125_v27 = vld [vmem:[%s20586_s0 + $0x298] sm:$0xff]  ;;  %v56_v28 = vld [vmem:[%s20586_s0 + $0x70] sm:$0xff]  ;;  %v126_v32 = vld [vmem:[%s20586_s0 + $0x2a0] sm:$0xff] }
   0x8   :  { %v211_v29 = vpack.c.bf16 %v125_v27, %v124_v26  ;;  %v14489_v30 = vld [vmem:[%s20587_s3 + $0x38] sm:$0xff]   ;;  %v127_v33 = vld [vmem:[%s20586_s0 + $0x2a8] sm:$0xff]  ;;  %v58_v34 = vld [vmem:[%s20586_s0 + $0x80] sm:$0xff] }
   0x9   :  { %12773 = vmatprep.mubr.msk.bf16.mxu1 %vm240_vm1, %v210_v25  ;;  %v57_v31 = vld [vmem:[%s20586_s0 + $0x78] sm:$0xff]  ;;  %v59_v35 = vld [vmem:[%s20586_s0 + $0x88] sm:$0xff]  ;;  %12821 = vmatprep.subr.bf16.mxu1 %v14489_v30  ;;  %v212_v36 = vpack.c.bf16 %v127_v33, %v126_v32  ;;  %v128_v37 = vld [vmem:[%s20586_s0 + $0x2b0] sm:$0xff] }
   0xa   :  { %12774 = vmatmul.mubr.msk.bf16.vlgmr.msra.gmra.mxu1 %vm240_vm1, %v211_v29  ;;  %v129_v38 = vld [vmem:[%s20586_s0 + $0x2b8] sm:$0xff]  ;;  %v177_v39 = vpack.c.bf16 %v57_v31, %v56_v28  ;;  %v130_v40 = vld [vmem:[%s20586_s0 + $0x2c0] sm:$0xff]  ;;  %v131_v41 = vld [vmem:[%s20586_s0 + $0x2c8] sm:$0xff]  ;;  %v178_v42 = vpack.c.bf16 %v59_v35, %v58_v34 }
   0xb   :  { %12822 = vmatpush3.bf16.msra.mxu1 %v14489_v30  ;;  %12777 = vmatprep.mubr.msk.bf16.mxu1 %vm240_vm1, %v212_v36  ;;  %v213_v43 = vpack.c.bf16 %v129_v38, %v128_v37  ;;  %v214_v44 = vpack.c.bf16 %v131_v41, %v130_v40  ;;  %v60_v45 = vld [vmem:[%s20586_s0 + $0x90] sm:$0xff]  ;;  %v61_v46 = vld [vmem:[%s20586_s0 + $0x98] sm:$0xff]  ;;  %v62_v48 = vld [vmem:[%s20586_s0 + $0xa0] sm:$0xff] }
   0xc   :  { %v14490_v47 = vld [vmem:[%s20587_s3 + $0x30] sm:$0xff]   ;;  %v63_v49 = vld [vmem:[%s20586_s0 + $0xa8] sm:$0xff]  ;;  %v133_v51 = vld [vmem:[%s20586_s0 + $0x2d8] sm:$0xff]  ;;  %v179_v52 = vpack.c.bf16 %v61_v46, %v60_v45 }
   0xd   :  { %v132_v50 = vld [vmem:[%s20586_s0 + $0x2d0] sm:$0xff]  ;;  %12823 = vmatprep.subr.bf16.mxu1 %v14490_v47  ;;  %v134_v53 = vld [vmem:[%s20586_s0 + $0x2e0] sm:$0xff]  ;;  %v135_v54 = vld [vmem:[%s20586_s0 + $0x2e8] sm:$0xff]  ;;  %v180_v55 = vpack.c.bf16 %v63_v49, %v62_v48 }
   0xe   :  { %12698 = vmatmul.mubr.msk.bf16.gmra.mxu0 %vm240_vm1, %v173_v15  ;;  %v215_v56 = vpack.c.bf16 %v133_v51, %v132_v50  ;;  %v216_v57 = vpack.c.bf16 %v135_v54, %v134_v53  ;;  %v64_v58 = vld [vmem:[%s20586_s0 + $0xb0] sm:$0xff]  ;;  %v65_v59 = vld [vmem:[%s20586_s0 + $0xb8] sm:$0xff]  ;;  %v66_v60 = vld [vmem:[%s20586_s0 + $0xc0] sm:$0xff] }
   0xf   :  { %12701 = vmatprep.mubr.msk.bf16.mxu0 %vm240_vm1, %v174_v16  ;;  %12824 = vmatpush3.bf16.msra.mxu1 %v14490_v47  ;;  %v67_v61 = vld [vmem:[%s20586_s0 + $0xc8] sm:$0xff]  ;;  %v136_v63 = vld [vmem:[%s20586_s0 + $0x2f0] sm:$0xff]  ;;  %v137_v0 = vld [vmem:[%s20586_s0 + $0x2f8] sm:$0xff]  ;;  %v181_v1 = vpack.c.bf16 %v65_v59, %v64_v58 }
  0x10   :  { %v14491_v62 = vld [vmem:[%s20587_s3 + $0x28] sm:$0xff]   ;;  %v138_v2 = vld [vmem:[%s20586_s0 + $0x300] sm:$0xff]  ;;  %v182_v4 = vpack.c.bf16 %v67_v61, %v66_v60  ;;  %v217_v5 = vpack.c.bf16 %v137_v0, %v136_v63  ;;  %v68_v6 = vld [vmem:[%s20586_s0 + $0xd0] sm:$0xff] }
  0x11   :  { %v139_v3 = vld [vmem:[%s20586_s0 + $0x308] sm:$0xff]  ;;  %12825 = vmatprep.subr.bf16.mxu1 %v14491_v62  ;;  %v69_v7 = vld [vmem:[%s20586_s0 + $0xd8] sm:$0xff]  ;;  %v14492_v9 = vld [vmem:[%s20587_s3 + $0x20] sm:$0xff]  }
  0x12   :  { %12778 = vmatmul.mubr.msk.bf16.gmra.mxu1 %vm240_vm1, %v213_v43  ;;  %v218_v8 = vpack.c.bf16 %v139_v3, %v138_v2  ;;  %v70_v10 = vld [vmem:[%s20586_s0 + $0xe0] sm:$0xff]  ;;  %v71_v11 = vld [vmem:[%s20586_s0 + $0xe8] sm:$0xff]  ;;  %v14493_v12 = vld [vmem:[%s20587_s3 + $0x18] sm:$0xff]   ;;  %v183_v18 = vpack.c.bf16 %v69_v7, %v68_v6 }
  0x13   :  { %12781 = vmatprep.mubr.msk.bf16.mxu1 %vm240_vm1, %v214_v44  ;;  %12826 = vmatpush3.bf16.msra.mxu1 %v14491_v62  ;;  %v140_v13 = vld [vmem:[%s20586_s0 + $0x310] sm:$0xff]  ;;  %v141_v14 = vld [vmem:[%s20586_s0 + $0x318] sm:$0xff]  ;;  %v142_v16 = vld [vmem:[%s20586_s0 + $0x320] sm:$0xff]  ;;  %v184_v20 = vpack.c.bf16 %v71_v11, %v70_v10 }
  0x14   :  { %12827 = vmatprep.subr.bf16.mxu1 %v14492_v9  ;;  %12957 = vmatprep.subr.bf16.mxu0 %v14493_v12  ;;  %v14494_v15 = vld [vmem:[%s20587_s3 + $0x10] sm:$0xff]   ;;  %v143_v17 = vld [vmem:[%s20586_s0 + $0x328] sm:$0xff]  ;;  %v73_v23 = vld [vmem:[%s20586_s0 + $0xf8] sm:$0xff] }
  0x15   :  { %12958 = vmatpush3.bf16.msra.mxu0 %v14493_v12  ;;  %v14495_v19 = vld [vmem:[%s20587_s3 + $0x8] sm:$0xff]   ;;  %v220_v24 = vpack.c.bf16 %v143_v17, %v142_v16  ;;  %v74_v25 = vld [vmem:[%s20586_s0 + $0x100] sm:$0xff]  ;;  %v144_v27 = vld [vmem:[%s20586_s0 + $0x330] sm:$0xff] }
  0x16   :  { %12702 = vmatmul.mubr.msk.bf16.gmra.mxu0 %vm240_vm1, %v175_v21  ;;  %12959 = vmatprep.subr.bf16.mxu0 %v14494_v15  ;;  %v219_v21 = vpack.c.bf16 %v141_v14, %v140_v13  ;;  %v75_v26 = vld [vmem:[%s20586_s0 + $0x108] sm:$0xff]  ;;  %v145_v28 = vld [vmem:[%s20586_s0 + $0x338] sm:$0xff]  ;;  %v146_v29 = vld [vmem:[%s20586_s0 + $0x340] sm:$0xff] }
  0x17   :  { %12705 = vmatprep.mubr.msk.bf16.mxu0 %vm240_vm1, %v176_v22  ;;  %12828 = vmatpush3.bf16.msra.mxu1 %v14492_v9  ;;  %v72_v22 = vld [vmem:[%s20586_s0 + $0xf0] sm:$0xff]  ;;  %v147_v30 = vld [vmem:[%s20586_s0 + $0x348] sm:$0xff]  ;;  %v186_v32 = vpack.c.bf16 %v75_v26, %v74_v25  ;;  %v221_v33 = vpack.c.bf16 %v145_v28, %v144_v27  ;;  %v77_v35 = vld [vmem:[%s20586_s0 + $0x118] sm:$0xff] }
  0x18   :  { %v185_v31 = vpack.c.bf16 %v73_v23, %v72_v22  ;;  %v76_v34 = vld [vmem:[%s20586_s0 + $0x110] sm:$0xff]  ;;  %v222_v36 = vpack.c.bf16 %v147_v30, %v146_v29  ;;  %v78_v37 = vld [vmem:[%s20586_s0 + $0x120] sm:$0xff]  ;;  %v79_v38 = vld [vmem:[%s20586_s0 + $0x128] sm:$0xff] }
  0x19   :  { %12960 = vmatpush3.bf16.msra.mxu0 %v14494_v15  ;;  %v149_v40 = vld [vmem:[%s20586_s0 + $0x358] sm:$0xff]  ;;  %v150_v41 = vld [vmem:[%s20586_s0 + $0x360] sm:$0xff]  ;;  %v187_v43 = vpack.c.bf16 %v77_v35, %v76_v34  ;;  %v188_v44 = vpack.c.bf16 %v79_v38, %v78_v37  ;;  %v80_v46 = vld [vmem:[%s20586_s0 + $0x130] sm:$0xff] }
  0x1a   :  { %12782 = vmatmul.mubr.msk.bf16.gmra.mxu1 %vm240_vm1, %v215_v56  ;;  %12961 = vmatprep.subr.bf16.mxu0 %v14495_v19  ;;  %v81_v47 = vld [vmem:[%s20586_s0 + $0x138] sm:$0xff]  ;;  %v82_v49 = vld [vmem:[%s20586_s0 + $0x140] sm:$0xff]  ;;  %v83_v50 = vld [vmem:[%s20586_s0 + $0x148] sm:$0xff] }
  0x1b   :  { %12785 = vmatprep.mubr.msk.bf16.mxu1 %vm240_vm1, %v216_v57  ;;  %v14496_v51 = vld [vmem:[%s20587_s3] sm:$0xff]   ;;  %v153_v53 = vld [vmem:[%s20586_s0 + $0x378] sm:$0xff]  ;;  %v155_v56 = vld [vmem:[%s20586_s0 + $0x388] sm:$0xff]  ;;  %v190_v57 = vpack.c.bf16 %v83_v50, %v82_v49 }
  0x1c   :  { %v154_v54 = vld [vmem:[%s20586_s0 + $0x380] sm:$0xff]  ;;  %v84_v60 = vld [vmem:[%s20586_s0 + $0x150] sm:$0xff]  ;;  %v85_v61 = vld [vmem:[%s20586_s0 + $0x158] sm:$0xff] }
  0x1d   :  { %12962 = vmatpush3.bf16.msra.mxu0 %v14495_v19  ;;  %v226_v59 = vpack.c.bf16 %v155_v56, %v154_v54  ;;  %v86_v62 = vld [vmem:[%s20586_s0 + $0x160] sm:$0xff]  ;;  %v87_v63 = vld [vmem:[%s20586_s0 + $0x168] sm:$0xff]  ;;  %v156_v0 = vld [vmem:[%s20586_s0 + $0x390] sm:$0xff]  ;;  %v191_v2 = vpack.c.bf16 %v85_v61, %v84_v60 }
  0x1e   :  { %12706 = vmatmul.mubr.msk.bf16.gmra.mxu0 %vm240_vm1, %v177_v39  ;;  %v148_v39 = vld [vmem:[%s20586_s0 + $0x350] sm:$0xff]  ;;  %12963 = vmatprep.subr.bf16.mxu0 %v14496_v51  ;;  %v158_v3 = vld [vmem:[%s20586_s0 + $0x3a0] sm:$0xff]  ;;  %v89_v9 = vld [vmem:[%s20586_s0 + $0x178] sm:$0xff] }
  0x1f   :  { %12709 = vmatprep.mubr.msk.bf16.mxu0 %vm240_vm1, %v178_v42  ;;  %v151_v42 = vld [vmem:[%s20586_s0 + $0x368] sm:$0xff]  ;;  %v223_v45 = vpack.c.bf16 %v149_v40, %v148_v39  ;;  %v15080_v10 = vld [vmem:[%s20587_s3 + $0x58] sm:$0xff]   ;;  %v90_v11 = vld [vmem:[%s20586_s0 + $0x180] sm:$0xff] }
  0x20   :  { %v224_v48 = vpack.c.bf16 %v151_v42, %v150_v41  ;;  %v91_v12 = vld [vmem:[%s20586_s0 + $0x188] sm:$0xff]  ;;  %v160_v13 = vld [vmem:[%s20586_s0 + $0x3b0] sm:$0xff]  ;;  %v161_v14 = vld [vmem:[%s20586_s0 + $0x3b8] sm:$0xff]  ;;  %13093 = vmatprep.subr.bf16.mxu1 %v15080_v10 }
  0x21   :  { %12964 = vmatpush3.bf16.msra.mxu0 %v14496_v51  ;;  %v162_v16 = vld [vmem:[%s20586_s0 + $0x3c0] sm:$0xff]  ;;  %v163_v17 = vld [vmem:[%s20586_s0 + $0x3c8] sm:$0xff]  ;;  %v229_v19 = vpack.c.bf16 %v161_v14, %v160_v13  ;;  %v93_v22 = vld [vmem:[%s20586_s0 + $0x198] sm:$0xff] }
  0x22   :  { %12786 = vmatmul.mubr.msk.bf16.gmra.mxu1 %vm240_vm1, %v217_v5  ;;  %v192_v5 = vpack.c.bf16 %v87_v63, %v86_v62  ;;  %v94_v23 = vld [vmem:[%s20586_s0 + $0x1a0] sm:$0xff]  ;;  %v164_v25 = vld [vmem:[%s20586_s0 + $0x3d0] sm:$0xff]  ;;  %v165_v26 = vld [vmem:[%s20586_s0 + $0x3d8] sm:$0xff] }
  0x23   :  { %12789 = vmatprep.mubr.msk.bf16.mxu1 %vm240_vm1, %v218_v8  ;;  %v88_v8 = vld [vmem:[%s20586_s0 + $0x170] sm:$0xff]  ;;  %v166_v28 = vld [vmem:[%s20586_s0 + $0x3e0] sm:$0xff]  ;;  %v167_v29 = vld [vmem:[%s20586_s0 + $0x3e8] sm:$0xff] }
  0x24   :  { %v193_v15 = vpack.c.bf16 %v89_v9, %v88_v8  ;;  %v97_v34 = vld [vmem:[%s20586_s0 + $0x1b8] sm:$0xff]  ;;  %v98_v35 = vld [vmem:[%s20586_s0 + $0x1c0] sm:$0xff]  ;;  %v168_v37 = vld [vmem:[%s20586_s0 + $0x3f0] sm:$0xff] }
  0x25   :  { %v169_v38 = vld [vmem:[%s20586_s0 + $0x3f8] sm:$0xff]  ;;  %v100_v42 = vld [vmem:[%s20586_s0 + $0x1d0] sm:$0xff]  ;;  %v106_v50 = vld [vmem:[%s20586_s0 + $0x200] sm:$0xff] }
  0x26   :  { %12710 = vmatmul.mubr.msk.bf16.gmra.mxu0 %vm240_vm1, %v179_v52  ;;  %v152_v52 = vld [vmem:[%s20586_s0 + $0x370] sm:$0xff]  ;;  %v233_v41 = vpack.c.bf16 %v169_v38, %v168_v37  ;;  %v105_v49 = vld [vmem:[%s20586_s0 + $0x1f8] sm:$0xff]  ;;  %v107_v51 = vld [vmem:[%s20586_s0 + $0x208] sm:$0xff] }
  0x27   :  { %12713 = vmatprep.mubr.msk.bf16.mxu0 %vm240_vm1, %v180_v55  ;;  %v189_v55 = vpack.c.bf16 %v81_v47, %v80_v46  ;;  %v225_v58 = vpack.c.bf16 %v153_v53, %v152_v52  ;;  %v202_v53 = vpack.c.bf16 %v107_v51, %v106_v50  ;;  %v108_v54 = vld [vmem:[%s20586_s0 + $0x210] sm:$0xff]  ;;  %v110_v56 = vld [vmem:[%s20586_s0 + $0x220] sm:$0xff]  ;;  %v113_v61 = vld [vmem:[%s20586_s0 + $0x238] sm:$0xff] }
  0x28   :  { %v112_v60 = vld [vmem:[%s20586_s0 + $0x230] sm:$0xff]  ;;  %v114_v62 = vld [vmem:[%s20586_s0 + $0x240] sm:$0xff]  ;;  %v115_v63 = vld [vmem:[%s20586_s0 + $0x248] sm:$0xff] }
  0x29   :  { %v120_v8 = vld [vmem:[%s20586_s0 + $0x270] sm:$0xff]  ;;  %v121_v9 = vld [vmem:[%s20586_s0 + $0x278] sm:$0xff] }
  0x2a   :  { %12790 = vmatmul.mubr.msk.bf16.gmra.mxu1 %vm240_vm1, %v219_v21  ;;  %v92_v21 = vld [vmem:[%s20586_s0 + $0x190] sm:$0xff] }
  0x2b   :  { %12793 = vmatprep.mubr.msk.bf16.mxu1 %vm240_vm1, %v220_v24  ;;  %v95_v24 = vld [vmem:[%s20586_s0 + $0x1a8] sm:$0xff]  ;;  %v195_v27 = vpack.c.bf16 %v93_v22, %v92_v21 }
  0x2c   :  { %v196_v30 = vpack.c.bf16 %v95_v24, %v94_v23 }
  0x2e   :  { %12714 = vmatmul.mubr.msk.bf16.gmra.mxu0 %vm240_vm1, %v181_v1  ;;  %v157_v1 = vld [vmem:[%s20586_s0 + $0x398] sm:$0xff] }
  0x2f   :  { %12717 = vmatprep.mubr.msk.bf16.mxu0 %vm240_vm1, %v182_v4  ;;  %v159_v4 = vld [vmem:[%s20586_s0 + $0x3a8] sm:$0xff]  ;;  %v227_v6 = vpack.c.bf16 %v157_v1, %v156_v0  ;;  %v205_v0 = vpack.c.bf16 %v113_v61, %v112_v60  ;;  %v206_v1 = vpack.c.bf16 %v115_v63, %v114_v62 }
  0x30   :  { %v228_v7 = vpack.c.bf16 %v159_v4, %v158_v3  ;;  %v117_v3 = vld [vmem:[%s20586_s0 + $0x258] sm:$0xff]  ;;  %v118_v4 = vld [vmem:[%s20586_s0 + $0x260] sm:$0xff] }
  0x32   :  { %12794 = vmatmul.mubr.msk.bf16.gmra.mxu1 %vm240_vm1, %v221_v33  ;;  %v96_v33 = vld [vmem:[%s20586_s0 + $0x1b0] sm:$0xff] }
  0x33   :  { %12797 = vmatprep.mubr.msk.bf16.mxu1 %vm240_vm1, %v222_v36  ;;  %v99_v36 = vld [vmem:[%s20586_s0 + $0x1c8] sm:$0xff]  ;;  %v197_v39 = vpack.c.bf16 %v97_v34, %v96_v33 }
  0x34   :  { %v198_v40 = vpack.c.bf16 %v99_v36, %v98_v35 }
  0x36   :  { %12718 = vmatmul.mubr.msk.bf16.gmra.mxu0 %vm240_vm1, %v183_v18  ;;  %v194_v18 = vpack.c.bf16 %v91_v12, %v90_v11  ;;  %v209_v11 = vpack.c.bf16 %v121_v9, %v120_v8  ;;  %v20598_v12 = vmov 0  }
  0x37   :  { %12721 = vmatprep.mubr.msk.bf16.mxu0 %vm240_vm1, %v184_v20  ;;  %v230_v20 = vpack.c.bf16 %v163_v17, %v162_v16 }
  0x3a   :  { %12798 = vmatmul.mubr.msk.bf16.gmra.mxu1 %vm240_vm1, %v223_v45  ;;  %v103_v45 = vld [vmem:[%s20586_s0 + $0x1e8] sm:$0xff] }
  0x3b   :  { %12801 = vmatprep.mubr.msk.bf16.mxu1 %vm240_vm1, %v224_v48  ;;  %v104_v48 = vld [vmem:[%s20586_s0 + $0x1f0] sm:$0xff] }
  0x3c   :  { %v201_v52 = vpack.c.bf16 %v105_v49, %v104_v48 }
  0x3e   :  { %12722 = vmatmul.mubr.msk.bf16.gmra.mxu0 %vm240_vm1, %v185_v31  ;;  %v231_v31 = vpack.c.bf16 %v165_v26, %v164_v25 }
  0x3f   :  { %12725 = vmatprep.mubr.msk.bf16.mxu0 %vm240_vm1, %v186_v32  ;;  %v232_v32 = vpack.c.bf16 %v167_v29, %v166_v28 }
  0x42   :  { %12802 = vmatmul.mubr.msk.bf16.gmra.mxu1 %vm240_vm1, %v225_v58 }
  0x43   :  { %12805 = vmatprep.mubr.msk.bf16.mxu1 %vm240_vm1, %v226_v59 }
  0x46   :  { %12726 = vmatmul.mubr.msk.bf16.gmra.mxu0 %vm240_vm1, %v187_v43  ;;  %v101_v43 = vld [vmem:[%s20586_s0 + $0x1d8] sm:$0xff] }
  0x47   :  { %12729 = vmatprep.mubr.msk.bf16.mxu0 %vm240_vm1, %v188_v44  ;;  %v102_v44 = vld [vmem:[%s20586_s0 + $0x1e0] sm:$0xff]  ;;  %v199_v46 = vpack.c.bf16 %v101_v43, %v100_v42 }
  0x48   :  { %v200_v47 = vpack.c.bf16 %v103_v45, %v102_v44 }
  0x4a   :  { %12806 = vmatmul.mubr.msk.bf16.gmra.mxu1 %vm240_vm1, %v227_v6 }
  0x4b   :  { %12809 = vmatprep.mubr.msk.bf16.mxu1 %vm240_vm1, %v228_v7 }
  0x4e   :  { %12730 = vmatmul.mubr.msk.bf16.gmra.mxu0 %vm240_vm1, %v189_v55  ;;  %v109_v55 = vld [vmem:[%s20586_s0 + $0x218] sm:$0xff] }
  0x4f   :  { %12733 = vmatprep.mubr.msk.bf16.mxu0 %vm240_vm1, %v190_v57  ;;  %v111_v57 = vld [vmem:[%s20586_s0 + $0x228] sm:$0xff]  ;;  %v203_v58 = vpack.c.bf16 %v109_v55, %v108_v54 }
  0x50   :  { %v204_v59 = vpack.c.bf16 %v111_v57, %v110_v56 }
  0x52   :  { %12810 = vmatmul.mubr.msk.bf16.gmra.mxu1 %vm240_vm1, %v229_v19 }
  0x53   :  { %12813 = vmatprep.mubr.msk.bf16.mxu1 %vm240_vm1, %v230_v20 }
  0x56   :  { %12734 = vmatmul.mubr.msk.bf16.gmra.mxu0 %vm240_vm1, %v191_v2  ;;  %v116_v2 = vld [vmem:[%s20586_s0 + $0x250] sm:$0xff] }
  0x57   :  { %12737 = vmatprep.mubr.msk.bf16.mxu0 %vm240_vm1, %v192_v5  ;;  %v119_v5 = vld [vmem:[%s20586_s0 + $0x268] sm:$0xff]  ;;  %v207_v6 = vpack.c.bf16 %v117_v3, %v116_v2 }
  0x58   :  { %v208_v7 = vpack.c.bf16 %v119_v5, %v118_v4 }
  0x5a   :  { %12814 = vmatmul.mubr.msk.bf16.gmra.mxu1 %vm240_vm1, %v231_v31  ;;  %v14498_v31 = vld [vmem:[%s20587_s3 + $0x50] sm:$0xff]  }
  0x5b   :  { %12817 = vmatprep.mubr.msk.bf16.mxu1 %vm240_vm1, %v232_v32 }
  0x5e   :  { %12738 = vmatmul.mubr.msk.bf16.gmra.mxu0 %vm240_vm1, %v193_v15  ;;  %v15238_v15 = vld [vmem:[%s20588_s4] ss:$0 sm:$0xff] }
  0x5f   :  { %12741 = vmatprep.mubr.msk.bf16.mxu0 %vm240_vm1, %v194_v18 }
  0x62   :  { %12818 = vmatmul.mubr.msk.bf16.gmra.mxu1 %vm240_vm1, %v233_v41  ;;  %v14499_v41 = vld [vmem:[%s20587_s3 + $0x48] sm:$0xff]  }
  0x66   :  { %12742 = vmatmul.mubr.msk.bf16.gmra.mxu0 %vm240_vm1, %v195_v27 }
  0x67   :  { %12745 = vmatprep.mubr.msk.bf16.mxu0 %vm240_vm1, %v196_v30 }
  0x6e   :  { %12746 = vmatmul.mubr.msk.bf16.gmra.mxu0 %vm240_vm1, %v197_v39 }
  0x6f   :  { %12749 = vmatprep.mubr.msk.bf16.mxu0 %vm240_vm1, %v198_v40 }
  0x76   :  { %12750 = vmatmul.mubr.msk.bf16.gmra.mxu0 %vm240_vm1, %v199_v46 }
  0x77   :  { %12753 = vmatprep.mubr.msk.bf16.mxu0 %vm240_vm1, %v200_v47 }
  0x7e   :  { %12754 = vmatmul.mubr.msk.bf16.gmra.mxu0 %vm240_vm1, %v201_v52 }
  0x7f   :  { %12757 = vmatprep.mubr.msk.bf16.mxu0 %vm240_vm1, %v202_v53 }
  0x86   :  { %12758 = vmatmul.mubr.msk.bf16.gmra.mxu0 %vm240_vm1, %v203_v58 }
  0x87   :  { %12761 = vmatprep.mubr.msk.bf16.mxu0 %vm240_vm1, %v204_v59 }
  0x8e   :  { %12762 = vmatmul.mubr.msk.bf16.gmra.mxu0 %vm240_vm1, %v205_v0 }
  0x8f   :  { %12765 = vmatprep.mubr.msk.bf16.mxu0 %vm240_vm1, %v206_v1 }
  0x96   :  { %12766 = vmatmul.mubr.msk.bf16.gmra.mxu0 %vm240_vm1, %v207_v6 }
  0x97   :  { %12769 = vmatprep.mubr.msk.bf16.mxu0 %vm240_vm1, %v208_v7 }
  0x9e   :  { %12770 = vmatmul.mubr.msk.bf16.gmra.mxu0 %vm240_vm1, %v209_v11 }
  0x9f   :  { %12965 = vmatprep.mubr.bf16.mxu0 %v20598_v12 }
  0xa6   :  { %12966 = vmatmul.mubr.bf16.vlgmr.msra.gmra.mxu0 %v20598_v12 }
  0xc6   :  { %v12695_v13 = vpop.f32.mrf.mxu0 }
  0xc7   :  { %v480_v19 = vadd.f32 %v12695_v13, %v15238_v15 }
  0xc8   :  { %v471_v14 = vpop.f32.mrf.mxu0 }
  0xc9   :  { %v472_v17 = vadd.f32 %v15238_v15, %v471_v14  ;;  %v984_v26 = vmax.f32 %v480_v19, 0.0 }
  0xca   :  { %v12696_v16 = vpop.f32.mrf.mxu0  ;;  %v15259_v44 = vpop.f32.mrf.mxu1 }
  0xcb   :  { %v483_v18 = vadd.f32 %v12696_v16, %v15238_v15  ;;  %v982_v24 = vmax.f32 %v472_v17, 0.0 }
  0xcc   :  { %v474_v20 = vpop.f32.mrf.mxu0 }
  0xcd   :  { %v475_v21 = vadd.f32 %v15238_v15, %v474_v20  ;;  %v985_v22 = vmax.f32 %v483_v18, 0.0 }
  0xce   :  { %v12699_v23 = vpop.f32.mrf.mxu0 }
  0xcf   :  { %v983_v25 = vmax.f32 %v475_v21, 0.0  ;;  %v1111_v29 = vpack.c.bf16 %v985_v22, %v984_v26  ;;  %v496_v34 = vadd.f32 %v12699_v23, %v15238_v15 }
  0xd0   :  { %v487_v27 = vpop.f32.mrf.mxu0 }
  0xd1   :  { %v1110_v28 = vpack.c.bf16 %v983_v25, %v982_v24  ;;  %v488_v32 = vadd.f32 %v15238_v15, %v487_v27  ;;  %v988_v42 = vmax.f32 %v496_v34, 0.0 }
  0xd2   :  { %v12700_v30 = vpop.f32.mrf.mxu0 }
  0xd3   :  { %v499_v33 = vadd.f32 %v12700_v30, %v15238_v15  ;;  %12829 = vmatprep.mubr.msk.bf16.mxu1 %vm1224_vm2, %v1110_v28  ;;  %12969 = vmatprep.mubr.msk.bf16.mxu0 %vm1224_vm2, %v1110_v28  ;;  %v986_v39 = vmax.f32 %v488_v32, 0.0 }
  0xd4   :  { %v490_v35 = vpop.f32.mrf.mxu0  ;;  %12830 = vmatmul.mubr.msk.bf16.vlgmr.msra.gmra.mxu1 %vm1224_vm2, %v1111_v29  ;;  %12970 = vmatmul.mubr.msk.bf16.gmra.mxu0 %vm1224_vm2, %v1111_v29 }
  0xd5   :  { %v491_v36 = vadd.f32 %v15238_v15, %v490_v35  ;;  %13094 = vmatpush3.bf16.msra.mxu1 %v15080_v10  ;;  %v989_v37 = vmax.f32 %v499_v33, 0.0  ;;  %v15265_v10 = vpop.f32.mrf.mxu1 }
  0xd6   :  { %v12703_v38 = vpop.f32.mrf.mxu0  ;;  %13095 = vmatprep.subr.bf16.mxu1 %v14498_v31 }
  0xd7   :  { %v987_v40 = vmax.f32 %v491_v36, 0.0  ;;  %v15263_v46 = vpack.c.bf16 %v989_v37, %v988_v42  ;;  %v512_v50 = vadd.f32 %v12703_v38, %v15238_v15  ;;  %v15279_v55 = vpop.f32.mrf.mxu1 }
  0xd8   :  { %v503_v43 = vpop.f32.mrf.mxu0 }
  0xd9   :  { %v15261_v45 = vpack.c.bf16 %v987_v40, %v986_v39  ;;  %13096 = vmatpush3.bf16.msra.mxu1 %v14498_v31  ;;  %v504_v48 = vadd.f32 %v15238_v15, %v503_v43  ;;  %v992_v58 = vmax.f32 %v512_v50, 0.0  ;;  %v15285_v63 = vpop.f32.mrf.mxu1 }
  0xda   :  { %v12704_v47 = vpop.f32.mrf.mxu0  ;;  %13097 = vmatprep.subr.bf16.mxu1 %v14499_v41 }
  0xdb   :  { %v515_v49 = vadd.f32 %v12704_v47, %v15238_v15  ;;  %12833 = vmatprep.mubr.msk.bf16.mxu1 %vm1224_vm2, %v15261_v45  ;;  %12973 = vmatprep.mubr.msk.bf16.mxu0 %vm1224_vm2, %v15261_v45  ;;  %v990_v56 = vmax.f32 %v504_v48, 0.0  ;;  %v15299_v7 = vpop.f32.mrf.mxu1 }
  0xdc   :  { %v506_v51 = vpop.f32.mrf.mxu0  ;;  %12834 = vmatmul.mubr.msk.bf16.gmra.mxu1 %vm1224_vm2, %v15263_v46  ;;  %12974 = vmatmul.mubr.msk.bf16.gmra.mxu0 %vm1224_vm2, %v15263_v46 }
  0xdd   :  { %v507_v52 = vadd.f32 %v15238_v15, %v506_v51  ;;  %13098 = vmatpush3.bf16.msra.mxu1 %v14499_v41  ;;  %v993_v53 = vmax.f32 %v515_v49, 0.0  ;;  %v15305_v18 = vpop.f32.mrf.mxu1 }
  0xde   :  { %v12707_v54 = vpop.f32.mrf.mxu0 }
  0xdf   :  { %v991_v57 = vmax.f32 %v507_v52, 0.0  ;;  %v15283_v61 = vpack.c.bf16 %v993_v53, %v992_v58  ;;  %v528_v2 = vadd.f32 %v12707_v54, %v15238_v15  ;;  %v15319_v26 = vpop.f32.mrf.mxu1 }
  0xe0   :  { %v519_v59 = vpop.f32.mrf.mxu0 }
  0xe1   :  { %v15281_v60 = vpack.c.bf16 %v991_v57, %v990_v56  ;;  %v520_v0 = vadd.f32 %v15238_v15, %v519_v59  ;;  %v996_v11 = vmax.f32 %v528_v2, 0.0  ;;  %v15325_v34 = vpop.f32.mrf.mxu1 }
  0xe2   :  { %v12708_v62 = vpop.f32.mrf.mxu0 }
  0xe3   :  { %v531_v1 = vadd.f32 %v12708_v62, %v15238_v15  ;;  %12837 = vmatprep.mubr.msk.bf16.mxu1 %vm1224_vm2, %v15281_v60  ;;  %12977 = vmatprep.mubr.msk.bf16.mxu0 %vm1224_vm2, %v15281_v60  ;;  %v994_v8 = vmax.f32 %v520_v0, 0.0  ;;  %v15339_v42 = vpop.f32.mrf.mxu1 }
  0xe4   :  { %v522_v3 = vpop.f32.mrf.mxu0  ;;  %12838 = vmatmul.mubr.msk.bf16.gmra.mxu1 %vm1224_vm2, %v15283_v61  ;;  %12978 = vmatmul.mubr.msk.bf16.gmra.mxu0 %vm1224_vm2, %v15283_v61 }
  0xe5   :  { %v523_v4 = vadd.f32 %v15238_v15, %v522_v3  ;;  %v997_v5 = vmax.f32 %v531_v1, 0.0  ;;  %v15345_v53 = vpop.f32.mrf.mxu1 }
  0xe6   :  { %v12711_v6 = vpop.f32.mrf.mxu0 }
  0xe7   :  { %v995_v9 = vmax.f32 %v523_v4, 0.0  ;;  %v15303_v16 = vpack.c.bf16 %v997_v5, %v996_v11  ;;  %v544_v21 = vadd.f32 %v12711_v6, %v15238_v15  ;;  %v15359_v1 = vpop.f32.mrf.mxu1 }
  0xe8   :  { %v535_v13 = vpop.f32.mrf.mxu0 }
  0xe9   :  { %v15301_v14 = vpack.c.bf16 %v995_v9, %v994_v8  ;;  %v536_v19 = vadd.f32 %v15238_v15, %v535_v13  ;;  %v1000_v29 = vmax.f32 %v544_v21, 0.0  ;;  %v15365_v11 = vpop.f32.mrf.mxu1 }
  0xea   :  { %v12712_v17 = vpop.f32.mrf.mxu0 }
  0xeb   :  { %v547_v20 = vadd.f32 %v12712_v17, %v15238_v15  ;;  %12841 = vmatprep.mubr.msk.bf16.mxu1 %vm1224_vm2, %v15301_v14  ;;  %12981 = vmatprep.mubr.msk.bf16.mxu0 %vm1224_vm2, %v15301_v14  ;;  %v998_v27 = vmax.f32 %v536_v19, 0.0 }
  0xec   :  { %v538_v22 = vpop.f32.mrf.mxu0  ;;  %12842 = vmatmul.mubr.msk.bf16.gmra.mxu1 %vm1224_vm2, %v15303_v16  ;;  %12982 = vmatmul.mubr.msk.bf16.gmra.mxu0 %vm1224_vm2, %v15303_v16 }
  0xed   :  { %v539_v23 = vadd.f32 %v15238_v15, %v538_v22  ;;  %v1001_v24 = vmax.f32 %v547_v20, 0.0 }
  0xee   :  { %v12715_v25 = vpop.f32.mrf.mxu0 }
  0xef   :  { %v999_v28 = vmax.f32 %v539_v23, 0.0  ;;  %v15323_v32 = vpack.c.bf16 %v1001_v24, %v1000_v29  ;;  %v560_v37 = vadd.f32 %v12715_v25, %v15238_v15  ;;  %v15379_v24 = vpop.f32.mrf.mxu1 }
  0xf0   :  { %v551_v30 = vpop.f32.mrf.mxu0 }
  0xf1   :  { %v15321_v31 = vpack.c.bf16 %v999_v28, %v998_v27  ;;  %v552_v35 = vadd.f32 %v15238_v15, %v551_v30  ;;  %v1004_v48 = vmax.f32 %v560_v37, 0.0 }
  0xf2   :  { %v12716_v33 = vpop.f32.mrf.mxu0 }
  0xf3   :  { %v563_v36 = vadd.f32 %v12716_v33, %v15238_v15  ;;  %12845 = vmatprep.mubr.msk.bf16.mxu1 %vm1224_vm2, %v15321_v31  ;;  %12985 = vmatprep.mubr.msk.bf16.mxu0 %vm1224_vm2, %v15321_v31  ;;  %v1002_v43 = vmax.f32 %v552_v35, 0.0 }
  0xf4   :  { %v554_v38 = vpop.f32.mrf.mxu0  ;;  %12846 = vmatmul.mubr.msk.bf16.gmra.mxu1 %vm1224_vm2, %v15323_v32  ;;  %12986 = vmatmul.mubr.msk.bf16.gmra.mxu0 %vm1224_vm2, %v15323_v32 }
  0xf5   :  { %v555_v39 = vadd.f32 %v15238_v15, %v554_v38  ;;  %v1005_v40 = vmax.f32 %v563_v36, 0.0  ;;  %v15385_v36 = vpop.f32.mrf.mxu1 }
  0xf6   :  { %v12719_v41 = vpop.f32.mrf.mxu0 }
  0xf7   :  { %v1003_v47 = vmax.f32 %v555_v39, 0.0  ;;  %v15343_v51 = vpack.c.bf16 %v1005_v40, %v1004_v48  ;;  %v576_v57 = vadd.f32 %v12719_v41, %v15238_v15 }
  0xf8   :  { %v567_v49 = vpop.f32.mrf.mxu0 }
  0xf9   :  { %v15341_v50 = vpack.c.bf16 %v1003_v47, %v1002_v43  ;;  %v568_v54 = vadd.f32 %v15238_v15, %v567_v49  ;;  %v1008_v4 = vmax.f32 %v576_v57, 0.0  ;;  %v14500_v43 = vld [vmem:[%s20587_s3 + $0x40] sm:$0xff]   ;;  %v15402_v49 = vpop.f32.mrf.mxu1 }
  0xfa   :  { %v12720_v52 = vpop.f32.mrf.mxu0  ;;  %13099 = vmatprep.subr.bf16.mxu1 %v14500_v43 }
  0xfb   :  { %v579_v56 = vadd.f32 %v12720_v52, %v15238_v15  ;;  %12849 = vmatprep.mubr.msk.bf16.mxu1 %vm1224_vm2, %v15341_v50  ;;  %12989 = vmatprep.mubr.msk.bf16.mxu0 %vm1224_vm2, %v15341_v50  ;;  %v1006_v2 = vmax.f32 %v568_v54, 0.0 }
  0xfc   :  { %v570_v58 = vpop.f32.mrf.mxu0  ;;  %12850 = vmatmul.mubr.msk.bf16.gmra.mxu1 %vm1224_vm2, %v15343_v51  ;;  %12990 = vmatmul.mubr.msk.bf16.gmra.mxu0 %vm1224_vm2, %v15343_v51 }
  0xfd   :  { %v571_v59 = vadd.f32 %v15238_v15, %v570_v58  ;;  %v1009_v62 = vmax.f32 %v579_v56, 0.0  ;;  %13100 = vmatpush3.bf16.msra.mxu1 %v14500_v43 }
  0xfe   :  { %v12723_v0 = vpop.f32.mrf.mxu0 }
  0xff   :  { %v1007_v3 = vmax.f32 %v571_v59, 0.0  ;;  %v15363_v8 = vpack.c.bf16 %v1009_v62, %v1008_v4  ;;  %v592_v19 = vadd.f32 %v12723_v0, %v15238_v15  ;;  %v15408_v0 = vpop.f32.mrf.mxu1 }
 0x100   :  { %v583_v5 = vpop.f32.mrf.mxu0 }
 0x101   :  { %v15361_v6 = vpack.c.bf16 %v1007_v3, %v1006_v2  ;;  %20746 = vst [vmem:[#allocation3_spill] sm:$0xff] %v15363_v8  ;;  %v584_v13 = vadd.f32 %v15238_v15, %v583_v5  ;;  %v1012_v28 = vmax.f32 %v592_v19, 0.0  ;;  %v15422_v19 = vpop.f32.mrf.mxu1 }
 0x102   :  { %v12724_v9 = vpop.f32.mrf.mxu0 }
 0x103   :  { %20745 = vst [vmem:[#allocation2_spill] sm:$0xff] %v15361_v6  ;;  %v595_v17 = vadd.f32 %v12724_v9, %v15238_v15  ;;  %12853 = vmatprep.mubr.msk.bf16.mxu1 %vm1224_vm2, %v15361_v6  ;;  %12993 = vmatprep.mubr.msk.bf16.mxu0 %vm1224_vm2, %v15361_v6  ;;  %v1010_v25 = vmax.f32 %v584_v13, 0.0 }
 0x104   :  { %v586_v20 = vpop.f32.mrf.mxu0  ;;  %12854 = vmatmul.mubr.msk.bf16.gmra.mxu1 %vm1224_vm2, %v15363_v8  ;;  %12994 = vmatmul.mubr.msk.bf16.gmra.mxu0 %vm1224_vm2, %v15363_v8 }
 0x105   :  { %v587_v21 = vadd.f32 %v15238_v15, %v586_v20  ;;  %v1013_v22 = vmax.f32 %v595_v17, 0.0 }
 0x106   :  { %v12727_v23 = vpop.f32.mrf.mxu0 }
 0x107   :  { %v1011_v27 = vmax.f32 %v587_v21, 0.0  ;;  %v15383_v33 = vpack.c.bf16 %v1013_v22, %v1012_v28  ;;  %v608_v39 = vadd.f32 %v12727_v23, %v15238_v15 }
 0x108   :  { %v599_v29 = vpop.f32.mrf.mxu0 }
 0x109   :  { %v15381_v30 = vpack.c.bf16 %v1011_v27, %v1010_v25  ;;  %20748 = vst [vmem:[#allocation5_spill] sm:$0xff] %v15383_v33  ;;  %v600_v37 = vadd.f32 %v15238_v15, %v599_v29  ;;  %v1016_v56 = vmax.f32 %v608_v39, 0.0  ;;  %v15428_v29 = vpop.f32.mrf.mxu1 }
 0x10a   :  { %v12728_v35 = vpop.f32.mrf.mxu0 }
 0x10b   :  { %20747 = vst [vmem:[#allocation4_spill] sm:$0xff] %v15381_v30  ;;  %v611_v38 = vadd.f32 %v12728_v35, %v15238_v15  ;;  %12857 = vmatprep.mubr.msk.bf16.mxu1 %vm1224_vm2, %v15381_v30  ;;  %12997 = vmatprep.mubr.msk.bf16.mxu0 %vm1224_vm2, %v15381_v30  ;;  %v1014_v52 = vmax.f32 %v600_v37, 0.0 }
 0x10c   :  { %v602_v40 = vpop.f32.mrf.mxu0  ;;  %12858 = vmatmul.mubr.msk.bf16.gmra.mxu1 %vm1224_vm2, %v15383_v33  ;;  %12998 = vmatmul.mubr.msk.bf16.gmra.mxu0 %vm1224_vm2, %v15383_v33 }
 0x10d   :  { %v603_v41 = vadd.f32 %v15238_v15, %v602_v40  ;;  %v1017_v47 = vmax.f32 %v611_v38, 0.0 }
 0x10e   :  { %v12731_v48 = vpop.f32.mrf.mxu0 }
 0x10f   :  { %v1015_v54 = vmax.f32 %v603_v41, 0.0  ;;  %v15406_v59 = vpack.c.bf16 %v1017_v47, %v1016_v56  ;;  %v624_v4 = vadd.f32 %v12731_v48, %v15238_v15  ;;  %v15442_v47 = vpop.f32.mrf.mxu1 }
 0x110   :  { %v615_v57 = vpop.f32.mrf.mxu0 }
 0x111   :  { %v15404_v58 = vpack.c.bf16 %v1015_v54, %v1014_v52  ;;  %20750 = vst [vmem:[#allocation7_spill] sm:$0xff] %v15406_v59  ;;  %v616_v2 = vadd.f32 %v15238_v15, %v615_v57  ;;  %v1020_v22 = vmax.f32 %v624_v4, 0.0 }
 0x112   :  { %v12732_v62 = vpop.f32.mrf.mxu0 }
 0x113   :  { %20749 = vst [vmem:[#allocation6_spill] sm:$0xff] %v15404_v58  ;;  %v627_v3 = vadd.f32 %v12732_v62, %v15238_v15  ;;  %12861 = vmatprep.mubr.msk.bf16.mxu1 %vm1224_vm2, %v15404_v58  ;;  %13001 = vmatprep.mubr.msk.bf16.mxu0 %vm1224_vm2, %v15404_v58  ;;  %v1018_v20 = vmax.f32 %v616_v2, 0.0 }
 0x114   :  { %v618_v5 = vpop.f32.mrf.mxu0  ;;  %12862 = vmatmul.mubr.msk.bf16.gmra.mxu1 %vm1224_vm2, %v15406_v59  ;;  %13002 = vmatmul.mubr.msk.bf16.gmra.mxu0 %vm1224_vm2, %v15406_v59 }
 0x115   :  { %v619_v9 = vadd.f32 %v15238_v15, %v618_v5  ;;  %v1021_v13 = vmax.f32 %v627_v3, 0.0  ;;  %v15448_v3 = vpop.f32.mrf.mxu1 }
 0x116   :  { %v12735_v17 = vpop.f32.mrf.mxu0 }
 0x117   :  { %v1019_v21 = vmax.f32 %v619_v9, 0.0  ;;  %v15426_v27 = vpack.c.bf16 %v1021_v13, %v1020_v22  ;;  %v640_v38 = vadd.f32 %v12735_v17, %v15238_v15  ;;  %v14501_v9 = vld [vmem:[%s20587_s3 + $0x98] sm:$0xff]  }
 0x118   :  { %v631_v23 = vpop.f32.mrf.mxu0  ;;  %13229 = vmatprep.subr.bf16.mxu0 %v14501_v9 }
 0x119   :  { %v15424_v25 = vpack.c.bf16 %v1019_v21, %v1018_v20  ;;  %20752 = vst [vmem:[#allocation9_spill] sm:$0xff] %v15426_v27  ;;  %v632_v35 = vadd.f32 %v15238_v15, %v631_v23  ;;  %v1024_v54 = vmax.f32 %v640_v38, 0.0  ;;  %v15465_v23 = vpop.f32.mrf.mxu1  ;;  %13230 = vmatpush3.bf16.msra.mxu0 %v14501_v9 }
 0x11a   :  { %v12736_v28 = vpop.f32.mrf.mxu0 }
 0x11b   :  { %20751 = vst [vmem:[#allocation8_spill] sm:$0xff] %v15424_v25  ;;  %v643_v37 = vadd.f32 %v12736_v28, %v15238_v15  ;;  %12865 = vmatprep.mubr.msk.bf16.mxu1 %vm1224_vm2, %v15424_v25  ;;  %13005 = vmatprep.mubr.msk.bf16.mxu0 %vm1224_vm2, %v15424_v25  ;;  %v1022_v48 = vmax.f32 %v632_v35, 0.0 }
 0x11c   :  { %v634_v39 = vpop.f32.mrf.mxu0  ;;  %12866 = vmatmul.mubr.msk.bf16.gmra.mxu1 %vm1224_vm2, %v15426_v27  ;;  %13006 = vmatmul.mubr.msk.bf16.gmra.mxu0 %vm1224_vm2, %v15426_v27 }
 0x11d   :  { %v635_v40 = vadd.f32 %v15238_v15, %v634_v39  ;;  %v1025_v41 = vmax.f32 %v643_v37, 0.0 }
 0x11e   :  { %v12739_v43 = vpop.f32.mrf.mxu0 }
 0x11f   :  { %v1023_v52 = vmax.f32 %v635_v40, 0.0  ;;  %v15446_v62 = vpack.c.bf16 %v1025_v41, %v1024_v54  ;;  %v656_v13 = vadd.f32 %v12739_v43, %v15238_v15  ;;  %v15471_v43 = vpop.f32.mrf.mxu1 }
 0x120   :  { %v647_v56 = vpop.f32.mrf.mxu0 }
 0x121   :  { %v15444_v57 = vpack.c.bf16 %v1023_v52, %v1022_v48  ;;  %20754 = vst [vmem:[#allocation11_spill] sm:$0xff] %v15446_v62  ;;  %v648_v4 = vadd.f32 %v15238_v15, %v647_v56  ;;  %v1028_v37 = vmax.f32 %v656_v13, 0.0  ;;  %v15485_v9 = vpop.f32.mrf.mxu1 }
 0x122   :  { %v12740_v2 = vpop.f32.mrf.mxu0 }
 0x123   :  { %20753 = vst [vmem:[#allocation10_spill] sm:$0xff] %v15444_v57  ;;  %v659_v5 = vadd.f32 %v12740_v2, %v15238_v15  ;;  %12869 = vmatprep.mubr.msk.bf16.mxu1 %vm1224_vm2, %v15444_v57  ;;  %13009 = vmatprep.mubr.msk.bf16.mxu0 %vm1224_vm2, %v15444_v57  ;;  %v1026_v28 = vmax.f32 %v648_v4, 0.0 }
 0x124   :  { %v650_v17 = vpop.f32.mrf.mxu0  ;;  %12870 = vmatmul.mubr.msk.bf16.gmra.mxu1 %vm1224_vm2, %v15446_v62  ;;  %13010 = vmatmul.mubr.msk.bf16.gmra.mxu0 %vm1224_vm2, %v15446_v62 }
 0x125   :  { %v651_v20 = vadd.f32 %v15238_v15, %v650_v17  ;;  %v1029_v21 = vmax.f32 %v659_v5, 0.0 }
 0x126   :  { %v12743_v22 = vpop.f32.mrf.mxu0 }
 0x127   :  { %v1027_v35 = vmax.f32 %v651_v20, 0.0  ;;  %v15469_v40 = vpack.c.bf16 %v1029_v21, %v1028_v37  ;;  %v672_v54 = vadd.f32 %v12743_v22, %v15238_v15  ;;  %v15491_v37 = vpop.f32.mrf.mxu1 }
 0x128   :  { %v663_v38 = vpop.f32.mrf.mxu0 }
 0x129   :  { %v15467_v39 = vpack.c.bf16 %v1027_v35, %v1026_v28  ;;  %20756 = vst [vmem:[#allocation13_spill] sm:$0xff] %v15469_v40  ;;  %v664_v48 = vadd.f32 %v15238_v15, %v663_v38  ;;  %v1032_v20 = vmax.f32 %v672_v54, 0.0 }
 0x12a   :  { %v12744_v41 = vpop.f32.mrf.mxu0 }
 0x12b   :  { %20755 = vst [vmem:[#allocation12_spill] sm:$0xff] %v15467_v39  ;;  %v675_v52 = vadd.f32 %v12744_v41, %v15238_v15  ;;  %12873 = vmatprep.mubr.msk.bf16.mxu1 %vm1224_vm2, %v15467_v39  ;;  %13013 = vmatprep.mubr.msk.bf16.mxu0 %vm1224_vm2, %v15467_v39  ;;  %v1030_v13 = vmax.f32 %v664_v48, 0.0 }
 0x12c   :  { %v666_v56 = vpop.f32.mrf.mxu0  ;;  %12874 = vmatmul.mubr.msk.bf16.gmra.mxu1 %vm1224_vm2, %v15469_v40  ;;  %13014 = vmatmul.mubr.msk.bf16.gmra.mxu0 %vm1224_vm2, %v15469_v40 }
 0x12d   :  { %v667_v2 = vadd.f32 %v15238_v15, %v666_v56  ;;  %v1033_v4 = vmax.f32 %v675_v52, 0.0 }
 0x12e   :  { %v12747_v5 = vpop.f32.mrf.mxu0 }
 0x12f   :  { %v1031_v17 = vmax.f32 %v667_v2, 0.0  ;;  %v15489_v22 = vpack.c.bf16 %v1033_v4, %v1032_v20  ;;  %v688_v48 = vadd.f32 %v12747_v5, %v15238_v15  ;;  %v15505_v4 = vpop.f32.mrf.mxu1 }
 0x130   :  { %v679_v21 = vpop.f32.mrf.mxu0 }
 0x131   :  { %v15487_v28 = vpack.c.bf16 %v1031_v17, %v1030_v13  ;;  %20758 = vst [vmem:[#allocation15_spill] sm:$0xff] %v15489_v22  ;;  %v680_v38 = vadd.f32 %v15238_v15, %v679_v21  ;;  %v1036_v20 = vmax.f32 %v688_v48, 0.0 }
 0x132   :  { %v12748_v35 = vpop.f32.mrf.mxu0 }
 0x133   :  { %20757 = vst [vmem:[#allocation14_spill] sm:$0xff] %v15487_v28  ;;  %v691_v41 = vadd.f32 %v12748_v35, %v15238_v15  ;;  %12877 = vmatprep.mubr.msk.bf16.mxu1 %vm1224_vm2, %v15487_v28  ;;  %13017 = vmatprep.mubr.msk.bf16.mxu0 %vm1224_vm2, %v15487_v28  ;;  %v1034_v13 = vmax.f32 %v680_v38, 0.0  ;;  %v15511_v28 = vpop.f32.mrf.mxu1 }
 0x134   :  { %v682_v52 = vpop.f32.mrf.mxu0  ;;  %12878 = vmatmul.mubr.msk.bf16.gmra.mxu1 %vm1224_vm2, %v15489_v22  ;;  %13018 = vmatmul.mubr.msk.bf16.gmra.mxu0 %vm1224_vm2, %v15489_v22 }
 0x135   :  { %v683_v54 = vadd.f32 %v15238_v15, %v682_v52  ;;  %v1037_v56 = vmax.f32 %v691_v41, 0.0 }
 0x136   :  { %v12751_v2 = vpop.f32.mrf.mxu0 }
 0x137   :  { %v1035_v17 = vmax.f32 %v683_v54, 0.0  ;;  %v15509_v5 = vpack.c.bf16 %v1037_v56, %v1036_v20  ;;  %v704_v38 = vadd.f32 %v12751_v2, %v15238_v15 }
 0x138   :  { %v695_v21 = vpop.f32.mrf.mxu0 }
 0x139   :  { %v15507_v35 = vpack.c.bf16 %v1035_v17, %v1034_v13  ;;  %20760 = vst [vmem:[#allocation17_spill] sm:$0xff] %v15509_v5  ;;  %v696_v40 = vadd.f32 %v15238_v15, %v695_v21  ;;  %v1040_v17 = vmax.f32 %v704_v38, 0.0 }
 0x13a   :  { %v12752_v12 = vpop.f32.mrf.mxu0 }
 0x13b   :  { %20759 = vst [vmem:[#allocation16_spill] sm:$0xff] %v15507_v35  ;;  %v707_v22 = vadd.f32 %v12752_v12, %v15238_v15  ;;  %12881 = vmatprep.mubr.msk.bf16.mxu1 %vm1224_vm2, %v15507_v35  ;;  %13021 = vmatprep.mubr.msk.bf16.mxu0 %vm1224_vm2, %v15507_v35  ;;  %v15525_v12 = vpop.f32.mrf.mxu1  ;;  %v1038_v56 = vmax.f32 %v696_v40, 0.0 }
 0x13c   :  { %v698_v41 = vpop.f32.mrf.mxu0  ;;  %12882 = vmatmul.mubr.msk.bf16.gmra.mxu1 %vm1224_vm2, %v15509_v5  ;;  %13022 = vmatmul.mubr.msk.bf16.gmra.mxu0 %vm1224_vm2, %v15509_v5 }
 0x13d   :  { %v699_v48 = vadd.f32 %v15238_v15, %v698_v41  ;;  %v1041_v52 = vmax.f32 %v707_v22, 0.0  ;;  %v15531_v39 = vpop.f32.mrf.mxu1 }
 0x13e   :  { %v12755_v54 = vpop.f32.mrf.mxu0 }
 0x13f   :  { %v1039_v13 = vmax.f32 %v699_v48, 0.0  ;;  %v15529_v2 = vpack.c.bf16 %v1041_v52, %v1040_v17  ;;  %v720_v40 = vadd.f32 %v12755_v54, %v15238_v15 }
 0x140   :  { %v711_v20 = vpop.f32.mrf.mxu0 }
 0x141   :  { %v15527_v21 = vpack.c.bf16 %v1039_v13, %v1038_v56  ;;  %20762 = vst [vmem:[#allocation19_spill] sm:$0xff] %v15529_v2  ;;  %v712_v62 = vadd.f32 %v15238_v15, %v711_v20  ;;  %v1044_v13 = vmax.f32 %v720_v40, 0.0 }
 0x142   :  { %v12756_v35 = vpop.f32.mrf.mxu0 }
 0x143   :  { %20761 = vst [vmem:[#allocation18_spill] sm:$0xff] %v15527_v21  ;;  %v723_v5 = vadd.f32 %v12756_v35, %v15238_v15  ;;  %12885 = vmatprep.mubr.msk.bf16.mxu1 %vm1224_vm2, %v15527_v21  ;;  %13025 = vmatprep.mubr.msk.bf16.mxu0 %vm1224_vm2, %v15527_v21  ;;  %v15545_v35 = vpop.f32.mrf.mxu1  ;;  %v1042_v52 = vmax.f32 %v712_v62, 0.0 }
 0x144   :  { %v714_v22 = vpop.f32.mrf.mxu0  ;;  %12886 = vmatmul.mubr.msk.bf16.gmra.mxu1 %vm1224_vm2, %v15529_v2  ;;  %13026 = vmatmul.mubr.msk.bf16.gmra.mxu0 %vm1224_vm2, %v15529_v2 }
 0x145   :  { %v715_v38 = vadd.f32 %v15238_v15, %v714_v22  ;;  %v1045_v41 = vmax.f32 %v723_v5, 0.0  ;;  %v15551_v57 = vpop.f32.mrf.mxu1 }
 0x146   :  { %v12759_v48 = vpop.f32.mrf.mxu0 }
 0x147   :  { %v1043_v56 = vmax.f32 %v715_v38, 0.0  ;;  %v15549_v54 = vpack.c.bf16 %v1045_v41, %v1044_v13  ;;  %v736_v62 = vadd.f32 %v12759_v48, %v15238_v15 }
 0x148   :  { %v727_v17 = vpop.f32.mrf.mxu0 }
 0x149   :  { %v15547_v20 = vpack.c.bf16 %v1043_v56, %v1042_v52  ;;  %20764 = vst [vmem:[#allocation21_spill] sm:$0xff] %v15549_v54  ;;  %v728_v27 = vadd.f32 %v15238_v15, %v727_v17  ;;  %v1048_v56 = vmax.f32 %v736_v62, 0.0 }
 0x14a   :  { %v12760_v21 = vpop.f32.mrf.mxu0 }
 0x14b   :  { %20763 = vst [vmem:[#allocation20_spill] sm:$0xff] %v15547_v20  ;;  %v739_v2 = vadd.f32 %v12760_v21, %v15238_v15  ;;  %12889 = vmatprep.mubr.msk.bf16.mxu1 %vm1224_vm2, %v15547_v20  ;;  %13029 = vmatprep.mubr.msk.bf16.mxu0 %vm1224_vm2, %v15547_v20  ;;  %v15565_v21 = vpop.f32.mrf.mxu1  ;;  %v1046_v41 = vmax.f32 %v728_v27, 0.0 }
 0x14c   :  { %v730_v5 = vpop.f32.mrf.mxu0  ;;  %12890 = vmatmul.mubr.msk.bf16.gmra.mxu1 %vm1224_vm2, %v15549_v54  ;;  %13030 = vmatmul.mubr.msk.bf16.gmra.mxu0 %vm1224_vm2, %v15549_v54 }
 0x14d   :  { %v731_v40 = vadd.f32 %v15238_v15, %v730_v5  ;;  %v1049_v22 = vmax.f32 %v739_v2, 0.0  ;;  %v15571_v25 = vpop.f32.mrf.mxu1 }
 0x14e   :  { %v12763_v38 = vpop.f32.mrf.mxu0 }
 0x14f   :  { %v1047_v52 = vmax.f32 %v731_v40, 0.0  ;;  %v15569_v48 = vpack.c.bf16 %v1049_v22, %v1048_v56  ;;  %v752_v27 = vadd.f32 %v12763_v38, %v15238_v15 }
 0x150   :  { %v743_v13 = vpop.f32.mrf.mxu0 }
 0x151   :  { %v15567_v17 = vpack.c.bf16 %v1047_v52, %v1046_v41  ;;  %20766 = vst [vmem:[#allocation23_spill] sm:$0xff] %v15569_v48  ;;  %v744_v59 = vadd.f32 %v15238_v15, %v743_v13  ;;  %v1052_v52 = vmax.f32 %v752_v27, 0.0 }
 0x152   :  { %v12764_v20 = vpop.f32.mrf.mxu0 }
 0x153   :  { %20765 = vst [vmem:[#allocation22_spill] sm:$0xff] %v15567_v17  ;;  %v755_v54 = vadd.f32 %v12764_v20, %v15238_v15  ;;  %12893 = vmatprep.mubr.msk.bf16.mxu1 %vm1224_vm2, %v15567_v17  ;;  %13033 = vmatprep.mubr.msk.bf16.mxu0 %vm1224_vm2, %v15567_v17  ;;  %v15585_v20 = vpop.f32.mrf.mxu1  ;;  %v1050_v22 = vmax.f32 %v744_v59, 0.0 }
 0x154   :  { %v746_v2 = vpop.f32.mrf.mxu0  ;;  %12894 = vmatmul.mubr.msk.bf16.gmra.mxu1 %vm1224_vm2, %v15569_v48  ;;  %13034 = vmatmul.mubr.msk.bf16.gmra.mxu0 %vm1224_vm2, %v15569_v48 }
 0x155   :  { %v747_v62 = vadd.f32 %v15238_v15, %v746_v2  ;;  %v1053_v5 = vmax.f32 %v755_v54, 0.0  ;;  %v15591_v58 = vpop.f32.mrf.mxu1 }
 0x156   :  { %v12767_v40 = vpop.f32.mrf.mxu0 }
 0x157   :  { %v1051_v41 = vmax.f32 %v747_v62, 0.0  ;;  %v15589_v38 = vpack.c.bf16 %v1053_v5, %v1052_v52  ;;  %v768_v59 = vadd.f32 %v12767_v40, %v15238_v15  ;;  %v792_v40 = vadd.f32 %v15238_v15, %v15265_v10  ;;  %v14502_v10 = vld [vmem:[%s20587_s3 + $0x90] sm:$0xff]  }
 0x158   :  { %v759_v56 = vpop.f32.mrf.mxu0  ;;  %13231 = vmatprep.subr.bf16.mxu0 %v14502_v10 }
 0x159   :  { %v15587_v13 = vpack.c.bf16 %v1051_v41, %v1050_v22  ;;  %20768 = vst [vmem:[#allocation25_spill] sm:$0xff] %v15589_v38  ;;  %v760_v33 = vadd.f32 %v15238_v15, %v759_v56  ;;  %v1056_v41 = vmax.f32 %v768_v59, 0.0  ;;  %13232 = vmatpush3.bf16.msra.mxu0 %v14502_v10  ;;  %v816_v10 = vadd.f32 %v15299_v7, %v15238_v15 }
 0x15a   :  { %v12768_v17 = vpop.f32.mrf.mxu0 }
 0x15b   :  { %20767 = vst [vmem:[#allocation24_spill] sm:$0xff] %v15587_v13  ;;  %v771_v48 = vadd.f32 %v12768_v17, %v15238_v15  ;;  %12897 = vmatprep.mubr.msk.bf16.mxu1 %vm1224_vm2, %v15587_v13  ;;  %13037 = vmatprep.mubr.msk.bf16.mxu0 %vm1224_vm2, %v15587_v13  ;;  %v15605_v17 = vpop.f32.mrf.mxu1  ;;  %v1054_v5 = vmax.f32 %v760_v33, 0.0  ;;  %v1068_v7 = vmax.f32 %v816_v10, 0.0 }
 0x15c   :  { %v762_v54 = vpop.f32.mrf.mxu0  ;;  %12898 = vmatmul.mubr.msk.bf16.gmra.mxu1 %vm1224_vm2, %v15589_v38  ;;  %13038 = vmatmul.mubr.msk.bf16.gmra.mxu0 %vm1224_vm2, %v15589_v38  ;;  %v800_v38 = vadd.f32 %v15259_v44, %v15238_v15 }
 0x15d   :  { %v763_v27 = vadd.f32 %v15238_v15, %v762_v54  ;;  %v1057_v2 = vmax.f32 %v771_v48, 0.0  ;;  %v15613_v8 = vpop.f32.mrf.mxu1  ;;  %v795_v48 = vadd.f32 %v15238_v15, %v15285_v63 }
 0x15e   :  { %v12771_v62 = vpop.f32.mrf.mxu0  ;;  %v1064_v44 = vmax.f32 %v800_v38, 0.0  ;;  %v824_v38 = vadd.f32 %v15238_v15, %v15345_v53 }
 0x15f   :  { %v1055_v22 = vmax.f32 %v763_v27, 0.0  ;;  %v15611_v13 = vpack.c.bf16 %v1057_v2, %v1056_v41  ;;  %v784_v59 = vadd.f32 %v12771_v62, %v15238_v15  ;;  %v15632_v2 = vpop.f32.mrf.mxu1 }
 0x160   :  { %v775_v52 = vpop.f32.mrf.mxu0  ;;  %v1070_v53 = vmax.f32 %v824_v38, 0.0 }
 0x161   :  { %v15607_v56 = vpack.c.bf16 %v1055_v22, %v1054_v5  ;;  %20770 = vst [vmem:[#allocation27_spill] sm:$0xff] %v15611_v13  ;;  %v776_v54 = vadd.f32 %v15238_v15, %v775_v52  ;;  %v1062_v5 = vmax.f32 %v792_v40, 0.0  ;;  %v1063_v22 = vmax.f32 %v795_v48, 0.0 }
 0x162   :  { %v12772_v30 = vpop.f32.mrf.mxu0  ;;  %v808_v40 = vadd.f32 %v15238_v15, %v15305_v18  ;;  %v811_v48 = vadd.f32 %v15238_v15, %v15325_v34 }
 0x163   :  { %20769 = vst [vmem:[#allocation26_spill] sm:$0xff] %v15607_v56  ;;  %v787_v33 = vadd.f32 %v12772_v30, %v15238_v15  ;;  %12901 = vmatprep.mubr.msk.bf16.mxu1 %vm1224_vm2, %v15607_v56  ;;  %13041 = vmatprep.mubr.msk.bf16.mxu0 %vm1224_vm2, %v15607_v56  ;;  %v1058_v41 = vmax.f32 %v776_v54, 0.0  ;;  %v1060_v56 = vmax.f32 %v784_v59, 0.0  ;;  %v819_v59 = vadd.f32 %v15319_v26, %v15238_v15 }
 0x164   :  { %v778_v27 = vpop.f32.mrf.mxu0  ;;  %12902 = vmatmul.mubr.msk.bf16.gmra.mxu1 %vm1224_vm2, %v15611_v13  ;;  %13042 = vmatmul.mubr.msk.bf16.gmra.mxu0 %vm1224_vm2, %v15611_v13  ;;  %v803_v13 = vadd.f32 %v15279_v55, %v15238_v15  ;;  %v1066_v34 = vmax.f32 %v808_v40, 0.0 }
 0x165   :  { %v779_v63 = vadd.f32 %v15238_v15, %v778_v27  ;;  %v1061_v30 = vmax.f32 %v787_v33, 0.0  ;;  %v15642_v27 = vpop.f32.mrf.mxu1  ;;  %v15644_v33 = vpack.c.bf16 %v1063_v22, %v1062_v5  ;;  %v1069_v26 = vmax.f32 %v819_v59, 0.0 }
 0x166   :  { %v1065_v55 = vmax.f32 %v803_v13, 0.0  ;;  %v827_v13 = vadd.f32 %v15238_v15, %v15365_v11  ;;  %v832_v11 = vadd.f32 %v15339_v42, %v15238_v15  ;;  %v851_v59 = vadd.f32 %v15402_v49, %v15238_v15 }
 0x167   :  { %v1059_v52 = vmax.f32 %v779_v63, 0.0  ;;  %v15640_v6 = vpack.c.bf16 %v1061_v30, %v1060_v56  ;;  %v15662_v18 = vpop.f32.mrf.mxu1  ;;  %v1067_v56 = vmax.f32 %v811_v48, 0.0 }
 0x168   :  { %v15664_v54 = vpack.c.bf16 %v1065_v55, %v1064_v44  ;;  %v1071_v22 = vmax.f32 %v827_v13, 0.0  ;;  %v840_v44 = vadd.f32 %v15238_v15, %v15385_v36  ;;  %v843_v55 = vadd.f32 %v15238_v15, %v15408_v0 }
 0x169   :  { %v15634_v62 = vpack.c.bf16 %v1059_v52, %v1058_v41  ;;  %v15670_v63 = vpop.f32.mrf.mxu1  ;;  %v15672_v30 = vpack.c.bf16 %v1067_v56, %v1066_v34  ;;  %v15688_v41 = vpack.c.bf16 %v1069_v26, %v1068_v7  ;;  %v835_v52 = vadd.f32 %v15359_v1, %v15238_v15 }
 0x16a   :  { %v15696_v48 = vpack.c.bf16 %v1071_v22, %v1070_v53  ;;  %v1072_v42 = vmax.f32 %v832_v11, 0.0  ;;  %v1074_v36 = vmax.f32 %v840_v44, 0.0  ;;  %v1075_v56 = vmax.f32 %v843_v55, 0.0 }
 0x16b   :  { %12905 = vmatprep.mubr.msk.bf16.mxu1 %vm1224_vm2, %v15634_v62  ;;  %13045 = vmatprep.mubr.msk.bf16.mxu0 %vm1224_vm2, %v15634_v62  ;;  %v15686_v5 = vpop.f32.mrf.mxu1  ;;  %v1073_v1 = vmax.f32 %v835_v52, 0.0  ;;  %v848_v0 = vadd.f32 %v15379_v24, %v15238_v15  ;;  %v856_v7 = vadd.f32 %v15238_v15, %v15428_v29  ;;  %v859_v26 = vadd.f32 %v15238_v15, %v15448_v3  ;;  %v12967_v24 = vpop.f32.mrf.mxu0 }
 0x16c   :  { %12906 = vmatmul.mubr.msk.bf16.gmra.mxu1 %vm1224_vm2, %v15640_v6  ;;  %13046 = vmatmul.mubr.msk.bf16.gmra.mxu0 %vm1224_vm2, %v15640_v6  ;;  %v15720_v13 = vpack.c.bf16 %v1075_v56, %v1074_v36  ;;  %v1077_v53 = vmax.f32 %v851_v59, 0.0  ;;  %v864_v44 = vadd.f32 %v15422_v19, %v15238_v15  ;;  %v867_v55 = vadd.f32 %v15442_v47, %v15238_v15 }
 0x16d   :  { %12909 = vmatprep.mubr.msk.bf16.mxu1 %vm1224_vm2, %v15644_v33  ;;  %13049 = vmatprep.mubr.msk.bf16.mxu0 %vm1224_vm2, %v15644_v33  ;;  %v15694_v40 = vpop.f32.mrf.mxu1  ;;  %v15712_v10 = vpack.c.bf16 %v1073_v1, %v1072_v42  ;;  %v1076_v49 = vmax.f32 %v848_v0, 0.0  ;;  %v1078_v29 = vmax.f32 %v856_v7, 0.0  ;;  %v1079_v11 = vmax.f32 %v859_v26, 0.0  ;;  %v2023_v3 = vpop.f32.mrf.mxu0 }
 0x16e   :  { %v872_v36 = vadd.f32 %v15238_v15, %v15471_v43  ;;  %v875_v56 = vadd.f32 %v15238_v15, %v15491_v37  ;;  %v1080_v47 = vmax.f32 %v864_v44, 0.0  ;;  %v1081_v0 = vmax.f32 %v867_v55, 0.0 }
 0x16f   :  { %v15710_v34 = vpop.f32.mrf.mxu1  ;;  %v15736_v52 = vpack.c.bf16 %v1077_v53, %v1076_v49  ;;  %v15744_v1 = vpack.c.bf16 %v1079_v11, %v1078_v29  ;;  %v12968_v19 = vpop.f32.mrf.mxu0  ;;  %v880_v49 = vadd.f32 %v15465_v23, %v15238_v15  ;;  %v883_v53 = vadd.f32 %v15485_v9, %v15238_v15 }
 0x170   :  { %v1082_v43 = vmax.f32 %v872_v36, 0.0  ;;  %v1083_v7 = vmax.f32 %v875_v56, 0.0  ;;  %v15760_v26 = vpack.c.bf16 %v1081_v0, %v1080_v47  ;;  %v888_v44 = vadd.f32 %v15238_v15, %v15511_v28 }
 0x171   :  { %v15718_v38 = vpop.f32.mrf.mxu1  ;;  %20771 = vst [vmem:[#allocation28_spill] sm:$0xff] %v15736_v52  ;;  %20772 = vst [vmem:[#allocation29_spill] sm:$0xff] %v15744_v1  ;;  %v2026_v37 = vpop.f32.mrf.mxu0  ;;  %v891_v55 = vadd.f32 %v15238_v15, %v15531_v39  ;;  %v1084_v9 = vmax.f32 %v880_v49, 0.0  ;;  %v1085_v28 = vmax.f32 %v883_v53, 0.0 }
 0x172   :  { %v15768_v11 = vpack.c.bf16 %v1083_v7, %v1082_v43  ;;  %v1086_v39 = vmax.f32 %v888_v44, 0.0 }
 0x173   :  { %v15734_v22 = vpop.f32.mrf.mxu1  ;;  %v1087_v0 = vmax.f32 %v891_v55, 0.0 }
 0x174   :  { %12910 = vmatmul.mubr.msk.bf16.gmra.mxu1 %vm1224_vm2, %v15664_v54  ;;  %13050 = vmatmul.mubr.msk.bf16.gmra.mxu0 %vm1224_vm2, %v15664_v54 }
 0x175   :  { %12913 = vmatprep.mubr.msk.bf16.mxu1 %vm1224_vm2, %v15672_v30  ;;  %13053 = vmatprep.mubr.msk.bf16.mxu0 %vm1224_vm2, %v15672_v30  ;;  %v15742_v42 = vpop.f32.mrf.mxu1  ;;  %v15799_v55 = vpack.c.bf16 %v1087_v0, %v1086_v39 }
 0x177   :  { %v15758_v59 = vpop.f32.mrf.mxu1  ;;  %20775 = vst [vmem:[#allocation32_spill] sm:$0xff] %v15799_v55 }
 0x179   :  { %v15766_v29 = vpop.f32.mrf.mxu1 }
 0x17c   :  { %12914 = vmatmul.mubr.msk.bf16.gmra.mxu1 %vm1224_vm2, %v15688_v41  ;;  %13054 = vmatmul.mubr.msk.bf16.gmra.mxu0 %vm1224_vm2, %v15688_v41 }
 0x17d   :  { %12917 = vmatprep.mubr.msk.bf16.mxu1 %vm1224_vm2, %v15696_v48  ;;  %13057 = vmatprep.mubr.msk.bf16.mxu0 %vm1224_vm2, %v15696_v48 }
 0x184   :  { %12918 = vmatmul.mubr.msk.bf16.gmra.mxu1 %vm1224_vm2, %v15712_v10  ;;  %13058 = vmatmul.mubr.msk.bf16.gmra.mxu0 %vm1224_vm2, %v15712_v10 }
 0x185   :  { %12921 = vmatprep.mubr.msk.bf16.mxu1 %vm1224_vm2, %v15720_v13  ;;  %13061 = vmatprep.mubr.msk.bf16.mxu0 %vm1224_vm2, %v15720_v13 }
 0x18c   :  { %12922 = vmatmul.mubr.msk.bf16.gmra.mxu1 %vm1224_vm2, %v15736_v52  ;;  %13062 = vmatmul.mubr.msk.bf16.gmra.mxu0 %vm1224_vm2, %v15736_v52 }
 0x18d   :  { %12925 = vmatprep.mubr.msk.bf16.mxu1 %vm1224_vm2, %v15744_v1  ;;  %13065 = vmatprep.mubr.msk.bf16.mxu0 %vm1224_vm2, %v15744_v1 }
 0x194   :  { %v12831_v36 = vpop.f32.mrf.mxu1  ;;  %12926 = vmatmul.mubr.msk.bf16.gmra.mxu1 %vm1224_vm2, %v15760_v26  ;;  %v12971_v56 = vpop.f32.mrf.mxu0  ;;  %13066 = vmatmul.mubr.msk.bf16.gmra.mxu0 %vm1224_vm2, %v15760_v26 }
 0x195   :  { %v15778_v23 = vadd.f32 %v12967_v24, %v12831_v36  ;;  %12929 = vmatprep.mubr.msk.bf16.mxu1 %vm1224_vm2, %v15768_v11  ;;  %13069 = vmatprep.mubr.msk.bf16.mxu0 %vm1224_vm2, %v15768_v11  ;;  %v15788_v24 = vpack.c.bf16 %v1085_v28, %v1084_v9  ;;  %v15793_v36 = vld [vmem:[%s20588_s4] ss:$0 sm:$0xff] }
 0x196   :  { %v1451_v47 = vpop.f32.mrf.mxu1  ;;  %v2039_v15 = vpop.f32.mrf.mxu0  ;;  %v896_v49 = vadd.f32 %v15793_v36, %v15505_v4  ;;  %v899_v53 = vadd.f32 %v15793_v36, %v15525_v12  ;;  %v907_v9 = vadd.f32 %v15793_v36, %v15571_v25 }
 0x197   :  { %v15784_v43 = vadd.f32 %v2023_v3, %v1451_v47 }
 0x198   :  { %v12832_v7 = vpop.f32.mrf.mxu1  ;;  %v12972_v1 = vpop.f32.mrf.mxu0  ;;  %v1089_v25 = vmax.f32 %v899_v53, 0.0 }
 0x199   :  { %20773 = vst [vmem:[#allocation30_spill] sm:$0xff] %v15784_v43  ;;  %v15786_v52 = vadd.f32 %v12968_v19, %v12832_v7  ;;  %v904_v19 = vadd.f32 %v15793_v36, %v15551_v57  ;;  %v1088_v57 = vmax.f32 %v896_v49, 0.0  ;;  %v1091_v7 = vmax.f32 %v907_v9, 0.0  ;;  %v14503_v9 = vld [vmem:[%s20587_s3 + $0x88] sm:$0xff]  }
 0x19a   :  { %v1454_v44 = vpop.f32.mrf.mxu1  ;;  %v2042_v3 = vpop.f32.mrf.mxu0  ;;  %13233 = vmatprep.subr.bf16.mxu0 %v14503_v9 }
 0x19b   :  { %20774 = vst [vmem:[#allocation31_spill] sm:$0xff] %v15786_v52  ;;  %v15805_v28 = vadd.f32 %v2026_v37, %v1454_v44  ;;  %v1090_v0 = vmax.f32 %v904_v19, 0.0  ;;  %v923_v19 = vadd.f32 %v15793_v36, %v15613_v8  ;;  %13234 = vmatpush3.bf16.msra.mxu0 %v14503_v9 }
 0x19c   :  { %v12835_v47 = vpop.f32.mrf.mxu1  ;;  %12930 = vmatmul.mubr.msk.bf16.gmra.mxu1 %vm1224_vm2, %v15788_v24  ;;  %v12975_v4 = vpop.f32.mrf.mxu0  ;;  %13070 = vmatmul.mubr.msk.bf16.gmra.mxu0 %vm1224_vm2, %v15788_v24 }
 0x19d   :  { %20776 = vst [vmem:[#allocation33_spill] sm:$0xff] %v15805_v28  ;;  %v15811_v12 = vadd.f32 %v12971_v56, %v12835_v47  ;;  %12933 = vmatprep.mubr.msk.bf16.mxu1 %vm1224_vm2, %v15799_v55  ;;  %13073 = vmatprep.mubr.msk.bf16.mxu0 %vm1224_vm2, %v15799_v55  ;;  %v15821_v56 = vpack.c.bf16 %v1089_v25, %v1088_v57 }
 0x19e   :  { %v1467_v37 = vpop.f32.mrf.mxu1  ;;  %v2055_v39 = vpop.f32.mrf.mxu0  ;;  %v912_v47 = vadd.f32 %v15793_v36, %v15545_v35  ;;  %v15827_v55 = vpack.c.bf16 %v1091_v7, %v1090_v0 }
 0x19f   :  { %20777 = vst [vmem:[#allocation34_spill] sm:$0xff] %v15811_v12  ;;  %v15817_v44 = vadd.f32 %v2039_v15, %v1467_v37  ;;  %v915_v12 = vadd.f32 %v15793_v36, %v15565_v21  ;;  %v920_v15 = vadd.f32 %v15793_v36, %v15591_v58  ;;  %v1095_v37 = vmax.f32 %v923_v19, 0.0 }
 0x1a0   :  { %v12836_v28 = vpop.f32.mrf.mxu1  ;;  %v12976_v52 = vpop.f32.mrf.mxu0  ;;  %v1092_v8 = vmax.f32 %v912_v47, 0.0 }
 0x1a1   :  { %v15819_v43 = vadd.f32 %v12972_v1, %v12836_v28  ;;  %v1093_v58 = vmax.f32 %v915_v12, 0.0  ;;  %v1094_v25 = vmax.f32 %v920_v15, 0.0  ;;  %v931_v12 = vadd.f32 %v15793_v36, %v15605_v17 }
 0x1a2   :  { %v1470_v49 = vpop.f32.mrf.mxu1  ;;  %v2058_v53 = vpop.f32.mrf.mxu0  ;;  %v939_v15 = vadd.f32 %v15793_v36, %v15670_v63 }
 0x1a3   :  { %20778 = vst [vmem:[#allocation35_spill] sm:$0xff] %v15819_v43  ;;  %v15833_v1 = vadd.f32 %v2042_v3, %v1470_v49  ;;  %v15858_v43 = vpack.c.bf16 %v1095_v37, %v1094_v25  ;;  %v1097_v63 = vmax.f32 %v931_v12, 0.0 }
 0x1a4   :  { %v12839_v35 = vpop.f32.mrf.mxu1  ;;  %12934 = vmatmul.mubr.msk.bf16.gmra.mxu1 %vm1224_vm2, %v15821_v56  ;;  %v12979_v21 = vpop.f32.mrf.mxu0  ;;  %13074 = vmatmul.mubr.msk.bf16.gmra.mxu0 %vm1224_vm2, %v15821_v56 }
 0x1a5   :  { %20779 = vst [vmem:[#allocation36_spill] sm:$0xff] %v15833_v1  ;;  %v15842_v28 = vadd.f32 %v12975_v4, %v12839_v35  ;;  %12937 = vmatprep.mubr.msk.bf16.mxu1 %vm1224_vm2, %v15827_v55  ;;  %13077 = vmatprep.mubr.msk.bf16.mxu0 %vm1224_vm2, %v15827_v55  ;;  %v15852_v35 = vpack.c.bf16 %v1093_v58, %v1092_v8  ;;  %v1099_v58 = vmax.f32 %v939_v15, 0.0 }
 0x1a6   :  { %v1483_v3 = vpop.f32.mrf.mxu1  ;;  %v2071_v57 = vpop.f32.mrf.mxu0 }
 0x1a7   :  { %20780 = vst [vmem:[#allocation37_spill] sm:$0xff] %v15842_v28  ;;  %v15848_v0 = vadd.f32 %v2055_v39, %v1483_v3  ;;  %v928_v28 = vadd.f32 %v15793_v36, %v15585_v20  ;;  %v936_v39 = vadd.f32 %v15793_v36, %v15642_v27 }
 0x1a8   :  { %v12840_v7 = vpop.f32.mrf.mxu1  ;;  %v12980_v49 = vpop.f32.mrf.mxu0 }
 0x1a9   :  { %v15850_v4 = vadd.f32 %v12976_v52, %v12840_v7  ;;  %v1096_v27 = vmax.f32 %v928_v28, 0.0  ;;  %v1098_v8 = vmax.f32 %v936_v39, 0.0  ;;  %v947_v28 = vadd.f32 %v15793_v36, %v15662_v18 }
 0x1aa   :  { %v1486_v47 = vpop.f32.mrf.mxu1  ;;  %v2074_v1 = vpop.f32.mrf.mxu0 }
 0x1ab   :  { %v15864_v52 = vadd.f32 %v2058_v53, %v1486_v47  ;;  %v15886_v7 = vpack.c.bf16 %v1097_v63, %v1096_v27  ;;  %v944_v47 = vadd.f32 %v15793_v36, %v15632_v2  ;;  %v15894_v39 = vpack.c.bf16 %v1099_v58, %v1098_v8 }
 0x1ac   :  { %v12843_v19 = vpop.f32.mrf.mxu1  ;;  %12938 = vmatmul.mubr.msk.bf16.gmra.mxu1 %vm1224_vm2, %v15852_v35  ;;  %v15868_v20 = vpop.f32.mrf.mxu0  ;;  %13078 = vmatmul.mubr.msk.bf16.gmra.mxu0 %vm1224_vm2, %v15852_v35  ;;  %v1101_v18 = vmax.f32 %v947_v28, 0.0  ;;  %v960_v58 = vadd.f32 %v15793_v36, %v15686_v5 }
 0x1ad   :  { %v15872_v17 = vadd.f32 %v12979_v21, %v12843_v19  ;;  %12941 = vmatprep.mubr.msk.bf16.mxu1 %vm1224_vm2, %v15858_v43  ;;  %13081 = vmatprep.mubr.msk.bf16.mxu0 %vm1224_vm2, %v15858_v43  ;;  %v1100_v2 = vmax.f32 %v944_v47, 0.0 }
 0x1ae   :  { %v1499_v53 = vpop.f32.mrf.mxu1  ;;  %v15878_v9 = vpop.f32.mrf.mxu0  ;;  %v1104_v5 = vmax.f32 %v960_v58, 0.0 }
 0x1af   :  { %v15880_v3 = vadd.f32 %v2071_v57, %v1499_v53  ;;  %v952_v57 = vadd.f32 %v15793_v36, %v15694_v40  ;;  %v15918_v8 = vpack.c.bf16 %v1101_v18, %v1100_v2 }
 0x1b0   :  { %v12844_v25 = vpop.f32.mrf.mxu1  ;;  %v15882_v37 = vpop.f32.mrf.mxu0 }
 0x1b1   :  { %v15884_v21 = vadd.f32 %v12980_v49, %v12844_v25  ;;  %v955_v49 = vadd.f32 %v15793_v36, %v15718_v38  ;;  %v963_v25 = vadd.f32 %v15793_v36, %v15710_v34 }
 0x1b2   :  { %v1502_v12 = vpop.f32.mrf.mxu1  ;;  %v15892_v19 = vpop.f32.mrf.mxu0 }
 0x1b3   :  { %20781 = vst [vmem:[#allocation38_spill] sm:$0xff] %v15892_v19  ;;  %v15900_v15 = vadd.f32 %v2074_v1, %v1502_v12  ;;  %v1102_v1 = vmax.f32 %v952_v57, 0.0  ;;  %v1103_v63 = vmax.f32 %v955_v49, 0.0  ;;  %v968_v57 = vadd.f32 %v15793_v36, %v15742_v42 }
 0x1b4   :  { %v15902_v27 = vpop.f32.mrf.mxu1  ;;  %12942 = vmatmul.mubr.msk.bf16.gmra.mxu1 %vm1224_vm2, %v15886_v7  ;;  %13082 = vmatmul.mubr.msk.bf16.gmra.mxu0 %vm1224_vm2, %v15886_v7  ;;  %v15912_v40 = vpop.f32.mrf.mxu0  ;;  %v971_v49 = vadd.f32 %v15793_v36, %v15766_v29  ;;  %v1105_v34 = vmax.f32 %v963_v25, 0.0 }
 0x1b5   :  { %12945 = vmatprep.mubr.msk.bf16.mxu1 %vm1224_vm2, %v15894_v39  ;;  %13085 = vmatprep.mubr.msk.bf16.mxu0 %vm1224_vm2, %v15894_v39  ;;  %20782 = vst [vmem:[#allocation39_spill] sm:$0xff] %v15912_v40  ;;  %v15928_v28 = vpack.c.bf16 %v1103_v63, %v1102_v1  ;;  %v1106_v29 = vmax.f32 %v968_v57, 0.0  ;;  %v976_v40 = vadd.f32 %v15793_v36, %v15734_v22 }
 0x1b6   :  { %v15914_v38 = vpop.f32.mrf.mxu1  ;;  %v15924_v12 = vpop.f32.mrf.mxu0  ;;  %v1107_v1 = vmax.f32 %v971_v49, 0.0 }
 0x1b7   :  { %20783 = vst [vmem:[#allocation40_spill] sm:$0xff] %v15924_v12  ;;  %v15950_v12 = vpack.c.bf16 %v1105_v34, %v1104_v5  ;;  %v1108_v22 = vmax.f32 %v976_v40, 0.0 }
 0x1b8   :  { %v15916_v53 = vpop.f32.mrf.mxu1  ;;  %v15944_v42 = vpop.f32.mrf.mxu0  ;;  %v15960_v25 = vpack.c.bf16 %v1107_v1, %v1106_v29 }
 0x1b9   :  { %20785 = vst [vmem:[#allocation42_spill] sm:$0xff] %v15944_v42 }
 0x1ba   :  { %v15926_v47 = vpop.f32.mrf.mxu1  ;;  %v15956_v19 = vpop.f32.mrf.mxu0 }
 0x1bc   :  { %v15934_v2 = vpop.f32.mrf.mxu1  ;;  %12946 = vmatmul.mubr.msk.bf16.gmra.mxu1 %vm1224_vm2, %v15918_v8  ;;  %13086 = vmatmul.mubr.msk.bf16.gmra.mxu0 %vm1224_vm2, %v15918_v8 }
 0x1bd   :  { %20784 = vst [vmem:[#allocation41_spill] sm:$0xff] %v15934_v2  ;;  %12949 = vmatprep.mubr.msk.bf16.mxu1 %vm1224_vm2, %v15928_v28  ;;  %13089 = vmatprep.mubr.msk.bf16.mxu0 %vm1224_vm2, %v15928_v28  ;;  %v979_v2 = vadd.f32 %v15793_v36, %v15758_v59  ;;  %v15970_v59 = vpop.f32.mrf.mxu0 }
 0x1be   :  { %v15946_v18 = vpop.f32.mrf.mxu1 }
 0x1bf   :  { %v1109_v57 = vmax.f32 %v979_v2, 0.0  ;;  %v15978_v34 = vpop.f32.mrf.mxu0 }
 0x1c0   :  { %v15948_v63 = vpop.f32.mrf.mxu1 }
 0x1c1   :  { %v15976_v5 = vpack.c.bf16 %v1109_v57, %v1108_v22  ;;  %v15988_v40 = vpop.f32.mrf.mxu0 }
 0x1c2   :  { %v15958_v58 = vpop.f32.mrf.mxu1 }
 0x1c3   :  { %v15994_v22 = vpop.f32.mrf.mxu0 }
 0x1c4   :  { %v15962_v42 = vpop.f32.mrf.mxu1  ;;  %12950 = vmatmul.mubr.msk.bf16.gmra.mxu1 %vm1224_vm2, %v15950_v12  ;;  %13090 = vmatmul.mubr.msk.bf16.gmra.mxu0 %vm1224_vm2, %v15950_v12  ;;  %20792 = vst [vmem:[#allocation49_spill] sm:$0xff] %v15994_v22 }
 0x1c5   :  { %12953 = vmatprep.mubr.msk.bf16.mxu1 %vm1224_vm2, %v15960_v25 }
 0x1c6   :  { %v15972_v36 = vpop.f32.mrf.mxu1 }
 0x1c7   :  { %20786 = vst [vmem:[#allocation43_spill] sm:$0xff] %v15972_v36 }
 0x1c8   :  { %v15974_v49 = vpop.f32.mrf.mxu1 }
 0x1c9   :  { %20787 = vst [vmem:[#allocation44_spill] sm:$0xff] %v15974_v49 }
 0x1ca   :  { %v15980_v29 = vpop.f32.mrf.mxu1 }
 0x1cb   :  { %20788 = vst [vmem:[#allocation45_spill] sm:$0xff] %v15980_v29 }
 0x1cc   :  { %v15982_v1 = vpop.f32.mrf.mxu1  ;;  %12954 = vmatmul.mubr.msk.bf16.gmra.mxu1 %vm1224_vm2, %v15976_v5 }
 0x1cd   :  { %20789 = vst [vmem:[#allocation46_spill] sm:$0xff] %v15982_v1  ;;  %13101 = vmatprep.mubr.msk.bf16.mxu1 %vm1224_vm2, %v15261_v45  ;;  %v16004_v1 = vpop.f32.mrf.mxu0 }
 0x1ce   :  { %v15990_v2 = vpop.f32.mrf.mxu1 }
 0x1cf   :  { %20790 = vst [vmem:[#allocation47_spill] sm:$0xff] %v15990_v2  ;;  %v16010_v2 = vpop.f32.mrf.mxu0 }
 0x1d0   :  { %v15992_v36 = vpop.f32.mrf.mxu1 }
 0x1d1   :  { %20791 = vst [vmem:[#allocation48_spill] sm:$0xff] %v15992_v36 }
 0x1d2   :  { %v15996_v57 = vpop.f32.mrf.mxu1 }
 0x1d4   :  { %v15998_v49 = vpop.f32.mrf.mxu1  ;;  %13102 = vmatmul.mubr.msk.bf16.vlgmr.msra.gmra.mxu1 %vm1224_vm2, %v15263_v46  ;;  %v16020_v46 = vpop.f32.mrf.mxu0 }
 0x1d5   :  { %20793 = vst [vmem:[#allocation50_spill] sm:$0xff] %v15998_v49  ;;  %13105 = vmatprep.mubr.msk.bf16.mxu1 %vm1224_vm2, %v15281_v60 }
 0x1d6   :  { %v16006_v45 = vpop.f32.mrf.mxu1 }
 0x1d7   :  { %20794 = vst [vmem:[#allocation51_spill] sm:$0xff] %v16006_v45  ;;  %v16026_v45 = vpop.f32.mrf.mxu0 }
 0x1d8   :  { %v16008_v29 = vpop.f32.mrf.mxu1  ;;  %20800 = vst [vmem:[#allocation57_spill] sm:$0xff] %v16026_v45 }
 0x1d9   :  { %20795 = vst [vmem:[#allocation52_spill] sm:$0xff] %v16008_v29 }
 0x1da   :  { %v16012_v36 = vpop.f32.mrf.mxu1 }
 0x1db   :  { %20796 = vst [vmem:[#allocation53_spill] sm:$0xff] %v16012_v36 }
 0x1dc   :  { %v16014_v22 = vpop.f32.mrf.mxu1  ;;  %13106 = vmatmul.mubr.msk.bf16.gmra.mxu1 %vm1224_vm2, %v15283_v61  ;;  %v16039_v61 = vpop.f32.mrf.mxu0 }
 0x1dd   :  { %20797 = vst [vmem:[#allocation54_spill] sm:$0xff] %v16014_v22  ;;  %13109 = vmatprep.mubr.msk.bf16.mxu1 %vm1224_vm2, %v15301_v14  ;;  %v14504_v22 = vld [vmem:[%s20587_s3 + $0x80] sm:$0xff]  }
 0x1de   :  { %v16022_v60 = vpop.f32.mrf.mxu1  ;;  %13235 = vmatprep.subr.bf16.mxu0 %v14504_v22 }
 0x1df   :  { %20798 = vst [vmem:[#allocation55_spill] sm:$0xff] %v16022_v60  ;;  %13236 = vmatpush3.bf16.msra.mxu0 %v14504_v22 }
 0x1e0   :  { %v16024_v49 = vpop.f32.mrf.mxu1 }
 0x1e1   :  { %20799 = vst [vmem:[#allocation56_spill] sm:$0xff] %v16024_v49 }
 0x1e2   :  { %v16028_v29 = vpop.f32.mrf.mxu1 }
 0x1e3   :  { %20801 = vst [vmem:[#allocation58_spill] sm:$0xff] %v16028_v29  ;;  %v16045_v29 = vpop.f32.mrf.mxu0 }
 0x1e4   :  { %v16033_v36 = vpop.f32.mrf.mxu1  ;;  %13110 = vmatmul.mubr.msk.bf16.gmra.mxu1 %vm1224_vm2, %v15303_v16 }
 0x1e5   :  { %20802 = vst [vmem:[#allocation59_spill] sm:$0xff] %v16033_v36  ;;  %13113 = vmatprep.mubr.msk.bf16.mxu1 %vm1224_vm2, %v15321_v31  ;;  %v16055_v16 = vpop.f32.mrf.mxu0 }
 0x1e6   :  { %v16041_v14 = vpop.f32.mrf.mxu1  ;;  %20807 = vst [vmem:[#allocation64_spill] sm:$0xff] %v16055_v16  ;;  %v20876_v16 = vld [vmem:[#allocation17_spill] sm:$0xff] }
 0x1e7   :  { %20803 = vst [vmem:[#allocation60_spill] sm:$0xff] %v16041_v14  ;;  %v16061_v22 = vpop.f32.mrf.mxu0 }
 0x1e8   :  { %v16043_v49 = vpop.f32.mrf.mxu1  ;;  %20810 = vst [vmem:[#allocation67_spill] sm:$0xff] %v16061_v22 }
 0x1e9   :  { %20804 = vst [vmem:[#allocation61_spill] sm:$0xff] %v16043_v49 }
 0x1ea   :  { %v16047_v60 = vpop.f32.mrf.mxu1 }
 0x1eb   :  { %20805 = vst [vmem:[#allocation62_spill] sm:$0xff] %v16047_v60 }
 0x1ec   :  { %v16049_v45 = vpop.f32.mrf.mxu1  ;;  %13114 = vmatmul.mubr.msk.bf16.gmra.mxu1 %vm1224_vm2, %v15323_v32  ;;  %v20813_v32 = vld [vmem:[#allocation2_spill] sm:$0xff] }
 0x1ed   :  { %20806 = vst [vmem:[#allocation63_spill] sm:$0xff] %v16049_v45  ;;  %13117 = vmatprep.mubr.msk.bf16.mxu1 %vm1224_vm2, %v15341_v50  ;;  %v14505_v45 = vld [vmem:[%s20587_s3 + $0x78] sm:$0xff]   ;;  %v16074_v50 = vpop.f32.mrf.mxu0 }
 0x1ee   :  { %v16057_v31 = vpop.f32.mrf.mxu1  ;;  %13365 = vmatprep.subr.bf16.mxu1 %v14505_v45  ;;  %20814 = vst [vmem:[#allocation2_spill] sm:$0xff] %v16074_v50 }
 0x1ef   :  { %20808 = vst [vmem:[#allocation65_spill] sm:$0xff] %v16057_v31  ;;  %13366 = vmatpush3.bf16.msra.mxu1 %v14505_v45 }
 0x1f0   :  { %v16059_v14 = vpop.f32.mrf.mxu1 }
 0x1f1   :  { %20809 = vst [vmem:[#allocation66_spill] sm:$0xff] %v16059_v14 }
 0x1f2   :  { %v16063_v49 = vpop.f32.mrf.mxu1 }
 0x1f3   :  { %20811 = vst [vmem:[#allocation68_spill] sm:$0xff] %v16063_v49  ;;  %v16080_v49 = vpop.f32.mrf.mxu0 }
 0x1f4   :  { %v16068_v60 = vpop.f32.mrf.mxu1  ;;  %13118 = vmatmul.mubr.msk.bf16.gmra.mxu1 %vm1224_vm2, %v15343_v51  ;;  %20817 = vst [vmem:[#allocation72_spill] sm:$0xff] %v16080_v49  ;;  %v20821_v51 = vld [vmem:[#allocation4_spill] sm:$0xff] }
 0x1f5   :  { %20812 = vst [vmem:[#allocation69_spill] sm:$0xff] %v16068_v60  ;;  %13121 = vmatprep.mubr.msk.bf16.mxu1 %vm1224_vm2, %v20813_v32  ;;  %v20820_v60 = vld [vmem:[#allocation3_spill] sm:$0xff]  ;;  %v16090_v32 = vpop.f32.mrf.mxu0 }
 0x1f6   :  { %v16076_v14 = vpop.f32.mrf.mxu1  ;;  %20822 = vst [vmem:[#allocation3_spill] sm:$0xff] %v16090_v32 }
 0x1f7   :  { %20815 = vst [vmem:[#allocation70_spill] sm:$0xff] %v16076_v14  ;;  %v16096_v45 = vpop.f32.mrf.mxu0 }
 0x1f8   :  { %v16078_v31 = vpop.f32.mrf.mxu1  ;;  %20825 = vst [vmem:[#allocation76_spill] sm:$0xff] %v16096_v45 }
 0x1f9   :  { %20816 = vst [vmem:[#allocation71_spill] sm:$0xff] %v16078_v31 }
 0x1fa   :  { %v16082_v36 = vpop.f32.mrf.mxu1 }
 0x1fb   :  { %20818 = vst [vmem:[#allocation73_spill] sm:$0xff] %v16082_v36  ;;  %v20828_v36 = vld [vmem:[#allocation5_spill] sm:$0xff] }
 0x1fc   :  { %v16084_v22 = vpop.f32.mrf.mxu1  ;;  %13122 = vmatmul.mubr.msk.bf16.gmra.mxu1 %vm1224_vm2, %v20820_v60  ;;  %v16106_v60 = vpop.f32.mrf.mxu0 }
 0x1fd   :  { %20819 = vst [vmem:[#allocation74_spill] sm:$0xff] %v16084_v22  ;;  %13125 = vmatprep.mubr.msk.bf16.mxu1 %vm1224_vm2, %v20821_v51  ;;  %v20829_v22 = vld [vmem:[#allocation6_spill] sm:$0xff]  ;;  %20830 = vst [vmem:[#allocation5_spill] sm:$0xff] %v16106_v60 }
 0x1fe   :  { %v16092_v50 = vpop.f32.mrf.mxu1 }
 0x1ff   :  { %20823 = vst [vmem:[#allocation4_spill] sm:$0xff] %v16092_v50  ;;  %v16112_v50 = vpop.f32.mrf.mxu0 }
 0x200   :  { %v16094_v14 = vpop.f32.mrf.mxu1  ;;  %20833 = vst [vmem:[#allocation80_spill] sm:$0xff] %v16112_v50 }
 0x201   :  { %20824 = vst [vmem:[#allocation75_spill] sm:$0xff] %v16094_v14 }
 0x202   :  { %v16098_v31 = vpop.f32.mrf.mxu1 }
 0x203   :  { %20826 = vst [vmem:[#allocation77_spill] sm:$0xff] %v16098_v31  ;;  %v20836_v31 = vld [vmem:[#allocation7_spill] sm:$0xff] }
 0x204   :  { %v16100_v49 = vpop.f32.mrf.mxu1  ;;  %13126 = vmatmul.mubr.msk.bf16.gmra.mxu1 %vm1224_vm2, %v20828_v36  ;;  %v16122_v36 = vpop.f32.mrf.mxu0 }
 0x205   :  { %20827 = vst [vmem:[#allocation78_spill] sm:$0xff] %v16100_v49  ;;  %13129 = vmatprep.mubr.msk.bf16.mxu1 %vm1224_vm2, %v20829_v22  ;;  %v20837_v49 = vld [vmem:[#allocation8_spill] sm:$0xff]  ;;  %20838 = vst [vmem:[#allocation7_spill] sm:$0xff] %v16122_v36 }
 0x206   :  { %v16108_v51 = vpop.f32.mrf.mxu1 }
 0x207   :  { %20831 = vst [vmem:[#allocation6_spill] sm:$0xff] %v16108_v51  ;;  %v16128_v51 = vpop.f32.mrf.mxu0 }
 0x208   :  { %v16110_v32 = vpop.f32.mrf.mxu1  ;;  %20841 = vst [vmem:[#allocation84_spill] sm:$0xff] %v16128_v51 }
 0x209   :  { %20832 = vst [vmem:[#allocation79_spill] sm:$0xff] %v16110_v32 }
 0x20a   :  { %v16114_v14 = vpop.f32.mrf.mxu1 }
 0x20b   :  { %20834 = vst [vmem:[#allocation81_spill] sm:$0xff] %v16114_v14  ;;  %v20844_v14 = vld [vmem:[#allocation9_spill] sm:$0xff] }
 0x20c   :  { %v16116_v45 = vpop.f32.mrf.mxu1  ;;  %13130 = vmatmul.mubr.msk.bf16.gmra.mxu1 %vm1224_vm2, %v20836_v31  ;;  %v16138_v31 = vpop.f32.mrf.mxu0 }
 0x20d   :  { %20835 = vst [vmem:[#allocation82_spill] sm:$0xff] %v16116_v45  ;;  %13133 = vmatprep.mubr.msk.bf16.mxu1 %vm1224_vm2, %v20837_v49  ;;  %v20845_v45 = vld [vmem:[#allocation10_spill] sm:$0xff]  ;;  %20846 = vst [vmem:[#allocation9_spill] sm:$0xff] %v16138_v31 }
 0x20e   :  { %v16124_v22 = vpop.f32.mrf.mxu1 }
 0x20f   :  { %20839 = vst [vmem:[#allocation8_spill] sm:$0xff] %v16124_v22  ;;  %v16144_v22 = vpop.f32.mrf.mxu0 }
 0x210   :  { %v16126_v60 = vpop.f32.mrf.mxu1  ;;  %20849 = vst [vmem:[#allocation88_spill] sm:$0xff] %v16144_v22 }
 0x211   :  { %20840 = vst [vmem:[#allocation83_spill] sm:$0xff] %v16126_v60 }
 0x212   :  { %v16130_v32 = vpop.f32.mrf.mxu1 }
 0x213   :  { %20842 = vst [vmem:[#allocation85_spill] sm:$0xff] %v16130_v32  ;;  %v20852_v32 = vld [vmem:[#allocation11_spill] sm:$0xff] }
 0x214   :  { %v16132_v50 = vpop.f32.mrf.mxu1  ;;  %13134 = vmatmul.mubr.msk.bf16.gmra.mxu1 %vm1224_vm2, %v20844_v14  ;;  %v16154_v14 = vpop.f32.mrf.mxu0 }
 0x215   :  { %20843 = vst [vmem:[#allocation86_spill] sm:$0xff] %v16132_v50  ;;  %13137 = vmatprep.mubr.msk.bf16.mxu1 %vm1224_vm2, %v20845_v45  ;;  %v20853_v50 = vld [vmem:[#allocation12_spill] sm:$0xff]  ;;  %20854 = vst [vmem:[#allocation11_spill] sm:$0xff] %v16154_v14 }
 0x216   :  { %v16140_v49 = vpop.f32.mrf.mxu1 }
 0x217   :  { %20847 = vst [vmem:[#allocation10_spill] sm:$0xff] %v16140_v49  ;;  %v16160_v49 = vpop.f32.mrf.mxu0 }
 0x218   :  { %v16142_v36 = vpop.f32.mrf.mxu1  ;;  %20857 = vst [vmem:[#allocation92_spill] sm:$0xff] %v16160_v49 }
 0x219   :  { %20848 = vst [vmem:[#allocation87_spill] sm:$0xff] %v16142_v36 }
 0x21a   :  { %v16146_v60 = vpop.f32.mrf.mxu1 }
 0x21b   :  { %20850 = vst [vmem:[#allocation89_spill] sm:$0xff] %v16146_v60  ;;  %v20860_v60 = vld [vmem:[#allocation13_spill] sm:$0xff] }
 0x21c   :  { %v16148_v51 = vpop.f32.mrf.mxu1  ;;  %13138 = vmatmul.mubr.msk.bf16.gmra.mxu1 %vm1224_vm2, %v20852_v32  ;;  %v16170_v32 = vpop.f32.mrf.mxu0 }
 0x21d   :  { %20851 = vst [vmem:[#allocation90_spill] sm:$0xff] %v16148_v51  ;;  %13141 = vmatprep.mubr.msk.bf16.mxu1 %vm1224_vm2, %v20853_v50  ;;  %v20861_v51 = vld [vmem:[#allocation14_spill] sm:$0xff]  ;;  %20862 = vst [vmem:[#allocation13_spill] sm:$0xff] %v16170_v32 }
 0x21e   :  { %v16156_v45 = vpop.f32.mrf.mxu1 }
 0x21f   :  { %20855 = vst [vmem:[#allocation12_spill] sm:$0xff] %v16156_v45  ;;  %v20869_v45 = vld [vmem:[#allocation16_spill] sm:$0xff] }
 0x220   :  { %v16158_v31 = vpop.f32.mrf.mxu1 }
 0x221   :  { %20856 = vst [vmem:[#allocation91_spill] sm:$0xff] %v16158_v31  ;;  %v16179_v31 = vld [vmem:[%s20587_s3 + $0xb8] sm:$0xff]  }
 0x222   :  { %v16162_v36 = vpop.f32.mrf.mxu1  ;;  %13501 = vmatprep.subr.bf16.mxu0 %v16179_v31 }
 0x223   :  { %20858 = vst [vmem:[#allocation93_spill] sm:$0xff] %v16162_v36  ;;  %v16181_v36 = vpop.f32.mrf.mxu0 }
 0x224   :  { %v16164_v22 = vpop.f32.mrf.mxu1  ;;  %13142 = vmatmul.mubr.msk.bf16.gmra.mxu1 %vm1224_vm2, %v20860_v60  ;;  %20865 = vst [vmem:[#allocation96_spill] sm:$0xff] %v16181_v36 }
 0x225   :  { %20859 = vst [vmem:[#allocation94_spill] sm:$0xff] %v16164_v22  ;;  %13145 = vmatprep.mubr.msk.bf16.mxu1 %vm1224_vm2, %v20861_v51  ;;  %v20868_v51 = vld [vmem:[#allocation15_spill] sm:$0xff] }
 0x226   :  { %v16172_v50 = vpop.f32.mrf.mxu1 }
 0x227   :  { %20863 = vst [vmem:[#allocation14_spill] sm:$0xff] %v16172_v50 }
 0x228   :  { %v16174_v14 = vpop.f32.mrf.mxu1 }
 0x229   :  { %20864 = vst [vmem:[#allocation95_spill] sm:$0xff] %v16174_v14  ;;  %v16192_v14 = vpop.f32.mrf.mxu0 }
 0x22a   :  { %v16183_v22 = vpop.f32.mrf.mxu1  ;;  %20870 = vst [vmem:[#allocation15_spill] sm:$0xff] %v16192_v14 }
 0x22b   :  { %20866 = vst [vmem:[#allocation97_spill] sm:$0xff] %v16183_v22  ;;  %v16198_v49 = vpop.f32.mrf.mxu0 }
 0x22c   :  { %v16186_v60 = vpop.f32.mrf.mxu1  ;;  %13146 = vmatmul.mubr.msk.bf16.gmra.mxu1 %vm1224_vm2, %v20868_v51  ;;  %20873 = vst [vmem:[#allocation100_spill] sm:$0xff] %v16198_v49 }
 0x22d   :  { %20867 = vst [vmem:[#allocation98_spill] sm:$0xff] %v16186_v60  ;;  %13149 = vmatprep.mubr.msk.bf16.mxu1 %vm1224_vm2, %v20869_v45  ;;  %v20877_v60 = vld [vmem:[#allocation18_spill] sm:$0xff]  ;;  %v16208_v51 = vpop.f32.mrf.mxu0 }
 0x22e   :  { %v16194_v50 = vpop.f32.mrf.mxu1  ;;  %20878 = vst [vmem:[#allocation17_spill] sm:$0xff] %v16208_v51 }
 0x22f   :  { %20871 = vst [vmem:[#allocation16_spill] sm:$0xff] %v16194_v50  ;;  %v16217_v50 = vpop.f32.mrf.mxu0 }
 0x230   :  { %v16196_v32 = vpop.f32.mrf.mxu1  ;;  %20881 = vst [vmem:[#allocation104_spill] sm:$0xff] %v16217_v50 }
 0x231   :  { %20872 = vst [vmem:[#allocation99_spill] sm:$0xff] %v16196_v32  ;;  %v14507_v32 = vld [vmem:[%s20587_s3 + $0x70] sm:$0xff]  }
 0x232   :  { %v16200_v36 = vpop.f32.mrf.mxu1  ;;  %13367 = vmatprep.subr.bf16.mxu1 %v14507_v32 }
 0x233   :  { %20874 = vst [vmem:[#allocation101_spill] sm:$0xff] %v16200_v36  ;;  %13368 = vmatpush3.bf16.msra.mxu1 %v14507_v32 }
 0x234   :  { %v16202_v22 = vpop.f32.mrf.mxu1  ;;  %13150 = vmatmul.mubr.msk.bf16.gmra.mxu1 %vm1224_vm2, %v20876_v16  ;;  %v20884_v16 = vld [vmem:[#allocation19_spill] sm:$0xff] }
 0x235   :  { %20875 = vst [vmem:[#allocation102_spill] sm:$0xff] %v16202_v22  ;;  %13153 = vmatprep.mubr.msk.bf16.mxu1 %vm1224_vm2, %v20877_v60  ;;  %v20885_v60 = vld [vmem:[#allocation20_spill] sm:$0xff] }
 0x236   :  { %v16210_v45 = vpop.f32.mrf.mxu1 }
 0x237   :  { %20879 = vst [vmem:[#allocation18_spill] sm:$0xff] %v16210_v45  ;;  %v16227_v45 = vpop.f32.mrf.mxu0 }
 0x238   :  { %v16212_v14 = vpop.f32.mrf.mxu1  ;;  %20886 = vst [vmem:[#allocation19_spill] sm:$0xff] %v16227_v45 }
 0x239   :  { %20880 = vst [vmem:[#allocation103_spill] sm:$0xff] %v16212_v14  ;;  %v16233_v49 = vpop.f32.mrf.mxu0 }
 0x23a   :  { %v16219_v36 = vpop.f32.mrf.mxu1  ;;  %20889 = vst [vmem:[#allocation108_spill] sm:$0xff] %v16233_v49 }
 0x23b   :  { %20882 = vst [vmem:[#allocation105_spill] sm:$0xff] %v16219_v36 }
 0x23c   :  { %v16221_v22 = vpop.f32.mrf.mxu1  ;;  %13154 = vmatmul.mubr.msk.bf16.gmra.mxu1 %vm1224_vm2, %v20884_v16  ;;  %v20893_v16 = vld [vmem:[#allocation22_spill] sm:$0xff] }
 0x23d   :  { %20883 = vst [vmem:[#allocation106_spill] sm:$0xff] %v16221_v22  ;;  %13157 = vmatprep.mubr.msk.bf16.mxu1 %vm1224_vm2, %v20885_v60  ;;  %v20892_v22 = vld [vmem:[#allocation21_spill] sm:$0xff]  ;;  %v16243_v60 = vpop.f32.mrf.mxu0 }
 0x23e   :  { %v16229_v14 = vpop.f32.mrf.mxu1  ;;  %20894 = vst [vmem:[#allocation21_spill] sm:$0xff] %v16243_v60 }
 0x23f   :  { %20887 = vst [vmem:[#allocation20_spill] sm:$0xff] %v16229_v14  ;;  %v16249_v14 = vpop.f32.mrf.mxu0 }
 0x240   :  { %v16231_v51 = vpop.f32.mrf.mxu1  ;;  %20897 = vst [vmem:[#allocation112_spill] sm:$0xff] %v16249_v14 }
 0x241   :  { %20888 = vst [vmem:[#allocation107_spill] sm:$0xff] %v16231_v51 }
 0x242   :  { %v16235_v50 = vpop.f32.mrf.mxu1 }
 0x243   :  { %20890 = vst [vmem:[#allocation109_spill] sm:$0xff] %v16235_v50 }
 0x244   :  { %v16237_v36 = vpop.f32.mrf.mxu1  ;;  %13158 = vmatmul.mubr.msk.bf16.gmra.mxu1 %vm1224_vm2, %v20892_v22  ;;  %v20900_v22 = vld [vmem:[#allocation23_spill] sm:$0xff] }
 0x245   :  { %20891 = vst [vmem:[#allocation110_spill] sm:$0xff] %v16237_v36  ;;  %13161 = vmatprep.mubr.msk.bf16.mxu1 %vm1224_vm2, %v20893_v16  ;;  %v14508_v36 = vld [vmem:[%s20587_s3 + $0x68] sm:$0xff]   ;;  %v20901_v16 = vld [vmem:[#allocation24_spill] sm:$0xff] }
 0x246   :  { %v16245_v32 = vpop.f32.mrf.mxu1  ;;  %13369 = vmatprep.subr.bf16.mxu1 %v14508_v36 }
 0x247   :  { %20895 = vst [vmem:[#allocation22_spill] sm:$0xff] %v16245_v32  ;;  %13370 = vmatpush3.bf16.msra.mxu1 %v14508_v36  ;;  %v16262_v32 = vpop.f32.mrf.mxu0  ;;  %v20909_v36 = vld [vmem:[#allocation26_spill] sm:$0xff] }
 0x248   :  { %v16247_v45 = vpop.f32.mrf.mxu1  ;;  %20902 = vst [vmem:[#allocation23_spill] sm:$0xff] %v16262_v32 }
 0x249   :  { %20896 = vst [vmem:[#allocation111_spill] sm:$0xff] %v16247_v45 }
 0x24a   :  { %v16251_v51 = vpop.f32.mrf.mxu1 }
 0x24b   :  { %20898 = vst [vmem:[#allocation113_spill] sm:$0xff] %v16251_v51  ;;  %v14509_v51 = vld [vmem:[%s20587_s3 + $0x60] sm:$0xff]  }
 0x24c   :  { %v16256_v50 = vpop.f32.mrf.mxu1  ;;  %13162 = vmatmul.mubr.msk.bf16.gmra.mxu1 %vm1224_vm2, %v20900_v22  ;;  %13371 = vmatprep.subr.bf16.mxu1 %v14509_v51 }
 0x24d   :  { %20899 = vst [vmem:[#allocation114_spill] sm:$0xff] %v16256_v50  ;;  %13165 = vmatprep.mubr.msk.bf16.mxu1 %vm1224_vm2, %v20901_v16  ;;  %13372 = vmatpush3.bf16.msra.mxu1 %v14509_v51  ;;  %v16271_v50 = vpop.f32.mrf.mxu0  ;;  %v20908_v16 = vld [vmem:[#allocation25_spill] sm:$0xff] }
 0x24e   :  { %v16264_v45 = vpop.f32.mrf.mxu1  ;;  %20905 = vst [vmem:[#allocation116_spill] sm:$0xff] %v16271_v50 }
 0x24f   :  { %20903 = vst [vmem:[#allocation24_spill] sm:$0xff] %v16264_v45  ;;  %v16281_v45 = vpop.f32.mrf.mxu0 }
 0x250   :  { %v16269_v14 = vpop.f32.mrf.mxu1 }
 0x251   :  { %20904 = vst [vmem:[#allocation115_spill] sm:$0xff] %v16269_v14  ;;  %v16287_v14 = vpop.f32.mrf.mxu0 }
 0x252   :  { %v16273_v22 = vpop.f32.mrf.mxu1  ;;  %20912 = vst [vmem:[#allocation119_spill] sm:$0xff] %v16287_v14 }
 0x253   :  { %20906 = vst [vmem:[#allocation117_spill] sm:$0xff] %v16273_v22  ;;  %v20915_v22 = vld [vmem:[#allocation27_spill] sm:$0xff] }
 0x254   :  { %v16275_v60 = vpop.f32.mrf.mxu1  ;;  %13166 = vmatmul.mubr.msk.bf16.gmra.mxu1 %vm1224_vm2, %v20908_v16  ;;  %v16297_v16 = vpop.f32.mrf.mxu0 }
 0x255   :  { %20907 = vst [vmem:[#allocation118_spill] sm:$0xff] %v16275_v60  ;;  %13169 = vmatprep.mubr.msk.bf16.mxu1 %vm1224_vm2, %v20909_v36 }
 0x256   :  { %v16283_v32 = vpop.f32.mrf.mxu1 }
 0x257   :  { %20910 = vst [vmem:[#allocation25_spill] sm:$0xff] %v16283_v32  ;;  %v16303_v32 = vpop.f32.mrf.mxu0 }
 0x258   :  { %v16285_v49 = vpop.f32.mrf.mxu1 }
 0x259   :  { %20911 = vst [vmem:[#allocation26_spill] sm:$0xff] %v16285_v49 }
 0x25a   :  { %v16289_v51 = vpop.f32.mrf.mxu1 }
 0x25b   :  { %20913 = vst [vmem:[#allocation120_spill] sm:$0xff] %v16289_v51 }
 0x25c   :  { %v16291_v50 = vpop.f32.mrf.mxu1  ;;  %13170 = vmatmul.mubr.msk.bf16.gmra.mxu1 %vm1224_vm2, %v20915_v22  ;;  %v16313_v22 = vpop.f32.mrf.mxu0 }
 0x25d   :  { %20914 = vst [vmem:[#allocation121_spill] sm:$0xff] %v16291_v50  ;;  %13173 = vmatprep.mubr.msk.bf16.mxu1 %vm1224_vm2, %v15634_v62 }
 0x25e   :  { %v16299_v36 = vpop.f32.mrf.mxu1 }
 0x25f   :  { %20916 = vst [vmem:[#allocation27_spill] sm:$0xff] %v16299_v36  ;;  %v16319_v36 = vpop.f32.mrf.mxu0 }
 0x260   :  { %v16301_v60 = vpop.f32.mrf.mxu1 }
 0x261   :  { %20917 = vst [vmem:[#allocation122_spill] sm:$0xff] %v16301_v60 }
 0x262   :  { %v16305_v49 = vpop.f32.mrf.mxu1 }
 0x263   :  { %20918 = vst [vmem:[#allocation123_spill] sm:$0xff] %v16305_v49 }
 0x264   :  { %v16307_v14 = vpop.f32.mrf.mxu1  ;;  %13174 = vmatmul.mubr.msk.bf16.gmra.mxu1 %vm1224_vm2, %v15640_v6  ;;  %v16329_v6 = vpop.f32.mrf.mxu0 }
 0x265   :  { %20919 = vst [vmem:[#allocation124_spill] sm:$0xff] %v16307_v14  ;;  %13177 = vmatprep.mubr.msk.bf16.mxu1 %vm1224_vm2, %v15644_v33  ;;  %20924 = vst [vmem:[#allocation129_spill] sm:$0xff] %v16329_v6 }
 0x266   :  { %v16315_v62 = vpop.f32.mrf.mxu1 }
 0x267   :  { %20920 = vst [vmem:[#allocation125_spill] sm:$0xff] %v16315_v62  ;;  %v16335_v62 = vpop.f32.mrf.mxu0 }
 0x268   :  { %v16317_v50 = vpop.f32.mrf.mxu1  ;;  %20927 = vst [vmem:[#allocation132_spill] sm:$0xff] %v16335_v62 }
 0x269   :  { %20921 = vst [vmem:[#allocation126_spill] sm:$0xff] %v16317_v50 }
 0x26a   :  { %v16321_v60 = vpop.f32.mrf.mxu1 }
 0x26b   :  { %20922 = vst [vmem:[#allocation127_spill] sm:$0xff] %v16321_v60 }
 0x26c   :  { %v16323_v51 = vpop.f32.mrf.mxu1  ;;  %13178 = vmatmul.mubr.msk.bf16.gmra.mxu1 %vm1224_vm2, %v15664_v54  ;;  %v16345_v54 = vpop.f32.mrf.mxu0 }
 0x26d   :  { %20923 = vst [vmem:[#allocation128_spill] sm:$0xff] %v16323_v51  ;;  %13181 = vmatprep.mubr.msk.bf16.mxu1 %vm1224_vm2, %v15672_v30  ;;  %20930 = vst [vmem:[#allocation135_spill] sm:$0xff] %v16345_v54 }
 0x26e   :  { %v16331_v33 = vpop.f32.mrf.mxu1 }
 0x26f   :  { %20925 = vst [vmem:[#allocation130_spill] sm:$0xff] %v16331_v33  ;;  %v16351_v33 = vpop.f32.mrf.mxu0 }
 0x270   :  { %v16333_v14 = vpop.f32.mrf.mxu1  ;;  %20933 = vst [vmem:[#allocation138_spill] sm:$0xff] %v16351_v33 }
 0x271   :  { %20926 = vst [vmem:[#allocation131_spill] sm:$0xff] %v16333_v14 }
 0x272   :  { %v16337_v50 = vpop.f32.mrf.mxu1 }
 0x273   :  { %20928 = vst [vmem:[#allocation133_spill] sm:$0xff] %v16337_v50 }
 0x274   :  { %v16339_v49 = vpop.f32.mrf.mxu1  ;;  %13182 = vmatmul.mubr.msk.bf16.gmra.mxu1 %vm1224_vm2, %v15688_v41  ;;  %v16361_v41 = vpop.f32.mrf.mxu0 }
 0x275   :  { %20929 = vst [vmem:[#allocation134_spill] sm:$0xff] %v16339_v49  ;;  %13185 = vmatprep.mubr.msk.bf16.mxu1 %vm1224_vm2, %v15696_v48  ;;  %20936 = vst [vmem:[#allocation141_spill] sm:$0xff] %v16361_v41 }
 0x276   :  { %v16347_v30 = vpop.f32.mrf.mxu1 }
 0x277   :  { %20931 = vst [vmem:[#allocation136_spill] sm:$0xff] %v16347_v30  ;;  %v16367_v30 = vpop.f32.mrf.mxu0 }
 0x278   :  { %v16349_v51 = vpop.f32.mrf.mxu1  ;;  %20939 = vst [vmem:[#allocation144_spill] sm:$0xff] %v16367_v30 }
 0x279   :  { %20932 = vst [vmem:[#allocation137_spill] sm:$0xff] %v16349_v51 }
 0x27a   :  { %v16353_v14 = vpop.f32.mrf.mxu1 }
 0x27b   :  { %20934 = vst [vmem:[#allocation139_spill] sm:$0xff] %v16353_v14  ;;  %v20942_v14 = vld [vmem:[#allocation28_spill] sm:$0xff] }
 0x27c   :  { %v16355_v60 = vpop.f32.mrf.mxu1  ;;  %13186 = vmatmul.mubr.msk.bf16.gmra.mxu1 %vm1224_vm2, %v15712_v10  ;;  %v16377_v10 = vpop.f32.mrf.mxu0 }
 0x27d   :  { %20935 = vst [vmem:[#allocation140_spill] sm:$0xff] %v16355_v60  ;;  %13189 = vmatprep.mubr.msk.bf16.mxu1 %vm1224_vm2, %v15720_v13  ;;  %v20943_v60 = vld [vmem:[#allocation29_spill] sm:$0xff]  ;;  %20944 = vst [vmem:[#allocation28_spill] sm:$0xff] %v16377_v10 }
 0x27e   :  { %v16363_v48 = vpop.f32.mrf.mxu1 }
 0x27f   :  { %20937 = vst [vmem:[#allocation142_spill] sm:$0xff] %v16363_v48  ;;  %v16383_v48 = vpop.f32.mrf.mxu0 }
 0x280   :  { %v16365_v49 = vpop.f32.mrf.mxu1  ;;  %20947 = vst [vmem:[#allocation148_spill] sm:$0xff] %v16383_v48  ;;  %v20958_v48 = vld [vmem:[#allocation31_spill] sm:$0xff] }
 0x281   :  { %20938 = vst [vmem:[#allocation143_spill] sm:$0xff] %v16365_v49 }
 0x282   :  { %v16369_v51 = vpop.f32.mrf.mxu1 }
 0x283   :  { %20940 = vst [vmem:[#allocation145_spill] sm:$0xff] %v16369_v51 }
 0x284   :  { %v16371_v50 = vpop.f32.mrf.mxu1  ;;  %13190 = vmatmul.mubr.msk.bf16.gmra.mxu1 %vm1224_vm2, %v20942_v14  ;;  %v16393_v14 = vpop.f32.mrf.mxu0 }
 0x285   :  { %20941 = vst [vmem:[#allocation146_spill] sm:$0xff] %v16371_v50  ;;  %13193 = vmatprep.mubr.msk.bf16.mxu1 %vm1224_vm2, %v20943_v60  ;;  %20950 = vst [vmem:[#allocation151_spill] sm:$0xff] %v16393_v14 }
 0x286   :  { %v16379_v13 = vpop.f32.mrf.mxu1 }
 0x287   :  { %20945 = vst [vmem:[#allocation29_spill] sm:$0xff] %v16379_v13  ;;  %v16399_v13 = vpop.f32.mrf.mxu0 }
 0x288   :  { %v16381_v41 = vpop.f32.mrf.mxu1  ;;  %20953 = vst [vmem:[#allocation154_spill] sm:$0xff] %v16399_v13 }
 0x289   :  { %20946 = vst [vmem:[#allocation147_spill] sm:$0xff] %v16381_v41 }
 0x28a   :  { %v16385_v49 = vpop.f32.mrf.mxu1 }
 0x28b   :  { %20948 = vst [vmem:[#allocation149_spill] sm:$0xff] %v16385_v49  ;;  %v20957_v49 = vld [vmem:[#allocation30_spill] sm:$0xff] }
 0x28c   :  { %v16387_v30 = vpop.f32.mrf.mxu1  ;;  %13194 = vmatmul.mubr.msk.bf16.gmra.mxu1 %vm1224_vm2, %v15760_v26  ;;  %v20955_v26 = vld [vmem:[#allocation32_spill] sm:$0xff] }
 0x28d   :  { %20949 = vst [vmem:[#allocation150_spill] sm:$0xff] %v16387_v30  ;;  %13197 = vmatprep.mubr.msk.bf16.mxu1 %vm1224_vm2, %v15768_v11  ;;  %v16408_v11 = vpop.f32.mrf.mxu0 }
 0x28e   :  { %v16395_v60 = vpop.f32.mrf.mxu1  ;;  %20956 = vst [vmem:[#allocation32_spill] sm:$0xff] %v16408_v11  ;;  %v20960_v11 = vld [vmem:[#allocation33_spill] sm:$0xff] }
 0x28f   :  { %20951 = vst [vmem:[#allocation152_spill] sm:$0xff] %v16395_v60  ;;  %v16413_v60 = vld [vmem:[%s20588_s4 + $0x1] ss:$0 sm:$0xff]  ;;  %v16418_v10 = vpop.f32.mrf.mxu0 }
 0x290   :  { %v16397_v50 = vpop.f32.mrf.mxu1  ;;  %20959 = vst [vmem:[#allocation30_spill] sm:$0xff] %v16418_v10 }
 0x291   :  { %20952 = vst [vmem:[#allocation153_spill] sm:$0xff] %v16397_v50 }
 0x292   :  { %v16401_v41 = vpop.f32.mrf.mxu1 }
 0x293   :  { %20954 = vst [vmem:[#allocation155_spill] sm:$0xff] %v16401_v41 }
 0x294   :  { %v13103_v51 = vpop.f32.mrf.mxu1  ;;  %13198 = vmatmul.mubr.msk.bf16.gmra.mxu1 %vm1224_vm2, %v15788_v24 }
 0x295   :  { %v3105_v30 = vadd.f32 %v13103_v51, %v15778_v23  ;;  %13201 = vmatprep.mubr.msk.bf16.mxu1 %vm1224_vm2, %v20955_v26 }
 0x296   :  { %v2592_v50 = vpop.f32.mrf.mxu1 }
 0x297   :  { %v3103_v13 = vadd.f32 %v2592_v50, %v20957_v49  ;;  %v3238_v14 = vadd.f32 %v16413_v60, %v3105_v30  ;;  %v20961_v30 = vld [vmem:[#allocation34_spill] sm:$0xff] }
 0x298   :  { %v13104_v41 = vpop.f32.mrf.mxu1 }
 0x299   :  { %v3106_v24 = vadd.f32 %v13104_v41, %v20958_v48  ;;  %v3236_v51 = vadd.f32 %v16413_v60, %v3103_v13  ;;  %v3366_v62 = vmax.f32 %v3238_v14, 0.0  ;;  %v16429_v41 = vpop.f32.mrf.mxu0 }
 0x29a   :  { %v2595_v23 = vpop.f32.mrf.mxu1 }
 0x29b   :  { %v3239_v26 = vadd.f32 %v16413_v60, %v3106_v24  ;;  %v3104_v33 = vadd.f32 %v2595_v23, %v20960_v11  ;;  %v3364_v13 = vmax.f32 %v3236_v51, 0.0 }
 0x29c   :  { %v13107_v54 = vpop.f32.mrf.mxu1  ;;  %13202 = vmatmul.mubr.msk.bf16.gmra.mxu1 %vm1224_vm2, %v15821_v56 }
 0x29d   :  { %v3367_v49 = vmax.f32 %v3239_v26, 0.0  ;;  %v3237_v50 = vadd.f32 %v16413_v60, %v3104_v33  ;;  %v3109_v6 = vadd.f32 %v13107_v54, %v20961_v30  ;;  %13205 = vmatprep.mubr.msk.bf16.mxu1 %vm1224_vm2, %v15827_v55  ;;  %v20962_v33 = vld [vmem:[#allocation35_spill] sm:$0xff]  ;;  %v16438_v54 = vpop.f32.mrf.mxu0  ;;  %v14510_v55 = vld [vmem:[%s20587_s3 + $0xb0] sm:$0xff]  }
 0x29e   :  { %v2608_v48 = vpop.f32.mrf.mxu1 }
 0x29f   :  { %v16431_v24 = vpack.c.bf16 %v3367_v49, %v3366_v62  ;;  %v3365_v11 = vmax.f32 %v3237_v50, 0.0  ;;  %v3107_v23 = vadd.f32 %v2608_v48, %v15817_v44  ;;  %v3242_v14 = vadd.f32 %v16413_v60, %v3109_v6  ;;  %v20963_v49 = vld [vmem:[#allocation36_spill] sm:$0xff] }
 0x2a0   :  { %v13108_v10 = vpop.f32.mrf.mxu1 }
 0x2a1   :  { %v16434_v56 = vpack.c.bf16 %v3365_v11, %v3364_v13  ;;  %v3110_v26 = vadd.f32 %v13108_v10, %v20962_v33  ;;  %v3240_v62 = vadd.f32 %v16413_v60, %v3107_v23  ;;  %v3370_v6 = vmax.f32 %v3242_v14, 0.0  ;;  %v20964_v13 = vld [vmem:[#allocation37_spill] sm:$0xff]  ;;  %v16457_v23 = vpop.f32.mrf.mxu0 }
 0x2a2   :  { %v2611_v30 = vpop.f32.mrf.mxu1 }
 0x2a3   :  { %v3243_v51 = vadd.f32 %v16413_v60, %v3110_v26  ;;  %v3108_v44 = vadd.f32 %v2611_v30, %v20963_v49  ;;  %13237 = vmatprep.mubr.msk.bf16.mxu0 %vm1224_vm2, %v16434_v56  ;;  %v3368_v26 = vmax.f32 %v3240_v62, 0.0 }
 0x2a4   :  { %v13111_v50 = vpop.f32.mrf.mxu1  ;;  %13206 = vmatmul.mubr.msk.bf16.gmra.mxu1 %vm1224_vm2, %v15852_v35  ;;  %13238 = vmatmul.mubr.msk.bf16.vlgmr.msra.gmra.mxu0 %vm1224_vm2, %v16431_v24 }
 0x2a5   :  { %v3371_v10 = vmax.f32 %v3243_v51, 0.0  ;;  %v3241_v48 = vadd.f32 %v16413_v60, %v3108_v44  ;;  %v3113_v11 = vadd.f32 %v13111_v50, %v20964_v13  ;;  %13502 = vmatpush3.bf16.msra.mxu0 %v16179_v31  ;;  %13209 = vmatprep.mubr.msk.bf16.mxu1 %vm1224_vm2, %v15858_v43  ;;  %v14511_v43 = vld [vmem:[%s20587_s3 + $0xa8] sm:$0xff]   ;;  %v16469_v50 = vpop.f32.mrf.mxu0 }
 0x2a6   :  { %v2624_v33 = vpop.f32.mrf.mxu1  ;;  %13503 = vmatprep.subr.bf16.mxu0 %v14510_v55 }
 0x2a7   :  { %v16459_v35 = vpack.c.bf16 %v3371_v10, %v3370_v6  ;;  %v3369_v30 = vmax.f32 %v3241_v48, 0.0  ;;  %v3111_v14 = vadd.f32 %v2624_v33, %v15848_v0  ;;  %v3246_v44 = vadd.f32 %v16413_v60, %v3113_v11 }
 0x2a8   :  { %v13112_v51 = vpop.f32.mrf.mxu1 }
 0x2a9   :  { %v16462_v49 = vpack.c.bf16 %v3369_v30, %v3368_v26  ;;  %v3114_v31 = vadd.f32 %v13112_v51, %v15850_v4  ;;  %13504 = vmatpush3.bf16.msra.mxu0 %v14510_v55  ;;  %v3244_v6 = vadd.f32 %v16413_v60, %v3111_v14  ;;  %v3374_v4 = vmax.f32 %v3246_v44, 0.0 }
 0x2aa   :  { %v2627_v62 = vpop.f32.mrf.mxu1  ;;  %13505 = vmatprep.subr.bf16.mxu0 %v14511_v43 }
 0x2ab   :  { %v3247_v10 = vadd.f32 %v16413_v60, %v3114_v31  ;;  %v3112_v0 = vadd.f32 %v2627_v62, %v15864_v52  ;;  %13241 = vmatprep.mubr.msk.bf16.mxu0 %vm1224_vm2, %v16462_v49  ;;  %v16484_v52 = vpop.f32.mrf.mxu0  ;;  %v3372_v26 = vmax.f32 %v3244_v6, 0.0 }
 0x2ac   :  { %v13115_v48 = vpop.f32.mrf.mxu1  ;;  %13210 = vmatmul.mubr.msk.bf16.gmra.mxu1 %vm1224_vm2, %v15886_v7  ;;  %13242 = vmatmul.mubr.msk.bf16.gmra.mxu0 %vm1224_vm2, %v16459_v35 }
 0x2ad   :  { %v3375_v55 = vmax.f32 %v3247_v10, 0.0  ;;  %v3245_v13 = vadd.f32 %v16413_v60, %v3112_v0  ;;  %v3117_v11 = vadd.f32 %v13115_v48, %v15872_v17  ;;  %13213 = vmatprep.mubr.msk.bf16.mxu1 %vm1224_vm2, %v15894_v39  ;;  %13506 = vmatpush3.bf16.msra.mxu0 %v14511_v43  ;;  %v16493_v62 = vpop.f32.mrf.mxu0  ;;  %v2096_v43 = vadd.f32 %v15868_v20, %v15902_v27 }
 0x2ae   :  { %v2640_v33 = vpop.f32.mrf.mxu1 }
 0x2af   :  { %v16486_v30 = vpack.c.bf16 %v3375_v55, %v3374_v4  ;;  %v3373_v7 = vmax.f32 %v3245_v13, 0.0  ;;  %v3115_v14 = vadd.f32 %v2640_v33, %v15880_v3  ;;  %v3250_v31 = vadd.f32 %v16413_v60, %v3117_v11  ;;  %v16513_v55 = vpop.f32.mrf.mxu0 }
 0x2b0   :  { %v13116_v51 = vpop.f32.mrf.mxu1  ;;  %v2088_v3 = vadd.f32 %v15878_v9, %v15914_v38 }
 0x2b1   :  { %20965 = vst [vmem:[#allocation31_spill] sm:$0xff] %v16486_v30  ;;  %v16489_v44 = vpack.c.bf16 %v3373_v7, %v3372_v26  ;;  %v3118_v17 = vadd.f32 %v13116_v51, %v15884_v21  ;;  %v3248_v6 = vadd.f32 %v16413_v60, %v3115_v14  ;;  %v3378_v20 = vmax.f32 %v3250_v31, 0.0  ;;  %v20968_v26 = vld [vmem:[#allocation38_spill] sm:$0xff]  ;;  %v16522_v31 = vpop.f32.mrf.mxu0 }
 0x2b2   :  { %v2643_v39 = vpop.f32.mrf.mxu1  ;;  %v2091_v7 = vadd.f32 %v20968_v26, %v15926_v47  ;;  %v20972_v47 = vld [vmem:[#allocation40_spill] sm:$0xff]  ;;  %v2107_v26 = vadd.f32 %v15956_v19, %v15958_v58  ;;  %v20976_v19 = vld [vmem:[#allocation43_spill] sm:$0xff] }
 0x2b3   :  { %20966 = vst [vmem:[#allocation33_spill] sm:$0xff] %v16489_v44  ;;  %v3251_v10 = vadd.f32 %v16413_v60, %v3118_v17  ;;  %v3116_v0 = vadd.f32 %v2643_v39, %v15900_v15  ;;  %13245 = vmatprep.mubr.msk.bf16.mxu0 %vm1224_vm2, %v16489_v44  ;;  %v2099_v15 = vadd.f32 %v15882_v37, %v15916_v53  ;;  %v3376_v38 = vmax.f32 %v3248_v6, 0.0  ;;  %v20970_v53 = vld [vmem:[#allocation41_spill] sm:$0xff]  ;;  %v20971_v17 = vld [vmem:[#allocation39_spill] sm:$0xff] }
 0x2b4   :  { %v13119_v48 = vpop.f32.mrf.mxu1  ;;  %13214 = vmatmul.mubr.msk.bf16.gmra.mxu1 %vm1224_vm2, %v15918_v8  ;;  %13246 = vmatmul.mubr.msk.bf16.gmra.mxu0 %vm1224_vm2, %v16486_v30  ;;  %v2112_v39 = vadd.f32 %v20971_v17, %v20970_v53  ;;  %v2120_v58 = vadd.f32 %v15978_v34, %v20976_v19 }
 0x2b5   :  { %v3379_v21 = vmax.f32 %v3251_v10, 0.0  ;;  %v3249_v27 = vadd.f32 %v16413_v60, %v3116_v0  ;;  %v3121_v4 = vadd.f32 %v13119_v48, %v2096_v43  ;;  %13217 = vmatprep.mubr.msk.bf16.mxu1 %vm1224_vm2, %v15928_v28  ;;  %v2104_v0 = vadd.f32 %v20972_v47, %v15946_v18 }
 0x2b6   :  { %v2656_v9 = vpop.f32.mrf.mxu1  ;;  %v20977_v47 = vmov 0  }
 0x2b7   :  { %v16515_v13 = vpack.c.bf16 %v3379_v21, %v3378_v20  ;;  %v3377_v8 = vmax.f32 %v3249_v27, 0.0  ;;  %v3119_v11 = vadd.f32 %v2656_v9, %v2088_v3  ;;  %v3254_v51 = vadd.f32 %v16413_v60, %v3121_v4  ;;  %v20973_v4 = vld [vmem:[#allocation42_spill] sm:$0xff]  ;;  %v16541_v9 = vpop.f32.mrf.mxu0 }
 0x2b8   :  { %v13120_v33 = vpop.f32.mrf.mxu1 }
 0x2b9   :  { %20967 = vst [vmem:[#allocation34_spill] sm:$0xff] %v16515_v13  ;;  %v16519_v14 = vpack.c.bf16 %v3377_v8, %v3376_v38  ;;  %v3122_v28 = vadd.f32 %v13120_v33, %v2099_v15  ;;  %v3252_v43 = vadd.f32 %v16413_v60, %v3119_v11  ;;  %v3382_v48 = vmax.f32 %v3254_v51, 0.0 }
 0x2ba   :  { %v2659_v37 = vpop.f32.mrf.mxu1  ;;  %v2115_v15 = vadd.f32 %v20973_v4, %v15948_v63 }
 0x2bb   :  { %20969 = vst [vmem:[#allocation35_spill] sm:$0xff] %v16519_v14  ;;  %v3255_v6 = vadd.f32 %v16413_v60, %v3122_v28  ;;  %v3120_v10 = vadd.f32 %v2659_v37, %v2091_v7  ;;  %13249 = vmatprep.mubr.msk.bf16.mxu0 %vm1224_vm2, %v16519_v14  ;;  %v3380_v38 = vmax.f32 %v3252_v43, 0.0  ;;  %v16550_v28 = vpop.f32.mrf.mxu0  ;;  %v2128_v37 = vadd.f32 %v15970_v59, %v15962_v42 }
 0x2bc   :  { %v13123_v3 = vpop.f32.mrf.mxu1  ;;  %13218 = vmatmul.mubr.msk.bf16.gmra.mxu1 %vm1224_vm2, %v15950_v12  ;;  %13250 = vmatmul.mubr.msk.bf16.gmra.mxu0 %vm1224_vm2, %v16515_v13 }
 0x2bd   :  { %v3383_v20 = vmax.f32 %v3255_v6, 0.0  ;;  %v3253_v21 = vadd.f32 %v16413_v60, %v3120_v10  ;;  %v3125_v27 = vadd.f32 %v13123_v3, %v2112_v39  ;;  %13221 = vmatprep.mubr.msk.bf16.mxu1 %vm1224_vm2, %v15960_v25 }
 0x2be   :  { %v2672_v18 = vpop.f32.mrf.mxu1 }
 0x2bf   :  { %v16543_v8 = vpack.c.bf16 %v3383_v20, %v3382_v48  ;;  %v3381_v12 = vmax.f32 %v3253_v21, 0.0  ;;  %v3123_v11 = vadd.f32 %v2672_v18, %v2104_v0  ;;  %v3258_v51 = vadd.f32 %v16413_v60, %v3125_v27  ;;  %v20978_v0 = vld [vmem:[#allocation44_spill] sm:$0xff]  ;;  %v16568_v48 = vpop.f32.mrf.mxu0  ;;  %v20981_v18 = vld [vmem:[#allocation49_spill] sm:$0xff] }
 0x2c0   :  { %v13124_v33 = vpop.f32.mrf.mxu1  ;;  %v2131_v3 = vadd.f32 %v15988_v40, %v20978_v0 }
 0x2c1   :  { %20974 = vst [vmem:[#allocation36_spill] sm:$0xff] %v16543_v8  ;;  %v16547_v7 = vpack.c.bf16 %v3381_v12, %v3380_v38  ;;  %v3126_v25 = vadd.f32 %v13124_v33, %v2115_v15  ;;  %v3256_v53 = vadd.f32 %v16413_v60, %v3123_v11  ;;  %v3386_v6 = vmax.f32 %v3258_v51, 0.0  ;;  %v20980_v15 = vld [vmem:[#allocation45_spill] sm:$0xff]  ;;  %v20983_v51 = vld [vmem:[#allocation46_spill] sm:$0xff] }
 0x2c2   :  { %v2675_v63 = vpop.f32.mrf.mxu1  ;;  %v2123_v38 = vadd.f32 %v20981_v18, %v20980_v15 }
 0x2c3   :  { %20975 = vst [vmem:[#allocation37_spill] sm:$0xff] %v16547_v7  ;;  %v3259_v17 = vadd.f32 %v16413_v60, %v3126_v25  ;;  %v3124_v39 = vadd.f32 %v2675_v63, %v2107_v26  ;;  %13253 = vmatprep.mubr.msk.bf16.mxu0 %vm1224_vm2, %v16547_v7  ;;  %v3384_v20 = vmax.f32 %v3256_v53, 0.0  ;;  %v16577_v26 = vpop.f32.mrf.mxu0  ;;  %v2144_v25 = vadd.f32 %v16004_v1, %v20983_v51 }
 0x2c4   :  { %v13127_v43 = vpop.f32.mrf.mxu1  ;;  %13222 = vmatmul.mubr.msk.bf16.gmra.mxu1 %vm1224_vm2, %v15976_v5  ;;  %13254 = vmatmul.mubr.msk.bf16.gmra.mxu0 %vm1224_vm2, %v16543_v8 }
 0x2c5   :  { %v3387_v42 = vmax.f32 %v3259_v17, 0.0  ;;  %v3257_v59 = vadd.f32 %v16413_v60, %v3124_v39  ;;  %v3129_v10 = vadd.f32 %v13127_v43, %v2128_v37  ;;  %13225 = vmatprep.mubr.bf16.mxu1 %v20977_v47  ;;  %v20984_v17 = vld [vmem:[#allocation47_spill] sm:$0xff] }
 0x2c6   :  { %v2688_v34 = vpop.f32.mrf.mxu1  ;;  %v2136_v39 = vadd.f32 %v16010_v2, %v20984_v17 }
 0x2c7   :  { %v16570_v21 = vpack.c.bf16 %v3387_v42, %v3386_v6  ;;  %v3385_v5 = vmax.f32 %v3257_v59, 0.0  ;;  %v3127_v27 = vadd.f32 %v2688_v34, %v2120_v58  ;;  %v3262_v11 = vadd.f32 %v16413_v60, %v3129_v10  ;;  %v20985_v42 = vld [vmem:[#allocation48_spill] sm:$0xff]  ;;  %v16594_v10 = vpop.f32.mrf.mxu0 }
 0x2c8   :  { %v13128_v4 = vpop.f32.mrf.mxu1  ;;  %v2147_v59 = vadd.f32 %v16020_v46, %v20985_v42 }
 0x2c9   :  { %20979 = vst [vmem:[#allocation38_spill] sm:$0xff] %v16570_v21  ;;  %v16574_v12 = vpack.c.bf16 %v3385_v5, %v3384_v20  ;;  %v3130_v33 = vadd.f32 %v13128_v4, %v2131_v3  ;;  %v3260_v63 = vadd.f32 %v16413_v60, %v3127_v27  ;;  %v3390_v58 = vmax.f32 %v3262_v11, 0.0  ;;  %v20987_v27 = vld [vmem:[#allocation57_spill] sm:$0xff]  ;;  %v16603_v11 = vpop.f32.mrf.mxu0 }
 0x2ca   :  { %v2691_v40 = vpop.f32.mrf.mxu1  ;;  %v2139_v4 = vadd.f32 %v20987_v27, %v15996_v57  ;;  %v20990_v57 = vld [vmem:[#allocation51_spill] sm:$0xff] }
 0x2cb   :  { %20982 = vst [vmem:[#allocation41_spill] sm:$0xff] %v16574_v12  ;;  %v3263_v37 = vadd.f32 %v16413_v60, %v3130_v33  ;;  %v3128_v53 = vadd.f32 %v2691_v40, %v2123_v38  ;;  %13257 = vmatprep.mubr.msk.bf16.mxu0 %vm1224_vm2, %v16574_v12  ;;  %v3388_v2 = vmax.f32 %v3260_v63, 0.0  ;;  %v20989_v33 = vld [vmem:[#allocation50_spill] sm:$0xff] }
 0x2cc   :  { %v13131_v19 = vpop.f32.mrf.mxu1  ;;  %13226 = vmatmul.mubr.bf16.gmra.mxu1 %v20977_v47  ;;  %13258 = vmatmul.mubr.msk.bf16.gmra.mxu0 %vm1224_vm2, %v16570_v21  ;;  %v2160_v40 = vadd.f32 %v16039_v61, %v20989_v33 }
 0x2cd   :  { %v3391_v43 = vmax.f32 %v3263_v37, 0.0  ;;  %v3261_v1 = vadd.f32 %v16413_v60, %v3128_v53  ;;  %v3133_v6 = vadd.f32 %v13131_v19, %v2144_v25  ;;  %13373 = vmatprep.mubr.bf16.mxu1 %v20977_v47  ;;  %v2152_v37 = vadd.f32 %v16045_v29, %v20990_v57 }
 0x2ce   :  { %v2704_v0 = vpop.f32.mrf.mxu1 }
 0x2cf   :  { %v16596_v3 = vpack.c.bf16 %v3391_v43, %v3390_v58  ;;  %v3389_v34 = vmax.f32 %v3261_v1, 0.0  ;;  %v3131_v20 = vadd.f32 %v2704_v0, %v2136_v39  ;;  %v3266_v18 = vadd.f32 %v16413_v60, %v3133_v6  ;;  %v20991_v58 = vld [vmem:[#allocation52_spill] sm:$0xff]  ;;  %v16620_v6 = vpop.f32.mrf.mxu0 }
 0x2d0   :  { %v13132_v5 = vpop.f32.mrf.mxu1  ;;  %v20992_v43 = vld [vmem:[#allocation64_spill] sm:$0xff] }
 0x2d1   :  { %20986 = vst [vmem:[#allocation39_spill] sm:$0xff] %v16596_v3  ;;  %v16600_v15 = vpack.c.bf16 %v3389_v34, %v3388_v2  ;;  %v3134_v38 = vadd.f32 %v13132_v5, %v2147_v59  ;;  %v3264_v51 = vadd.f32 %v16413_v60, %v3131_v20  ;;  %v3394_v17 = vmax.f32 %v3266_v18, 0.0  ;;  %v20994_v20 = vld [vmem:[#allocation53_spill] sm:$0xff]  ;;  %v20995_v5 = vld [vmem:[#allocation67_spill] sm:$0xff] }
 0x2d2   :  { %v2707_v46 = vpop.f32.mrf.mxu1  ;;  %v2163_v1 = vadd.f32 %v20992_v43, %v20991_v58  ;;  %v2155_v27 = vadd.f32 %v20995_v5, %v20994_v20 }
 0x2d3   :  { %20988 = vst [vmem:[#allocation40_spill] sm:$0xff] %v16600_v15  ;;  %v3267_v25 = vadd.f32 %v16413_v60, %v3134_v38  ;;  %v3132_v63 = vadd.f32 %v2707_v46, %v2139_v4  ;;  %13261 = vmatprep.mubr.msk.bf16.mxu0 %vm1224_vm2, %v16600_v15  ;;  %v3392_v29 = vmax.f32 %v3264_v51, 0.0  ;;  %v16629_v46 = vpop.f32.mrf.mxu0 }
 0x2d4   :  { %v13135_v53 = vpop.f32.mrf.mxu1  ;;  %13262 = vmatmul.mubr.msk.bf16.gmra.mxu0 %vm1224_vm2, %v16596_v3  ;;  %13374 = vmatmul.mubr.bf16.vlgmr.msra.gmra.mxu1 %v20977_v47 }
 0x2d5   :  { %v3395_v39 = vmax.f32 %v3267_v25, 0.0  ;;  %v3265_v61 = vadd.f32 %v16413_v60, %v3132_v63  ;;  %v3137_v19 = vadd.f32 %v13135_v53, %v2160_v40  ;;  %13377 = vmatprep.mubr.bf16.mxu1 %v20977_v47  ;;  %v20997_v40 = vld [vmem:[#allocation54_spill] sm:$0xff]  ;;  %v20999_v53 = vld [vmem:[#allocation55_spill] sm:$0xff] }
 0x2d6   :  { %v2720_v42 = vpop.f32.mrf.mxu1  ;;  %v20998_v25 = vld [vmem:[#allocation2_spill] sm:$0xff] }
 0x2d7   :  { %v16622_v59 = vpack.c.bf16 %v3395_v39, %v3394_v17  ;;  %v3393_v0 = vmax.f32 %v3265_v61, 0.0  ;;  %v3135_v2 = vadd.f32 %v2720_v42, %v2152_v37  ;;  %v3270_v18 = vadd.f32 %v16413_v60, %v3137_v19  ;;  %v21000_v17 = vld [vmem:[#allocation72_spill] sm:$0xff] }
 0x2d8   :  { %v13136_v34 = vpop.f32.mrf.mxu1  ;;  %v2176_v63 = vadd.f32 %v20998_v25, %v20997_v40  ;;  %v2168_v39 = vadd.f32 %v21000_v17, %v20999_v53  ;;  %v21001_v42 = vld [vmem:[#allocation56_spill] sm:$0xff]  ;;  %v21007_v17 = vld [vmem:[#allocation59_spill] sm:$0xff] }
 0x2d9   :  { %20993 = vst [vmem:[#allocation42_spill] sm:$0xff] %v16622_v59  ;;  %v16626_v4 = vpack.c.bf16 %v3393_v0, %v3392_v29  ;;  %v3138_v38 = vadd.f32 %v13136_v34, %v2163_v1  ;;  %v3268_v51 = vadd.f32 %v16413_v60, %v3135_v2  ;;  %v3398_v19 = vmax.f32 %v3270_v18, 0.0  ;;  %v21002_v29 = vld [vmem:[#allocation3_spill] sm:$0xff]  ;;  %v16647_v2 = vpop.f32.mrf.mxu0  ;;  %v21004_v18 = vld [vmem:[#allocation58_spill] sm:$0xff]  ;;  %v21005_v40 = vld [vmem:[#allocation76_spill] sm:$0xff] }
 0x2da   :  { %v2723_v33 = vpop.f32.mrf.mxu1  ;;  %v2179_v0 = vadd.f32 %v21002_v29, %v21001_v42  ;;  %v2171_v25 = vadd.f32 %v21005_v40, %v21004_v18 }
 0x2db   :  { %20996 = vst [vmem:[#allocation43_spill] sm:$0xff] %v16626_v4  ;;  %v3271_v57 = vadd.f32 %v16413_v60, %v3138_v38  ;;  %v3136_v37 = vadd.f32 %v2723_v33, %v2155_v27  ;;  %13265 = vmatprep.mubr.msk.bf16.mxu0 %vm1224_vm2, %v16626_v4  ;;  %v3396_v20 = vmax.f32 %v3268_v51, 0.0 }
 0x2dc   :  { %v13139_v61 = vpop.f32.mrf.mxu1  ;;  %13266 = vmatmul.mubr.msk.bf16.gmra.mxu0 %vm1224_vm2, %v16622_v59  ;;  %13378 = vmatmul.mubr.bf16.gmra.mxu1 %v20977_v47  ;;  %v21025_v47 = vld [vmem:[#allocation92_spill] sm:$0xff] }
 0x2dd   :  { %v3399_v58 = vmax.f32 %v3271_v57, 0.0  ;;  %v3269_v43 = vadd.f32 %v16413_v60, %v3136_v37  ;;  %v3141_v1 = vadd.f32 %v13139_v61, %v2176_v63  ;;  %13381 = vmatprep.mubr.msk.bf16.mxu1 %vm1224_vm2, %v16434_v56  ;;  %v16656_v37 = vpop.f32.mrf.mxu0  ;;  %v21008_v61 = vld [vmem:[#allocation5_spill] sm:$0xff] }
 0x2de   :  { %v2736_v34 = vpop.f32.mrf.mxu1  ;;  %v2192_v42 = vadd.f32 %v21008_v61, %v21007_v17 }
 0x2df   :  { %v16649_v5 = vpack.c.bf16 %v3399_v58, %v3398_v19  ;;  %v3397_v27 = vmax.f32 %v3269_v43, 0.0  ;;  %v3139_v38 = vadd.f32 %v2736_v34, %v2168_v39  ;;  %v3274_v63 = vadd.f32 %v16413_v60, %v3141_v1  ;;  %v21009_v58 = vld [vmem:[#allocation60_spill] sm:$0xff]  ;;  %v16675_v40 = vpop.f32.mrf.mxu0 }
 0x2e0   :  { %v13140_v33 = vpop.f32.mrf.mxu1  ;;  %v21010_v43 = vld [vmem:[#allocation80_spill] sm:$0xff] }
 0x2e1   :  { %21003 = vst [vmem:[#allocation44_spill] sm:$0xff] %v16649_v5  ;;  %v16653_v57 = vpack.c.bf16 %v3397_v27, %v3396_v20  ;;  %v3142_v56 = vadd.f32 %v13140_v33, %v2179_v0  ;;  %v3272_v51 = vadd.f32 %v16413_v60, %v3139_v38  ;;  %v2184_v29 = vadd.f32 %v21010_v43, %v21009_v58  ;;  %v21011_v38 = vld [vmem:[#allocation61_spill] sm:$0xff]  ;;  %v21012_v33 = vld [vmem:[#allocation7_spill] sm:$0xff]  ;;  %v14512_v43 = vld [vmem:[%s20587_s3 + $0xa0] sm:$0xff]  }
 0x2e2   :  { %v2739_v53 = vpop.f32.mrf.mxu1  ;;  %v3402_v1 = vmax.f32 %v3274_v63, 0.0  ;;  %v2195_v18 = vadd.f32 %v21012_v33, %v21011_v38  ;;  %v21013_v63 = vld [vmem:[#allocation62_spill] sm:$0xff]  ;;  %v21017_v38 = vld [vmem:[#allocation9_spill] sm:$0xff]  ;;  %13507 = vmatprep.subr.bf16.mxu0 %v14512_v43 }
 0x2e3   :  { %21006 = vst [vmem:[#allocation45_spill] sm:$0xff] %v16653_v57  ;;  %v3275_v19 = vadd.f32 %v16413_v60, %v3142_v56  ;;  %v3140_v39 = vadd.f32 %v2739_v53, %v2171_v25  ;;  %13269 = vmatprep.mubr.msk.bf16.mxu0 %vm1224_vm2, %v16653_v57  ;;  %v3400_v56 = vmax.f32 %v3272_v51, 0.0  ;;  %13508 = vmatpush3.bf16.msra.mxu0 %v14512_v43 }
 0x2e4   :  { %v13143_v34 = vpop.f32.mrf.mxu1  ;;  %13270 = vmatmul.mubr.msk.bf16.gmra.mxu0 %vm1224_vm2, %v16649_v5  ;;  %13382 = vmatmul.mubr.msk.bf16.gmra.mxu1 %vm1224_vm2, %v16431_v24 }
 0x2e5   :  { %v3403_v0 = vmax.f32 %v3275_v19, 0.0  ;;  %v3273_v20 = vadd.f32 %v16413_v60, %v3140_v39  ;;  %v3145_v27 = vadd.f32 %v13143_v34, %v2192_v42  ;;  %13385 = vmatprep.mubr.msk.bf16.mxu1 %vm1224_vm2, %v16462_v49  ;;  %v21014_v19 = vld [vmem:[#allocation84_spill] sm:$0xff]  ;;  %v21016_v34 = vld [vmem:[#allocation63_spill] sm:$0xff] }
 0x2e6   :  { %v2752_v25 = vpop.f32.mrf.mxu1  ;;  %v2187_v58 = vadd.f32 %v21014_v19, %v21013_v63  ;;  %v2208_v51 = vadd.f32 %v21017_v38, %v21016_v34  ;;  %v21021_v19 = vld [vmem:[#allocation66_spill] sm:$0xff] }
 0x2e7   :  { %v16677_v53 = vpack.c.bf16 %v3403_v0, %v3402_v1  ;;  %v3401_v17 = vmax.f32 %v3273_v20, 0.0  ;;  %v3143_v61 = vadd.f32 %v2752_v25, %v2184_v29  ;;  %v3278_v42 = vadd.f32 %v16413_v60, %v3145_v27  ;;  %v16689_v1 = vpop.f32.mrf.mxu0  ;;  %v21019_v27 = vld [vmem:[#allocation65_spill] sm:$0xff] }
 0x2e8   :  { %v13144_v24 = vpop.f32.mrf.mxu1  ;;  %21018 = vst [vmem:[#allocation46_spill] sm:$0xff] %v16689_v1 }
 0x2e9   :  { %v16681_v39 = vpack.c.bf16 %v3401_v17, %v3400_v56  ;;  %v3146_v49 = vadd.f32 %v13144_v24, %v2195_v18  ;;  %v3276_v29 = vadd.f32 %v16413_v60, %v3143_v61  ;;  %v21020_v18 = vld [vmem:[#allocation88_spill] sm:$0xff]  ;;  %v3406_v17 = vmax.f32 %v3278_v42, 0.0  ;;  %v16706_v34 = vpop.f32.mrf.mxu0 }
 0x2ea   :  { %v2755_v0 = vpop.f32.mrf.mxu1  ;;  %v2200_v25 = vadd.f32 %v21020_v18, %v21019_v27  ;;  %21023 = vst [vmem:[#allocation47_spill] sm:$0xff] %v16706_v34  ;;  %v21029_v34 = vld [vmem:[#allocation13_spill] sm:$0xff] }
 0x2eb   :  { %21015 = vst [vmem:[#allocation49_spill] sm:$0xff] %v16681_v39  ;;  %v3279_v20 = vadd.f32 %v16413_v60, %v3146_v49  ;;  %v3144_v33 = vadd.f32 %v2755_v0, %v2187_v58  ;;  %13273 = vmatprep.mubr.msk.bf16.mxu0 %vm1224_vm2, %v16681_v39  ;;  %v21022_v58 = vld [vmem:[#allocation11_spill] sm:$0xff]  ;;  %v3404_v0 = vmax.f32 %v3276_v29, 0.0 }
 0x2ec   :  { %v13147_v56 = vpop.f32.mrf.mxu1  ;;  %13274 = vmatmul.mubr.msk.bf16.gmra.mxu0 %vm1224_vm2, %v16677_v53  ;;  %13386 = vmatmul.mubr.msk.bf16.gmra.mxu1 %vm1224_vm2, %v16459_v35  ;;  %v2211_v49 = vadd.f32 %v21022_v58, %v21021_v19  ;;  %v21028_v58 = vld [vmem:[#allocation69_spill] sm:$0xff] }
 0x2ed   :  { %v3407_v24 = vmax.f32 %v3279_v20, 0.0  ;;  %v3277_v61 = vadd.f32 %v16413_v60, %v3144_v33  ;;  %v3149_v63 = vadd.f32 %v13147_v56, %v2208_v51  ;;  %13389 = vmatprep.mubr.msk.bf16.mxu1 %vm1224_vm2, %v16489_v44  ;;  %v21024_v20 = vld [vmem:[#allocation68_spill] sm:$0xff]  ;;  %v16715_v44 = vpop.f32.mrf.mxu0  ;;  %v2224_v1 = vadd.f32 %v21029_v34, %v21028_v58 }
 0x2ee   :  { %v2768_v38 = vpop.f32.mrf.mxu1  ;;  %v2203_v33 = vadd.f32 %v21025_v47, %v21024_v20  ;;  %21027 = vst [vmem:[#allocation57_spill] sm:$0xff] %v16715_v44  ;;  %v21030_v47 = vld [vmem:[#allocation70_spill] sm:$0xff] }
 0x2ef   :  { %v16708_v27 = vpack.c.bf16 %v3407_v24, %v3406_v17  ;;  %v3405_v18 = vmax.f32 %v3277_v61, 0.0  ;;  %v3147_v35 = vadd.f32 %v2768_v38, %v2200_v25  ;;  %v3282_v56 = vadd.f32 %v16413_v60, %v3149_v63  ;;  %v21031_v24 = vld [vmem:[#allocation96_spill] sm:$0xff]  ;;  %v16734_v20 = vpop.f32.mrf.mxu0 }
 0x2f0   :  { %v13148_v42 = vpop.f32.mrf.mxu1  ;;  %v2216_v61 = vadd.f32 %v21031_v24, %v21030_v47  ;;  %21034 = vst [vmem:[#allocation50_spill] sm:$0xff] %v16734_v20  ;;  %v21048_v20 = vld [vmem:[#allocation108_spill] sm:$0xff] }
 0x2f1   :  { %v16712_v51 = vpack.c.bf16 %v3405_v18, %v3404_v0  ;;  %v3150_v43 = vadd.f32 %v13148_v42, %v2211_v49  ;;  %v3280_v29 = vadd.f32 %v16413_v60, %v3147_v35  ;;  %v3410_v63 = vmax.f32 %v3282_v56, 0.0  ;;  %v21032_v18 = vld [vmem:[#allocation71_spill] sm:$0xff]  ;;  %v21036_v56 = vld [vmem:[#allocation73_spill] sm:$0xff] }
 0x2f2   :  { %v2771_v19 = vpop.f32.mrf.mxu1  ;;  %v21033_v35 = vld [vmem:[#allocation15_spill] sm:$0xff] }
 0x2f3   :  { %21026 = vst [vmem:[#allocation48_spill] sm:$0xff] %v16712_v51  ;;  %v3283_v17 = vadd.f32 %v16413_v60, %v3150_v43  ;;  %v3148_v25 = vadd.f32 %v2771_v19, %v2203_v33  ;;  %13277 = vmatprep.mubr.msk.bf16.mxu0 %vm1224_vm2, %v16712_v51  ;;  %v2227_v42 = vadd.f32 %v21033_v35, %v21032_v18  ;;  %v3408_v43 = vmax.f32 %v3280_v29, 0.0  ;;  %v14513_v18 = vld [vmem:[%s20587_s3 + $0xf8] sm:$0xff]   ;;  %v21038_v35 = vld [vmem:[#allocation74_spill] sm:$0xff] }
 0x2f4   :  { %v13151_v38 = vpop.f32.mrf.mxu1  ;;  %13278 = vmatmul.mubr.msk.bf16.gmra.mxu0 %vm1224_vm2, %v16708_v27  ;;  %13390 = vmatmul.mubr.msk.bf16.gmra.mxu1 %vm1224_vm2, %v16486_v30 }
 0x2f5   :  { %v3411_v49 = vmax.f32 %v3283_v17, 0.0  ;;  %v3281_v34 = vadd.f32 %v16413_v60, %v3148_v25  ;;  %v3153_v0 = vadd.f32 %v13151_v38, %v2224_v1  ;;  %13393 = vmatprep.mubr.msk.bf16.mxu1 %vm1224_vm2, %v16519_v14  ;;  %v21037_v17 = vld [vmem:[#allocation100_spill] sm:$0xff]  ;;  %v21039_v14 = vld [vmem:[#allocation17_spill] sm:$0xff]  ;;  %13637 = vmatprep.subr.bf16.mxu1 %v14513_v18 }
 0x2f6   :  { %v2784_v33 = vpop.f32.mrf.mxu1  ;;  %v2219_v30 = vadd.f32 %v21037_v17, %v21036_v56  ;;  %v2240_v29 = vadd.f32 %v21039_v14, %v21038_v35  ;;  %13638 = vmatpush3.bf16.msra.mxu1 %v14513_v18  ;;  %v21044_v17 = vld [vmem:[#allocation19_spill] sm:$0xff] }
 0x2f7   :  { %v16736_v19 = vpack.c.bf16 %v3411_v49, %v3410_v63  ;;  %v3409_v58 = vmax.f32 %v3281_v34, 0.0  ;;  %v3151_v47 = vadd.f32 %v2784_v33, %v2216_v61  ;;  %v3286_v1 = vadd.f32 %v16413_v60, %v3153_v0  ;;  %v16748_v63 = vpop.f32.mrf.mxu0  ;;  %v21041_v0 = vld [vmem:[#allocation4_spill] sm:$0xff] }
 0x2f8   :  { %v13152_v24 = vpop.f32.mrf.mxu1  ;;  %21040 = vst [vmem:[#allocation52_spill] sm:$0xff] %v16748_v63 }
 0x2f9   :  { %21035 = vst [vmem:[#allocation51_spill] sm:$0xff] %v16736_v19  ;;  %v16740_v25 = vpack.c.bf16 %v3409_v58, %v3408_v43  ;;  %v3154_v38 = vadd.f32 %v13152_v24, %v2227_v42  ;;  %v3284_v61 = vadd.f32 %v16413_v60, %v3151_v47  ;;  %v21042_v42 = vld [vmem:[#allocation104_spill] sm:$0xff]  ;;  %v3414_v14 = vmax.f32 %v3286_v1, 0.0  ;;  %v16765_v35 = vpop.f32.mrf.mxu0 }
 0x2fa   :  { %v2787_v49 = vpop.f32.mrf.mxu1  ;;  %v2232_v43 = vadd.f32 %v21042_v42, %v21041_v0  ;;  %21045 = vst [vmem:[#allocation64_spill] sm:$0xff] %v16765_v35  ;;  %v21051_v35 = vld [vmem:[#allocation21_spill] sm:$0xff] }
 0x2fb   :  { %v3287_v34 = vadd.f32 %v16413_v60, %v3154_v38  ;;  %v3152_v33 = vadd.f32 %v2787_v49, %v2219_v30  ;;  %13281 = vmatprep.mubr.msk.bf16.mxu0 %vm1224_vm2, %v16740_v25  ;;  %v21043_v30 = vld [vmem:[#allocation75_spill] sm:$0xff]  ;;  %v3412_v0 = vmax.f32 %v3284_v61, 0.0 }
 0x2fc   :  { %v13155_v58 = vpop.f32.mrf.mxu1  ;;  %13282 = vmatmul.mubr.msk.bf16.gmra.mxu0 %vm1224_vm2, %v16736_v19  ;;  %13394 = vmatmul.mubr.msk.bf16.gmra.mxu1 %vm1224_vm2, %v16515_v13  ;;  %v2243_v38 = vadd.f32 %v21044_v17, %v21043_v30  ;;  %v21050_v17 = vld [vmem:[#allocation78_spill] sm:$0xff] }
 0x2fd   :  { %v3415_v24 = vmax.f32 %v3287_v34, 0.0  ;;  %v3285_v47 = vadd.f32 %v16413_v60, %v3152_v33  ;;  %v3157_v56 = vadd.f32 %v13155_v58, %v2240_v29  ;;  %13397 = vmatprep.mubr.msk.bf16.mxu1 %vm1224_vm2, %v16547_v7  ;;  %v21047_v34 = vld [vmem:[#allocation77_spill] sm:$0xff]  ;;  %v16774_v7 = vpop.f32.mrf.mxu0  ;;  %v2256_v44 = vadd.f32 %v21051_v35, %v21050_v17 }
 0x2fe   :  { %v2800_v49 = vpop.f32.mrf.mxu1  ;;  %v2235_v33 = vadd.f32 %v21048_v20, %v21047_v34  ;;  %v21052_v20 = vld [vmem:[#allocation6_spill] sm:$0xff] }
 0x2ff   :  { %v16767_v42 = vpack.c.bf16 %v3415_v24, %v3414_v14  ;;  %v3413_v63 = vmax.f32 %v3285_v47, 0.0  ;;  %v3155_v13 = vadd.f32 %v2800_v49, %v2232_v43  ;;  %v3290_v58 = vadd.f32 %v16413_v60, %v3157_v56  ;;  %v21054_v49 = vld [vmem:[#allocation79_spill] sm:$0xff]  ;;  %v16793_v34 = vpop.f32.mrf.mxu0 }
 0x300   :  { %v13156_v1 = vpop.f32.mrf.mxu1  ;;  %21056 = vst [vmem:[#allocation54_spill] sm:$0xff] %v16793_v34 }
 0x301   :  { %21046 = vst [vmem:[#allocation53_spill] sm:$0xff] %v16767_v42  ;;  %v16771_v29 = vpack.c.bf16 %v3413_v63, %v3412_v0  ;;  %v3158_v18 = vadd.f32 %v13156_v1, %v2243_v38  ;;  %v3288_v61 = vadd.f32 %v16413_v60, %v3155_v13  ;;  %v21053_v63 = vld [vmem:[#allocation112_spill] sm:$0xff]  ;;  %v3418_v56 = vmax.f32 %v3290_v58, 0.0  ;;  %v21055_v0 = vld [vmem:[#allocation23_spill] sm:$0xff]  ;;  %v21058_v58 = vld [vmem:[#allocation81_spill] sm:$0xff] }
 0x302   :  { %v2803_v30 = vpop.f32.mrf.mxu1  ;;  %v2248_v24 = vadd.f32 %v21053_v63, %v21052_v20  ;;  %v2259_v1 = vadd.f32 %v21055_v0, %v21054_v49  ;;  %v21061_v0 = vld [vmem:[#allocation82_spill] sm:$0xff] }
 0x303   :  { %21049 = vst [vmem:[#allocation67_spill] sm:$0xff] %v16771_v29  ;;  %v3291_v14 = vadd.f32 %v16413_v60, %v3158_v18  ;;  %v3156_v43 = vadd.f32 %v2803_v30, %v2235_v33  ;;  %13285 = vmatprep.mubr.msk.bf16.mxu0 %vm1224_vm2, %v16771_v29  ;;  %v3416_v18 = vmax.f32 %v3288_v61, 0.0  ;;  %v2272_v34 = vadd.f32 %v16281_v45, %v21061_v0 }
 0x304   :  { %v13159_v47 = vpop.f32.mrf.mxu1  ;;  %13286 = vmatmul.mubr.msk.bf16.gmra.mxu0 %vm1224_vm2, %v16767_v42  ;;  %13398 = vmatmul.mubr.msk.bf16.gmra.mxu1 %vm1224_vm2, %v16543_v8 }
 0x305   :  { %v3419_v38 = vmax.f32 %v3291_v14, 0.0  ;;  %v3289_v13 = vadd.f32 %v16413_v60, %v3156_v43  ;;  %v3161_v35 = vadd.f32 %v13159_v47, %v2256_v44  ;;  %13401 = vmatprep.mubr.msk.bf16.mxu1 %vm1224_vm2, %v16574_v12  ;;  %v21059_v14 = vld [vmem:[#allocation116_spill] sm:$0xff]  ;;  %v16802_v12 = vpop.f32.mrf.mxu0 }
 0x306   :  { %v2816_v33 = vpop.f32.mrf.mxu1  ;;  %v2251_v8 = vadd.f32 %v21059_v14, %v21058_v58 }
 0x307   :  { %v16795_v30 = vpack.c.bf16 %v3419_v38, %v3418_v56  ;;  %v3417_v17 = vmax.f32 %v3289_v13, 0.0  ;;  %v3159_v20 = vadd.f32 %v2816_v33, %v2248_v24  ;;  %v3294_v44 = vadd.f32 %v16413_v60, %v3161_v35  ;;  %v21062_v38 = vld [vmem:[#allocation8_spill] sm:$0xff]  ;;  %v21063_v13 = vld [vmem:[#allocation119_spill] sm:$0xff] }
 0x308   :  { %v13160_v63 = vpop.f32.mrf.mxu1  ;;  %v2264_v33 = vadd.f32 %v21063_v13, %v21062_v38 }
 0x309   :  { %21057 = vst [vmem:[#allocation2_spill] sm:$0xff] %v16795_v30  ;;  %v16799_v43 = vpack.c.bf16 %v3417_v17, %v3416_v18  ;;  %v3162_v47 = vadd.f32 %v13160_v63, %v2259_v1  ;;  %v3292_v61 = vadd.f32 %v16413_v60, %v3159_v20  ;;  %v3422_v35 = vmax.f32 %v3294_v44, 0.0  ;;  %v16821_v63 = vpop.f32.mrf.mxu0  ;;  %v21066_v44 = vld [vmem:[#allocation85_spill] sm:$0xff] }
 0x30a   :  { %v2819_v49 = vpop.f32.mrf.mxu1 }
 0x30b   :  { %21060 = vst [vmem:[#allocation55_spill] sm:$0xff] %v16799_v43  ;;  %v3295_v56 = vadd.f32 %v16413_v60, %v3162_v47  ;;  %v3160_v24 = vadd.f32 %v2819_v49, %v2251_v8  ;;  %13289 = vmatprep.mubr.msk.bf16.mxu0 %vm1224_vm2, %v16799_v43  ;;  %v21064_v8 = vld [vmem:[#allocation83_spill] sm:$0xff]  ;;  %v3420_v14 = vmax.f32 %v3292_v61, 0.0 }
 0x30c   :  { %v13163_v18 = vpop.f32.mrf.mxu1  ;;  %13290 = vmatmul.mubr.msk.bf16.gmra.mxu0 %vm1224_vm2, %v16795_v30  ;;  %13402 = vmatmul.mubr.msk.bf16.gmra.mxu1 %vm1224_vm2, %v16570_v21  ;;  %v2275_v20 = vadd.f32 %v16297_v16, %v21064_v8  ;;  %v21068_v8 = vld [vmem:[#allocation86_spill] sm:$0xff] }
 0x30d   :  { %v3423_v45 = vmax.f32 %v3295_v56, 0.0  ;;  %v3293_v1 = vadd.f32 %v16413_v60, %v3160_v24  ;;  %v3165_v17 = vadd.f32 %v13163_v18, %v2272_v34  ;;  %13405 = vmatprep.mubr.msk.bf16.mxu1 %vm1224_vm2, %v16600_v15  ;;  %v2267_v56 = vadd.f32 %v16303_v32, %v21066_v44  ;;  %v16830_v18 = vpop.f32.mrf.mxu0  ;;  %v21069_v32 = vld [vmem:[#allocation10_spill] sm:$0xff] }
 0x30e   :  { %v2832_v58 = vpop.f32.mrf.mxu1  ;;  %v2288_v15 = vadd.f32 %v16313_v22, %v21068_v8 }
 0x30f   :  { %v16823_v47 = vpack.c.bf16 %v3423_v45, %v3422_v35  ;;  %v3421_v49 = vmax.f32 %v3293_v1, 0.0  ;;  %v3163_v0 = vadd.f32 %v2832_v58, %v2264_v33  ;;  %v3298_v34 = vadd.f32 %v16413_v60, %v3165_v17 }
 0x310   :  { %v13164_v38 = vpop.f32.mrf.mxu1  ;;  %v2280_v45 = vadd.f32 %v16319_v36, %v21069_v32 }
 0x311   :  { %21065 = vst [vmem:[#allocation72_spill] sm:$0xff] %v16823_v47  ;;  %v16827_v24 = vpack.c.bf16 %v3421_v49, %v3420_v14  ;;  %v3166_v13 = vadd.f32 %v13164_v38, %v2275_v20  ;;  %v3296_v61 = vadd.f32 %v16413_v60, %v3163_v0  ;;  %v3426_v17 = vmax.f32 %v3298_v34, 0.0  ;;  %v21070_v14 = vld [vmem:[#allocation87_spill] sm:$0xff]  ;;  %v21071_v49 = vld [vmem:[#allocation129_spill] sm:$0xff]  ;;  %v16849_v38 = vpop.f32.mrf.mxu0 }
 0x312   :  { %v2835_v16 = vpop.f32.mrf.mxu1  ;;  %v2291_v0 = vadd.f32 %v21071_v49, %v21070_v14  ;;  %v21073_v34 = vld [vmem:[#allocation89_spill] sm:$0xff]  ;;  %v21077_v49 = vld [vmem:[#allocation90_spill] sm:$0xff] }
 0x313   :  { %21067 = vst [vmem:[#allocation56_spill] sm:$0xff] %v16827_v24  ;;  %v3299_v35 = vadd.f32 %v16413_v60, %v3166_v13  ;;  %v3164_v33 = vadd.f32 %v2835_v16, %v2267_v56  ;;  %13293 = vmatprep.mubr.msk.bf16.mxu0 %vm1224_vm2, %v16827_v24  ;;  %v3424_v44 = vmax.f32 %v3296_v61, 0.0 }
 0x314   :  { %v13167_v1 = vpop.f32.mrf.mxu1  ;;  %13294 = vmatmul.mubr.msk.bf16.gmra.mxu0 %vm1224_vm2, %v16823_v47  ;;  %13406 = vmatmul.mubr.msk.bf16.gmra.mxu1 %vm1224_vm2, %v16596_v3  ;;  %v21078_v3 = vld [vmem:[#allocation135_spill] sm:$0xff] }
 0x315   :  { %v3427_v22 = vmax.f32 %v3299_v35, 0.0  ;;  %v3297_v20 = vadd.f32 %v16413_v60, %v3164_v33  ;;  %v3169_v58 = vadd.f32 %v13167_v1, %v2288_v15  ;;  %13409 = vmatprep.mubr.msk.bf16.mxu1 %vm1224_vm2, %v16626_v4  ;;  %v21074_v35 = vld [vmem:[#allocation132_spill] sm:$0xff]  ;;  %v16858_v4 = vpop.f32.mrf.mxu0  ;;  %v2304_v21 = vadd.f32 %v21078_v3, %v21077_v49 }
 0x316   :  { %v2848_v36 = vpop.f32.mrf.mxu1  ;;  %v2283_v32 = vadd.f32 %v21074_v35, %v21073_v34  ;;  %21076 = vst [vmem:[#allocation76_spill] sm:$0xff] %v16858_v4 }
 0x317   :  { %v16851_v56 = vpack.c.bf16 %v3427_v22, %v3426_v17  ;;  %v3425_v13 = vmax.f32 %v3297_v20, 0.0  ;;  %v3167_v16 = vadd.f32 %v2848_v36, %v2280_v45  ;;  %v3302_v15 = vadd.f32 %v16413_v60, %v3169_v58  ;;  %v21079_v22 = vld [vmem:[#allocation12_spill] sm:$0xff]  ;;  %v21080_v20 = vld [vmem:[#allocation138_spill] sm:$0xff]  ;;  %v16877_v35 = vpop.f32.mrf.mxu0 }
 0x318   :  { %v13168_v8 = vpop.f32.mrf.mxu1  ;;  %v2296_v36 = vadd.f32 %v21080_v20, %v21079_v22  ;;  %21083 = vst [vmem:[#allocation59_spill] sm:$0xff] %v16877_v35  ;;  %v21090_v35 = vld [vmem:[#allocation28_spill] sm:$0xff] }
 0x319   :  { %21072 = vst [vmem:[#allocation3_spill] sm:$0xff] %v16851_v56  ;;  %v16855_v33 = vpack.c.bf16 %v3425_v13, %v3424_v44  ;;  %v3170_v1 = vadd.f32 %v13168_v8, %v2291_v0  ;;  %v3300_v61 = vadd.f32 %v16413_v60, %v3167_v16  ;;  %v3430_v58 = vmax.f32 %v3302_v15, 0.0  ;;  %v21081_v16 = vld [vmem:[#allocation91_spill] sm:$0xff]  ;;  %v21082_v8 = vld [vmem:[#allocation141_spill] sm:$0xff] }
 0x31a   :  { %v2851_v14 = vpop.f32.mrf.mxu1  ;;  %v2307_v34 = vadd.f32 %v21082_v8, %v21081_v16  ;;  %v21085_v15 = vld [vmem:[#allocation93_spill] sm:$0xff]  ;;  %v21089_v8 = vld [vmem:[#allocation94_spill] sm:$0xff] }
 0x31b   :  { %21075 = vst [vmem:[#allocation58_spill] sm:$0xff] %v16855_v33  ;;  %v3303_v17 = vadd.f32 %v16413_v60, %v3170_v1  ;;  %v3168_v45 = vadd.f32 %v2851_v14, %v2283_v32  ;;  %13297 = vmatprep.mubr.msk.bf16.mxu0 %vm1224_vm2, %v16855_v33  ;;  %v3428_v1 = vmax.f32 %v3300_v61, 0.0  ;;  %v2320_v4 = vadd.f32 %v21090_v35, %v21089_v8 }
 0x31c   :  { %v13171_v44 = vpop.f32.mrf.mxu1  ;;  %13298 = vmatmul.mubr.msk.bf16.gmra.mxu0 %vm1224_vm2, %v16851_v56  ;;  %13410 = vmatmul.mubr.msk.bf16.gmra.mxu1 %vm1224_vm2, %v16622_v59 }
 0x31d   :  { %v3431_v3 = vmax.f32 %v3303_v17, 0.0  ;;  %v3301_v0 = vadd.f32 %v16413_v60, %v3168_v45  ;;  %v3173_v13 = vadd.f32 %v13171_v44, %v2304_v21  ;;  %13413 = vmatprep.mubr.msk.bf16.mxu1 %vm1224_vm2, %v16653_v57  ;;  %v21086_v17 = vld [vmem:[#allocation144_spill] sm:$0xff]  ;;  %v16886_v57 = vpop.f32.mrf.mxu0 }
 0x31e   :  { %v2864_v32 = vpop.f32.mrf.mxu1  ;;  %v2299_v59 = vadd.f32 %v21086_v17, %v21085_v15  ;;  %21088 = vst [vmem:[#allocation80_spill] sm:$0xff] %v16886_v57 }
 0x31f   :  { %v16879_v14 = vpack.c.bf16 %v3431_v3, %v3430_v58  ;;  %v3429_v49 = vmax.f32 %v3301_v0, 0.0  ;;  %v3171_v22 = vadd.f32 %v2864_v32, %v2296_v36  ;;  %v3306_v21 = vadd.f32 %v16413_v60, %v3173_v13  ;;  %v21091_v3 = vld [vmem:[#allocation14_spill] sm:$0xff]  ;;  %v21092_v0 = vld [vmem:[#allocation148_spill] sm:$0xff]  ;;  %v16905_v15 = vpop.f32.mrf.mxu0 }
 0x320   :  { %v13172_v20 = vpop.f32.mrf.mxu1  ;;  %v2312_v32 = vadd.f32 %v21092_v0, %v21091_v3  ;;  %21095 = vst [vmem:[#allocation61_spill] sm:$0xff] %v16905_v15  ;;  %v21101_v15 = vld [vmem:[#allocation32_spill] sm:$0xff] }
 0x321   :  { %21084 = vst [vmem:[#allocation5_spill] sm:$0xff] %v16879_v14  ;;  %v16883_v45 = vpack.c.bf16 %v3429_v49, %v3428_v1  ;;  %v3174_v44 = vadd.f32 %v13172_v20, %v2307_v34  ;;  %v3304_v61 = vadd.f32 %v16413_v60, %v3171_v22  ;;  %v3434_v13 = vmax.f32 %v3306_v21, 0.0  ;;  %v21094_v22 = vld [vmem:[#allocation151_spill] sm:$0xff]  ;;  %v21097_v21 = vld [vmem:[#allocation97_spill] sm:$0xff] }
 0x322   :  { %v2867_v16 = vpop.f32.mrf.mxu1 }
 0x323   :  { %21087 = vst [vmem:[#allocation60_spill] sm:$0xff] %v16883_v45  ;;  %v3307_v58 = vadd.f32 %v16413_v60, %v3174_v44  ;;  %v3172_v36 = vadd.f32 %v2867_v16, %v2299_v59  ;;  %13301 = vmatprep.mubr.msk.bf16.mxu0 %vm1224_vm2, %v16883_v45  ;;  %v21093_v59 = vld [vmem:[#allocation95_spill] sm:$0xff]  ;;  %v3432_v44 = vmax.f32 %v3304_v61, 0.0  ;;  %v16921_v61 = vld [vmem:[%s20588_s4 + $0x1] ss:$0 sm:$0xff] }
 0x324   :  { %v13175_v1 = vpop.f32.mrf.mxu1  ;;  %13302 = vmatmul.mubr.msk.bf16.gmra.mxu0 %vm1224_vm2, %v16879_v14  ;;  %13414 = vmatmul.mubr.msk.bf16.gmra.mxu1 %vm1224_vm2, %v16649_v5  ;;  %v2323_v20 = vadd.f32 %v21094_v22, %v21093_v59  ;;  %v21100_v22 = vld [vmem:[#allocation98_spill] sm:$0xff] }
 0x325   :  { %v3435_v34 = vmax.f32 %v3307_v58, 0.0  ;;  %v3305_v35 = vadd.f32 %v16413_v60, %v3172_v36  ;;  %v3177_v49 = vadd.f32 %v13175_v1, %v2320_v4  ;;  %13417 = vmatprep.mubr.msk.bf16.mxu1 %vm1224_vm2, %v16681_v39  ;;  %v21098_v58 = vld [vmem:[#allocation154_spill] sm:$0xff]  ;;  %v16914_v39 = vpop.f32.mrf.mxu0  ;;  %v2336_v57 = vadd.f32 %v21101_v15, %v21100_v22 }
 0x326   :  { %v2880_v17 = vpop.f32.mrf.mxu1  ;;  %v2315_v5 = vadd.f32 %v21098_v58, %v21097_v21 }
 0x327   :  { %v16907_v16 = vpack.c.bf16 %v3435_v34, %v3434_v13  ;;  %v3433_v8 = vmax.f32 %v3305_v35, 0.0  ;;  %v3175_v3 = vadd.f32 %v2880_v17, %v2312_v32  ;;  %v3310_v4 = vadd.f32 %v16413_v60, %v3177_v49  ;;  %v21102_v60 = vld [vmem:[#allocation16_spill] sm:$0xff]  ;;  %v21103_v35 = vld [vmem:[#allocation30_spill] sm:$0xff] }
 0x328   :  { %v13176_v0 = vpop.f32.mrf.mxu1  ;;  %v2328_v49 = vadd.f32 %v21103_v35, %v21102_v60 }
 0x329   :  { %21096 = vst [vmem:[#allocation7_spill] sm:$0xff] %v16907_v16  ;;  %v16911_v36 = vpack.c.bf16 %v3433_v8, %v3432_v44  ;;  %v3178_v1 = vadd.f32 %v13176_v0, %v2323_v20  ;;  %v3308_v32 = vadd.f32 %v16921_v61, %v3175_v3  ;;  %v3438_v15 = vmax.f32 %v3310_v4, 0.0  ;;  %v16938_v0 = vpop.f32.mrf.mxu0  ;;  %v21106_v4 = vld [vmem:[#allocation101_spill] sm:$0xff] }
 0x32a   :  { %v2883_v59 = vpop.f32.mrf.mxu1 }
 0x32b   :  { %21099 = vst [vmem:[#allocation62_spill] sm:$0xff] %v16911_v36  ;;  %v3311_v13 = vadd.f32 %v16921_v61, %v3178_v1  ;;  %v3176_v34 = vadd.f32 %v2883_v59, %v2315_v5  ;;  %13305 = vmatprep.mubr.msk.bf16.mxu0 %vm1224_vm2, %v16911_v36  ;;  %v21104_v5 = vld [vmem:[#allocation99_spill] sm:$0xff]  ;;  %v3436_v58 = vmax.f32 %v3308_v32, 0.0 }
 0x32c   :  { %v13179_v20 = vpop.f32.mrf.mxu1  ;;  %13306 = vmatmul.mubr.msk.bf16.gmra.mxu0 %vm1224_vm2, %v16907_v16  ;;  %13418 = vmatmul.mubr.msk.bf16.gmra.mxu1 %vm1224_vm2, %v16677_v53  ;;  %v2339_v3 = vadd.f32 %v16429_v41, %v21104_v5  ;;  %v21108_v5 = vld [vmem:[#allocation102_spill] sm:$0xff] }
 0x32d   :  { %v3439_v17 = vmax.f32 %v3311_v13, 0.0  ;;  %v3309_v44 = vadd.f32 %v16921_v61, %v3176_v34  ;;  %v3181_v8 = vadd.f32 %v13179_v20, %v2336_v57  ;;  %13421 = vmatprep.mubr.msk.bf16.mxu1 %vm1224_vm2, %v16712_v51  ;;  %v2331_v13 = vadd.f32 %v16438_v54, %v21106_v4  ;;  %v16947_v20 = vpop.f32.mrf.mxu0  ;;  %v14514_v54 = vld [vmem:[%s20587_s3 + $0xf0] sm:$0xff]  }
 0x32e   :  { %v2896_v21 = vpop.f32.mrf.mxu1  ;;  %v2352_v51 = vadd.f32 %v16457_v23, %v21108_v5  ;;  %13639 = vmatprep.subr.bf16.mxu1 %v14514_v54  ;;  %v21112_v5 = vld [vmem:[#allocation105_spill] sm:$0xff] }
 0x32f   :  { %v16940_v1 = vpack.c.bf16 %v3439_v17, %v3438_v15  ;;  %v3437_v59 = vmax.f32 %v3309_v44, 0.0  ;;  %v3179_v22 = vadd.f32 %v2896_v21, %v2328_v49  ;;  %v3314_v57 = vadd.f32 %v16921_v61, %v3181_v8  ;;  %v21109_v17 = vld [vmem:[#allocation18_spill] sm:$0xff]  ;;  %13640 = vmatpush3.bf16.msra.mxu1 %v14514_v54 }
 0x330   :  { %v13180_v60 = vpop.f32.mrf.mxu1  ;;  %v2344_v44 = vadd.f32 %v16469_v50, %v21109_v17  ;;  %v16969_v50 = vpop.f32.mrf.mxu0 }
 0x331   :  { %21105 = vst [vmem:[#allocation84_spill] sm:$0xff] %v16940_v1  ;;  %v16944_v34 = vpack.c.bf16 %v3437_v59, %v3436_v58  ;;  %v3182_v35 = vadd.f32 %v13180_v60, %v2339_v3  ;;  %v3312_v32 = vadd.f32 %v16921_v61, %v3179_v22  ;;  %v3442_v23 = vmax.f32 %v3314_v57, 0.0  ;;  %v21110_v59 = vld [vmem:[#allocation103_spill] sm:$0xff] }
 0x332   :  { %v2899_v41 = vpop.f32.mrf.mxu1  ;;  %v2355_v22 = vadd.f32 %v16484_v52, %v21110_v59  ;;  %v21114_v59 = vld [vmem:[#allocation106_spill] sm:$0xff] }
 0x333   :  { %21107 = vst [vmem:[#allocation63_spill] sm:$0xff] %v16944_v34  ;;  %v3315_v15 = vadd.f32 %v16921_v61, %v3182_v35  ;;  %v3180_v49 = vadd.f32 %v2899_v41, %v2331_v13  ;;  %13309 = vmatprep.mubr.msk.bf16.mxu0 %vm1224_vm2, %v16944_v34  ;;  %v3440_v4 = vmax.f32 %v3312_v32, 0.0  ;;  %v2368_v54 = vadd.f32 %v16513_v55, %v21114_v59 }
 0x334   :  { %v13183_v8 = vpop.f32.mrf.mxu1  ;;  %13310 = vmatmul.mubr.msk.bf16.gmra.mxu0 %vm1224_vm2, %v16940_v1  ;;  %13422 = vmatmul.mubr.msk.bf16.gmra.mxu1 %vm1224_vm2, %v16708_v27 }
 0x335   :  { %v3443_v3 = vmax.f32 %v3315_v15, 0.0  ;;  %v3313_v21 = vadd.f32 %v16921_v61, %v3180_v49  ;;  %v3185_v58 = vadd.f32 %v13183_v8, %v2352_v51  ;;  %13425 = vmatprep.mubr.msk.bf16.mxu1 %vm1224_vm2, %v16740_v25  ;;  %v2347_v51 = vadd.f32 %v16493_v62, %v21112_v5  ;;  %v16978_v8 = vpop.f32.mrf.mxu0  ;;  %v21115_v62 = vld [vmem:[#allocation20_spill] sm:$0xff] }
 0x336   :  { %v2912_v60 = vpop.f32.mrf.mxu1 }
 0x337   :  { %v16971_v13 = vpack.c.bf16 %v3443_v3, %v3442_v23  ;;  %v3441_v35 = vmax.f32 %v3313_v21, 0.0  ;;  %v3183_v57 = vadd.f32 %v2912_v60, %v2344_v44  ;;  %v3318_v49 = vadd.f32 %v16921_v61, %v3185_v58 }
 0x338   :  { %v13184_v41 = vpop.f32.mrf.mxu1  ;;  %v2360_v3 = vadd.f32 %v16522_v31, %v21115_v62 }
 0x339   :  { %21111 = vst [vmem:[#allocation9_spill] sm:$0xff] %v16971_v13  ;;  %v16975_v15 = vpack.c.bf16 %v3441_v35, %v3440_v4  ;;  %v3186_v17 = vadd.f32 %v13184_v41, %v2355_v22  ;;  %v3316_v32 = vadd.f32 %v16921_v61, %v3183_v57  ;;  %v3446_v58 = vmax.f32 %v3318_v49, 0.0  ;;  %v21116_v4 = vld [vmem:[#allocation107_spill] sm:$0xff]  ;;  %v16997_v57 = vpop.f32.mrf.mxu0  ;;  %v21117_v49 = vld [vmem:[#allocation109_spill] sm:$0xff] }
 0x33a   :  { %v2915_v52 = vpop.f32.mrf.mxu1  ;;  %v2371_v35 = vadd.f32 %v16541_v9, %v21116_v4  ;;  %v2363_v59 = vadd.f32 %v16550_v28, %v21117_v49  ;;  %v21120_v28 = vld [vmem:[#allocation22_spill] sm:$0xff] }
 0x33b   :  { %21113 = vst [vmem:[#allocation65_spill] sm:$0xff] %v16975_v15  ;;  %v3319_v23 = vadd.f32 %v16921_v61, %v3186_v17  ;;  %v3184_v44 = vadd.f32 %v2915_v52, %v2347_v51  ;;  %13313 = vmatprep.mubr.msk.bf16.mxu0 %vm1224_vm2, %v16975_v15  ;;  %v3444_v41 = vmax.f32 %v3316_v32, 0.0  ;;  %v17006_v62 = vpop.f32.mrf.mxu0 }
 0x33c   :  { %v13187_v21 = vpop.f32.mrf.mxu1  ;;  %13314 = vmatmul.mubr.msk.bf16.gmra.mxu0 %vm1224_vm2, %v16971_v13  ;;  %13426 = vmatmul.mubr.msk.bf16.gmra.mxu1 %vm1224_vm2, %v16736_v19 }
 0x33d   :  { %v3447_v55 = vmax.f32 %v3319_v23, 0.0  ;;  %v3317_v22 = vadd.f32 %v16921_v61, %v3184_v44  ;;  %v3189_v60 = vadd.f32 %v13187_v21, %v2368_v54  ;;  %13429 = vmatprep.mubr.msk.bf16.mxu1 %vm1224_vm2, %v16771_v29  ;;  %v21119_v21 = vld [vmem:[#allocation110_spill] sm:$0xff] }
 0x33e   :  { %v2928_v31 = vpop.f32.mrf.mxu1  ;;  %v2384_v4 = vadd.f32 %v16568_v48, %v21119_v21  ;;  %v21153_v29 = vld [vmem:[#allocation134_spill] sm:$0xff] }
 0x33f   :  { %v16999_v5 = vpack.c.bf16 %v3447_v55, %v3446_v58  ;;  %v3445_v51 = vmax.f32 %v3317_v22, 0.0  ;;  %v3187_v17 = vadd.f32 %v2928_v31, %v2360_v3  ;;  %v3322_v54 = vadd.f32 %v16921_v61, %v3189_v60 }
 0x340   :  { %v13188_v52 = vpop.f32.mrf.mxu1  ;;  %v2376_v55 = vadd.f32 %v16577_v26, %v21120_v28 }
 0x341   :  { %v17003_v23 = vpack.c.bf16 %v3445_v51, %v3444_v41  ;;  %v3190_v44 = vadd.f32 %v13188_v52, %v2371_v35  ;;  %v3320_v32 = vadd.f32 %v16921_v61, %v3187_v17  ;;  %v3450_v60 = vmax.f32 %v3322_v54, 0.0  ;;  %v21121_v41 = vld [vmem:[#allocation111_spill] sm:$0xff]  ;;  %v17025_v17 = vpop.f32.mrf.mxu0  ;;  %v21122_v54 = vld [vmem:[#allocation113_spill] sm:$0xff] }
 0x342   :  { %v2931_v9 = vpop.f32.mrf.mxu1  ;;  %v2387_v51 = vadd.f32 %v16594_v10, %v21121_v41  ;;  %v2379_v21 = vadd.f32 %v16603_v11, %v21122_v54  ;;  %v21124_v11 = vld [vmem:[#allocation24_spill] sm:$0xff] }
 0x343   :  { %21118 = vst [vmem:[#allocation88_spill] sm:$0xff] %v17003_v23  ;;  %v3323_v58 = vadd.f32 %v16921_v61, %v3190_v44  ;;  %v3188_v3 = vadd.f32 %v2931_v9, %v2363_v59  ;;  %13317 = vmatprep.mubr.msk.bf16.mxu0 %vm1224_vm2, %v17003_v23  ;;  %v3448_v52 = vmax.f32 %v3320_v32, 0.0  ;;  %v17034_v28 = vpop.f32.mrf.mxu0 }
 0x344   :  { %v13191_v22 = vpop.f32.mrf.mxu1  ;;  %13318 = vmatmul.mubr.msk.bf16.gmra.mxu0 %vm1224_vm2, %v16999_v5  ;;  %13430 = vmatmul.mubr.msk.bf16.gmra.mxu1 %vm1224_vm2, %v16767_v42 }
 0x345   :  { %v3451_v48 = vmax.f32 %v3323_v58, 0.0  ;;  %v3321_v35 = vadd.f32 %v16921_v61, %v3188_v3  ;;  %v3193_v31 = vadd.f32 %v13191_v22, %v2384_v4  ;;  %13433 = vmatprep.mubr.msk.bf16.mxu1 %vm1224_vm2, %v16799_v43  ;;  %v21123_v22 = vld [vmem:[#allocation114_spill] sm:$0xff] }
 0x346   :  { %v2944_v26 = vpop.f32.mrf.mxu1  ;;  %v2400_v41 = vadd.f32 %v16620_v6, %v21123_v22 }
 0x347   :  { %v17027_v49 = vpack.c.bf16 %v3451_v48, %v3450_v60  ;;  %v3449_v59 = vmax.f32 %v3321_v35, 0.0  ;;  %v3191_v44 = vadd.f32 %v2944_v26, %v2376_v55  ;;  %v3326_v4 = vadd.f32 %v16921_v61, %v3193_v31 }
 0x348   :  { %v13192_v9 = vpop.f32.mrf.mxu1  ;;  %v2392_v48 = vadd.f32 %v16629_v46, %v21124_v11 }
 0x349   :  { %v17031_v58 = vpack.c.bf16 %v3449_v59, %v3448_v52  ;;  %v3194_v3 = vadd.f32 %v13192_v9, %v2387_v51  ;;  %v3324_v32 = vadd.f32 %v16921_v61, %v3191_v44  ;;  %v3454_v31 = vmax.f32 %v3326_v4, 0.0  ;;  %v21125_v52 = vld [vmem:[#allocation115_spill] sm:$0xff]  ;;  %v17053_v44 = vpop.f32.mrf.mxu0  ;;  %v21126_v4 = vld [vmem:[#allocation117_spill] sm:$0xff] }
 0x34a   :  { %v2947_v10 = vpop.f32.mrf.mxu1  ;;  %v2403_v59 = vadd.f32 %v16647_v2, %v21125_v52  ;;  %v2395_v22 = vadd.f32 %v16656_v37, %v21126_v4  ;;  %v21128_v37 = vld [vmem:[#allocation25_spill] sm:$0xff] }
 0x34b   :  { %v3327_v60 = vadd.f32 %v16921_v61, %v3194_v3  ;;  %v3192_v55 = vadd.f32 %v2947_v10, %v2379_v21  ;;  %13321 = vmatprep.mubr.msk.bf16.mxu0 %vm1224_vm2, %v17031_v58  ;;  %v3452_v9 = vmax.f32 %v3324_v32, 0.0  ;;  %v17062_v11 = vpop.f32.mrf.mxu0 }
 0x34c   :  { %v13195_v35 = vpop.f32.mrf.mxu1  ;;  %13322 = vmatmul.mubr.msk.bf16.gmra.mxu0 %vm1224_vm2, %v17027_v49  ;;  %13434 = vmatmul.mubr.msk.bf16.gmra.mxu1 %vm1224_vm2, %v16795_v30 }
 0x34d   :  { %v3455_v6 = vmax.f32 %v3327_v60, 0.0  ;;  %v3325_v51 = vadd.f32 %v16921_v61, %v3192_v55  ;;  %v3197_v26 = vadd.f32 %v13195_v35, %v2400_v41  ;;  %13437 = vmatprep.mubr.msk.bf16.mxu1 %vm1224_vm2, %v16827_v24  ;;  %v21127_v35 = vld [vmem:[#allocation118_spill] sm:$0xff]  ;;  %v17081_v4 = vpop.f32.mrf.mxu0 }
 0x34e   :  { %v2960_v46 = vpop.f32.mrf.mxu1  ;;  %v2416_v52 = vadd.f32 %v16675_v40, %v21127_v35  ;;  %v21135_v24 = vld [vmem:[#allocation50_spill] sm:$0xff] }
 0x34f   :  { %v17055_v54 = vpack.c.bf16 %v3455_v6, %v3454_v31  ;;  %v3453_v21 = vmax.f32 %v3325_v51, 0.0  ;;  %v3195_v3 = vadd.f32 %v2960_v46, %v2392_v48  ;;  %v3330_v41 = vadd.f32 %v16921_v61, %v3197_v26  ;;  %v21129_v6 = vld [vmem:[#allocation46_spill] sm:$0xff] }
 0x350   :  { %v13196_v10 = vpop.f32.mrf.mxu1  ;;  %v2408_v51 = vadd.f32 %v21129_v6, %v21128_v37 }
 0x351   :  { %v17059_v60 = vpack.c.bf16 %v3453_v21, %v3452_v9  ;;  %v3198_v55 = vadd.f32 %v13196_v10, %v2403_v59  ;;  %v3328_v32 = vadd.f32 %v16921_v61, %v3195_v3  ;;  %v3458_v26 = vmax.f32 %v3330_v41, 0.0  ;;  %v21130_v21 = vld [vmem:[#allocation26_spill] sm:$0xff]  ;;  %v21131_v3 = vld [vmem:[#allocation47_spill] sm:$0xff]  ;;  %v21132_v41 = vld [vmem:[#allocation120_spill] sm:$0xff] }
 0x352   :  { %v2963_v2 = vpop.f32.mrf.mxu1  ;;  %v2419_v10 = vadd.f32 %v21131_v3, %v21130_v21  ;;  %v21134_v3 = vld [vmem:[#allocation121_spill] sm:$0xff] }
 0x353   :  { %v3331_v31 = vadd.f32 %v16921_v61, %v3198_v55  ;;  %v3196_v48 = vadd.f32 %v2963_v2, %v2395_v22  ;;  %13325 = vmatprep.mubr.msk.bf16.mxu0 %vm1224_vm2, %v17059_v60  ;;  %v3456_v55 = vmax.f32 %v3328_v32, 0.0  ;;  %v2432_v30 = vadd.f32 %v21135_v24, %v21134_v3 }
 0x354   :  { %v13199_v46 = vpop.f32.mrf.mxu1  ;;  %13326 = vmatmul.mubr.msk.bf16.gmra.mxu0 %vm1224_vm2, %v17055_v54  ;;  %13438 = vmatmul.mubr.msk.bf16.gmra.mxu1 %vm1224_vm2, %v16823_v47 }
 0x355   :  { %v3459_v40 = vmax.f32 %v3331_v31, 0.0  ;;  %v3329_v59 = vadd.f32 %v16921_v61, %v3196_v48  ;;  %v3201_v9 = vadd.f32 %v13199_v46, %v2416_v52  ;;  %13441 = vmatprep.mubr.msk.bf16.mxu1 %vm1224_vm2, %v16855_v33  ;;  %v21133_v31 = vld [vmem:[#allocation57_spill] sm:$0xff]  ;;  %v17090_v33 = vpop.f32.mrf.mxu0 }
 0x356   :  { %v2976_v22 = vpop.f32.mrf.mxu1  ;;  %v2411_v47 = vadd.f32 %v21133_v31, %v21132_v41 }
 0x357   :  { %v17083_v2 = vpack.c.bf16 %v3459_v40, %v3458_v26  ;;  %v3457_v35 = vmax.f32 %v3329_v59, 0.0  ;;  %v3199_v37 = vadd.f32 %v2976_v22, %v2408_v51  ;;  %v3334_v52 = vadd.f32 %v16921_v61, %v3201_v9  ;;  %v21136_v40 = vld [vmem:[#allocation27_spill] sm:$0xff]  ;;  %v21137_v59 = vld [vmem:[#allocation52_spill] sm:$0xff]  ;;  %v17109_v41 = vpop.f32.mrf.mxu0 }
 0x358   :  { %v13200_v6 = vpop.f32.mrf.mxu1  ;;  %v2424_v22 = vadd.f32 %v21137_v59, %v21136_v40 }
 0x359   :  { %v17087_v48 = vpack.c.bf16 %v3457_v35, %v3456_v55  ;;  %v3202_v46 = vadd.f32 %v13200_v6, %v2419_v10  ;;  %v3332_v32 = vadd.f32 %v16921_v61, %v3199_v37  ;;  %v3462_v9 = vmax.f32 %v3334_v52, 0.0  ;;  %v21139_v37 = vld [vmem:[#allocation64_spill] sm:$0xff]  ;;  %v21140_v52 = vld [vmem:[#allocation123_spill] sm:$0xff] }
 0x35a   :  { %v2979_v21 = vpop.f32.mrf.mxu1 }
 0x35b   :  { %v3335_v26 = vadd.f32 %v16921_v61, %v3202_v46  ;;  %v3200_v51 = vadd.f32 %v2979_v21, %v2411_v47  ;;  %13329 = vmatprep.mubr.msk.bf16.mxu0 %vm1224_vm2, %v17087_v48  ;;  %v21138_v47 = vld [vmem:[#allocation122_spill] sm:$0xff]  ;;  %v3460_v46 = vmax.f32 %v3332_v32, 0.0 }
 0x35c   :  { %v13203_v55 = vpop.f32.mrf.mxu1  ;;  %13330 = vmatmul.mubr.msk.bf16.gmra.mxu0 %vm1224_vm2, %v17083_v2  ;;  %13442 = vmatmul.mubr.msk.bf16.gmra.mxu1 %vm1224_vm2, %v16851_v56  ;;  %v2435_v6 = vadd.f32 %v21139_v37, %v21138_v47  ;;  %v21141_v37 = vld [vmem:[#allocation124_spill] sm:$0xff]  ;;  %v21142_v56 = vld [vmem:[#allocation54_spill] sm:$0xff] }
 0x35d   :  { %v3463_v24 = vmax.f32 %v3335_v26, 0.0  ;;  %v3333_v10 = vadd.f32 %v16921_v61, %v3200_v51  ;;  %v3205_v35 = vadd.f32 %v13203_v55, %v2432_v30  ;;  %13445 = vmatprep.mubr.msk.bf16.mxu1 %vm1224_vm2, %v16883_v45  ;;  %v2427_v26 = vadd.f32 %v16774_v7, %v21140_v52  ;;  %v17118_v45 = vpop.f32.mrf.mxu0  ;;  %v21143_v7 = vld [vmem:[#allocation125_spill] sm:$0xff] }
 0x35e   :  { %v2992_v31 = vpop.f32.mrf.mxu1  ;;  %v2448_v43 = vadd.f32 %v21142_v56, %v21141_v37 }
 0x35f   :  { %v17111_v21 = vpack.c.bf16 %v3463_v24, %v3462_v9  ;;  %v3461_v3 = vmax.f32 %v3333_v10, 0.0  ;;  %v3203_v40 = vadd.f32 %v2992_v31, %v2424_v22  ;;  %v3338_v30 = vadd.f32 %v16921_v61, %v3205_v35 }
 0x360   :  { %v13204_v59 = vpop.f32.mrf.mxu1  ;;  %v2440_v24 = vadd.f32 %v16802_v12, %v21143_v7 }
 0x361   :  { %v17115_v51 = vpack.c.bf16 %v3461_v3, %v3460_v46  ;;  %v3206_v55 = vadd.f32 %v13204_v59, %v2435_v6  ;;  %v3336_v32 = vadd.f32 %v16921_v61, %v3203_v40  ;;  %v3466_v56 = vmax.f32 %v3338_v30, 0.0  ;;  %v21144_v3 = vld [vmem:[#allocation126_spill] sm:$0xff] }
 0x362   :  { %v2995_v47 = vpop.f32.mrf.mxu1  ;;  %v2451_v12 = vadd.f32 %v16821_v63, %v21144_v3 }
 0x363   :  { %v3339_v9 = vadd.f32 %v16921_v61, %v3206_v55  ;;  %v3204_v22 = vadd.f32 %v2995_v47, %v2427_v26  ;;  %13333 = vmatprep.mubr.msk.bf16.mxu0 %vm1224_vm2, %v17115_v51  ;;  %v3464_v52 = vmax.f32 %v3336_v32, 0.0 }
 0x364   :  { %v13207_v10 = vpop.f32.mrf.mxu1  ;;  %v17128_v35 = vpop.f32.mrf.mxu0  ;;  %13334 = vmatmul.mubr.msk.bf16.gmra.mxu0 %vm1224_vm2, %v17111_v21  ;;  %13446 = vmatmul.mubr.msk.bf16.gmra.mxu1 %vm1224_vm2, %v16879_v14 }
 0x365   :  { %v3467_v6 = vmax.f32 %v3339_v9, 0.0  ;;  %v3337_v31 = vadd.f32 %v16921_v61, %v3204_v22  ;;  %v3209_v46 = vadd.f32 %v13207_v10, %v2448_v43  ;;  %13449 = vmatprep.mubr.msk.bf16.mxu1 %vm1224_vm2, %v16911_v36  ;;  %v21145_v9 = vld [vmem:[#allocation127_spill] sm:$0xff]  ;;  %v21146_v36 = vld [vmem:[#allocation128_spill] sm:$0xff] }
 0x366   :  { %v3008_v40 = vpop.f32.mrf.mxu1  ;;  %v17139_v59 = vpop.f32.mrf.mxu0  ;;  %v2443_v43 = vadd.f32 %v16830_v18, %v21145_v9  ;;  %v2464_v32 = vadd.f32 %v16849_v38, %v21146_v36  ;;  %v21147_v18 = vld [vmem:[#allocation130_spill] sm:$0xff] }
 0x367   :  { %v17141_v26 = vpack.c.bf16 %v3467_v6, %v3466_v56  ;;  %v3465_v55 = vmax.f32 %v3337_v31, 0.0  ;;  %v3207_v47 = vadd.f32 %v3008_v40, %v2440_v24  ;;  %v3342_v7 = vadd.f32 %v16921_v61, %v3209_v46  ;;  %v21148_v31 = vld [vmem:[#allocation76_spill] sm:$0xff] }
 0x368   :  { %v13208_v37 = vpop.f32.mrf.mxu1  ;;  %v17143_v30 = vpop.f32.mrf.mxu0  ;;  %v2456_v40 = vadd.f32 %v21148_v31, %v21147_v18 }
 0x369   :  { %v17147_v22 = vpack.c.bf16 %v3465_v55, %v3464_v52  ;;  %v3210_v10 = vadd.f32 %v13208_v37, %v2451_v12  ;;  %v3340_v56 = vadd.f32 %v16921_v61, %v3207_v47  ;;  %v3470_v38 = vmax.f32 %v3342_v7, 0.0  ;;  %v21149_v47 = vld [vmem:[#allocation131_spill] sm:$0xff] }
 0x36a   :  { %v3011_v63 = vpop.f32.mrf.mxu1  ;;  %v17150_v3 = vpop.f32.mrf.mxu0  ;;  %v21150_v37 = vld [vmem:[#allocation59_spill] sm:$0xff] }
 0x36b   :  { %v3343_v24 = vadd.f32 %v16921_v61, %v3210_v10  ;;  %v3208_v6 = vadd.f32 %v3011_v63, %v2443_v43  ;;  %13337 = vmatprep.mubr.msk.bf16.mxu0 %vm1224_vm2, %v17147_v22  ;;  %v2467_v9 = vadd.f32 %v21150_v37, %v21149_v47  ;;  %v3468_v63 = vmax.f32 %v3340_v56, 0.0  ;;  %v21154_v56 = vld [vmem:[#allocation61_spill] sm:$0xff] }
 0x36c   :  { %v13211_v52 = vpop.f32.mrf.mxu1  ;;  %v17160_v46 = vpop.f32.mrf.mxu0  ;;  %13338 = vmatmul.mubr.msk.bf16.gmra.mxu0 %vm1224_vm2, %v17141_v26  ;;  %13450 = vmatmul.mubr.msk.bf16.gmra.mxu1 %vm1224_vm2, %v16907_v16 }
 0x36d   :  { %v3471_v36 = vmax.f32 %v3343_v24, 0.0  ;;  %v3341_v12 = vadd.f32 %v16921_v61, %v3208_v6  ;;  %v3213_v55 = vadd.f32 %v13211_v52, %v2464_v32  ;;  %13453 = vmatprep.mubr.msk.bf16.mxu1 %vm1224_vm2, %v16944_v34  ;;  %v21151_v24 = vld [vmem:[#allocation133_spill] sm:$0xff]  ;;  %v21152_v6 = vld [vmem:[#allocation80_spill] sm:$0xff] }
 0x36e   :  { %v3024_v43 = vpop.f32.mrf.mxu1  ;;  %v17171_v10 = vpop.f32.mrf.mxu0  ;;  %v2459_v32 = vadd.f32 %v21152_v6, %v21151_v24  ;;  %v21156_v24 = vld [vmem:[#allocation137_spill] sm:$0xff] }
 0x36f   :  { %v17173_v18 = vpack.c.bf16 %v3471_v36, %v3470_v38  ;;  %v3469_v31 = vmax.f32 %v3341_v12, 0.0  ;;  %v3211_v14 = vadd.f32 %v3024_v43, %v2456_v40  ;;  %v3346_v34 = vadd.f32 %v16921_v61, %v3213_v55  ;;  %v14515_v43 = vld [vmem:[%s20587_s3 + $0xe8] sm:$0xff]   ;;  %v21155_v55 = vld [vmem:[#allocation136_spill] sm:$0xff] }
 0x370   :  { %v13212_v16 = vpop.f32.mrf.mxu1  ;;  %v17175_v7 = vpop.f32.mrf.mxu0  ;;  %v2480_v38 = vadd.f32 %v21154_v56, %v21153_v29  ;;  %13641 = vmatprep.subr.bf16.mxu1 %v14515_v43 }
 0x371   :  { %v17179_v52 = vpack.c.bf16 %v3469_v31, %v3468_v63  ;;  %v3214_v42 = vadd.f32 %v13212_v16, %v2467_v9  ;;  %v3344_v36 = vadd.f32 %v16921_v61, %v3211_v14  ;;  %v2472_v16 = vadd.f32 %v16914_v39, %v21155_v55  ;;  %13642 = vmatpush3.bf16.msra.mxu1 %v14515_v43  ;;  %v21158_v43 = vld [vmem:[#allocation140_spill] sm:$0xff] }
 0x372   :  { %v3027_v47 = vpop.f32.mrf.mxu1  ;;  %v17182_v37 = vpop.f32.mrf.mxu0  ;;  %v2483_v39 = vadd.f32 %v16938_v0, %v21156_v24 }
 0x373   :  { %v3347_v40 = vadd.f32 %v16921_v61, %v3214_v42  ;;  %v3212_v12 = vadd.f32 %v3027_v47, %v2459_v32  ;;  %13341 = vmatprep.mubr.msk.bf16.mxu0 %vm1224_vm2, %v17179_v52  ;;  %v3474_v42 = vmax.f32 %v3346_v34, 0.0  ;;  %v3472_v47 = vmax.f32 %v3344_v36, 0.0 }
 0x374   :  { %v13215_v9 = vpop.f32.mrf.mxu1  ;;  %v17195_v63 = vpop.f32.mrf.mxu0  ;;  %13342 = vmatmul.mubr.msk.bf16.gmra.mxu0 %vm1224_vm2, %v17173_v18  ;;  %13454 = vmatmul.mubr.msk.bf16.gmra.mxu1 %vm1224_vm2, %v16940_v1  ;;  %v2496_v36 = vadd.f32 %v16969_v50, %v21158_v43 }
 0x375   :  { %v3475_v29 = vmax.f32 %v3347_v40, 0.0  ;;  %v3345_v14 = vadd.f32 %v16921_v61, %v3212_v12  ;;  %v3217_v31 = vadd.f32 %v13215_v9, %v2480_v38  ;;  %13457 = vmatprep.mubr.msk.bf16.mxu1 %vm1224_vm2, %v16975_v15  ;;  %v21157_v38 = vld [vmem:[#allocation139_spill] sm:$0xff] }
 0x376   :  { %v3040_v6 = vpop.f32.mrf.mxu1  ;;  %v17206_v32 = vpop.f32.mrf.mxu0  ;;  %v2475_v12 = vadd.f32 %v16947_v20, %v21157_v38  ;;  %v21159_v20 = vld [vmem:[#allocation142_spill] sm:$0xff] }
 0x377   :  { %v17208_v56 = vpack.c.bf16 %v3475_v29, %v3474_v42  ;;  %v3473_v55 = vmax.f32 %v3345_v14, 0.0  ;;  %v3215_v34 = vadd.f32 %v3040_v6, %v2472_v16  ;;  %v3350_v15 = vadd.f32 %v16921_v61, %v3217_v31 }
 0x378   :  { %v13216_v40 = vpop.f32.mrf.mxu1  ;;  %v17210_v1 = vpop.f32.mrf.mxu0  ;;  %v2488_v14 = vadd.f32 %v16978_v8, %v21159_v20 }
 0x379   :  { %v17214_v9 = vpack.c.bf16 %v3473_v55, %v3472_v47  ;;  %v3218_v0 = vadd.f32 %v13216_v40, %v2483_v39  ;;  %v3348_v42 = vadd.f32 %v16921_v61, %v3215_v34  ;;  %v3478_v50 = vmax.f32 %v3350_v15, 0.0  ;;  %v21160_v34 = vld [vmem:[#allocation143_spill] sm:$0xff] }
 0x37a   :  { %v3043_v24 = vpop.f32.mrf.mxu1  ;;  %v17217_v19 = vpop.f32.mrf.mxu0  ;;  %v2499_v8 = vadd.f32 %v16997_v57, %v21160_v34 }
 0x37b   :  { %v3351_v16 = vadd.f32 %v16921_v61, %v3218_v0  ;;  %v3216_v29 = vadd.f32 %v3043_v24, %v2475_v12  ;;  %13345 = vmatprep.mubr.msk.bf16.mxu0 %vm1224_vm2, %v17214_v9  ;;  %v3476_v12 = vmax.f32 %v3348_v42, 0.0 }
 0x37c   :  { %v13219_v6 = vpop.f32.mrf.mxu1  ;;  %v17227_v31 = vpop.f32.mrf.mxu0  ;;  %13346 = vmatmul.mubr.msk.bf16.gmra.mxu0 %vm1224_vm2, %v17208_v56  ;;  %13458 = vmatmul.mubr.msk.bf16.gmra.mxu1 %vm1224_vm2, %v16971_v13  ;;  %v21162_v13 = vld [vmem:[#allocation146_spill] sm:$0xff] }
 0x37d   :  { %v3479_v39 = vmax.f32 %v3351_v16, 0.0  ;;  %v3349_v47 = vadd.f32 %v16921_v61, %v3216_v29  ;;  %v3221_v55 = vadd.f32 %v13219_v6, %v2496_v36  ;;  %13461 = vmatprep.mubr.msk.bf16.mxu1 %vm1224_vm2, %v17003_v23  ;;  %v21161_v16 = vld [vmem:[#allocation145_spill] sm:$0xff]  ;;  %v2512_v42 = vadd.f32 %v17025_v17, %v21162_v13 }
 0x37e   :  { %v3056_v40 = vpop.f32.mrf.mxu1  ;;  %v17238_v38 = vpop.f32.mrf.mxu0  ;;  %v2491_v36 = vadd.f32 %v17006_v62, %v21161_v16  ;;  %v21163_v62 = vld [vmem:[#allocation29_spill] sm:$0xff] }
 0x37f   :  { %v17240_v0 = vpack.c.bf16 %v3479_v39, %v3478_v50  ;;  %v3477_v24 = vmax.f32 %v3349_v47, 0.0  ;;  %v3219_v43 = vadd.f32 %v3056_v40, %v2488_v14  ;;  %v3354_v6 = vadd.f32 %v16921_v61, %v3221_v55 }
 0x380   :  { %v13220_v20 = vpop.f32.mrf.mxu1  ;;  %v17242_v15 = vpop.f32.mrf.mxu0  ;;  %v2504_v47 = vadd.f32 %v17034_v28, %v21163_v62 }
 0x381   :  { %v17246_v29 = vpack.c.bf16 %v3477_v24, %v3476_v12  ;;  %v3222_v23 = vadd.f32 %v13220_v20, %v2499_v8  ;;  %v3352_v50 = vadd.f32 %v16921_v61, %v3219_v43  ;;  %v3482_v13 = vmax.f32 %v3354_v6, 0.0  ;;  %v21165_v12 = vld [vmem:[#allocation147_spill] sm:$0xff] }
 0x382   :  { %v3059_v57 = vpop.f32.mrf.mxu1  ;;  %v17249_v34 = vpop.f32.mrf.mxu0  ;;  %v2515_v28 = vadd.f32 %v17053_v44, %v21165_v12 }
 0x383   :  { %v3355_v14 = vadd.f32 %v16921_v61, %v3222_v23  ;;  %v3220_v39 = vadd.f32 %v3059_v57, %v2491_v36  ;;  %13349 = vmatprep.mubr.msk.bf16.mxu0 %vm1224_vm2, %v17246_v29  ;;  %v3480_v20 = vmax.f32 %v3352_v50, 0.0 }
 0x384   :  { %v13223_v40 = vpop.f32.mrf.mxu1  ;;  %v17259_v55 = vpop.f32.mrf.mxu0  ;;  %13350 = vmatmul.mubr.msk.bf16.gmra.mxu0 %vm1224_vm2, %v17240_v0  ;;  %13462 = vmatmul.mubr.msk.bf16.gmra.mxu1 %vm1224_vm2, %v16999_v5 }
 0x385   :  { %21164 = vst [vmem:[#allocation66_spill] sm:$0xff] %v17259_v55  ;;  %v3483_v17 = vmax.f32 %v3355_v14, 0.0  ;;  %v3353_v23 = vadd.f32 %v16921_v61, %v3220_v39  ;;  %v3225_v8 = vadd.f32 %v13223_v40, %v2512_v42  ;;  %13465 = vmatprep.mubr.msk.bf16.mxu1 %vm1224_vm2, %v17031_v58  ;;  %v21167_v14 = vld [vmem:[#allocation149_spill] sm:$0xff] }
 0x386   :  { %v3072_v24 = vpop.f32.mrf.mxu1  ;;  %v17270_v43 = vpop.f32.mrf.mxu0  ;;  %v2507_v42 = vadd.f32 %v17062_v11, %v21167_v14  ;;  %v21169_v11 = vld [vmem:[#allocation152_spill] sm:$0xff] }
 0x387   :  { %21166 = vst [vmem:[#allocation11_spill] sm:$0xff] %v17270_v43  ;;  %v17272_v16 = vpack.c.bf16 %v3483_v17, %v3482_v13  ;;  %v3481_v36 = vmax.f32 %v3353_v23, 0.0  ;;  %v3223_v57 = vadd.f32 %v3072_v24, %v2504_v47  ;;  %v3358_v40 = vadd.f32 %v16921_v61, %v3225_v8  ;;  %v21168_v43 = vld [vmem:[#allocation150_spill] sm:$0xff] }
 0x388   :  { %v13224_v62 = vpop.f32.mrf.mxu1  ;;  %v17274_v6 = vpop.f32.mrf.mxu0  ;;  %v2528_v50 = vadd.f32 %v17081_v4, %v21168_v43  ;;  %v2520_v23 = vadd.f32 %v17090_v33, %v21169_v11 }
 0x389   :  { %v17278_v39 = vpack.c.bf16 %v3481_v36, %v3480_v20  ;;  %v3226_v55 = vadd.f32 %v13224_v62, %v2515_v28  ;;  %v3356_v13 = vadd.f32 %v16921_v61, %v3223_v57  ;;  %v3486_v4 = vmax.f32 %v3358_v40, 0.0  ;;  %v21171_v20 = vld [vmem:[#allocation153_spill] sm:$0xff] }
 0x38a   :  { %v3075_v44 = vpop.f32.mrf.mxu1  ;;  %v17281_v12 = vpop.f32.mrf.mxu0  ;;  %v2531_v33 = vadd.f32 %v17109_v41, %v21171_v20 }
 0x38b   :  { %v3359_v47 = vadd.f32 %v16921_v61, %v3226_v55  ;;  %v3224_v17 = vadd.f32 %v3075_v44, %v2507_v42  ;;  %13353 = vmatprep.mubr.msk.bf16.mxu0 %vm1224_vm2, %v17278_v39  ;;  %v3484_v62 = vmax.f32 %v3356_v13, 0.0 }
 0x38c   :  { %v13227_v24 = vpop.f32.mrf.mxu1  ;;  %v17291_v8 = vpop.f32.mrf.mxu0  ;;  %13354 = vmatmul.mubr.msk.bf16.gmra.mxu0 %vm1224_vm2, %v17272_v16  ;;  %13466 = vmatmul.mubr.msk.bf16.gmra.mxu1 %vm1224_vm2, %v17027_v49 }
 0x38d   :  { %21170 = vst [vmem:[#allocation68_spill] sm:$0xff] %v17291_v8  ;;  %v3487_v28 = vmax.f32 %v3359_v47, 0.0  ;;  %v3357_v55 = vadd.f32 %v16921_v61, %v3224_v17  ;;  %v3229_v43 = vadd.f32 %v13227_v24, %v2528_v50  ;;  %13469 = vmatprep.mubr.msk.bf16.mxu1 %vm1224_vm2, %v17059_v60  ;;  %v21172_v47 = vld [vmem:[#allocation155_spill] sm:$0xff] }
 0x38e   :  { %v3088_v36 = vpop.f32.mrf.mxu1  ;;  %v17302_v57 = vpop.f32.mrf.mxu0  ;;  %v2523_v50 = vadd.f32 %v17118_v45, %v21172_v47 }
 0x38f   :  { %v17304_v14 = vpack.c.bf16 %v3487_v28, %v3486_v4  ;;  %v3485_v42 = vmax.f32 %v3357_v55, 0.0  ;;  %v3227_v44 = vadd.f32 %v3088_v36, %v2520_v23  ;;  %v3362_v24 = vadd.f32 %v16921_v61, %v3229_v43 }
 0x390   :  { %v13228_v11 = vpop.f32.mrf.mxu1  ;;  %v17306_v40 = vpop.f32.mrf.mxu0 }
 0x391   :  { %v17310_v17 = vpack.c.bf16 %v3485_v42, %v3484_v62  ;;  %v3230_v8 = vadd.f32 %v13228_v11, %v2531_v33  ;;  %v3360_v13 = vadd.f32 %v16921_v61, %v3227_v44  ;;  %v3490_v55 = vmax.f32 %v3362_v24, 0.0 }
 0x392   :  { %v3091_v41 = vpop.f32.mrf.mxu1  ;;  %v17313_v20 = vpop.f32.mrf.mxu0 }
 0x393   :  { %v3363_v4 = vadd.f32 %v16921_v61, %v3230_v8  ;;  %v3228_v28 = vadd.f32 %v3091_v41, %v2523_v50  ;;  %13357 = vmatprep.mubr.msk.bf16.mxu0 %vm1224_vm2, %v17310_v17  ;;  %v3488_v42 = vmax.f32 %v3360_v13, 0.0 }
 0x394   :  { %v17319_v23 = vpop.f32.mrf.mxu0  ;;  %13358 = vmatmul.mubr.msk.bf16.gmra.mxu0 %vm1224_vm2, %v17304_v14  ;;  %v13375_v45 = vpop.f32.mrf.mxu1  ;;  %13470 = vmatmul.mubr.msk.bf16.gmra.mxu1 %vm1224_vm2, %v17055_v54 }
 0x395   :  { %21173 = vst [vmem:[#allocation92_spill] sm:$0xff] %v17319_v23  ;;  %v3491_v43 = vmax.f32 %v3363_v4, 0.0  ;;  %v3361_v33 = vadd.f32 %v16921_v61, %v3228_v28  ;;  %v17327_v36 = vadd.f32 %v13375_v45, %v17128_v35  ;;  %13473 = vmatprep.mubr.msk.bf16.mxu1 %vm1224_vm2, %v17087_v48 }
 0x396   :  { %v17331_v8 = vpop.f32.mrf.mxu0  ;;  %v4402_v62 = vpop.f32.mrf.mxu1 }
 0x397   :  { %21174 = vst [vmem:[#allocation69_spill] sm:$0xff] %v17331_v8  ;;  %v17333_v44 = vpack.c.bf16 %v3491_v43, %v3490_v55  ;;  %v3489_v11 = vmax.f32 %v3361_v33, 0.0  ;;  %v17336_v47 = vadd.f32 %v4402_v62, %v17139_v59 }
 0x398   :  { %v17338_v50 = vpop.f32.mrf.mxu0  ;;  %v13376_v24 = vpop.f32.mrf.mxu1 }
 0x399   :  { %21175 = vst [vmem:[#allocation13_spill] sm:$0xff] %v17338_v50  ;;  %v17340_v61 = vpack.c.bf16 %v3489_v11, %v3488_v42  ;;  %v17343_v35 = vadd.f32 %v13376_v24, %v17143_v30 }
 0x39a   :  { %v17345_v41 = vpop.f32.mrf.mxu0  ;;  %v4405_v4 = vpop.f32.mrf.mxu1 }
 0x39b   :  { %21176 = vst [vmem:[#allocation70_spill] sm:$0xff] %v17345_v41  ;;  %v17348_v28 = vadd.f32 %v4405_v4, %v17150_v3  ;;  %13361 = vmatprep.mubr.msk.bf16.mxu0 %vm1224_vm2, %v17340_v61  ;;  %v21178_v3 = vld [vmem:[#allocation33_spill] sm:$0xff] }
 0x39c   :  { %v17352_v13 = vpop.f32.mrf.mxu0  ;;  %13362 = vmatmul.mubr.msk.bf16.gmra.mxu0 %vm1224_vm2, %v17333_v44  ;;  %v13379_v59 = vpop.f32.mrf.mxu1  ;;  %13474 = vmatmul.mubr.msk.bf16.gmra.mxu1 %vm1224_vm2, %v17083_v2 }
 0x39d   :  { %21177 = vst [vmem:[#allocation96_spill] sm:$0xff] %v17352_v13  ;;  %v17359_v30 = vadd.f32 %v13379_v59, %v17160_v46  ;;  %13477 = vmatprep.mubr.msk.bf16.mxu1 %vm1224_vm2, %v17115_v51  ;;  %13509 = vmatprep.mubr.msk.bf16.mxu0 %vm1224_vm2, %v21178_v3 }
 0x39e   :  { %v17365_v45 = vpop.f32.mrf.mxu0  ;;  %v4418_v55 = vpop.f32.mrf.mxu1 }
 0x39f   :  { %21179 = vst [vmem:[#allocation71_spill] sm:$0xff] %v17365_v45  ;;  %v17368_v43 = vadd.f32 %v4418_v55, %v17171_v10  ;;  %v21183_v10 = vld [vmem:[#allocation31_spill] sm:$0xff] }
 0x3a0   :  { %v17370_v33 = vpop.f32.mrf.mxu0  ;;  %v13380_v62 = vpop.f32.mrf.mxu1 }
 0x3a1   :  { %21180 = vst [vmem:[#allocation15_spill] sm:$0xff] %v17370_v33  ;;  %v17373_v42 = vadd.f32 %v13380_v62, %v17175_v7  ;;  %v21184_v7 = vld [vmem:[#allocation35_spill] sm:$0xff] }
 0x3a2   :  { %v17375_v46 = vpop.f32.mrf.mxu0  ;;  %v4421_v11 = vpop.f32.mrf.mxu1 }
 0x3a3   :  { %21181 = vst [vmem:[#allocation73_spill] sm:$0xff] %v17375_v46  ;;  %v17378_v24 = vadd.f32 %v4421_v11, %v17182_v37 }
 0x3a4   :  { %v17380_v4 = vpop.f32.mrf.mxu0  ;;  %v13383_v59 = vpop.f32.mrf.mxu1  ;;  %13478 = vmatmul.mubr.msk.bf16.gmra.mxu1 %vm1224_vm2, %v17111_v21  ;;  %13510 = vmatmul.mubr.msk.bf16.vlgmr.msra.gmra.mxu0 %vm1224_vm2, %v21183_v10 }
 0x3a5   :  { %21182 = vst [vmem:[#allocation100_spill] sm:$0xff] %v17380_v4  ;;  %v17387_v3 = vadd.f32 %v13383_v59, %v17195_v63  ;;  %13481 = vmatprep.mubr.msk.bf16.mxu1 %vm1224_vm2, %v17147_v22  ;;  %13513 = vmatprep.mubr.msk.bf16.mxu0 %vm1224_vm2, %v21184_v7 }
 0x3a6   :  { %v17393_v37 = vpop.f32.mrf.mxu0  ;;  %v4434_v55 = vpop.f32.mrf.mxu1 }
 0x3a7   :  { %21185 = vst [vmem:[#allocation74_spill] sm:$0xff] %v17393_v37  ;;  %v17396_v62 = vadd.f32 %v4434_v55, %v17206_v32  ;;  %v21189_v32 = vld [vmem:[#allocation34_spill] sm:$0xff] }
 0x3a8   :  { %v17398_v11 = vpop.f32.mrf.mxu0  ;;  %v13384_v4 = vpop.f32.mrf.mxu1 }
 0x3a9   :  { %21186 = vst [vmem:[#allocation17_spill] sm:$0xff] %v17398_v11  ;;  %v17401_v10 = vadd.f32 %v13384_v4, %v17210_v1  ;;  %v21190_v1 = vld [vmem:[#allocation37_spill] sm:$0xff] }
 0x3aa   :  { %v17403_v63 = vpop.f32.mrf.mxu0  ;;  %v4437_v59 = vpop.f32.mrf.mxu1 }
 0x3ab   :  { %21187 = vst [vmem:[#allocation4_spill] sm:$0xff] %v17403_v63  ;;  %v17406_v46 = vadd.f32 %v4437_v59, %v17217_v19 }
 0x3ac   :  { %v17408_v33 = vpop.f32.mrf.mxu0  ;;  %v13387_v7 = vpop.f32.mrf.mxu1  ;;  %13482 = vmatmul.mubr.msk.bf16.gmra.mxu1 %vm1224_vm2, %v17141_v26  ;;  %13514 = vmatmul.mubr.msk.bf16.gmra.mxu0 %vm1224_vm2, %v21189_v32 }
 0x3ad   :  { %21188 = vst [vmem:[#allocation104_spill] sm:$0xff] %v17408_v33  ;;  %v17415_v55 = vadd.f32 %v13387_v7, %v17227_v31  ;;  %13485 = vmatprep.mubr.msk.bf16.mxu1 %vm1224_vm2, %v17179_v52  ;;  %13517 = vmatprep.mubr.msk.bf16.mxu0 %vm1224_vm2, %v21190_v1  ;;  %v14516_v1 = vld [vmem:[%s20587_s3 + $0xe0] sm:$0xff]  }
 0x3ae   :  { %v17421_v19 = vpop.f32.mrf.mxu0  ;;  %v4450_v4 = vpop.f32.mrf.mxu1  ;;  %13643 = vmatprep.subr.bf16.mxu1 %v14516_v1 }
 0x3af   :  { %21191 = vst [vmem:[#allocation75_spill] sm:$0xff] %v17421_v19  ;;  %v17424_v59 = vadd.f32 %v4450_v4, %v17238_v38  ;;  %v21195_v4 = vld [vmem:[#allocation36_spill] sm:$0xff]  ;;  %13644 = vmatpush3.bf16.msra.mxu1 %v14516_v1 }
 0x3b0   :  { %v17426_v33 = vpop.f32.mrf.mxu0  ;;  %v13388_v63 = vpop.f32.mrf.mxu1  ;;  %v21202_v1 = vld [vmem:[#allocation40_spill] sm:$0xff] }
 0x3b1   :  { %21192 = vst [vmem:[#allocation19_spill] sm:$0xff] %v17426_v33  ;;  %v17429_v32 = vadd.f32 %v13388_v63, %v17242_v15  ;;  %v21196_v15 = vld [vmem:[#allocation41_spill] sm:$0xff] }
 0x3b2   :  { %v17431_v31 = vpop.f32.mrf.mxu0  ;;  %v4453_v7 = vpop.f32.mrf.mxu1 }
 0x3b3   :  { %21193 = vst [vmem:[#allocation77_spill] sm:$0xff] %v17431_v31  ;;  %v17434_v11 = vadd.f32 %v4453_v7, %v17249_v34 }
 0x3b4   :  { %v17439_v19 = vpop.f32.mrf.mxu0  ;;  %v17441_v38 = vpop.f32.mrf.mxu1  ;;  %13486 = vmatmul.mubr.msk.bf16.gmra.mxu1 %vm1224_vm2, %v17173_v18  ;;  %13518 = vmatmul.mubr.msk.bf16.gmra.mxu0 %vm1224_vm2, %v21195_v4 }
 0x3b5   :  { %21194 = vst [vmem:[#allocation108_spill] sm:$0xff] %v17439_v19  ;;  %13489 = vmatprep.mubr.msk.bf16.mxu1 %vm1224_vm2, %v17214_v9  ;;  %13521 = vmatprep.mubr.msk.bf16.mxu0 %vm1224_vm2, %v21196_v15  ;;  %v21201_v15 = vld [vmem:[#allocation38_spill] sm:$0xff] }
 0x3b6   :  { %v17451_v34 = vpop.f32.mrf.mxu0  ;;  %v17453_v63 = vpop.f32.mrf.mxu1 }
 0x3b7   :  { %21197 = vst [vmem:[#allocation78_spill] sm:$0xff] %v17451_v34 }
 0x3b8   :  { %v17455_v7 = vpop.f32.mrf.mxu0  ;;  %v17457_v19 = vpop.f32.mrf.mxu1 }
 0x3b9   :  { %21198 = vst [vmem:[#allocation21_spill] sm:$0xff] %v17455_v7 }
 0x3ba   :  { %v17459_v31 = vpop.f32.mrf.mxu0  ;;  %v17461_v33 = vpop.f32.mrf.mxu1 }
 0x3bb   :  { %21199 = vst [vmem:[#allocation6_spill] sm:$0xff] %v17459_v31 }
 0x3bc   :  { %v17463_v4 = vpop.f32.mrf.mxu0  ;;  %v17465_v37 = vpop.f32.mrf.mxu1  ;;  %13490 = vmatmul.mubr.msk.bf16.gmra.mxu1 %vm1224_vm2, %v17208_v56  ;;  %13522 = vmatmul.mubr.msk.bf16.gmra.mxu0 %vm1224_vm2, %v21201_v15  ;;  %v14517_v15 = vld [vmem:[%s20587_s3 + $0xd8] sm:$0xff]  }
 0x3bd   :  { %21200 = vst [vmem:[#allocation112_spill] sm:$0xff] %v17463_v4  ;;  %13493 = vmatprep.mubr.msk.bf16.mxu1 %vm1224_vm2, %v17246_v29  ;;  %13525 = vmatprep.mubr.msk.bf16.mxu0 %vm1224_vm2, %v21202_v1  ;;  %v21209_v1 = vld [vmem:[#allocation39_spill] sm:$0xff] }
 0x3be   :  { %v17475_v7 = vpop.f32.mrf.mxu0  ;;  %v17477_v31 = vpop.f32.mrf.mxu1  ;;  %13773 = vmatprep.subr.bf16.mxu0 %v14517_v15 }
 0x3bf   :  { %21203 = vst [vmem:[#allocation79_spill] sm:$0xff] %v17475_v7  ;;  %13774 = vmatpush3.bf16.msra.mxu0 %v14517_v15 }
 0x3c0   :  { %v17479_v34 = vpop.f32.mrf.mxu0  ;;  %v17481_v4 = vpop.f32.mrf.mxu1 }
 0x3c1   :  { %21204 = vst [vmem:[#allocation23_spill] sm:$0xff] %v17479_v34 }
 0x3c2   :  { %v17483_v45 = vpop.f32.mrf.mxu0  ;;  %v17485_v13 = vpop.f32.mrf.mxu1 }
 0x3c3   :  { %21205 = vst [vmem:[#allocation81_spill] sm:$0xff] %v17483_v45  ;;  %21206 = vst [vmem:[#allocation116_spill] sm:$0xff] %v17485_v13  ;;  %v21210_v45 = vld [vmem:[#allocation43_spill] sm:$0xff] }
 0x3c4   :  { %v17490_v41 = vpop.f32.mrf.mxu0  ;;  %v17492_v50 = vpop.f32.mrf.mxu1  ;;  %13494 = vmatmul.mubr.msk.bf16.gmra.mxu1 %vm1224_vm2, %v17240_v0  ;;  %13526 = vmatmul.mubr.msk.bf16.gmra.mxu0 %vm1224_vm2, %v21209_v1 }
 0x3c5   :  { %21207 = vst [vmem:[#allocation82_spill] sm:$0xff] %v17490_v41  ;;  %21208 = vst [vmem:[#allocation8_spill] sm:$0xff] %v17492_v50  ;;  %13497 = vmatprep.mubr.msk.bf16.mxu1 %vm1224_vm2, %v17278_v39  ;;  %13529 = vmatprep.mubr.msk.bf16.mxu0 %vm1224_vm2, %v21210_v45  ;;  %v21219_v45 = vld [vmem:[#allocation42_spill] sm:$0xff] }
 0x3c6   :  { %v17502_v34 = vpop.f32.mrf.mxu0  ;;  %v17504_v7 = vpop.f32.mrf.mxu1 }
 0x3c7   :  { %21211 = vst [vmem:[#allocation119_spill] sm:$0xff] %v17502_v34  ;;  %21212 = vst [vmem:[#allocation83_spill] sm:$0xff] %v17504_v7  ;;  %v21220_v34 = vld [vmem:[#allocation45_spill] sm:$0xff] }
 0x3c8   :  { %v17506_v41 = vpop.f32.mrf.mxu0  ;;  %v17508_v8 = vpop.f32.mrf.mxu1 }
 0x3c9   :  { %21213 = vst [vmem:[#allocation85_spill] sm:$0xff] %v17506_v41  ;;  %21214 = vst [vmem:[#allocation86_spill] sm:$0xff] %v17508_v8 }
 0x3ca   :  { %v17510_v50 = vpop.f32.mrf.mxu0  ;;  %v17512_v23 = vpop.f32.mrf.mxu1 }
 0x3cb   :  { %21215 = vst [vmem:[#allocation10_spill] sm:$0xff] %v17510_v50  ;;  %21216 = vst [vmem:[#allocation87_spill] sm:$0xff] %v17512_v23 }
 0x3cc   :  { %v17514_v1 = vpop.f32.mrf.mxu0  ;;  %v17516_v13 = vpop.f32.mrf.mxu1  ;;  %13498 = vmatmul.mubr.msk.bf16.gmra.mxu1 %vm1224_vm2, %v17272_v16  ;;  %13530 = vmatmul.mubr.msk.bf16.gmra.mxu0 %vm1224_vm2, %v21219_v45  ;;  %v21229_v45 = vld [vmem:[#allocation44_spill] sm:$0xff] }
 0x3cd   :  { %21217 = vst [vmem:[#allocation129_spill] sm:$0xff] %v17514_v1  ;;  %21218 = vst [vmem:[#allocation89_spill] sm:$0xff] %v17516_v13  ;;  %13533 = vmatprep.mubr.msk.bf16.mxu0 %vm1224_vm2, %v21220_v34  ;;  %v21230_v34 = vld [vmem:[#allocation49_spill] sm:$0xff] }
 0x3ce   :  { %v17524_v15 = vpop.f32.mrf.mxu0  ;;  %v17526_v41 = vpop.f32.mrf.mxu1 }
 0x3cf   :  { %21221 = vst [vmem:[#allocation132_spill] sm:$0xff] %v17524_v15  ;;  %21222 = vst [vmem:[#allocation90_spill] sm:$0xff] %v17526_v41 }
 0x3d0   :  { %v17528_v50 = vpop.f32.mrf.mxu0  ;;  %v17530_v23 = vpop.f32.mrf.mxu1 }
 0x3d1   :  { %21223 = vst [vmem:[#allocation135_spill] sm:$0xff] %v17528_v50  ;;  %21224 = vst [vmem:[#allocation12_spill] sm:$0xff] %v17530_v23 }
 0x3d2   :  { %v17532_v1 = vpop.f32.mrf.mxu0  ;;  %v17534_v13 = vpop.f32.mrf.mxu1 }
 0x3d3   :  { %21225 = vst [vmem:[#allocation138_spill] sm:$0xff] %v17532_v1  ;;  %21226 = vst [vmem:[#allocation91_spill] sm:$0xff] %v17534_v13 }
 0x3d4   :  { %v17536_v8 = vpop.f32.mrf.mxu0  ;;  %v17538_v7 = vpop.f32.mrf.mxu1  ;;  %13534 = vmatmul.mubr.msk.bf16.gmra.mxu0 %vm1224_vm2, %v21229_v45  ;;  %v21238_v45 = vld [vmem:[#allocation48_spill] sm:$0xff] }
 0x3d5   :  { %21227 = vst [vmem:[#allocation141_spill] sm:$0xff] %v17536_v8  ;;  %21228 = vst [vmem:[#allocation93_spill] sm:$0xff] %v17538_v7  ;;  %13537 = vmatprep.mubr.msk.bf16.mxu0 %vm1224_vm2, %v21230_v34 }
 0x3d6   :  { %v17544_v15 = vpop.f32.mrf.mxu0  ;;  %v17546_v41 = vpop.f32.mrf.mxu1 }
 0x3d7   :  { %21231 = vst [vmem:[#allocation144_spill] sm:$0xff] %v17544_v15 }
 0x3d8   :  { %v17548_v50 = vpop.f32.mrf.mxu0  ;;  %v17550_v23 = vpop.f32.mrf.mxu1 }
 0x3d9   :  { %21232 = vst [vmem:[#allocation94_spill] sm:$0xff] %v17548_v50  ;;  %21233 = vst [vmem:[#allocation28_spill] sm:$0xff] %v17550_v23 }
 0x3da   :  { %v17552_v1 = vpop.f32.mrf.mxu0  ;;  %v17554_v13 = vpop.f32.mrf.mxu1 }
 0x3db   :  { %21234 = vst [vmem:[#allocation14_spill] sm:$0xff] %v17552_v1  ;;  %21235 = vst [vmem:[#allocation148_spill] sm:$0xff] %v17554_v13 }
 0x3dc   :  { %v17556_v8 = vpop.f32.mrf.mxu0  ;;  %v17558_v7 = vpop.f32.mrf.mxu1  ;;  %13538 = vmatmul.mubr.msk.bf16.gmra.mxu0 %vm1224_vm2, %v16677_v53 }
 0x3dd   :  { %21236 = vst [vmem:[#allocation95_spill] sm:$0xff] %v17556_v8  ;;  %21237 = vst [vmem:[#allocation151_spill] sm:$0xff] %v17558_v7  ;;  %13541 = vmatprep.mubr.msk.bf16.mxu0 %vm1224_vm2, %v21238_v45 }
 0x3de   :  { %v17564_v34 = vpop.f32.mrf.mxu0  ;;  %v17566_v15 = vpop.f32.mrf.mxu1 }
 0x3df   :  { %21239 = vst [vmem:[#allocation97_spill] sm:$0xff] %v17564_v34 }
 0x3e0   :  { %v17568_v50 = vpop.f32.mrf.mxu0  ;;  %v17570_v23 = vpop.f32.mrf.mxu1 }
 0x3e1   :  { %21240 = vst [vmem:[#allocation154_spill] sm:$0xff] %v17568_v50  ;;  %21241 = vst [vmem:[#allocation98_spill] sm:$0xff] %v17570_v23  ;;  %v21279_v23 = vld [vmem:[#allocation72_spill] sm:$0xff] }
 0x3e2   :  { %v17572_v1 = vpop.f32.mrf.mxu0  ;;  %v17574_v13 = vpop.f32.mrf.mxu1 }
 0x3e3   :  { %21242 = vst [vmem:[#allocation32_spill] sm:$0xff] %v17572_v1  ;;  %21243 = vst [vmem:[#allocation16_spill] sm:$0xff] %v17574_v13 }
 0x3e4   :  { %v17576_v8 = vpop.f32.mrf.mxu0  ;;  %v17578_v7 = vpop.f32.mrf.mxu1  ;;  %13542 = vmatmul.mubr.msk.bf16.gmra.mxu0 %vm1224_vm2, %v16708_v27  ;;  %v21254_v27 = vld [vmem:[#allocation51_spill] sm:$0xff] }
 0x3e5   :  { %21244 = vst [vmem:[#allocation30_spill] sm:$0xff] %v17576_v8  ;;  %21245 = vst [vmem:[#allocation99_spill] sm:$0xff] %v17578_v7  ;;  %13545 = vmatprep.mubr.msk.bf16.mxu0 %vm1224_vm2, %v16740_v25  ;;  %v21255_v25 = vld [vmem:[#allocation67_spill] sm:$0xff] }
 0x3e6   :  { %v17584_v53 = vpop.f32.mrf.mxu0  ;;  %v17586_v45 = vpop.f32.mrf.mxu1 }
 0x3e7   :  { %21246 = vst [vmem:[#allocation101_spill] sm:$0xff] %v17584_v53  ;;  %21247 = vst [vmem:[#allocation102_spill] sm:$0xff] %v17586_v45 }
 0x3e8   :  { %v17588_v50 = vpop.f32.mrf.mxu0  ;;  %v17590_v34 = vpop.f32.mrf.mxu1 }
 0x3e9   :  { %21248 = vst [vmem:[#allocation18_spill] sm:$0xff] %v17588_v50  ;;  %21249 = vst [vmem:[#allocation103_spill] sm:$0xff] %v17590_v34 }
 0x3ea   :  { %v17592_v1 = vpop.f32.mrf.mxu0  ;;  %v17594_v13 = vpop.f32.mrf.mxu1 }
 0x3eb   :  { %21250 = vst [vmem:[#allocation105_spill] sm:$0xff] %v17592_v1  ;;  %21251 = vst [vmem:[#allocation106_spill] sm:$0xff] %v17594_v13 }
 0x3ec   :  { %v17596_v8 = vpop.f32.mrf.mxu0  ;;  %v17598_v7 = vpop.f32.mrf.mxu1  ;;  %13546 = vmatmul.mubr.msk.bf16.gmra.mxu0 %vm1224_vm2, %v21254_v27  ;;  %v21264_v27 = vld [vmem:[#allocation55_spill] sm:$0xff] }
 0x3ed   :  { %21252 = vst [vmem:[#allocation20_spill] sm:$0xff] %v17596_v8  ;;  %21253 = vst [vmem:[#allocation107_spill] sm:$0xff] %v17598_v7  ;;  %13549 = vmatprep.mubr.msk.bf16.mxu0 %vm1224_vm2, %v21255_v25  ;;  %v21263_v7 = vld [vmem:[#allocation53_spill] sm:$0xff] }
 0x3ee   :  { %v17604_v53 = vpop.f32.mrf.mxu0  ;;  %v17606_v45 = vpop.f32.mrf.mxu1 }
 0x3ef   :  { %21256 = vst [vmem:[#allocation109_spill] sm:$0xff] %v17604_v53  ;;  %21257 = vst [vmem:[#allocation110_spill] sm:$0xff] %v17606_v45 }
 0x3f0   :  { %v17608_v50 = vpop.f32.mrf.mxu0  ;;  %v17610_v34 = vpop.f32.mrf.mxu1 }
 0x3f1   :  { %21258 = vst [vmem:[#allocation22_spill] sm:$0xff] %v17608_v50  ;;  %21259 = vst [vmem:[#allocation111_spill] sm:$0xff] %v17610_v34 }
 0x3f2   :  { %v17612_v1 = vpop.f32.mrf.mxu0  ;;  %v17614_v13 = vpop.f32.mrf.mxu1 }
 0x3f3   :  { %21260 = vst [vmem:[#allocation113_spill] sm:$0xff] %v17612_v1  ;;  %21261 = vst [vmem:[#allocation114_spill] sm:$0xff] %v17614_v13  ;;  %v17631_v1 = vld [vmem:[%s20587_s3 + $0x118] sm:$0xff]  }
 0x3f4   :  { %v17616_v8 = vpop.f32.mrf.mxu0  ;;  %13550 = vmatmul.mubr.msk.bf16.gmra.mxu0 %vm1224_vm2, %v21263_v7  ;;  %v17622_v25 = vpop.f32.mrf.mxu1  ;;  %13909 = vmatprep.subr.bf16.mxu1 %v17631_v1 }
 0x3f5   :  { %21262 = vst [vmem:[#allocation24_spill] sm:$0xff] %v17616_v8  ;;  %13553 = vmatprep.mubr.msk.bf16.mxu0 %vm1224_vm2, %v21264_v27  ;;  %21265 = vst [vmem:[#allocation115_spill] sm:$0xff] %v17622_v25  ;;  %v21271_v27 = vld [vmem:[#allocation2_spill] sm:$0xff]  ;;  %v21272_v25 = vld [vmem:[#allocation56_spill] sm:$0xff] }
 0x3f6   :  { %v17624_v53 = vpop.f32.mrf.mxu0  ;;  %v17633_v50 = vpop.f32.mrf.mxu1 }
 0x3f7   :  { %21266 = vst [vmem:[#allocation117_spill] sm:$0xff] %v17624_v53  ;;  %21268 = vst [vmem:[#allocation25_spill] sm:$0xff] %v17633_v50 }
 0x3f8   :  { %v17626_v45 = vpop.f32.mrf.mxu0 }
 0x3f9   :  { %21267 = vst [vmem:[#allocation118_spill] sm:$0xff] %v17626_v45  ;;  %v17644_v45 = vpop.f32.mrf.mxu1 }
 0x3fa   :  { %v17635_v8 = vpop.f32.mrf.mxu0  ;;  %21273 = vst [vmem:[#allocation47_spill] sm:$0xff] %v17644_v45 }
 0x3fb   :  { %21269 = vst [vmem:[#allocation46_spill] sm:$0xff] %v17635_v8  ;;  %v17650_v34 = vpop.f32.mrf.mxu1 }
 0x3fc   :  { %v17638_v7 = vpop.f32.mrf.mxu0  ;;  %13554 = vmatmul.mubr.msk.bf16.gmra.mxu0 %vm1224_vm2, %v21271_v27  ;;  %21276 = vst [vmem:[#allocation121_spill] sm:$0xff] %v17650_v34 }
 0x3fd   :  { %21270 = vst [vmem:[#allocation26_spill] sm:$0xff] %v17638_v7  ;;  %13557 = vmatprep.mubr.msk.bf16.mxu0 %vm1224_vm2, %v21272_v25  ;;  %v21280_v7 = vld [vmem:[#allocation58_spill] sm:$0xff]  ;;  %v17660_v27 = vpop.f32.mrf.mxu1 }
 0x3fe   :  { %v17646_v53 = vpop.f32.mrf.mxu0  ;;  %21281 = vst [vmem:[#allocation52_spill] sm:$0xff] %v17660_v27 }
 0x3ff   :  { %21274 = vst [vmem:[#allocation120_spill] sm:$0xff] %v17646_v53  ;;  %v17669_v53 = vpop.f32.mrf.mxu1 }
 0x400   :  { %v17648_v13 = vpop.f32.mrf.mxu0  ;;  %21284 = vst [vmem:[#allocation123_spill] sm:$0xff] %v17669_v53 }
 0x401   :  { %21275 = vst [vmem:[#allocation57_spill] sm:$0xff] %v17648_v13  ;;  %v14519_v13 = vld [vmem:[%s20587_s3 + $0xd0] sm:$0xff]  }
 0x402   :  { %v17652_v50 = vpop.f32.mrf.mxu0  ;;  %13775 = vmatprep.subr.bf16.mxu0 %v14519_v13 }
 0x403   :  { %21277 = vst [vmem:[#allocation50_spill] sm:$0xff] %v17652_v50  ;;  %13776 = vmatpush3.bf16.msra.mxu0 %v14519_v13 }
 0x404   :  { %v17654_v8 = vpop.f32.mrf.mxu0  ;;  %13558 = vmatmul.mubr.msk.bf16.gmra.mxu0 %vm1224_vm2, %v21279_v23  ;;  %v21287_v23 = vld [vmem:[#allocation3_spill] sm:$0xff] }
 0x405   :  { %21278 = vst [vmem:[#allocation27_spill] sm:$0xff] %v17654_v8  ;;  %13561 = vmatprep.mubr.msk.bf16.mxu0 %vm1224_vm2, %v21280_v7  ;;  %v21288_v7 = vld [vmem:[#allocation60_spill] sm:$0xff] }
 0x406   :  { %v17662_v25 = vpop.f32.mrf.mxu0 }
 0x407   :  { %21282 = vst [vmem:[#allocation122_spill] sm:$0xff] %v17662_v25  ;;  %v17679_v25 = vpop.f32.mrf.mxu1 }
 0x408   :  { %v17664_v45 = vpop.f32.mrf.mxu0  ;;  %21289 = vst [vmem:[#allocation125_spill] sm:$0xff] %v17679_v25 }
 0x409   :  { %21283 = vst [vmem:[#allocation64_spill] sm:$0xff] %v17664_v45  ;;  %v17685_v34 = vpop.f32.mrf.mxu1 }
 0x40a   :  { %v17671_v50 = vpop.f32.mrf.mxu0  ;;  %21292 = vst [vmem:[#allocation128_spill] sm:$0xff] %v17685_v34 }
 0x40b   :  { %21285 = vst [vmem:[#allocation124_spill] sm:$0xff] %v17671_v50 }
 0x40c   :  { %v17673_v8 = vpop.f32.mrf.mxu0  ;;  %13562 = vmatmul.mubr.msk.bf16.gmra.mxu0 %vm1224_vm2, %v21287_v23  ;;  %v21296_v23 = vld [vmem:[#allocation62_spill] sm:$0xff] }
 0x40d   :  { %21286 = vst [vmem:[#allocation54_spill] sm:$0xff] %v17673_v8  ;;  %13565 = vmatprep.mubr.msk.bf16.mxu0 %vm1224_vm2, %v21288_v7  ;;  %v21295_v8 = vld [vmem:[#allocation5_spill] sm:$0xff]  ;;  %v17695_v7 = vpop.f32.mrf.mxu1 }
 0x40e   :  { %v17681_v45 = vpop.f32.mrf.mxu0  ;;  %21297 = vst [vmem:[#allocation131_spill] sm:$0xff] %v17695_v7 }
 0x40f   :  { %21290 = vst [vmem:[#allocation126_spill] sm:$0xff] %v17681_v45  ;;  %v17701_v45 = vpop.f32.mrf.mxu1 }
 0x410   :  { %v17683_v27 = vpop.f32.mrf.mxu0  ;;  %21300 = vst [vmem:[#allocation80_spill] sm:$0xff] %v17701_v45 }
 0x411   :  { %21291 = vst [vmem:[#allocation127_spill] sm:$0xff] %v17683_v27 }
 0x412   :  { %v17687_v53 = vpop.f32.mrf.mxu0 }
 0x413   :  { %21293 = vst [vmem:[#allocation130_spill] sm:$0xff] %v17687_v53 }
 0x414   :  { %v17689_v50 = vpop.f32.mrf.mxu0  ;;  %13566 = vmatmul.mubr.msk.bf16.gmra.mxu0 %vm1224_vm2, %v21295_v8  ;;  %v21303_v8 = vld [vmem:[#allocation7_spill] sm:$0xff] }
 0x415   :  { %21294 = vst [vmem:[#allocation76_spill] sm:$0xff] %v17689_v50  ;;  %13569 = vmatprep.mubr.msk.bf16.mxu0 %vm1224_vm2, %v21296_v23  ;;  %v14520_v50 = vld [vmem:[%s20587_s3 + $0xc8] sm:$0xff]  }
 0x416   :  { %v17697_v13 = vpop.f32.mrf.mxu0  ;;  %v21304_v23 = vld [vmem:[#allocation63_spill] sm:$0xff]  ;;  %13777 = vmatprep.subr.bf16.mxu0 %v14520_v50 }
 0x417   :  { %21298 = vst [vmem:[#allocation59_spill] sm:$0xff] %v17697_v13  ;;  %v17714_v13 = vpop.f32.mrf.mxu1  ;;  %13778 = vmatpush3.bf16.msra.mxu0 %v14520_v50 }
 0x418   :  { %v17699_v25 = vpop.f32.mrf.mxu0  ;;  %21305 = vst [vmem:[#allocation136_spill] sm:$0xff] %v17714_v13  ;;  %v21312_v13 = vld [vmem:[#allocation65_spill] sm:$0xff] }
 0x419   :  { %21299 = vst [vmem:[#allocation133_spill] sm:$0xff] %v17699_v25 }
 0x41a   :  { %v17703_v27 = vpop.f32.mrf.mxu0 }
 0x41b   :  { %21301 = vst [vmem:[#allocation134_spill] sm:$0xff] %v17703_v27  ;;  %v14521_v27 = vld [vmem:[%s20587_s3 + $0xc0] sm:$0xff]  }
 0x41c   :  { %v17708_v53 = vpop.f32.mrf.mxu0  ;;  %13570 = vmatmul.mubr.msk.bf16.gmra.mxu0 %vm1224_vm2, %v21303_v8  ;;  %13779 = vmatprep.subr.bf16.mxu0 %v14521_v27 }
 0x41d   :  { %21302 = vst [vmem:[#allocation61_spill] sm:$0xff] %v17708_v53  ;;  %13573 = vmatprep.mubr.msk.bf16.mxu0 %vm1224_vm2, %v21304_v23  ;;  %v17723_v53 = vpop.f32.mrf.mxu1  ;;  %13780 = vmatpush3.bf16.msra.mxu0 %v14521_v27  ;;  %v21311_v23 = vld [vmem:[#allocation84_spill] sm:$0xff]  ;;  %v21319_v27 = vld [vmem:[#allocation9_spill] sm:$0xff] }
 0x41e   :  { %v17716_v25 = vpop.f32.mrf.mxu0  ;;  %21308 = vst [vmem:[#allocation140_spill] sm:$0xff] %v17723_v53 }
 0x41f   :  { %21306 = vst [vmem:[#allocation137_spill] sm:$0xff] %v17716_v25  ;;  %v17733_v50 = vpop.f32.mrf.mxu1 }
 0x420   :  { %v17721_v45 = vpop.f32.mrf.mxu0  ;;  %21313 = vst [vmem:[#allocation145_spill] sm:$0xff] %v17733_v50 }
 0x421   :  { %21307 = vst [vmem:[#allocation139_spill] sm:$0xff] %v17721_v45  ;;  %v17739_v45 = vpop.f32.mrf.mxu1 }
 0x422   :  { %v17725_v7 = vpop.f32.mrf.mxu0  ;;  %21316 = vst [vmem:[#allocation147_spill] sm:$0xff] %v17739_v45 }
 0x423   :  { %21309 = vst [vmem:[#allocation142_spill] sm:$0xff] %v17725_v7 }
 0x424   :  { %v17727_v8 = vpop.f32.mrf.mxu0  ;;  %13574 = vmatmul.mubr.msk.bf16.gmra.mxu0 %vm1224_vm2, %v21311_v23  ;;  %v17749_v23 = vpop.f32.mrf.mxu1 }
 0x425   :  { %21310 = vst [vmem:[#allocation143_spill] sm:$0xff] %v17727_v8  ;;  %13577 = vmatprep.mubr.msk.bf16.mxu0 %vm1224_vm2, %v21312_v13  ;;  %v21320_v8 = vld [vmem:[#allocation88_spill] sm:$0xff] }
 0x426   :  { %v17735_v25 = vpop.f32.mrf.mxu0 }
 0x427   :  { %21314 = vst [vmem:[#allocation146_spill] sm:$0xff] %v17735_v25  ;;  %v17755_v25 = vpop.f32.mrf.mxu1 }
 0x428   :  { %v17737_v34 = vpop.f32.mrf.mxu0 }
 0x429   :  { %21315 = vst [vmem:[#allocation29_spill] sm:$0xff] %v17737_v34 }
 0x42a   :  { %v17741_v53 = vpop.f32.mrf.mxu0 }
 0x42b   :  { %21317 = vst [vmem:[#allocation149_spill] sm:$0xff] %v17741_v53 }
 0x42c   :  { %v17743_v7 = vpop.f32.mrf.mxu0  ;;  %13578 = vmatmul.mubr.msk.bf16.gmra.mxu0 %vm1224_vm2, %v21319_v27  ;;  %v17765_v27 = vpop.f32.mrf.mxu1 }
 0x42d   :  { %21318 = vst [vmem:[#allocation150_spill] sm:$0xff] %v17743_v7  ;;  %13581 = vmatprep.mubr.msk.bf16.mxu0 %vm1224_vm2, %v21320_v8 }
 0x42e   :  { %v17751_v13 = vpop.f32.mrf.mxu0 }
 0x42f   :  { %21321 = vst [vmem:[#allocation152_spill] sm:$0xff] %v17751_v13  ;;  %v17771_v13 = vpop.f32.mrf.mxu1 }
 0x430   :  { %v17753_v50 = vpop.f32.mrf.mxu0 }
 0x431   :  { %21322 = vst [vmem:[#allocation153_spill] sm:$0xff] %v17753_v50 }
 0x432   :  { %v17757_v34 = vpop.f32.mrf.mxu0 }
 0x433   :  { %21323 = vst [vmem:[#allocation155_spill] sm:$0xff] %v17757_v34 }
 0x434   :  { %v17759_v45 = vpop.f32.mrf.mxu0  ;;  %13582 = vmatmul.mubr.msk.bf16.gmra.mxu0 %vm1224_vm2, %v16999_v5  ;;  %v17781_v5 = vpop.f32.mrf.mxu1 }
 0x435   :  { %21324 = vst [vmem:[#allocation33_spill] sm:$0xff] %v17759_v45  ;;  %13585 = vmatprep.mubr.msk.bf16.mxu0 %vm1224_vm2, %v17031_v58 }
 0x436   :  { %v17767_v8 = vpop.f32.mrf.mxu0 }
 0x437   :  { %21325 = vst [vmem:[#allocation31_spill] sm:$0xff] %v17767_v8  ;;  %v17787_v8 = vpop.f32.mrf.mxu1 }
 0x438   :  { %v17769_v7 = vpop.f32.mrf.mxu0 }
 0x439   :  { %21326 = vst [vmem:[#allocation35_spill] sm:$0xff] %v17769_v7 }
 0x43a   :  { %v17773_v50 = vpop.f32.mrf.mxu0 }
 0x43b   :  { %21327 = vst [vmem:[#allocation34_spill] sm:$0xff] %v17773_v50 }
 0x43c   :  { %v17775_v53 = vpop.f32.mrf.mxu0  ;;  %13586 = vmatmul.mubr.msk.bf16.gmra.mxu0 %vm1224_vm2, %v17027_v49  ;;  %v17797_v49 = vpop.f32.mrf.mxu1 }
 0x43d   :  { %21328 = vst [vmem:[#allocation37_spill] sm:$0xff] %v17775_v53  ;;  %13589 = vmatprep.mubr.msk.bf16.mxu0 %vm1224_vm2, %v17059_v60 }
 0x43e   :  { %v17783_v58 = vpop.f32.mrf.mxu0 }
 0x43f   :  { %21329 = vst [vmem:[#allocation36_spill] sm:$0xff] %v17783_v58  ;;  %v17803_v58 = vpop.f32.mrf.mxu1 }
 0x440   :  { %v17785_v45 = vpop.f32.mrf.mxu0 }
 0x441   :  { %21330 = vst [vmem:[#allocation41_spill] sm:$0xff] %v17785_v45 }
 0x442   :  { %v17789_v7 = vpop.f32.mrf.mxu0 }
 0x443   :  { %21331 = vst [vmem:[#allocation38_spill] sm:$0xff] %v17789_v7 }
 0x444   :  { %v17791_v34 = vpop.f32.mrf.mxu0  ;;  %13590 = vmatmul.mubr.msk.bf16.gmra.mxu0 %vm1224_vm2, %v17055_v54  ;;  %v17813_v54 = vpop.f32.mrf.mxu1 }
 0x445   :  { %21332 = vst [vmem:[#allocation40_spill] sm:$0xff] %v17791_v34  ;;  %13593 = vmatprep.mubr.msk.bf16.mxu0 %vm1224_vm2, %v17087_v48 }
 0x446   :  { %v17799_v60 = vpop.f32.mrf.mxu0 }
 0x447   :  { %21333 = vst [vmem:[#allocation39_spill] sm:$0xff] %v17799_v60  ;;  %v17819_v60 = vpop.f32.mrf.mxu1 }
 0x448   :  { %v17801_v53 = vpop.f32.mrf.mxu0 }
 0x449   :  { %21334 = vst [vmem:[#allocation43_spill] sm:$0xff] %v17801_v53 }
 0x44a   :  { %v17805_v45 = vpop.f32.mrf.mxu0 }
 0x44b   :  { %21335 = vst [vmem:[#allocation42_spill] sm:$0xff] %v17805_v45 }
 0x44c   :  { %v17807_v50 = vpop.f32.mrf.mxu0  ;;  %13594 = vmatmul.mubr.msk.bf16.gmra.mxu0 %vm1224_vm2, %v17083_v2  ;;  %v17829_v2 = vpop.f32.mrf.mxu1 }
 0x44d   :  { %21336 = vst [vmem:[#allocation45_spill] sm:$0xff] %v17807_v50  ;;  %13597 = vmatprep.mubr.msk.bf16.mxu0 %vm1224_vm2, %v17115_v51 }
 0x44e   :  { %v17815_v48 = vpop.f32.mrf.mxu0 }
 0x44f   :  { %21337 = vst [vmem:[#allocation44_spill] sm:$0xff] %v17815_v48  ;;  %v17835_v48 = vpop.f32.mrf.mxu1 }
 0x450   :  { %v17817_v34 = vpop.f32.mrf.mxu0  ;;  %21343 = vst [vmem:[#allocation55_spill] sm:$0xff] %v17835_v48 }
 0x451   :  { %21338 = vst [vmem:[#allocation49_spill] sm:$0xff] %v17817_v34 }
 0x452   :  { %v17821_v53 = vpop.f32.mrf.mxu0 }
 0x453   :  { %21339 = vst [vmem:[#allocation48_spill] sm:$0xff] %v17821_v53 }
 0x454   :  { %v17823_v7 = vpop.f32.mrf.mxu0  ;;  %13598 = vmatmul.mubr.msk.bf16.gmra.mxu0 %vm1224_vm2, %v17111_v21  ;;  %v17845_v21 = vpop.f32.mrf.mxu1 }
 0x455   :  { %21340 = vst [vmem:[#allocation51_spill] sm:$0xff] %v17823_v7  ;;  %13601 = vmatprep.mubr.msk.bf16.mxu0 %vm1224_vm2, %v17147_v22  ;;  %21346 = vst [vmem:[#allocation72_spill] sm:$0xff] %v17845_v21 }
 0x456   :  { %v17831_v51 = vpop.f32.mrf.mxu0 }
 0x457   :  { %21341 = vst [vmem:[#allocation67_spill] sm:$0xff] %v17831_v51  ;;  %v17851_v51 = vpop.f32.mrf.mxu1 }
 0x458   :  { %v17833_v50 = vpop.f32.mrf.mxu0  ;;  %21349 = vst [vmem:[#allocation60_spill] sm:$0xff] %v17851_v51 }
 0x459   :  { %21342 = vst [vmem:[#allocation53_spill] sm:$0xff] %v17833_v50 }
 0x45a   :  { %v17837_v34 = vpop.f32.mrf.mxu0 }
 0x45b   :  { %21344 = vst [vmem:[#allocation2_spill] sm:$0xff] %v17837_v34 }
 0x45c   :  { %v17839_v45 = vpop.f32.mrf.mxu0  ;;  %13602 = vmatmul.mubr.msk.bf16.gmra.mxu0 %vm1224_vm2, %v17141_v26  ;;  %v17860_v26 = vpop.f32.mrf.mxu1 }
 0x45d   :  { %21345 = vst [vmem:[#allocation56_spill] sm:$0xff] %v17839_v45  ;;  %13605 = vmatprep.mubr.msk.bf16.mxu0 %vm1224_vm2, %v17179_v52  ;;  %21351 = vst [vmem:[#allocation62_spill] sm:$0xff] %v17860_v26  ;;  %v17865_v52 = vld [vmem:[%s20588_s4 + $0x2] ss:$0 sm:$0xff] }
 0x45e   :  { %v17847_v22 = vpop.f32.mrf.mxu0  ;;  %v17870_v51 = vpop.f32.mrf.mxu1 }
 0x45f   :  { %21347 = vst [vmem:[#allocation58_spill] sm:$0xff] %v17847_v22  ;;  %21352 = vst [vmem:[#allocation7_spill] sm:$0xff] %v17870_v51 }
 0x460   :  { %v17849_v7 = vpop.f32.mrf.mxu0 }
 0x461   :  { %21348 = vst [vmem:[#allocation3_spill] sm:$0xff] %v17849_v7 }
 0x462   :  { %v17853_v50 = vpop.f32.mrf.mxu0 }
 0x463   :  { %21350 = vst [vmem:[#allocation5_spill] sm:$0xff] %v17853_v50 }
 0x464   :  { %v13511_v53 = vpop.f32.mrf.mxu0  ;;  %13606 = vmatmul.mubr.msk.bf16.gmra.mxu0 %vm1224_vm2, %v17173_v18 }
 0x465   :  { %v5484_v45 = vadd.f32 %v13511_v53, %v17327_v36  ;;  %13609 = vmatprep.mubr.msk.bf16.mxu0 %vm1224_vm2, %v17214_v9 }
 0x466   :  { %v4971_v7 = vpop.f32.mrf.mxu0 }
 0x467   :  { %v5482_v22 = vadd.f32 %v4971_v7, %v17336_v47  ;;  %v5617_v34 = vadd.f32 %v17865_v52, %v5484_v45 }
 0x468   :  { %v13512_v50 = vpop.f32.mrf.mxu0 }
 0x469   :  { %v5485_v18 = vadd.f32 %v13512_v50, %v17343_v35  ;;  %v5615_v9 = vadd.f32 %v17865_v52, %v5482_v22  ;;  %v5745_v48 = vmax.f32 %v5617_v34, 0.0  ;;  %v17881_v35 = vpop.f32.mrf.mxu1 }
 0x46a   :  { %v4974_v36 = vpop.f32.mrf.mxu0 }
 0x46b   :  { %v5618_v53 = vadd.f32 %v17865_v52, %v5485_v18  ;;  %v5483_v26 = vadd.f32 %v4974_v36, %v17348_v28  ;;  %v5743_v22 = vmax.f32 %v5615_v9, 0.0 }
 0x46c   :  { %v13515_v21 = vpop.f32.mrf.mxu0  ;;  %13610 = vmatmul.mubr.msk.bf16.gmra.mxu0 %vm1224_vm2, %v17208_v56 }
 0x46d   :  { %v5746_v47 = vmax.f32 %v5618_v53, 0.0  ;;  %v5616_v7 = vadd.f32 %v17865_v52, %v5483_v26  ;;  %v5488_v45 = vadd.f32 %v13515_v21, %v17359_v30  ;;  %13613 = vmatprep.mubr.msk.bf16.mxu0 %vm1224_vm2, %v17246_v29  ;;  %v17890_v30 = vpop.f32.mrf.mxu1  ;;  %v14522_v29 = vld [vmem:[%s20587_s3 + $0x110] sm:$0xff]  }
 0x46e   :  { %v4987_v50 = vpop.f32.mrf.mxu0 }
 0x46f   :  { %v17883_v18 = vpack.c.bf16 %v5746_v47, %v5745_v48  ;;  %v5744_v28 = vmax.f32 %v5616_v7, 0.0  ;;  %v5486_v36 = vadd.f32 %v4987_v50, %v17368_v43  ;;  %v5621_v34 = vadd.f32 %v17865_v52, %v5488_v45 }
 0x470   :  { %v13516_v51 = vpop.f32.mrf.mxu0 }
 0x471   :  { %v17886_v56 = vpack.c.bf16 %v5744_v28, %v5743_v22  ;;  %v5489_v26 = vadd.f32 %v13516_v51, %v17373_v42  ;;  %v5619_v48 = vadd.f32 %v17865_v52, %v5486_v36  ;;  %v5749_v42 = vmax.f32 %v5621_v34, 0.0 }
 0x472   :  { %v4990_v21 = vpop.f32.mrf.mxu0 }
 0x473   :  { %v5622_v9 = vadd.f32 %v17865_v52, %v5489_v26  ;;  %v5487_v43 = vadd.f32 %v4990_v21, %v17378_v24  ;;  %13645 = vmatprep.mubr.msk.bf16.mxu1 %vm1224_vm2, %v17886_v56  ;;  %v17909_v24 = vpop.f32.mrf.mxu1  ;;  %v5747_v50 = vmax.f32 %v5619_v48, 0.0 }
 0x474   :  { %v13519_v53 = vpop.f32.mrf.mxu0  ;;  %13614 = vmatmul.mubr.msk.bf16.gmra.mxu0 %vm1224_vm2, %v17240_v0  ;;  %13646 = vmatmul.mubr.msk.bf16.vlgmr.msra.gmra.mxu1 %vm1224_vm2, %v17883_v18 }
 0x475   :  { %v5750_v51 = vmax.f32 %v5622_v9, 0.0  ;;  %v5620_v47 = vadd.f32 %v17865_v52, %v5487_v43  ;;  %v5492_v7 = vadd.f32 %v13519_v53, %v17387_v3  ;;  %13910 = vmatpush3.bf16.msra.mxu1 %v17631_v1  ;;  %13617 = vmatprep.mubr.msk.bf16.mxu0 %vm1224_vm2, %v17278_v39  ;;  %v14523_v39 = vld [vmem:[%s20587_s3 + $0x108] sm:$0xff]   ;;  %v17921_v26 = vpop.f32.mrf.mxu1 }
 0x476   :  { %v5003_v45 = vpop.f32.mrf.mxu0  ;;  %13911 = vmatprep.subr.bf16.mxu1 %v14522_v29 }
 0x477   :  { %v17911_v0 = vpack.c.bf16 %v5750_v51, %v5749_v42  ;;  %v5748_v22 = vmax.f32 %v5620_v47, 0.0  ;;  %v5490_v28 = vadd.f32 %v5003_v45, %v17396_v62  ;;  %v5625_v3 = vadd.f32 %v17865_v52, %v5492_v7 }
 0x478   :  { %v13520_v36 = vpop.f32.mrf.mxu0 }
 0x479   :  { %v17914_v34 = vpack.c.bf16 %v5748_v22, %v5747_v50  ;;  %v5493_v1 = vadd.f32 %v13520_v36, %v17401_v10  ;;  %13912 = vmatpush3.bf16.msra.mxu1 %v14522_v29  ;;  %v5623_v48 = vadd.f32 %v17865_v52, %v5490_v28  ;;  %v5753_v10 = vmax.f32 %v5625_v3, 0.0  ;;  %v21353_v3 = vld [vmem:[#allocation66_spill] sm:$0xff] }
 0x47a   :  { %v5006_v21 = vpop.f32.mrf.mxu0  ;;  %13913 = vmatprep.subr.bf16.mxu1 %v14523_v39 }
 0x47b   :  { %v5626_v9 = vadd.f32 %v17865_v52, %v5493_v1  ;;  %v5491_v62 = vadd.f32 %v5006_v21, %v17406_v46  ;;  %13649 = vmatprep.mubr.msk.bf16.mxu1 %vm1224_vm2, %v17914_v34  ;;  %v17936_v46 = vpop.f32.mrf.mxu1  ;;  %v5751_v47 = vmax.f32 %v5623_v48, 0.0  ;;  %v4475_v1 = vadd.f32 %v17441_v38, %v21353_v3 }
 0x47c   :  { %v13523_v43 = vpop.f32.mrf.mxu0  ;;  %13618 = vmatmul.mubr.msk.bf16.gmra.mxu0 %vm1224_vm2, %v17272_v16  ;;  %13650 = vmatmul.mubr.msk.bf16.gmra.mxu1 %vm1224_vm2, %v17911_v0 }
 0x47d   :  { %v5754_v29 = vmax.f32 %v5626_v9, 0.0  ;;  %v5624_v53 = vadd.f32 %v17865_v52, %v5491_v62  ;;  %v5496_v42 = vadd.f32 %v13523_v43, %v17415_v55  ;;  %13621 = vmatprep.mubr.msk.bf16.mxu0 %vm1224_vm2, %v17310_v17  ;;  %13914 = vmatpush3.bf16.msra.mxu1 %v14523_v39  ;;  %v17945_v36 = vpop.f32.mrf.mxu1  ;;  %v21354_v43 = vld [vmem:[#allocation11_spill] sm:$0xff] }
 0x47e   :  { %v5019_v51 = vpop.f32.mrf.mxu0 }
 0x47f   :  { %v17938_v7 = vpack.c.bf16 %v5754_v29, %v5753_v10  ;;  %v5752_v16 = vmax.f32 %v5624_v53, 0.0  ;;  %v5494_v45 = vadd.f32 %v5019_v51, %v17424_v59  ;;  %v5629_v28 = vadd.f32 %v17865_v52, %v5496_v42  ;;  %v17963_v10 = vpop.f32.mrf.mxu1 }
 0x480   :  { %v13524_v50 = vpop.f32.mrf.mxu0 }
 0x481   :  { %v17941_v22 = vpack.c.bf16 %v5752_v16, %v5751_v47  ;;  %v5497_v55 = vadd.f32 %v13524_v50, %v17429_v32  ;;  %v5627_v39 = vadd.f32 %v17865_v52, %v5494_v45  ;;  %v5757_v32 = vmax.f32 %v5629_v28, 0.0  ;;  %v17974_v28 = vpop.f32.mrf.mxu1 }
 0x482   :  { %v5022_v17 = vpop.f32.mrf.mxu0  ;;  %v4470_v45 = vadd.f32 %v17461_v33, %v17281_v12 }
 0x483   :  { %v5630_v21 = vadd.f32 %v17865_v52, %v5497_v55  ;;  %v5495_v48 = vadd.f32 %v5022_v17, %v17434_v11  ;;  %13653 = vmatprep.mubr.msk.bf16.mxu1 %vm1224_vm2, %v17941_v22  ;;  %v4467_v11 = vadd.f32 %v17453_v63, %v21354_v43  ;;  %v5755_v53 = vmax.f32 %v5627_v39, 0.0  ;;  %v21355_v17 = vld [vmem:[#allocation68_spill] sm:$0xff] }
 0x484   :  { %v13527_v59 = vpop.f32.mrf.mxu0  ;;  %13622 = vmatmul.mubr.msk.bf16.gmra.mxu0 %vm1224_vm2, %v17304_v14  ;;  %13654 = vmatmul.mubr.msk.bf16.gmra.mxu1 %vm1224_vm2, %v17938_v7  ;;  %v4478_v14 = vadd.f32 %v17457_v19, %v17274_v6  ;;  %v4491_v6 = vadd.f32 %v17465_v37, %v21355_v17  ;;  %v21363_v17 = vld [vmem:[#allocation83_spill] sm:$0xff] }
 0x485   :  { %v5758_v9 = vmax.f32 %v5630_v21, 0.0  ;;  %v5628_v38 = vadd.f32 %v17865_v52, %v5495_v48  ;;  %v5500_v62 = vadd.f32 %v13527_v59, %v4475_v1  ;;  %13625 = vmatprep.mubr.msk.bf16.mxu0 %vm1224_vm2, %v17340_v61  ;;  %v21356_v48 = vmov 0  }
 0x486   :  { %v5035_v29 = vpop.f32.mrf.mxu0  ;;  %v4483_v59 = vadd.f32 %v17477_v31, %v17302_v57 }
 0x487   :  { %v17967_v42 = vpack.c.bf16 %v5758_v9, %v5757_v32  ;;  %v5756_v51 = vmax.f32 %v5628_v38, 0.0  ;;  %v5498_v47 = vadd.f32 %v5035_v29, %v4467_v11  ;;  %v5633_v61 = vadd.f32 %v17865_v52, %v5500_v62  ;;  %v17990_v32 = vpop.f32.mrf.mxu1 }
 0x488   :  { %v13528_v16 = vpop.f32.mrf.mxu0  ;;  %v4494_v38 = vadd.f32 %v17481_v4, %v17306_v40 }
 0x489   :  { %v17971_v50 = vpack.c.bf16 %v5756_v51, %v5755_v53  ;;  %v5501_v63 = vadd.f32 %v13528_v16, %v4478_v14  ;;  %v5631_v19 = vadd.f32 %v17865_v52, %v5498_v47  ;;  %v5761_v33 = vmax.f32 %v5633_v61, 0.0  ;;  %v21358_v14 = vld [vmem:[#allocation116_spill] sm:$0xff]  ;;  %v18001_v31 = vpop.f32.mrf.mxu1 }
 0x48a   :  { %v5038_v55 = vpop.f32.mrf.mxu0  ;;  %v4486_v53 = vadd.f32 %v21358_v14, %v17313_v20  ;;  %21359 = vst [vmem:[#allocation84_spill] sm:$0xff] %v18001_v31  ;;  %v21361_v61 = vld [vmem:[#allocation8_spill] sm:$0xff]  ;;  %v21362_v20 = vld [vmem:[#allocation69_spill] sm:$0xff]  ;;  %v21368_v14 = vld [vmem:[#allocation70_spill] sm:$0xff] }
 0x48b   :  { %v5634_v3 = vadd.f32 %v17865_v52, %v5501_v63  ;;  %v5499_v1 = vadd.f32 %v5038_v55, %v4470_v45  ;;  %13657 = vmatprep.mubr.msk.bf16.mxu1 %vm1224_vm2, %v17971_v50  ;;  %v21360_v45 = vld [vmem:[#allocation92_spill] sm:$0xff] }
 0x48c   :  { %v13531_v12 = vpop.f32.mrf.mxu0  ;;  %13626 = vmatmul.mubr.msk.bf16.gmra.mxu0 %vm1224_vm2, %v17333_v44  ;;  %13658 = vmatmul.mubr.msk.bf16.gmra.mxu1 %vm1224_vm2, %v17967_v42  ;;  %v5759_v44 = vmax.f32 %v5631_v19, 0.0  ;;  %v4507_v40 = vadd.f32 %v21361_v61, %v21360_v45 }
 0x48d   :  { %v5762_v39 = vmax.f32 %v5634_v3, 0.0  ;;  %v5632_v21 = vadd.f32 %v17865_v52, %v5499_v1  ;;  %v5504_v37 = vadd.f32 %v13531_v12, %v4491_v6  ;;  %13629 = vmatprep.mubr.bf16.mxu0 %v21356_v48  ;;  %v4499_v6 = vadd.f32 %v21363_v17, %v21362_v20 }
 0x48e   :  { %v5051_v9 = vpop.f32.mrf.mxu0 }
 0x48f   :  { %v17994_v62 = vpack.c.bf16 %v5762_v39, %v5761_v33  ;;  %v5760_v43 = vmax.f32 %v5632_v21, 0.0  ;;  %v5502_v11 = vadd.f32 %v5051_v9, %v4483_v59  ;;  %v5637_v47 = vadd.f32 %v17865_v52, %v5504_v37  ;;  %v21364_v39 = vld [vmem:[#allocation13_spill] sm:$0xff]  ;;  %v21365_v21 = vld [vmem:[#allocation86_spill] sm:$0xff]  ;;  %v18018_v59 = vpop.f32.mrf.mxu1 }
 0x490   :  { %v13532_v29 = vpop.f32.mrf.mxu0  ;;  %v4510_v37 = vadd.f32 %v21365_v21, %v21364_v39  ;;  %21366 = vst [vmem:[#allocation65_spill] sm:$0xff] %v18018_v59 }
 0x491   :  { %21357 = vst [vmem:[#allocation63_spill] sm:$0xff] %v17994_v62  ;;  %v17998_v51 = vpack.c.bf16 %v5760_v43, %v5759_v44  ;;  %v5505_v57 = vadd.f32 %v13532_v29, %v4494_v38  ;;  %v5635_v4 = vadd.f32 %v17865_v52, %v5502_v11  ;;  %v5765_v3 = vmax.f32 %v5637_v47, 0.0  ;;  %v18027_v61 = vpop.f32.mrf.mxu1 }
 0x492   :  { %v5054_v16 = vpop.f32.mrf.mxu0  ;;  %21371 = vst [vmem:[#allocation66_spill] sm:$0xff] %v18027_v61 }
 0x493   :  { %v5638_v63 = vadd.f32 %v17865_v52, %v5505_v57  ;;  %v5503_v55 = vadd.f32 %v5054_v16, %v4486_v53  ;;  %13661 = vmatprep.mubr.msk.bf16.mxu1 %vm1224_vm2, %v17998_v51  ;;  %v5763_v38 = vmax.f32 %v5635_v4, 0.0  ;;  %v21369_v53 = vld [vmem:[#allocation87_spill] sm:$0xff] }
 0x494   :  { %v13535_v19 = vpop.f32.mrf.mxu0  ;;  %13630 = vmatmul.mubr.bf16.gmra.mxu0 %v21356_v48  ;;  %13662 = vmatmul.mubr.msk.bf16.gmra.mxu1 %vm1224_vm2, %v17994_v62  ;;  %v4502_v47 = vadd.f32 %v21369_v53, %v21368_v14 }
 0x495   :  { %v5766_v1 = vmax.f32 %v5638_v63, 0.0  ;;  %v5636_v12 = vadd.f32 %v17865_v52, %v5503_v55  ;;  %v5508_v33 = vadd.f32 %v13535_v19, %v4507_v40  ;;  %13633 = vmatprep.mubr.bf16.mxu0 %v21356_v48  ;;  %v21372_v63 = vld [vmem:[#allocation96_spill] sm:$0xff]  ;;  %v21373_v55 = vld [vmem:[#allocation89_spill] sm:$0xff]  ;;  %v21374_v19 = vld [vmem:[#allocation71_spill] sm:$0xff] }
 0x496   :  { %v5067_v9 = vpop.f32.mrf.mxu0  ;;  %v4523_v20 = vadd.f32 %v21373_v55, %v21372_v63  ;;  %v21380_v63 = vld [vmem:[#allocation73_spill] sm:$0xff] }
 0x497   :  { %v18020_v44 = vpack.c.bf16 %v5766_v1, %v5765_v3  ;;  %v5764_v43 = vmax.f32 %v5636_v12, 0.0  ;;  %v5506_v11 = vadd.f32 %v5067_v9, %v4499_v6  ;;  %v5641_v16 = vadd.f32 %v17865_v52, %v5508_v33  ;;  %v21375_v3 = vld [vmem:[#allocation90_spill] sm:$0xff]  ;;  %v21376_v9 = vld [vmem:[#allocation15_spill] sm:$0xff] }
 0x498   :  { %v13536_v29 = vpop.f32.mrf.mxu0  ;;  %v4515_v1 = vadd.f32 %v21375_v3, %v21374_v19 }
 0x499   :  { %21367 = vst [vmem:[#allocation9_spill] sm:$0xff] %v18020_v44  ;;  %v18024_v57 = vpack.c.bf16 %v5764_v43, %v5763_v38  ;;  %v5509_v45 = vadd.f32 %v13536_v29, %v4510_v37  ;;  %v5639_v4 = vadd.f32 %v17865_v52, %v5506_v11  ;;  %v5769_v33 = vmax.f32 %v5641_v16, 0.0  ;;  %v21377_v38 = vld [vmem:[#allocation12_spill] sm:$0xff]  ;;  %v18044_v11 = vpop.f32.mrf.mxu1  ;;  %v21381_v16 = vld [vmem:[#allocation91_spill] sm:$0xff] }
 0x49a   :  { %v5070_v40 = vpop.f32.mrf.mxu0  ;;  %v4526_v43 = vadd.f32 %v21377_v38, %v21376_v9  ;;  %21378 = vst [vmem:[#allocation11_spill] sm:$0xff] %v18044_v11  ;;  %v4518_v55 = vadd.f32 %v21381_v16, %v21380_v63  ;;  %v21385_v9 = vld [vmem:[#allocation93_spill] sm:$0xff] }
 0x49b   :  { %21370 = vst [vmem:[#allocation88_spill] sm:$0xff] %v18024_v57  ;;  %v5642_v17 = vadd.f32 %v17865_v52, %v5509_v45  ;;  %v5507_v6 = vadd.f32 %v5070_v40, %v4502_v47  ;;  %13665 = vmatprep.mubr.msk.bf16.mxu1 %vm1224_vm2, %v18024_v57  ;;  %v5767_v14 = vmax.f32 %v5639_v4, 0.0  ;;  %v18053_v19 = vpop.f32.mrf.mxu1 }
 0x49c   :  { %v13539_v12 = vpop.f32.mrf.mxu0  ;;  %13634 = vmatmul.mubr.bf16.gmra.mxu0 %v21356_v48  ;;  %13666 = vmatmul.mubr.msk.bf16.gmra.mxu1 %vm1224_vm2, %v18020_v44  ;;  %21383 = vst [vmem:[#allocation92_spill] sm:$0xff] %v18053_v19 }
 0x49d   :  { %v5770_v39 = vmax.f32 %v5642_v17, 0.0  ;;  %v5640_v21 = vadd.f32 %v17865_v52, %v5507_v6  ;;  %v5512_v37 = vadd.f32 %v13539_v12, %v4523_v20  ;;  %13781 = vmatprep.mubr.bf16.mxu0 %v21356_v48  ;;  %v21384_v12 = vld [vmem:[#allocation100_spill] sm:$0xff]  ;;  %v18070_v16 = vpop.f32.mrf.mxu1 }
 0x49e   :  { %v5083_v29 = vpop.f32.mrf.mxu0  ;;  %v4539_v38 = vadd.f32 %v21385_v9, %v21384_v12  ;;  %21389 = vst [vmem:[#allocation8_spill] sm:$0xff] %v18070_v16  ;;  %v21396_v16 = vld [vmem:[#allocation151_spill] sm:$0xff] }
 0x49f   :  { %v18046_v53 = vpack.c.bf16 %v5770_v39, %v5769_v33  ;;  %v5768_v47 = vmax.f32 %v5640_v21, 0.0  ;;  %v5510_v45 = vadd.f32 %v5083_v29, %v4515_v1  ;;  %v5645_v20 = vadd.f32 %v17865_v52, %v5512_v37  ;;  %v21386_v39 = vld [vmem:[#allocation74_spill] sm:$0xff] }
 0x4a0   :  { %v13540_v40 = vpop.f32.mrf.mxu0  ;;  %v4531_v21 = vadd.f32 %v17546_v41, %v21386_v39  ;;  %v21391_v39 = vld [vmem:[#allocation4_spill] sm:$0xff] }
 0x4a1   :  { %21379 = vst [vmem:[#allocation68_spill] sm:$0xff] %v18046_v53  ;;  %v18050_v17 = vpack.c.bf16 %v5768_v47, %v5767_v14  ;;  %v5513_v6 = vadd.f32 %v13540_v40, %v4526_v43  ;;  %v5643_v4 = vadd.f32 %v17865_v52, %v5510_v45  ;;  %v5773_v37 = vmax.f32 %v5645_v20, 0.0  ;;  %v21387_v45 = vld [vmem:[#allocation17_spill] sm:$0xff]  ;;  %v21388_v40 = vld [vmem:[#allocation28_spill] sm:$0xff] }
 0x4a2   :  { %v5086_v3 = vpop.f32.mrf.mxu0  ;;  %v4542_v63 = vadd.f32 %v21388_v40, %v21387_v45  ;;  %v21392_v20 = vld [vmem:[#allocation148_spill] sm:$0xff] }
 0x4a3   :  { %21382 = vst [vmem:[#allocation116_spill] sm:$0xff] %v18050_v17  ;;  %v5646_v33 = vadd.f32 %v17865_v52, %v5513_v6  ;;  %v5511_v1 = vadd.f32 %v5086_v3, %v4518_v55  ;;  %13669 = vmatprep.mubr.msk.bf16.mxu1 %vm1224_vm2, %v18050_v17  ;;  %v5771_v41 = vmax.f32 %v5643_v4, 0.0  ;;  %v21395_v40 = vld [vmem:[#allocation104_spill] sm:$0xff] }
 0x4a4   :  { %v13543_v29 = vpop.f32.mrf.mxu0  ;;  %13670 = vmatmul.mubr.msk.bf16.gmra.mxu1 %vm1224_vm2, %v18046_v53  ;;  %13782 = vmatmul.mubr.bf16.vlgmr.msra.gmra.mxu0 %v21356_v48  ;;  %v4555_v11 = vadd.f32 %v21396_v16, %v21395_v40 }
 0x4a5   :  { %v5774_v43 = vmax.f32 %v5646_v33, 0.0  ;;  %v5644_v14 = vadd.f32 %v17865_v52, %v5511_v1  ;;  %v5516_v47 = vadd.f32 %v13543_v29, %v4539_v38  ;;  %13785 = vmatprep.mubr.bf16.mxu0 %v21356_v48  ;;  %v4534_v33 = vadd.f32 %v21392_v20, %v21391_v39  ;;  %v18079_v29 = vpop.f32.mrf.mxu1 }
 0x4a6   :  { %v5099_v55 = vpop.f32.mrf.mxu0  ;;  %21394 = vst [vmem:[#allocation13_spill] sm:$0xff] %v18079_v29 }
 0x4a7   :  { %v18072_v6 = vpack.c.bf16 %v5774_v43, %v5773_v37  ;;  %v5772_v3 = vmax.f32 %v5644_v14, 0.0  ;;  %v5514_v12 = vadd.f32 %v5099_v55, %v4531_v21  ;;  %v5649_v38 = vadd.f32 %v17865_v52, %v5516_v47  ;;  %v21397_v43 = vld [vmem:[#allocation75_spill] sm:$0xff]  ;;  %v18096_v39 = vpop.f32.mrf.mxu1 }
 0x4a8   :  { %v13544_v9 = vpop.f32.mrf.mxu0  ;;  %v4547_v14 = vadd.f32 %v17566_v15, %v21397_v43  ;;  %21400 = vst [vmem:[#allocation86_spill] sm:$0xff] %v18096_v39  ;;  %v21402_v43 = vld [vmem:[#allocation77_spill] sm:$0xff]  ;;  %v21407_v39 = vld [vmem:[#allocation99_spill] sm:$0xff] }
 0x4a9   :  { %21390 = vst [vmem:[#allocation69_spill] sm:$0xff] %v18072_v6  ;;  %v18076_v19 = vpack.c.bf16 %v5772_v3, %v5771_v41  ;;  %v5517_v1 = vadd.f32 %v13544_v9, %v4542_v63  ;;  %v5647_v4 = vadd.f32 %v17865_v52, %v5514_v12  ;;  %v5777_v47 = vmax.f32 %v5649_v38, 0.0  ;;  %v21398_v3 = vld [vmem:[#allocation19_spill] sm:$0xff]  ;;  %v21399_v12 = vld [vmem:[#allocation98_spill] sm:$0xff]  ;;  %v21403_v38 = vld [vmem:[#allocation16_spill] sm:$0xff] }
 0x4aa   :  { %v5102_v45 = vpop.f32.mrf.mxu0  ;;  %v4558_v9 = vadd.f32 %v21399_v12, %v21398_v3  ;;  %v21406_v12 = vld [vmem:[#allocation108_spill] sm:$0xff] }
 0x4ab   :  { %21393 = vst [vmem:[#allocation83_spill] sm:$0xff] %v18076_v19  ;;  %v5650_v37 = vadd.f32 %v17865_v52, %v5517_v1  ;;  %v5515_v21 = vadd.f32 %v5102_v45, %v4534_v33  ;;  %13673 = vmatprep.mubr.msk.bf16.mxu1 %vm1224_vm2, %v18076_v19  ;;  %v5775_v15 = vmax.f32 %v5647_v4, 0.0  ;;  %v4571_v61 = vadd.f32 %v21407_v39, %v21406_v12 }
 0x4ac   :  { %v13547_v55 = vpop.f32.mrf.mxu0  ;;  %13674 = vmatmul.mubr.msk.bf16.gmra.mxu1 %vm1224_vm2, %v18072_v6  ;;  %13786 = vmatmul.mubr.bf16.gmra.mxu0 %v21356_v48 }
 0x4ad   :  { %v5778_v63 = vmax.f32 %v5650_v37, 0.0  ;;  %v5648_v16 = vadd.f32 %v17865_v52, %v5515_v21  ;;  %v5520_v41 = vadd.f32 %v13547_v55, %v4555_v11  ;;  %13789 = vmatprep.mubr.bf16.mxu0 %v21356_v48  ;;  %v4550_v37 = vadd.f32 %v21403_v38, %v21402_v43  ;;  %v18105_v55 = vpop.f32.mrf.mxu1 }
 0x4ae   :  { %v5115_v20 = vpop.f32.mrf.mxu0  ;;  %21405 = vst [vmem:[#allocation96_spill] sm:$0xff] %v18105_v55  ;;  %v21414_v55 = vld [vmem:[#allocation6_spill] sm:$0xff] }
 0x4af   :  { %v18098_v33 = vpack.c.bf16 %v5778_v63, %v5777_v47  ;;  %v5776_v1 = vmax.f32 %v5648_v16, 0.0  ;;  %v5518_v45 = vadd.f32 %v5115_v20, %v4547_v14  ;;  %v5653_v11 = vadd.f32 %v17865_v52, %v5520_v41  ;;  %v21408_v63 = vld [vmem:[#allocation78_spill] sm:$0xff]  ;;  %v18122_v38 = vpop.f32.mrf.mxu1 }
 0x4b0   :  { %v13548_v40 = vpop.f32.mrf.mxu0  ;;  %v21409_v16 = vld [vmem:[#allocation102_spill] sm:$0xff]  ;;  %21412 = vst [vmem:[#allocation89_spill] sm:$0xff] %v18122_v38 }
 0x4b1   :  { %21401 = vst [vmem:[#allocation70_spill] sm:$0xff] %v18098_v33  ;;  %v18102_v29 = vpack.c.bf16 %v5776_v1, %v5775_v15  ;;  %v5521_v21 = vadd.f32 %v13548_v40, %v4558_v9  ;;  %v5651_v4 = vadd.f32 %v17865_v52, %v5518_v45  ;;  %v4563_v20 = vadd.f32 %v21409_v16, %v21408_v63  ;;  %v21410_v45 = vld [vmem:[#allocation21_spill] sm:$0xff]  ;;  %v21411_v40 = vld [vmem:[#allocation103_spill] sm:$0xff]  ;;  %v21427_v38 = vld [vmem:[#allocation114_spill] sm:$0xff] }
 0x4b2   :  { %v5118_v3 = vpop.f32.mrf.mxu0  ;;  %v5781_v41 = vmax.f32 %v5653_v11, 0.0  ;;  %v4574_v43 = vadd.f32 %v21411_v40, %v21410_v45  ;;  %v21415_v11 = vld [vmem:[#allocation106_spill] sm:$0xff]  ;;  %v21417_v45 = vld [vmem:[#allocation112_spill] sm:$0xff]  ;;  %v21418_v40 = vld [vmem:[#allocation107_spill] sm:$0xff] }
 0x4b3   :  { %21404 = vst [vmem:[#allocation87_spill] sm:$0xff] %v18102_v29  ;;  %v5654_v47 = vadd.f32 %v17865_v52, %v5521_v21  ;;  %v5519_v14 = vadd.f32 %v5118_v3, %v4550_v37  ;;  %13677 = vmatprep.mubr.msk.bf16.mxu1 %vm1224_vm2, %v18102_v29  ;;  %v5779_v21 = vmax.f32 %v5651_v4, 0.0  ;;  %v4587_v4 = vadd.f32 %v21418_v40, %v21417_v45 }
 0x4b4   :  { %v13551_v15 = vpop.f32.mrf.mxu0  ;;  %13678 = vmatmul.mubr.msk.bf16.gmra.mxu1 %vm1224_vm2, %v18098_v33  ;;  %13790 = vmatmul.mubr.bf16.gmra.mxu0 %v21356_v48 }
 0x4b5   :  { %v5782_v9 = vmax.f32 %v5654_v47, 0.0  ;;  %v5652_v39 = vadd.f32 %v17865_v52, %v5519_v14  ;;  %v5524_v1 = vadd.f32 %v13551_v15, %v4571_v61  ;;  %13793 = vmatprep.mubr.bf16.mxu0 %v21356_v48  ;;  %v4566_v47 = vadd.f32 %v21415_v11, %v21414_v55  ;;  %v14524_v15 = vld [vmem:[%s20587_s3 + $0x100] sm:$0xff]  }
 0x4b6   :  { %v5131_v37 = vpop.f32.mrf.mxu0  ;;  %13915 = vmatprep.subr.bf16.mxu1 %v14524_v15 }
 0x4b7   :  { %v18124_v3 = vpack.c.bf16 %v5782_v9, %v5781_v41  ;;  %v5780_v12 = vmax.f32 %v5652_v39, 0.0  ;;  %v5522_v63 = vadd.f32 %v5131_v37, %v4563_v20  ;;  %v5657_v61 = vadd.f32 %v17865_v52, %v5524_v1  ;;  %v18136_v41 = vpop.f32.mrf.mxu1  ;;  %v21420_v1 = vld [vmem:[#allocation79_spill] sm:$0xff]  ;;  %13916 = vmatpush3.bf16.msra.mxu1 %v14524_v15 }
 0x4b8   :  { %v13552_v16 = vpop.f32.mrf.mxu0  ;;  %21419 = vst [vmem:[#allocation15_spill] sm:$0xff] %v18136_v41 }
 0x4b9   :  { %21413 = vst [vmem:[#allocation71_spill] sm:$0xff] %v18124_v3  ;;  %v18128_v59 = vpack.c.bf16 %v5780_v12, %v5779_v21  ;;  %v5525_v14 = vadd.f32 %v13552_v16, %v4574_v43  ;;  %v5655_v20 = vadd.f32 %v17865_v52, %v5522_v63  ;;  %v21421_v43 = vld [vmem:[#allocation110_spill] sm:$0xff]  ;;  %v5785_v12 = vmax.f32 %v5657_v61, 0.0  ;;  %v18152_v40 = vpop.f32.mrf.mxu1 }
 0x4ba   :  { %v5134_v9 = vpop.f32.mrf.mxu0  ;;  %v4579_v37 = vadd.f32 %v21421_v43, %v21420_v1  ;;  %21424 = vst [vmem:[#allocation12_spill] sm:$0xff] %v18152_v40  ;;  %v21431_v40 = vld [vmem:[#allocation115_spill] sm:$0xff] }
 0x4bb   :  { %21416 = vst [vmem:[#allocation90_spill] sm:$0xff] %v18128_v59  ;;  %v5658_v39 = vadd.f32 %v17865_v52, %v5525_v14  ;;  %v5523_v55 = vadd.f32 %v5134_v9, %v4566_v47  ;;  %13681 = vmatprep.mubr.msk.bf16.mxu1 %vm1224_vm2, %v18128_v59  ;;  %v21422_v47 = vld [vmem:[#allocation23_spill] sm:$0xff]  ;;  %v5783_v1 = vmax.f32 %v5655_v20, 0.0 }
 0x4bc   :  { %v13555_v21 = vpop.f32.mrf.mxu0  ;;  %13682 = vmatmul.mubr.msk.bf16.gmra.mxu1 %vm1224_vm2, %v18124_v3  ;;  %13794 = vmatmul.mubr.bf16.gmra.mxu0 %v21356_v48  ;;  %v21423_v14 = vld [vmem:[#allocation111_spill] sm:$0xff] }
 0x4bd   :  { %v5786_v16 = vmax.f32 %v5658_v39, 0.0  ;;  %v5656_v63 = vadd.f32 %v17865_v52, %v5523_v55  ;;  %v5528_v11 = vadd.f32 %v13555_v21, %v4587_v4  ;;  %13797 = vmatprep.mubr.msk.bf16.mxu0 %vm1224_vm2, %v17886_v56  ;;  %v4590_v45 = vadd.f32 %v21423_v14, %v21422_v47  ;;  %v21426_v39 = vld [vmem:[#allocation81_spill] sm:$0xff]  ;;  %v18161_v21 = vpop.f32.mrf.mxu1  ;;  %v21430_v14 = vld [vmem:[#allocation82_spill] sm:$0xff] }
 0x4be   :  { %v5147_v9 = vpop.f32.mrf.mxu0  ;;  %v4582_v55 = vadd.f32 %v21427_v38, %v21426_v39  ;;  %21429 = vst [vmem:[#allocation100_spill] sm:$0xff] %v18161_v21  ;;  %v4603_v31 = vadd.f32 %v21431_v40, %v21430_v14  ;;  %v21432_v38 = vld [vmem:[#allocation119_spill] sm:$0xff] }
 0x4bf   :  { %v18154_v43 = vpack.c.bf16 %v5786_v16, %v5785_v12  ;;  %v5784_v41 = vmax.f32 %v5656_v63, 0.0  ;;  %v5526_v48 = vadd.f32 %v5147_v9, %v4579_v37  ;;  %v5661_v56 = vadd.f32 %v17865_v52, %v5528_v11  ;;  %v21434_v9 = vld [vmem:[#allocation85_spill] sm:$0xff]  ;;  %v18180_v39 = vpop.f32.mrf.mxu1 }
 0x4c0   :  { %v13556_v61 = vpop.f32.mrf.mxu0  ;;  %21436 = vst [vmem:[#allocation93_spill] sm:$0xff] %v18180_v39  ;;  %v21451_v39 = vld [vmem:[#allocation128_spill] sm:$0xff] }
 0x4c1   :  { %21425 = vst [vmem:[#allocation73_spill] sm:$0xff] %v18154_v43  ;;  %v18158_v4 = vpack.c.bf16 %v5784_v41, %v5783_v1  ;;  %v5529_v15 = vadd.f32 %v13556_v61, %v4590_v45  ;;  %v5659_v20 = vadd.f32 %v17865_v52, %v5526_v48  ;;  %v21433_v41 = vld [vmem:[#allocation25_spill] sm:$0xff]  ;;  %v5789_v11 = vmax.f32 %v5661_v56, 0.0  ;;  %v21435_v1 = vld [vmem:[#allocation47_spill] sm:$0xff]  ;;  %v21438_v56 = vld [vmem:[#allocation10_spill] sm:$0xff] }
 0x4c2   :  { %v5150_v47 = vpop.f32.mrf.mxu0  ;;  %v4595_v16 = vadd.f32 %v21433_v41, %v21432_v38  ;;  %v4606_v61 = vadd.f32 %v21435_v1, %v21434_v9  ;;  %v21441_v9 = vld [vmem:[#allocation129_spill] sm:$0xff]  ;;  %v21442_v1 = vld [vmem:[#allocation52_spill] sm:$0xff] }
 0x4c3   :  { %21428 = vst [vmem:[#allocation91_spill] sm:$0xff] %v18158_v4  ;;  %v5662_v12 = vadd.f32 %v17865_v52, %v5529_v15  ;;  %v5527_v37 = vadd.f32 %v5150_v47, %v4582_v55  ;;  %13685 = vmatprep.mubr.msk.bf16.mxu1 %vm1224_vm2, %v18158_v4  ;;  %v5787_v15 = vmax.f32 %v5659_v20, 0.0  ;;  %v4619_v20 = vadd.f32 %v21442_v1, %v21441_v9 }
 0x4c4   :  { %v13559_v63 = vpop.f32.mrf.mxu0  ;;  %13686 = vmatmul.mubr.msk.bf16.gmra.mxu1 %vm1224_vm2, %v18154_v43  ;;  %13798 = vmatmul.mubr.msk.bf16.gmra.mxu0 %vm1224_vm2, %v17883_v18 }
 0x4c5   :  { %v5790_v45 = vmax.f32 %v5662_v12, 0.0  ;;  %v5660_v48 = vadd.f32 %v17865_v52, %v5527_v37  ;;  %v5532_v40 = vadd.f32 %v13559_v63, %v4603_v31  ;;  %13801 = vmatprep.mubr.msk.bf16.mxu0 %vm1224_vm2, %v17914_v34  ;;  %v21439_v12 = vld [vmem:[#allocation121_spill] sm:$0xff] }
 0x4c6   :  { %v5163_v55 = vpop.f32.mrf.mxu0  ;;  %v4598_v41 = vadd.f32 %v21439_v12, %v21438_v56  ;;  %v14525_v63 = vld [vmem:[%s20587_s3 + $0x158] sm:$0xff]  }
 0x4c7   :  { %v18182_v47 = vpack.c.bf16 %v5790_v45, %v5789_v11  ;;  %v5788_v14 = vmax.f32 %v5660_v48, 0.0  ;;  %v5530_v38 = vadd.f32 %v5163_v55, %v4595_v16  ;;  %v5665_v31 = vadd.f32 %v17865_v52, %v5532_v40  ;;  %v18194_v11 = vpop.f32.mrf.mxu1  ;;  %14045 = vmatprep.subr.bf16.mxu0 %v14525_v63  ;;  %v21444_v40 = vld [vmem:[#allocation132_spill] sm:$0xff] }
 0x4c8   :  { %v13560_v18 = vpop.f32.mrf.mxu0  ;;  %21443 = vst [vmem:[#allocation28_spill] sm:$0xff] %v18194_v11  ;;  %14046 = vmatpush3.bf16.msra.mxu0 %v14525_v63 }
 0x4c9   :  { %21437 = vst [vmem:[#allocation74_spill] sm:$0xff] %v18182_v47  ;;  %v18186_v37 = vpack.c.bf16 %v5788_v14, %v5787_v15  ;;  %v5533_v34 = vadd.f32 %v13560_v18, %v4606_v61  ;;  %v5663_v16 = vadd.f32 %v17865_v52, %v5530_v38  ;;  %v21445_v61 = vld [vmem:[#allocation123_spill] sm:$0xff]  ;;  %v5793_v18 = vmax.f32 %v5665_v31, 0.0  ;;  %v18211_v1 = vpop.f32.mrf.mxu1 }
 0x4ca   :  { %v5166_v45 = vpop.f32.mrf.mxu0  ;;  %v4611_v15 = vadd.f32 %v21445_v61, %v21444_v40  ;;  %21448 = vst [vmem:[#allocation4_spill] sm:$0xff] %v18211_v1  ;;  %v21455_v1 = vld [vmem:[#allocation131_spill] sm:$0xff] }
 0x4cb   :  { %21440 = vst [vmem:[#allocation17_spill] sm:$0xff] %v18186_v37  ;;  %v5666_v48 = vadd.f32 %v17865_v52, %v5533_v34  ;;  %v5531_v55 = vadd.f32 %v5166_v45, %v4598_v41  ;;  %13689 = vmatprep.mubr.msk.bf16.mxu1 %vm1224_vm2, %v18186_v37  ;;  %v21446_v41 = vld [vmem:[#allocation135_spill] sm:$0xff]  ;;  %v21447_v34 = vld [vmem:[#allocation125_spill] sm:$0xff]  ;;  %v5791_v40 = vmax.f32 %v5663_v16, 0.0 }
 0x4cc   :  { %v13563_v14 = vpop.f32.mrf.mxu0  ;;  %13690 = vmatmul.mubr.msk.bf16.gmra.mxu1 %vm1224_vm2, %v18182_v47  ;;  %13802 = vmatmul.mubr.msk.bf16.gmra.mxu0 %vm1224_vm2, %v17911_v0  ;;  %v4622_v9 = vadd.f32 %v21447_v34, %v21446_v41  ;;  %v21454_v34 = vld [vmem:[#allocation141_spill] sm:$0xff] }
 0x4cd   :  { %v5794_v56 = vmax.f32 %v5666_v48, 0.0  ;;  %v5664_v38 = vadd.f32 %v17865_v52, %v5531_v55  ;;  %v5536_v12 = vadd.f32 %v13563_v14, %v4619_v20  ;;  %13805 = vmatprep.mubr.msk.bf16.mxu0 %vm1224_vm2, %v17941_v22  ;;  %v21450_v48 = vld [vmem:[#allocation138_spill] sm:$0xff]  ;;  %v18220_v14 = vpop.f32.mrf.mxu1  ;;  %v4635_v21 = vadd.f32 %v21455_v1, %v21454_v34 }
 0x4ce   :  { %v5179_v45 = vpop.f32.mrf.mxu0  ;;  %v4614_v55 = vadd.f32 %v21451_v39, %v21450_v48  ;;  %21453 = vst [vmem:[#allocation151_spill] sm:$0xff] %v18220_v14  ;;  %v21456_v39 = vld [vmem:[#allocation144_spill] sm:$0xff] }
 0x4cf   :  { %v18213_v61 = vpack.c.bf16 %v5794_v56, %v5793_v18  ;;  %v5792_v11 = vmax.f32 %v5664_v38, 0.0  ;;  %v5534_v0 = vadd.f32 %v5179_v45, %v4611_v15  ;;  %v5669_v22 = vadd.f32 %v17865_v52, %v5536_v12  ;;  %v18239_v48 = vpop.f32.mrf.mxu1 }
 0x4d0   :  { %v13564_v31 = vpop.f32.mrf.mxu0  ;;  %21460 = vst [vmem:[#allocation75_spill] sm:$0xff] %v18239_v48  ;;  %v21466_v48 = vld [vmem:[#allocation145_spill] sm:$0xff] }
 0x4d1   :  { %21449 = vst [vmem:[#allocation148_spill] sm:$0xff] %v18213_v61  ;;  %v18217_v20 = vpack.c.bf16 %v5792_v11, %v5791_v40  ;;  %v5537_v63 = vadd.f32 %v13564_v31, %v4622_v9  ;;  %v5667_v16 = vadd.f32 %v17865_v52, %v5534_v0  ;;  %v21457_v11 = vld [vmem:[#allocation80_spill] sm:$0xff]  ;;  %v5797_v12 = vmax.f32 %v5669_v22, 0.0  ;;  %v21458_v40 = vld [vmem:[#allocation94_spill] sm:$0xff] }
 0x4d2   :  { %v5182_v41 = vpop.f32.mrf.mxu0  ;;  %v4627_v56 = vadd.f32 %v21457_v11, %v21456_v39  ;;  %v21459_v0 = vld [vmem:[#allocation136_spill] sm:$0xff]  ;;  %v21462_v22 = vld [vmem:[#allocation14_spill] sm:$0xff] }
 0x4d3   :  { %21452 = vst [vmem:[#allocation104_spill] sm:$0xff] %v18217_v20  ;;  %v5670_v18 = vadd.f32 %v17865_v52, %v5537_v63  ;;  %v5535_v15 = vadd.f32 %v5182_v41, %v4614_v55  ;;  %13693 = vmatprep.mubr.msk.bf16.mxu1 %vm1224_vm2, %v18217_v20  ;;  %v4638_v31 = vadd.f32 %v21459_v0, %v21458_v40  ;;  %v5795_v63 = vmax.f32 %v5667_v16, 0.0  ;;  %v21465_v0 = vld [vmem:[#allocation95_spill] sm:$0xff] }
 0x4d4   :  { %v13567_v38 = vpop.f32.mrf.mxu0  ;;  %13694 = vmatmul.mubr.msk.bf16.gmra.mxu1 %vm1224_vm2, %v18213_v61  ;;  %13806 = vmatmul.mubr.msk.bf16.gmra.mxu0 %vm1224_vm2, %v17938_v7  ;;  %v4651_v14 = vadd.f32 %v21466_v48, %v21465_v0 }
 0x4d5   :  { %v5798_v9 = vmax.f32 %v5670_v18, 0.0  ;;  %v5668_v1 = vadd.f32 %v17865_v52, %v5535_v15  ;;  %v5540_v45 = vadd.f32 %v13567_v38, %v4635_v21  ;;  %13809 = vmatprep.mubr.msk.bf16.mxu0 %vm1224_vm2, %v17971_v50  ;;  %v21463_v18 = vld [vmem:[#allocation140_spill] sm:$0xff]  ;;  %v18248_v38 = vpop.f32.mrf.mxu1 }
 0x4d6   :  { %v5195_v55 = vpop.f32.mrf.mxu0  ;;  %v4630_v11 = vadd.f32 %v21463_v18, %v21462_v22 }
 0x4d7   :  { %v18241_v41 = vpack.c.bf16 %v5798_v9, %v5797_v12  ;;  %v5796_v34 = vmax.f32 %v5668_v1, 0.0  ;;  %v5538_v39 = vadd.f32 %v5195_v55, %v4627_v56  ;;  %v5673_v21 = vadd.f32 %v17865_v52, %v5540_v45  ;;  %v21467_v9 = vld [vmem:[#allocation97_spill] sm:$0xff]  ;;  %v21468_v1 = vld [vmem:[#allocation147_spill] sm:$0xff]  ;;  %v18267_v22 = vpop.f32.mrf.mxu1 }
 0x4d8   :  { %v13568_v7 = vpop.f32.mrf.mxu0  ;;  %v4643_v55 = vadd.f32 %v21468_v1, %v21467_v9 }
 0x4d9   :  { %21461 = vst [vmem:[#allocation19_spill] sm:$0xff] %v18241_v41  ;;  %v18245_v15 = vpack.c.bf16 %v5796_v34, %v5795_v63  ;;  %v5541_v50 = vadd.f32 %v13568_v7, %v4638_v31  ;;  %v5671_v16 = vadd.f32 %v17865_v52, %v5538_v39  ;;  %v5801_v45 = vmax.f32 %v5673_v21, 0.0  ;;  %v21469_v39 = vld [vmem:[#allocation154_spill] sm:$0xff]  ;;  %v21470_v21 = vld [vmem:[#allocation32_spill] sm:$0xff]  ;;  %v18276_v1 = vpop.f32.mrf.mxu1 }
 0x4da   :  { %v5198_v40 = vpop.f32.mrf.mxu0  ;;  %v4654_v7 = vadd.f32 %v17749_v23, %v21469_v39 }
 0x4db   :  { %21464 = vst [vmem:[#allocation98_spill] sm:$0xff] %v18245_v15  ;;  %v5674_v12 = vadd.f32 %v17865_v52, %v5541_v50  ;;  %v5539_v56 = vadd.f32 %v5198_v40, %v4630_v11  ;;  %13697 = vmatprep.mubr.msk.bf16.mxu1 %vm1224_vm2, %v18245_v15  ;;  %v5799_v11 = vmax.f32 %v5671_v16, 0.0 }
 0x4dc   :  { %v13571_v63 = vpop.f32.mrf.mxu0  ;;  %13698 = vmatmul.mubr.msk.bf16.gmra.mxu1 %vm1224_vm2, %v18241_v41  ;;  %13810 = vmatmul.mubr.msk.bf16.gmra.mxu0 %vm1224_vm2, %v17967_v42 }
 0x4dd   :  { %v5802_v31 = vmax.f32 %v5674_v12, 0.0  ;;  %v5672_v48 = vadd.f32 %v17865_v52, %v5539_v56  ;;  %v5544_v34 = vadd.f32 %v13571_v63, %v4651_v14  ;;  %13813 = vmatprep.mubr.msk.bf16.mxu0 %vm1224_vm2, %v17998_v51  ;;  %v4646_v12 = vadd.f32 %v17755_v25, %v21470_v21  ;;  %v21472_v63 = vld [vmem:[#allocation30_spill] sm:$0xff]  ;;  %v21473_v25 = vld [vmem:[#allocation101_spill] sm:$0xff] }
 0x4de   :  { %v5211_v18 = vpop.f32.mrf.mxu0  ;;  %v4667_v39 = vadd.f32 %v17765_v27, %v21472_v63 }
 0x4df   :  { %v18269_v50 = vpack.c.bf16 %v5802_v31, %v5801_v45  ;;  %v5800_v40 = vmax.f32 %v5672_v48, 0.0  ;;  %v5542_v0 = vadd.f32 %v5211_v18, %v4643_v55  ;;  %v5677_v14 = vadd.f32 %v17865_v52, %v5544_v34 }
 0x4e0   :  { %v13572_v42 = vpop.f32.mrf.mxu0  ;;  %v4659_v31 = vadd.f32 %v17771_v13, %v21473_v25 }
 0x4e1   :  { %v18273_v56 = vpack.c.bf16 %v5800_v40, %v5799_v11  ;;  %v5545_v9 = vadd.f32 %v13572_v42, %v4654_v7  ;;  %v5675_v16 = vadd.f32 %v17865_v52, %v5542_v0  ;;  %v5805_v34 = vmax.f32 %v5677_v14, 0.0  ;;  %v21474_v11 = vld [vmem:[#allocation18_spill] sm:$0xff]  ;;  %v18295_v0 = vpop.f32.mrf.mxu1  ;;  %v21476_v14 = vld [vmem:[#allocation105_spill] sm:$0xff] }
 0x4e2   :  { %v5214_v23 = vpop.f32.mrf.mxu0  ;;  %v4670_v40 = vadd.f32 %v17781_v5, %v21474_v11  ;;  %v4662_v63 = vadd.f32 %v17787_v8, %v21476_v14  ;;  %v21479_v8 = vld [vmem:[#allocation109_spill] sm:$0xff] }
 0x4e3   :  { %21471 = vst [vmem:[#allocation77_spill] sm:$0xff] %v18273_v56  ;;  %v5678_v45 = vadd.f32 %v17865_v52, %v5545_v9  ;;  %v5543_v55 = vadd.f32 %v5214_v23, %v4646_v12  ;;  %13701 = vmatprep.mubr.msk.bf16.mxu1 %vm1224_vm2, %v18273_v56  ;;  %v5803_v42 = vmax.f32 %v5675_v16, 0.0  ;;  %v18304_v25 = vpop.f32.mrf.mxu1 }
 0x4e4   :  { %v13575_v48 = vpop.f32.mrf.mxu0  ;;  %13702 = vmatmul.mubr.msk.bf16.gmra.mxu1 %vm1224_vm2, %v18269_v50  ;;  %13814 = vmatmul.mubr.msk.bf16.gmra.mxu0 %vm1224_vm2, %v17994_v62  ;;  %v21537_v62 = vld [vmem:[#allocation93_spill] sm:$0xff] }
 0x4e5   :  { %v5806_v27 = vmax.f32 %v5678_v45, 0.0  ;;  %v5676_v7 = vadd.f32 %v17865_v52, %v5543_v55  ;;  %v5548_v18 = vadd.f32 %v13575_v48, %v4667_v39  ;;  %13817 = vmatprep.mubr.msk.bf16.mxu0 %vm1224_vm2, %v18024_v57  ;;  %v21478_v48 = vld [vmem:[#allocation20_spill] sm:$0xff] }
 0x4e6   :  { %v5227_v13 = vpop.f32.mrf.mxu0  ;;  %v4683_v11 = vadd.f32 %v17797_v49, %v21478_v48 }
 0x4e7   :  { %v18297_v21 = vpack.c.bf16 %v5806_v27, %v5805_v34  ;;  %v5804_v12 = vmax.f32 %v5676_v7, 0.0  ;;  %v5546_v9 = vadd.f32 %v5227_v13, %v4659_v31  ;;  %v5681_v39 = vadd.f32 %v17865_v52, %v5548_v18 }
 0x4e8   :  { %v13576_v23 = vpop.f32.mrf.mxu0  ;;  %v4675_v27 = vadd.f32 %v17803_v58, %v21479_v8 }
 0x4e9   :  { %21475 = vst [vmem:[#allocation16_spill] sm:$0xff] %v18297_v21  ;;  %v18301_v45 = vpack.c.bf16 %v5804_v12, %v5803_v42  ;;  %v5549_v55 = vadd.f32 %v13576_v23, %v4670_v40  ;;  %v5679_v16 = vadd.f32 %v17865_v52, %v5546_v9  ;;  %v5809_v18 = vmax.f32 %v5681_v39, 0.0  ;;  %v21480_v42 = vld [vmem:[#allocation22_spill] sm:$0xff]  ;;  %v18323_v9 = vpop.f32.mrf.mxu1  ;;  %v21482_v39 = vld [vmem:[#allocation113_spill] sm:$0xff] }
 0x4ea   :  { %v5230_v5 = vpop.f32.mrf.mxu0  ;;  %v4686_v12 = vadd.f32 %v17813_v54, %v21480_v42  ;;  %v4678_v48 = vadd.f32 %v17819_v60, %v21482_v39  ;;  %v21485_v60 = vld [vmem:[#allocation117_spill] sm:$0xff] }
 0x4eb   :  { %21477 = vst [vmem:[#allocation108_spill] sm:$0xff] %v18301_v45  ;;  %v5682_v34 = vadd.f32 %v17865_v52, %v5549_v55  ;;  %v5547_v31 = vadd.f32 %v5230_v5, %v4662_v63  ;;  %13705 = vmatprep.mubr.msk.bf16.mxu1 %vm1224_vm2, %v18301_v45  ;;  %v5807_v23 = vmax.f32 %v5679_v16, 0.0  ;;  %v18332_v8 = vpop.f32.mrf.mxu1 }
 0x4ec   :  { %v13579_v7 = vpop.f32.mrf.mxu0  ;;  %13706 = vmatmul.mubr.msk.bf16.gmra.mxu1 %vm1224_vm2, %v18297_v21  ;;  %13818 = vmatmul.mubr.msk.bf16.gmra.mxu0 %vm1224_vm2, %v18020_v44 }
 0x4ed   :  { %v5810_v49 = vmax.f32 %v5682_v34, 0.0  ;;  %v5680_v40 = vadd.f32 %v17865_v52, %v5547_v31  ;;  %v5552_v13 = vadd.f32 %v13579_v7, %v4683_v11  ;;  %13821 = vmatprep.mubr.msk.bf16.mxu0 %vm1224_vm2, %v18050_v17  ;;  %v21484_v7 = vld [vmem:[#allocation24_spill] sm:$0xff]  ;;  %v18351_v39 = vpop.f32.mrf.mxu1  ;;  %v21494_v17 = vld [vmem:[#allocation62_spill] sm:$0xff] }
 0x4ee   :  { %v5243_v58 = vpop.f32.mrf.mxu0  ;;  %v4699_v42 = vadd.f32 %v17829_v2, %v21484_v7 }
 0x4ef   :  { %v18325_v14 = vpack.c.bf16 %v5810_v49, %v5809_v18  ;;  %v5808_v63 = vmax.f32 %v5680_v40, 0.0  ;;  %v5550_v55 = vadd.f32 %v5243_v58, %v4675_v27  ;;  %v5685_v11 = vadd.f32 %v17865_v52, %v5552_v13  ;;  %v21486_v49 = vld [vmem:[#allocation55_spill] sm:$0xff] }
 0x4f0   :  { %v13580_v5 = vpop.f32.mrf.mxu0  ;;  %v4691_v40 = vadd.f32 %v21486_v49, %v21485_v60 }
 0x4f1   :  { %21481 = vst [vmem:[#allocation99_spill] sm:$0xff] %v18325_v14  ;;  %v18329_v34 = vpack.c.bf16 %v5808_v63, %v5807_v23  ;;  %v5553_v31 = vadd.f32 %v13580_v5, %v4686_v12  ;;  %v5683_v16 = vadd.f32 %v17865_v52, %v5550_v55  ;;  %v5813_v13 = vmax.f32 %v5685_v11, 0.0  ;;  %v21487_v63 = vld [vmem:[#allocation118_spill] sm:$0xff]  ;;  %v21488_v55 = vld [vmem:[#allocation72_spill] sm:$0xff] }
 0x4f2   :  { %v5246_v54 = vpop.f32.mrf.mxu0  ;;  %v4702_v5 = vadd.f32 %v21488_v55, %v21487_v63  ;;  %v21490_v11 = vld [vmem:[#allocation46_spill] sm:$0xff] }
 0x4f3   :  { %21483 = vst [vmem:[#allocation78_spill] sm:$0xff] %v18329_v34  ;;  %v5686_v18 = vadd.f32 %v17865_v52, %v5553_v31  ;;  %v5551_v27 = vadd.f32 %v5246_v54, %v4678_v48  ;;  %13709 = vmatprep.mubr.msk.bf16.mxu1 %vm1224_vm2, %v18329_v34  ;;  %v5811_v31 = vmax.f32 %v5683_v16, 0.0  ;;  %v21493_v55 = vld [vmem:[#allocation26_spill] sm:$0xff] }
 0x4f4   :  { %v13583_v58 = vpop.f32.mrf.mxu0  ;;  %13710 = vmatmul.mubr.msk.bf16.gmra.mxu1 %vm1224_vm2, %v18325_v14  ;;  %13822 = vmatmul.mubr.msk.bf16.gmra.mxu0 %vm1224_vm2, %v18046_v53  ;;  %v4715_v44 = vadd.f32 %v21494_v17, %v21493_v55  ;;  %v18367_v16 = vld [vmem:[%s20588_s4 + $0x2] ss:$0 sm:$0xff] }
 0x4f5   :  { %v5814_v2 = vmax.f32 %v5686_v18, 0.0  ;;  %v5684_v12 = vadd.f32 %v17865_v52, %v5551_v27  ;;  %v5556_v23 = vadd.f32 %v13583_v58, %v4699_v42  ;;  %13825 = vmatprep.mubr.msk.bf16.mxu0 %vm1224_vm2, %v18076_v19  ;;  %v21491_v18 = vld [vmem:[#allocation60_spill] sm:$0xff]  ;;  %v18360_v19 = vpop.f32.mrf.mxu1 }
 0x4f6   :  { %v5259_v48 = vpop.f32.mrf.mxu0  ;;  %v4694_v53 = vadd.f32 %v21491_v18, %v21490_v11 }
 0x4f7   :  { %v18353_v54 = vpack.c.bf16 %v5814_v2, %v5813_v13  ;;  %v5812_v7 = vmax.f32 %v5684_v12, 0.0  ;;  %v5554_v60 = vadd.f32 %v5259_v48, %v4691_v40  ;;  %v5689_v42 = vadd.f32 %v17865_v52, %v5556_v23  ;;  %v21495_v52 = vld [vmem:[#allocation120_spill] sm:$0xff]  ;;  %v21496_v12 = vld [vmem:[#allocation7_spill] sm:$0xff] }
 0x4f8   :  { %v13584_v49 = vpop.f32.mrf.mxu0  ;;  %v4707_v23 = vadd.f32 %v21496_v12, %v21495_v52 }
 0x4f9   :  { %21489 = vst [vmem:[#allocation102_spill] sm:$0xff] %v18353_v54  ;;  %v18357_v27 = vpack.c.bf16 %v5812_v7, %v5811_v31  ;;  %v5557_v58 = vadd.f32 %v13584_v49, %v4702_v5  ;;  %v5687_v40 = vadd.f32 %v18367_v16, %v5554_v60  ;;  %v5817_v17 = vmax.f32 %v5689_v42, 0.0  ;;  %v18384_v49 = vpop.f32.mrf.mxu1  ;;  %v21498_v42 = vld [vmem:[#allocation50_spill] sm:$0xff] }
 0x4fa   :  { %v5262_v63 = vpop.f32.mrf.mxu0 }
 0x4fb   :  { %21492 = vst [vmem:[#allocation21_spill] sm:$0xff] %v18357_v27  ;;  %v5690_v13 = vadd.f32 %v18367_v16, %v5557_v58  ;;  %v5555_v2 = vadd.f32 %v5262_v63, %v4694_v53  ;;  %13713 = vmatprep.mubr.msk.bf16.mxu1 %vm1224_vm2, %v18357_v27  ;;  %v21497_v53 = vld [vmem:[#allocation57_spill] sm:$0xff]  ;;  %v5815_v18 = vmax.f32 %v5687_v40, 0.0 }
 0x4fc   :  { %v13587_v5 = vpop.f32.mrf.mxu0  ;;  %13714 = vmatmul.mubr.msk.bf16.gmra.mxu1 %vm1224_vm2, %v18353_v54  ;;  %13826 = vmatmul.mubr.msk.bf16.gmra.mxu0 %vm1224_vm2, %v18072_v6  ;;  %v4718_v60 = vadd.f32 %v17881_v35, %v21497_v53  ;;  %v21500_v53 = vld [vmem:[#allocation27_spill] sm:$0xff]  ;;  %v21527_v6 = vld [vmem:[#allocation89_spill] sm:$0xff] }
 0x4fd   :  { %v5818_v48 = vmax.f32 %v5690_v13, 0.0  ;;  %v5688_v31 = vadd.f32 %v18367_v16, %v5555_v2  ;;  %v5560_v7 = vadd.f32 %v13587_v5, %v4715_v44  ;;  %13829 = vmatprep.mubr.msk.bf16.mxu0 %vm1224_vm2, %v18102_v29  ;;  %v4710_v13 = vadd.f32 %v17890_v30, %v21498_v42  ;;  %v18393_v5 = vpop.f32.mrf.mxu1  ;;  %v14526_v30 = vld [vmem:[%s20587_s3 + $0x150] sm:$0xff]  }
 0x4fe   :  { %v5275_v11 = vpop.f32.mrf.mxu0  ;;  %v4731_v29 = vadd.f32 %v17909_v24, %v21500_v53  ;;  %14047 = vmatprep.subr.bf16.mxu0 %v14526_v30  ;;  %v21503_v53 = vld [vmem:[#allocation124_spill] sm:$0xff] }
 0x4ff   :  { %v18386_v58 = vpack.c.bf16 %v5818_v48, %v5817_v17  ;;  %v5816_v63 = vmax.f32 %v5688_v31, 0.0  ;;  %v5558_v55 = vadd.f32 %v5275_v11, %v4707_v23  ;;  %v5693_v44 = vadd.f32 %v18367_v16, %v5560_v7  ;;  %v21501_v48 = vld [vmem:[#allocation122_spill] sm:$0xff]  ;;  %14048 = vmatpush3.bf16.msra.mxu0 %v14526_v30 }
 0x500   :  { %v13588_v52 = vpop.f32.mrf.mxu0  ;;  %v4723_v31 = vadd.f32 %v17921_v26, %v21501_v48  ;;  %v18415_v26 = vpop.f32.mrf.mxu1 }
 0x501   :  { %v18390_v2 = vpack.c.bf16 %v5816_v63, %v5815_v18  ;;  %v5561_v12 = vadd.f32 %v13588_v52, %v4718_v60  ;;  %v5691_v40 = vadd.f32 %v18367_v16, %v5558_v55  ;;  %v5821_v24 = vmax.f32 %v5693_v44, 0.0  ;;  %v21502_v63 = vld [vmem:[#allocation64_spill] sm:$0xff] }
 0x502   :  { %v5278_v35 = vpop.f32.mrf.mxu0  ;;  %v4734_v55 = vadd.f32 %v17936_v46, %v21502_v63  ;;  %v21504_v63 = vld [vmem:[#allocation54_spill] sm:$0xff] }
 0x503   :  { %21499 = vst [vmem:[#allocation103_spill] sm:$0xff] %v18390_v2  ;;  %v5694_v17 = vadd.f32 %v18367_v16, %v5561_v12  ;;  %v5559_v23 = vadd.f32 %v5278_v35, %v4710_v13  ;;  %13717 = vmatprep.mubr.msk.bf16.mxu1 %vm1224_vm2, %v18390_v2  ;;  %v5819_v42 = vmax.f32 %v5691_v40, 0.0  ;;  %v4747_v30 = vadd.f32 %v17963_v10, %v21504_v63  ;;  %v21508_v63 = vld [vmem:[#allocation84_spill] sm:$0xff] }
 0x504   :  { %v13591_v7 = vpop.f32.mrf.mxu0  ;;  %13718 = vmatmul.mubr.msk.bf16.gmra.mxu1 %vm1224_vm2, %v18386_v58  ;;  %13830 = vmatmul.mubr.msk.bf16.gmra.mxu0 %vm1224_vm2, %v18098_v33 }
 0x505   :  { %v5822_v60 = vmax.f32 %v5694_v17, 0.0  ;;  %v5692_v11 = vadd.f32 %v18367_v16, %v5559_v23  ;;  %v5564_v18 = vadd.f32 %v13591_v7, %v4731_v29  ;;  %13833 = vmatprep.mubr.msk.bf16.mxu0 %vm1224_vm2, %v18128_v59  ;;  %v4726_v29 = vadd.f32 %v17945_v36, %v21503_v53  ;;  %v18424_v7 = vpop.f32.mrf.mxu1  ;;  %v21505_v36 = vld [vmem:[#allocation126_spill] sm:$0xff]  ;;  %v21518_v59 = vld [vmem:[#allocation8_spill] sm:$0xff] }
 0x506   :  { %v5291_v52 = vpop.f32.mrf.mxu0 }
 0x507   :  { %v18417_v13 = vpack.c.bf16 %v5822_v60, %v5821_v24  ;;  %v5820_v12 = vmax.f32 %v5692_v11, 0.0  ;;  %v5562_v44 = vadd.f32 %v5291_v52, %v4723_v31  ;;  %v5697_v23 = vadd.f32 %v18367_v16, %v5564_v18 }
 0x508   :  { %v13592_v35 = vpop.f32.mrf.mxu0  ;;  %v4739_v60 = vadd.f32 %v17974_v28, %v21505_v36 }
 0x509   :  { %v18421_v17 = vpack.c.bf16 %v5820_v12, %v5819_v42  ;;  %v5565_v48 = vadd.f32 %v13592_v35, %v4734_v55  ;;  %v5695_v40 = vadd.f32 %v18367_v16, %v5562_v44  ;;  %v5825_v18 = vmax.f32 %v5697_v23, 0.0  ;;  %v21506_v42 = vld [vmem:[#allocation127_spill] sm:$0xff]  ;;  %v18443_v44 = vpop.f32.mrf.mxu1  ;;  %v21507_v23 = vld [vmem:[#allocation130_spill] sm:$0xff] }
 0x50a   :  { %v5294_v46 = vpop.f32.mrf.mxu0  ;;  %v4750_v12 = vadd.f32 %v17990_v32, %v21506_v42  ;;  %v21509_v42 = vld [vmem:[#allocation76_spill] sm:$0xff] }
 0x50b   :  { %v5698_v24 = vadd.f32 %v18367_v16, %v5565_v48  ;;  %v5563_v31 = vadd.f32 %v5294_v46, %v4726_v29  ;;  %13721 = vmatprep.mubr.msk.bf16.mxu1 %vm1224_vm2, %v18421_v17  ;;  %v5823_v35 = vmax.f32 %v5695_v40, 0.0 }
 0x50c   :  { %v13595_v11 = vpop.f32.mrf.mxu0  ;;  %13722 = vmatmul.mubr.msk.bf16.gmra.mxu1 %vm1224_vm2, %v18417_v13  ;;  %13834 = vmatmul.mubr.msk.bf16.gmra.mxu0 %vm1224_vm2, %v18124_v3 }
 0x50d   :  { %v5826_v10 = vmax.f32 %v5698_v24, 0.0  ;;  %v5696_v55 = vadd.f32 %v18367_v16, %v5563_v31  ;;  %v5568_v52 = vadd.f32 %v13595_v11, %v4747_v30  ;;  %13837 = vmatprep.mubr.msk.bf16.mxu0 %vm1224_vm2, %v18158_v4  ;;  %v4742_v24 = vadd.f32 %v21508_v63, %v21507_v23  ;;  %v18452_v11 = vpop.f32.mrf.mxu1  ;;  %v21510_v4 = vld [vmem:[#allocation65_spill] sm:$0xff] }
 0x50e   :  { %v5307_v28 = vpop.f32.mrf.mxu0  ;;  %v4763_v3 = vadd.f32 %v21510_v4, %v21509_v42 }
 0x50f   :  { %v18445_v53 = vpack.c.bf16 %v5826_v10, %v5825_v18  ;;  %v5824_v29 = vmax.f32 %v5696_v55, 0.0  ;;  %v5566_v48 = vadd.f32 %v5307_v28, %v4739_v60  ;;  %v5701_v30 = vadd.f32 %v18367_v16, %v5568_v52  ;;  %v21511_v10 = vld [vmem:[#allocation59_spill] sm:$0xff]  ;;  %v21512_v55 = vld [vmem:[#allocation66_spill] sm:$0xff]  ;;  %v18471_v63 = vpop.f32.mrf.mxu1 }
 0x510   :  { %v13596_v46 = vpop.f32.mrf.mxu0  ;;  %v4755_v28 = vadd.f32 %v21512_v55, %v21511_v10 }
 0x511   :  { %v18449_v31 = vpack.c.bf16 %v5824_v29, %v5823_v35  ;;  %v5569_v36 = vadd.f32 %v13596_v46, %v4750_v12  ;;  %v5699_v40 = vadd.f32 %v18367_v16, %v5566_v48  ;;  %v5829_v52 = vmax.f32 %v5701_v30, 0.0  ;;  %v21513_v48 = vld [vmem:[#allocation133_spill] sm:$0xff]  ;;  %v21514_v46 = vld [vmem:[#allocation11_spill] sm:$0xff]  ;;  %v21515_v30 = vld [vmem:[#allocation134_spill] sm:$0xff] }
 0x512   :  { %v5310_v32 = vpop.f32.mrf.mxu0  ;;  %v4766_v23 = vadd.f32 %v21514_v46, %v21513_v48  ;;  %v21517_v46 = vld [vmem:[#allocation61_spill] sm:$0xff] }
 0x513   :  { %v5702_v18 = vadd.f32 %v18367_v16, %v5569_v36  ;;  %v5567_v60 = vadd.f32 %v5310_v32, %v4742_v24  ;;  %13725 = vmatprep.mubr.msk.bf16.mxu1 %vm1224_vm2, %v18449_v31  ;;  %v5827_v36 = vmax.f32 %v5699_v40, 0.0  ;;  %v4779_v33 = vadd.f32 %v21518_v59, %v21517_v46 }
 0x514   :  { %v13599_v35 = vpop.f32.mrf.mxu0  ;;  %13726 = vmatmul.mubr.msk.bf16.gmra.mxu1 %vm1224_vm2, %v18445_v53  ;;  %13838 = vmatmul.mubr.msk.bf16.gmra.mxu0 %vm1224_vm2, %v18154_v43 }
 0x515   :  { %v5830_v4 = vmax.f32 %v5702_v18, 0.0  ;;  %v5700_v12 = vadd.f32 %v18367_v16, %v5567_v60  ;;  %v5572_v29 = vadd.f32 %v13599_v35, %v4763_v3  ;;  %13841 = vmatprep.mubr.msk.bf16.mxu0 %vm1224_vm2, %v18186_v37  ;;  %v21516_v18 = vld [vmem:[#allocation92_spill] sm:$0xff]  ;;  %v18480_v37 = vpop.f32.mrf.mxu1 }
 0x516   :  { %v5323_v24 = vpop.f32.mrf.mxu0  ;;  %v4758_v43 = vadd.f32 %v21516_v18, %v21515_v30 }
 0x517   :  { %v18473_v32 = vpack.c.bf16 %v5830_v4, %v5829_v52  ;;  %v5828_v42 = vmax.f32 %v5700_v12, 0.0  ;;  %v5570_v10 = vadd.f32 %v5323_v24, %v4755_v28  ;;  %v5705_v3 = vadd.f32 %v18367_v16, %v5572_v29  ;;  %v21519_v4 = vld [vmem:[#allocation137_spill] sm:$0xff]  ;;  %v18499_v30 = vpop.f32.mrf.mxu1 }
 0x518   :  { %v13600_v55 = vpop.f32.mrf.mxu0  ;;  %v21520_v12 = vld [vmem:[#allocation13_spill] sm:$0xff] }
 0x519   :  { %v18477_v60 = vpack.c.bf16 %v5828_v42, %v5827_v36  ;;  %v5573_v35 = vadd.f32 %v13600_v55, %v4766_v23  ;;  %v5703_v40 = vadd.f32 %v18367_v16, %v5570_v10  ;;  %v4771_v24 = vadd.f32 %v21520_v12, %v21519_v4  ;;  %v21522_v10 = vld [vmem:[#allocation86_spill] sm:$0xff] }
 0x51a   :  { %v5326_v48 = vpop.f32.mrf.mxu0  ;;  %v5833_v29 = vmax.f32 %v5705_v3, 0.0  ;;  %v21524_v3 = vld [vmem:[#allocation142_spill] sm:$0xff] }
 0x51b   :  { %v5706_v52 = vadd.f32 %v18367_v16, %v5573_v35  ;;  %v5571_v28 = vadd.f32 %v5326_v48, %v4758_v43  ;;  %13729 = vmatprep.mubr.msk.bf16.mxu1 %vm1224_vm2, %v18477_v60  ;;  %v21521_v43 = vld [vmem:[#allocation139_spill] sm:$0xff]  ;;  %v5831_v35 = vmax.f32 %v5703_v40, 0.0 }
 0x51c   :  { %v13603_v36 = vpop.f32.mrf.mxu0  ;;  %13730 = vmatmul.mubr.msk.bf16.gmra.mxu1 %vm1224_vm2, %v18473_v32  ;;  %13842 = vmatmul.mubr.msk.bf16.gmra.mxu0 %vm1224_vm2, %v18182_v47  ;;  %v4782_v55 = vadd.f32 %v21522_v10, %v21521_v43  ;;  %v21526_v10 = vld [vmem:[#allocation143_spill] sm:$0xff] }
 0x51d   :  { %v5834_v59 = vmax.f32 %v5706_v52, 0.0  ;;  %v5704_v23 = vadd.f32 %v18367_v16, %v5571_v28  ;;  %v5576_v42 = vadd.f32 %v13603_v36, %v4779_v33  ;;  %13845 = vmatprep.mubr.msk.bf16.mxu0 %vm1224_vm2, %v18217_v20  ;;  %v21525_v52 = vld [vmem:[#allocation96_spill] sm:$0xff]  ;;  %v18508_v20 = vpop.f32.mrf.mxu1  ;;  %v4795_v57 = vadd.f32 %v21527_v6, %v21526_v10 }
 0x51e   :  { %v5339_v18 = vpop.f32.mrf.mxu0  ;;  %v4774_v47 = vadd.f32 %v21525_v52, %v21524_v3 }
 0x51f   :  { %v18501_v48 = vpack.c.bf16 %v5834_v59, %v5833_v29  ;;  %v5832_v46 = vmax.f32 %v5704_v23, 0.0  ;;  %v5574_v4 = vadd.f32 %v5339_v18, %v4771_v24  ;;  %v5709_v33 = vadd.f32 %v18367_v16, %v5576_v42  ;;  %v21528_v59 = vld [vmem:[#allocation146_spill] sm:$0xff]  ;;  %v21529_v23 = vld [vmem:[#allocation15_spill] sm:$0xff]  ;;  %v18527_v3 = vpop.f32.mrf.mxu1 }
 0x520   :  { %v13604_v12 = vpop.f32.mrf.mxu0  ;;  %v4787_v18 = vadd.f32 %v21529_v23, %v21528_v59 }
 0x521   :  { %21523 = vst [vmem:[#allocation6_spill] sm:$0xff] %v18501_v48  ;;  %v18505_v28 = vpack.c.bf16 %v5832_v46, %v5831_v35  ;;  %v5577_v36 = vadd.f32 %v13604_v12, %v4782_v55  ;;  %v5707_v40 = vadd.f32 %v18367_v16, %v5574_v4  ;;  %v5837_v42 = vmax.f32 %v5709_v33, 0.0  ;;  %v21531_v4 = vld [vmem:[#allocation12_spill] sm:$0xff]  ;;  %v21533_v33 = vld [vmem:[#allocation149_spill] sm:$0xff] }
 0x522   :  { %v5342_v43 = vpop.f32.mrf.mxu0 }
 0x523   :  { %v5710_v29 = vadd.f32 %v18367_v16, %v5577_v36  ;;  %v5575_v24 = vadd.f32 %v5342_v43, %v4774_v47  ;;  %13733 = vmatprep.mubr.msk.bf16.mxu1 %vm1224_vm2, %v18505_v28  ;;  %v21530_v47 = vld [vmem:[#allocation29_spill] sm:$0xff]  ;;  %v5835_v36 = vmax.f32 %v5707_v40, 0.0 }
 0x524   :  { %v13607_v35 = vpop.f32.mrf.mxu0  ;;  %13734 = vmatmul.mubr.msk.bf16.gmra.mxu1 %vm1224_vm2, %v18501_v48  ;;  %13846 = vmatmul.mubr.msk.bf16.gmra.mxu0 %vm1224_vm2, %v18213_v61  ;;  %v4798_v12 = vadd.f32 %v21531_v4, %v21530_v47  ;;  %v21536_v4 = vld [vmem:[#allocation150_spill] sm:$0xff] }
 0x525   :  { %v5838_v6 = vmax.f32 %v5710_v29, 0.0  ;;  %v5708_v55 = vadd.f32 %v18367_v16, %v5575_v24  ;;  %v5580_v46 = vadd.f32 %v13607_v35, %v4795_v57  ;;  %13849 = vmatprep.mubr.msk.bf16.mxu0 %vm1224_vm2, %v18245_v15  ;;  %v21534_v29 = vld [vmem:[#allocation100_spill] sm:$0xff]  ;;  %v18536_v15 = vpop.f32.mrf.mxu1  ;;  %v4811_v48 = vadd.f32 %v21537_v62, %v21536_v4 }
 0x526   :  { %v5355_v52 = vpop.f32.mrf.mxu0  ;;  %v4790_v61 = vadd.f32 %v21534_v29, %v21533_v33 }
 0x527   :  { %v18529_v43 = vpack.c.bf16 %v5838_v6, %v5837_v42  ;;  %v5836_v10 = vmax.f32 %v5708_v55, 0.0  ;;  %v5578_v59 = vadd.f32 %v5355_v52, %v4787_v18  ;;  %v5713_v57 = vadd.f32 %v18367_v16, %v5580_v46  ;;  %v21538_v6 = vld [vmem:[#allocation152_spill] sm:$0xff]  ;;  %v18555_v33 = vpop.f32.mrf.mxu1 }
 0x528   :  { %v13608_v23 = vpop.f32.mrf.mxu0  ;;  %v21539_v55 = vld [vmem:[#allocation28_spill] sm:$0xff] }
 0x529   :  { %21532 = vst [vmem:[#allocation106_spill] sm:$0xff] %v18529_v43  ;;  %v18533_v24 = vpack.c.bf16 %v5836_v10, %v5835_v36  ;;  %v5581_v35 = vadd.f32 %v13608_v23, %v4798_v12  ;;  %v5711_v40 = vadd.f32 %v18367_v16, %v5578_v59  ;;  %v4803_v52 = vadd.f32 %v21539_v55, %v21538_v6  ;;  %v21541_v59 = vld [vmem:[#allocation4_spill] sm:$0xff] }
 0x52a   :  { %v5358_v47 = vpop.f32.mrf.mxu0  ;;  %v5841_v46 = vmax.f32 %v5713_v57, 0.0  ;;  %v21542_v57 = vld [vmem:[#allocation155_spill] sm:$0xff] }
 0x52b   :  { %21535 = vst [vmem:[#allocation112_spill] sm:$0xff] %v18533_v24  ;;  %v5714_v42 = vadd.f32 %v18367_v16, %v5581_v35  ;;  %v5579_v18 = vadd.f32 %v5358_v47, %v4790_v61  ;;  %13737 = vmatprep.mubr.msk.bf16.mxu1 %vm1224_vm2, %v18533_v24  ;;  %v21540_v61 = vld [vmem:[#allocation153_spill] sm:$0xff]  ;;  %v5839_v35 = vmax.f32 %v5711_v40, 0.0 }
 0x52c   :  { %v13611_v36 = vpop.f32.mrf.mxu0  ;;  %13738 = vmatmul.mubr.msk.bf16.gmra.mxu1 %vm1224_vm2, %v18529_v43  ;;  %13850 = vmatmul.mubr.msk.bf16.gmra.mxu0 %vm1224_vm2, %v18241_v41  ;;  %v4814_v23 = vadd.f32 %v21541_v59, %v21540_v61  ;;  %v21544_v59 = vld [vmem:[#allocation33_spill] sm:$0xff]  ;;  %v21545_v43 = vld [vmem:[#allocation75_spill] sm:$0xff] }
 0x52d   :  { %v5842_v62 = vmax.f32 %v5714_v42, 0.0  ;;  %v5712_v12 = vadd.f32 %v18367_v16, %v5579_v18  ;;  %v5584_v10 = vadd.f32 %v13611_v36, %v4811_v48  ;;  %13853 = vmatprep.mubr.msk.bf16.mxu0 %vm1224_vm2, %v18273_v56  ;;  %v21543_v42 = vld [vmem:[#allocation151_spill] sm:$0xff]  ;;  %v18564_v56 = vpop.f32.mrf.mxu1  ;;  %v4827_v24 = vadd.f32 %v21545_v43, %v21544_v59 }
 0x52e   :  { %v5371_v29 = vpop.f32.mrf.mxu0  ;;  %v4806_v41 = vadd.f32 %v21543_v42, %v21542_v57 }
 0x52f   :  { %v18557_v47 = vpack.c.bf16 %v5842_v62, %v5841_v46  ;;  %v5840_v4 = vmax.f32 %v5712_v12, 0.0  ;;  %v5582_v6 = vadd.f32 %v5371_v29, %v4803_v52  ;;  %v5717_v48 = vadd.f32 %v18367_v16, %v5584_v10  ;;  %v21546_v62 = vld [vmem:[#allocation31_spill] sm:$0xff] }
 0x530   :  { %v13612_v55 = vpop.f32.mrf.mxu0  ;;  %v4819_v12 = vadd.f32 %v18248_v38, %v21546_v62 }
 0x531   :  { %v18561_v18 = vpack.c.bf16 %v5840_v4, %v5839_v35  ;;  %v5585_v36 = vadd.f32 %v13612_v55, %v4814_v23  ;;  %v5715_v40 = vadd.f32 %v18367_v16, %v5582_v6  ;;  %v5845_v43 = vmax.f32 %v5717_v48, 0.0  ;;  %v21547_v4 = vld [vmem:[#allocation35_spill] sm:$0xff] }
 0x532   :  { %v5374_v61 = vpop.f32.mrf.mxu0  ;;  %v4830_v38 = vadd.f32 %v18267_v22, %v21547_v4 }
 0x533   :  { %v5718_v46 = vadd.f32 %v18367_v16, %v5585_v36  ;;  %v5583_v52 = vadd.f32 %v5374_v61, %v4806_v41  ;;  %13741 = vmatprep.mubr.msk.bf16.mxu1 %vm1224_vm2, %v18561_v18  ;;  %v5843_v57 = vmax.f32 %v5715_v40, 0.0 }
 0x534   :  { %v13615_v29 = vpop.f32.mrf.mxu0  ;;  %v18574_v10 = vpop.f32.mrf.mxu1  ;;  %13742 = vmatmul.mubr.msk.bf16.gmra.mxu1 %vm1224_vm2, %v18557_v47  ;;  %13854 = vmatmul.mubr.msk.bf16.gmra.mxu0 %vm1224_vm2, %v18269_v50 }
 0x535   :  { %v5846_v23 = vmax.f32 %v5718_v46, 0.0  ;;  %v5716_v35 = vadd.f32 %v18367_v16, %v5583_v52  ;;  %v5588_v41 = vadd.f32 %v13615_v29, %v4827_v24  ;;  %13857 = vmatprep.mubr.msk.bf16.mxu0 %vm1224_vm2, %v18301_v45  ;;  %v21548_v46 = vld [vmem:[#allocation34_spill] sm:$0xff]  ;;  %v21549_v45 = vld [vmem:[#allocation37_spill] sm:$0xff] }
 0x536   :  { %v5387_v6 = vpop.f32.mrf.mxu0  ;;  %v18585_v55 = vpop.f32.mrf.mxu1  ;;  %v4822_v24 = vadd.f32 %v18276_v1, %v21548_v46  ;;  %v4843_v40 = vadd.f32 %v18295_v0, %v21549_v45  ;;  %v21550_v1 = vld [vmem:[#allocation36_spill] sm:$0xff] }
 0x537   :  { %v18587_v42 = vpack.c.bf16 %v5846_v23, %v5845_v43  ;;  %v5844_v36 = vmax.f32 %v5716_v35, 0.0  ;;  %v5586_v61 = vadd.f32 %v5387_v6, %v4819_v12  ;;  %v5721_v62 = vadd.f32 %v18367_v16, %v5588_v41 }
 0x538   :  { %v13616_v59 = vpop.f32.mrf.mxu0  ;;  %v18589_v48 = vpop.f32.mrf.mxu1  ;;  %v4835_v35 = vadd.f32 %v18304_v25, %v21550_v1 }
 0x539   :  { %v18593_v52 = vpack.c.bf16 %v5844_v36, %v5843_v57  ;;  %v5589_v29 = vadd.f32 %v13616_v59, %v4830_v38  ;;  %v5719_v43 = vadd.f32 %v18367_v16, %v5586_v61  ;;  %v5849_v0 = vmax.f32 %v5721_v62, 0.0  ;;  %v21551_v36 = vld [vmem:[#allocation41_spill] sm:$0xff] }
 0x53a   :  { %v5390_v22 = vpop.f32.mrf.mxu0  ;;  %v18596_v4 = vpop.f32.mrf.mxu1  ;;  %v4846_v25 = vadd.f32 %v18323_v9, %v21551_v36 }
 0x53b   :  { %v5722_v12 = vadd.f32 %v18367_v16, %v5589_v29  ;;  %v5587_v23 = vadd.f32 %v5390_v22, %v4822_v24  ;;  %13745 = vmatprep.mubr.msk.bf16.mxu1 %vm1224_vm2, %v18593_v52  ;;  %v5847_v46 = vmax.f32 %v5719_v43, 0.0 }
 0x53c   :  { %v13619_v6 = vpop.f32.mrf.mxu0  ;;  %v18606_v41 = vpop.f32.mrf.mxu1  ;;  %13746 = vmatmul.mubr.msk.bf16.gmra.mxu1 %vm1224_vm2, %v18587_v42  ;;  %13858 = vmatmul.mubr.msk.bf16.gmra.mxu0 %vm1224_vm2, %v18297_v21  ;;  %v21553_v21 = vld [vmem:[#allocation40_spill] sm:$0xff] }
 0x53d   :  { %v5850_v45 = vmax.f32 %v5722_v12, 0.0  ;;  %v5720_v38 = vadd.f32 %v18367_v16, %v5587_v23  ;;  %v5592_v57 = vadd.f32 %v13619_v6, %v4843_v40  ;;  %13861 = vmatprep.mubr.msk.bf16.mxu0 %vm1224_vm2, %v18329_v34  ;;  %v21552_v12 = vld [vmem:[#allocation38_spill] sm:$0xff]  ;;  %v4859_v43 = vadd.f32 %v18351_v39, %v21553_v21 }
 0x53e   :  { %v5403_v61 = vpop.f32.mrf.mxu0  ;;  %v18617_v59 = vpop.f32.mrf.mxu1  ;;  %v4838_v40 = vadd.f32 %v18332_v8, %v21552_v12  ;;  %v14527_v8 = vld [vmem:[%s20587_s3 + $0x148] sm:$0xff]  }
 0x53f   :  { %v18619_v24 = vpack.c.bf16 %v5850_v45, %v5849_v0  ;;  %v5848_v29 = vmax.f32 %v5720_v38, 0.0  ;;  %v5590_v22 = vadd.f32 %v5403_v61, %v4835_v35  ;;  %v5725_v6 = vadd.f32 %v18367_v16, %v5592_v57  ;;  %v21554_v38 = vld [vmem:[#allocation39_spill] sm:$0xff]  ;;  %14049 = vmatprep.subr.bf16.mxu0 %v14527_v8 }
 0x540   :  { %v13620_v1 = vpop.f32.mrf.mxu0  ;;  %v18621_v62 = vpop.f32.mrf.mxu1  ;;  %v4851_v57 = vadd.f32 %v18360_v19, %v21554_v38  ;;  %14050 = vmatpush3.bf16.msra.mxu0 %v14527_v8  ;;  %v21557_v8 = vld [vmem:[#allocation45_spill] sm:$0xff] }
 0x541   :  { %v18625_v23 = vpack.c.bf16 %v5848_v29, %v5847_v46  ;;  %v5593_v34 = vadd.f32 %v13620_v1, %v4846_v25  ;;  %v5723_v0 = vadd.f32 %v18367_v16, %v5590_v22  ;;  %v5853_v21 = vmax.f32 %v5725_v6, 0.0  ;;  %v21555_v29 = vld [vmem:[#allocation43_spill] sm:$0xff] }
 0x542   :  { %v5406_v9 = vpop.f32.mrf.mxu0  ;;  %v18628_v36 = vpop.f32.mrf.mxu1  ;;  %v4862_v19 = vadd.f32 %v18384_v49, %v21555_v29 }
 0x543   :  { %v5726_v35 = vadd.f32 %v18367_v16, %v5593_v34  ;;  %v5591_v45 = vadd.f32 %v5406_v9, %v4838_v40  ;;  %13749 = vmatprep.mubr.msk.bf16.mxu1 %vm1224_vm2, %v18625_v23  ;;  %v5851_v12 = vmax.f32 %v5723_v0, 0.0  ;;  %v4875_v0 = vadd.f32 %v18415_v26, %v21557_v8 }
 0x544   :  { %v13623_v25 = vpop.f32.mrf.mxu0  ;;  %v18641_v61 = vpop.f32.mrf.mxu1  ;;  %13750 = vmatmul.mubr.msk.bf16.gmra.mxu1 %vm1224_vm2, %v18619_v24  ;;  %13862 = vmatmul.mubr.msk.bf16.gmra.mxu0 %vm1224_vm2, %v18325_v14 }
 0x545   :  { %v5854_v34 = vmax.f32 %v5726_v35, 0.0  ;;  %v5724_v39 = vadd.f32 %v18367_v16, %v5591_v45  ;;  %v5596_v46 = vadd.f32 %v13623_v25, %v4859_v43  ;;  %13865 = vmatprep.mubr.msk.bf16.mxu0 %vm1224_vm2, %v18357_v27  ;;  %v21556_v43 = vld [vmem:[#allocation42_spill] sm:$0xff] }
 0x546   :  { %v5419_v22 = vpop.f32.mrf.mxu0  ;;  %v18652_v1 = vpop.f32.mrf.mxu1  ;;  %v4854_v45 = vadd.f32 %v18393_v5, %v21556_v43  ;;  %v21558_v5 = vld [vmem:[#allocation44_spill] sm:$0xff] }
 0x547   :  { %v18654_v40 = vpack.c.bf16 %v5854_v34, %v5853_v21  ;;  %v5852_v9 = vmax.f32 %v5724_v39, 0.0  ;;  %v5594_v6 = vadd.f32 %v5419_v22, %v4851_v57  ;;  %v5729_v27 = vadd.f32 %v18367_v16, %v5596_v46 }
 0x548   :  { %v13624_v35 = vpop.f32.mrf.mxu0  ;;  %v18656_v38 = vpop.f32.mrf.mxu1  ;;  %v4867_v39 = vadd.f32 %v18424_v7, %v21558_v5 }
 0x549   :  { %v18660_v25 = vpack.c.bf16 %v5852_v9, %v5851_v12  ;;  %v5597_v49 = vadd.f32 %v13624_v35, %v4862_v19  ;;  %v5727_v21 = vadd.f32 %v18367_v16, %v5594_v6  ;;  %v5857_v26 = vmax.f32 %v5729_v27, 0.0  ;;  %v21559_v6 = vld [vmem:[#allocation49_spill] sm:$0xff] }
 0x54a   :  { %v5422_v29 = vpop.f32.mrf.mxu0  ;;  %v18663_v14 = vpop.f32.mrf.mxu1  ;;  %v4878_v7 = vadd.f32 %v18443_v44, %v21559_v6 }
 0x54b   :  { %v5730_v57 = vadd.f32 %v18367_v16, %v5597_v49  ;;  %v5595_v34 = vadd.f32 %v5422_v29, %v4854_v45  ;;  %13753 = vmatprep.mubr.msk.bf16.mxu1 %vm1224_vm2, %v18660_v25  ;;  %v5855_v45 = vmax.f32 %v5727_v21, 0.0 }
 0x54c   :  { %v13627_v22 = vpop.f32.mrf.mxu0  ;;  %v18673_v46 = vpop.f32.mrf.mxu1  ;;  %13754 = vmatmul.mubr.msk.bf16.gmra.mxu1 %vm1224_vm2, %v18654_v40  ;;  %13866 = vmatmul.mubr.msk.bf16.gmra.mxu0 %vm1224_vm2, %v18353_v54  ;;  %v21561_v54 = vld [vmem:[#allocation51_spill] sm:$0xff] }
 0x54d   :  { %v5858_v19 = vmax.f32 %v5730_v57, 0.0  ;;  %v5728_v12 = vadd.f32 %v18367_v16, %v5595_v34  ;;  %v5600_v9 = vadd.f32 %v13627_v22, %v4875_v0  ;;  %13869 = vmatprep.mubr.msk.bf16.mxu0 %vm1224_vm2, %v18390_v2  ;;  %v21560_v57 = vld [vmem:[#allocation48_spill] sm:$0xff]  ;;  %v4891_v21 = vadd.f32 %v18471_v63, %v21561_v54 }
 0x54e   :  { %v5435_v35 = vpop.f32.mrf.mxu0  ;;  %v18684_v43 = vpop.f32.mrf.mxu1  ;;  %v4870_v0 = vadd.f32 %v18452_v11, %v21560_v57  ;;  %v21562_v11 = vld [vmem:[#allocation67_spill] sm:$0xff] }
 0x54f   :  { %v18686_v49 = vpack.c.bf16 %v5858_v19, %v5857_v26  ;;  %v5856_v29 = vmax.f32 %v5728_v12, 0.0  ;;  %v5598_v8 = vadd.f32 %v5435_v35, %v4867_v39  ;;  %v5733_v22 = vadd.f32 %v18367_v16, %v5600_v9 }
 0x550   :  { %v13628_v5 = vpop.f32.mrf.mxu0  ;;  %v18688_v27 = vpop.f32.mrf.mxu1  ;;  %v4883_v12 = vadd.f32 %v18480_v37, %v21562_v11 }
 0x551   :  { %v18692_v34 = vpack.c.bf16 %v5856_v29, %v5855_v45  ;;  %v5601_v2 = vadd.f32 %v13628_v5, %v4878_v7  ;;  %v5731_v26 = vadd.f32 %v18367_v16, %v5598_v8  ;;  %v5861_v54 = vmax.f32 %v5733_v22, 0.0  ;;  %v21564_v45 = vld [vmem:[#allocation53_spill] sm:$0xff] }
 0x552   :  { %v5438_v44 = vpop.f32.mrf.mxu0  ;;  %v18695_v6 = vpop.f32.mrf.mxu1  ;;  %v4894_v37 = vadd.f32 %v18499_v30, %v21564_v45 }
 0x553   :  { %v5734_v39 = vadd.f32 %v18367_v16, %v5601_v2  ;;  %v5599_v19 = vadd.f32 %v5438_v44, %v4870_v0  ;;  %13757 = vmatprep.mubr.msk.bf16.mxu1 %vm1224_vm2, %v18692_v34  ;;  %v5859_v5 = vmax.f32 %v5731_v26, 0.0 }
 0x554   :  { %v13631_v35 = vpop.f32.mrf.mxu0  ;;  %v18705_v9 = vpop.f32.mrf.mxu1  ;;  %13758 = vmatmul.mubr.msk.bf16.gmra.mxu1 %vm1224_vm2, %v18686_v49  ;;  %13870 = vmatmul.mubr.msk.bf16.gmra.mxu0 %vm1224_vm2, %v18386_v58 }
 0x555   :  { %21563 = vst [vmem:[#allocation107_spill] sm:$0xff] %v18705_v9  ;;  %v5862_v63 = vmax.f32 %v5734_v39, 0.0  ;;  %v5732_v2 = vadd.f32 %v18367_v16, %v5599_v19  ;;  %v5604_v7 = vadd.f32 %v13631_v35, %v4891_v21  ;;  %13873 = vmatprep.mubr.msk.bf16.mxu0 %vm1224_vm2, %v18421_v17  ;;  %v21566_v39 = vld [vmem:[#allocation2_spill] sm:$0xff] }
 0x556   :  { %v5451_v29 = vpop.f32.mrf.mxu0  ;;  %v18716_v8 = vpop.f32.mrf.mxu1  ;;  %v4886_v21 = vadd.f32 %v18508_v20, %v21566_v39  ;;  %v21568_v20 = vld [vmem:[#allocation58_spill] sm:$0xff] }
 0x557   :  { %21565 = vst [vmem:[#allocation79_spill] sm:$0xff] %v18716_v8  ;;  %v18718_v57 = vpack.c.bf16 %v5862_v63, %v5861_v54  ;;  %v5860_v0 = vmax.f32 %v5732_v2, 0.0  ;;  %v5602_v44 = vadd.f32 %v5451_v29, %v4883_v12  ;;  %v5737_v35 = vadd.f32 %v18367_v16, %v5604_v7  ;;  %v21567_v8 = vld [vmem:[#allocation56_spill] sm:$0xff] }
 0x558   :  { %v13632_v11 = vpop.f32.mrf.mxu0  ;;  %v18720_v22 = vpop.f32.mrf.mxu1  ;;  %v4907_v26 = vadd.f32 %v18527_v3, %v21567_v8  ;;  %v4899_v2 = vadd.f32 %v18536_v15, %v21568_v20 }
 0x559   :  { %v18724_v19 = vpack.c.bf16 %v5860_v0, %v5859_v5  ;;  %v5605_v9 = vadd.f32 %v13632_v11, %v4894_v37  ;;  %v5735_v54 = vadd.f32 %v18367_v16, %v5602_v44  ;;  %v5865_v3 = vmax.f32 %v5737_v35, 0.0  ;;  %v21570_v5 = vld [vmem:[#allocation3_spill] sm:$0xff] }
 0x55a   :  { %v5454_v30 = vpop.f32.mrf.mxu0  ;;  %v18727_v45 = vpop.f32.mrf.mxu1  ;;  %v4910_v15 = vadd.f32 %v18555_v33, %v21570_v5 }
 0x55b   :  { %v5738_v12 = vadd.f32 %v18367_v16, %v5605_v9  ;;  %v5603_v63 = vadd.f32 %v5454_v30, %v4886_v21  ;;  %13761 = vmatprep.mubr.msk.bf16.mxu1 %vm1224_vm2, %v18724_v19  ;;  %v5863_v11 = vmax.f32 %v5735_v54, 0.0 }
 0x55c   :  { %v13635_v29 = vpop.f32.mrf.mxu0  ;;  %v18737_v7 = vpop.f32.mrf.mxu1  ;;  %13762 = vmatmul.mubr.msk.bf16.gmra.mxu1 %vm1224_vm2, %v18718_v57  ;;  %13874 = vmatmul.mubr.msk.bf16.gmra.mxu0 %vm1224_vm2, %v18417_v13 }
 0x55d   :  { %21569 = vst [vmem:[#allocation110_spill] sm:$0xff] %v18737_v7  ;;  %v5866_v37 = vmax.f32 %v5738_v12, 0.0  ;;  %v5736_v9 = vadd.f32 %v18367_v16, %v5603_v63  ;;  %v5608_v8 = vadd.f32 %v13635_v29, %v4907_v26  ;;  %13877 = vmatprep.mubr.msk.bf16.mxu0 %vm1224_vm2, %v18449_v31  ;;  %v21571_v12 = vld [vmem:[#allocation5_spill] sm:$0xff] }
 0x55e   :  { %v5467_v0 = vpop.f32.mrf.mxu0  ;;  %v18748_v44 = vpop.f32.mrf.mxu1  ;;  %v4902_v26 = vadd.f32 %v18564_v56, %v21571_v12 }
 0x55f   :  { %v18750_v39 = vpack.c.bf16 %v5866_v37, %v5865_v3  ;;  %v5864_v21 = vmax.f32 %v5736_v9, 0.0  ;;  %v5606_v30 = vadd.f32 %v5467_v0, %v4899_v2  ;;  %v5741_v29 = vadd.f32 %v18367_v16, %v5608_v8 }
 0x560   :  { %v13636_v20 = vpop.f32.mrf.mxu0  ;;  %v18752_v35 = vpop.f32.mrf.mxu1 }
 0x561   :  { %v18756_v63 = vpack.c.bf16 %v5864_v21, %v5863_v11  ;;  %v5609_v7 = vadd.f32 %v13636_v20, %v4910_v15  ;;  %v5739_v54 = vadd.f32 %v18367_v16, %v5606_v30  ;;  %v5869_v9 = vmax.f32 %v5741_v29, 0.0 }
 0x562   :  { %v5470_v33 = vpop.f32.mrf.mxu0  ;;  %v18759_v5 = vpop.f32.mrf.mxu1 }
 0x563   :  { %21572 = vst [vmem:[#allocation23_spill] sm:$0xff] %v18759_v5  ;;  %v5742_v3 = vadd.f32 %v18367_v16, %v5609_v7  ;;  %v5607_v37 = vadd.f32 %v5470_v33, %v4902_v26  ;;  %13765 = vmatprep.mubr.msk.bf16.mxu1 %vm1224_vm2, %v18756_v63  ;;  %v5867_v21 = vmax.f32 %v5739_v54, 0.0 }
 0x564   :  { %v18765_v2 = vpop.f32.mrf.mxu1  ;;  %13766 = vmatmul.mubr.msk.bf16.gmra.mxu1 %vm1224_vm2, %v18750_v39  ;;  %v13783_v56 = vpop.f32.mrf.mxu0  ;;  %13878 = vmatmul.mubr.msk.bf16.gmra.mxu0 %vm1224_vm2, %v18445_v53 }
 0x565   :  { %21573 = vst [vmem:[#allocation111_spill] sm:$0xff] %v18765_v2  ;;  %v5870_v8 = vmax.f32 %v5742_v3, 0.0  ;;  %v5740_v15 = vadd.f32 %v18367_v16, %v5607_v37  ;;  %v18773_v0 = vadd.f32 %v13783_v56, %v18574_v10  ;;  %13881 = vmatprep.mubr.msk.bf16.mxu0 %vm1224_vm2, %v18477_v60 }
 0x566   :  { %v18777_v7 = vpop.f32.mrf.mxu1  ;;  %v6781_v11 = vpop.f32.mrf.mxu0 }
 0x567   :  { %21574 = vst [vmem:[#allocation81_spill] sm:$0xff] %v18777_v7  ;;  %v18779_v30 = vpack.c.bf16 %v5870_v8, %v5869_v9  ;;  %v5868_v20 = vmax.f32 %v5740_v15, 0.0  ;;  %v18782_v12 = vadd.f32 %v6781_v11, %v18585_v55 }
 0x568   :  { %v18784_v26 = vpop.f32.mrf.mxu1  ;;  %v13784_v29 = vpop.f32.mrf.mxu0 }
 0x569   :  { %21575 = vst [vmem:[#allocation114_spill] sm:$0xff] %v18784_v26  ;;  %v18786_v16 = vpack.c.bf16 %v5868_v20, %v5867_v21  ;;  %v18789_v10 = vadd.f32 %v13784_v29, %v18589_v48 }
 0x56a   :  { %v18791_v33 = vpop.f32.mrf.mxu1  ;;  %v6784_v3 = vpop.f32.mrf.mxu0 }
 0x56b   :  { %21576 = vst [vmem:[#allocation82_spill] sm:$0xff] %v18791_v33  ;;  %v18794_v37 = vadd.f32 %v6784_v3, %v18596_v4  ;;  %13769 = vmatprep.mubr.msk.bf16.mxu1 %vm1224_vm2, %v18786_v16  ;;  %v21582_v3 = vld [vmem:[#allocation6_spill] sm:$0xff] }
 0x56c   :  { %v18798_v54 = vpop.f32.mrf.mxu1  ;;  %13770 = vmatmul.mubr.msk.bf16.gmra.mxu1 %vm1224_vm2, %v18779_v30  ;;  %v13787_v55 = vpop.f32.mrf.mxu0  ;;  %13882 = vmatmul.mubr.msk.bf16.gmra.mxu0 %vm1224_vm2, %v18473_v32 }
 0x56d   :  { %21577 = vst [vmem:[#allocation115_spill] sm:$0xff] %v18798_v54  ;;  %v18805_v48 = vadd.f32 %v13787_v55, %v18606_v41  ;;  %13885 = vmatprep.mubr.msk.bf16.mxu0 %vm1224_vm2, %v18505_v28  ;;  %13917 = vmatprep.mubr.msk.bf16.mxu1 %vm1224_vm2, %v17998_v51 }
 0x56e   :  { %v18811_v4 = vpop.f32.mrf.mxu1  ;;  %v6797_v56 = vpop.f32.mrf.mxu0 }
 0x56f   :  { %21578 = vst [vmem:[#allocation119_spill] sm:$0xff] %v18811_v4  ;;  %v18814_v9 = vadd.f32 %v6797_v56, %v18617_v59  ;;  %v21583_v59 = vld [vmem:[#allocation63_spill] sm:$0xff]  ;;  %v21585_v56 = vld [vmem:[#allocation88_spill] sm:$0xff] }
 0x570   :  { %v18816_v8 = vpop.f32.mrf.mxu1  ;;  %v13788_v15 = vpop.f32.mrf.mxu0 }
 0x571   :  { %21579 = vst [vmem:[#allocation25_spill] sm:$0xff] %v18816_v8  ;;  %v18819_v11 = vadd.f32 %v13788_v15, %v18621_v62  ;;  %v21584_v62 = vld [vmem:[#allocation112_spill] sm:$0xff] }
 0x572   :  { %v18821_v41 = vpop.f32.mrf.mxu1  ;;  %v6800_v21 = vpop.f32.mrf.mxu0 }
 0x573   :  { %21580 = vst [vmem:[#allocation85_spill] sm:$0xff] %v18821_v41  ;;  %v18824_v20 = vadd.f32 %v6800_v21, %v18628_v36 }
 0x574   :  { %v18826_v29 = vpop.f32.mrf.mxu1  ;;  %v13791_v51 = vpop.f32.mrf.mxu0  ;;  %13886 = vmatmul.mubr.msk.bf16.gmra.mxu0 %vm1224_vm2, %v21582_v3  ;;  %13918 = vmatmul.mubr.msk.bf16.vlgmr.msra.gmra.mxu1 %vm1224_vm2, %v21583_v59 }
 0x575   :  { %21581 = vst [vmem:[#allocation47_spill] sm:$0xff] %v18826_v29  ;;  %v18833_v55 = vadd.f32 %v13791_v51, %v18641_v61  ;;  %13889 = vmatprep.mubr.msk.bf16.mxu0 %vm1224_vm2, %v21584_v62  ;;  %13921 = vmatprep.mubr.msk.bf16.mxu1 %vm1224_vm2, %v21585_v56 }
 0x576   :  { %v18839_v36 = vpop.f32.mrf.mxu1  ;;  %v6813_v15 = vpop.f32.mrf.mxu0 }
 0x577   :  { %21586 = vst [vmem:[#allocation10_spill] sm:$0xff] %v18839_v36  ;;  %v18842_v21 = vadd.f32 %v6813_v15, %v18652_v1  ;;  %v21590_v36 = vld [vmem:[#allocation106_spill] sm:$0xff]  ;;  %v21591_v1 = vld [vmem:[#allocation9_spill] sm:$0xff] }
 0x578   :  { %v18844_v29 = vpop.f32.mrf.mxu1  ;;  %v13792_v41 = vpop.f32.mrf.mxu0 }
 0x579   :  { %21587 = vst [vmem:[#allocation121_spill] sm:$0xff] %v18844_v29  ;;  %v18847_v59 = vadd.f32 %v13792_v41, %v18656_v38  ;;  %v21592_v38 = vld [vmem:[#allocation116_spill] sm:$0xff] }
 0x57a   :  { %v18849_v61 = vpop.f32.mrf.mxu1  ;;  %v6816_v51 = vpop.f32.mrf.mxu0 }
 0x57b   :  { %21588 = vst [vmem:[#allocation129_spill] sm:$0xff] %v18849_v61  ;;  %v18852_v8 = vadd.f32 %v6816_v51, %v18663_v14 }
 0x57c   :  { %v18854_v4 = vpop.f32.mrf.mxu1  ;;  %v13795_v56 = vpop.f32.mrf.mxu0  ;;  %13890 = vmatmul.mubr.msk.bf16.gmra.mxu0 %vm1224_vm2, %v21590_v36  ;;  %13922 = vmatmul.mubr.msk.bf16.gmra.mxu1 %vm1224_vm2, %v21591_v1 }
 0x57d   :  { %21589 = vst [vmem:[#allocation52_spill] sm:$0xff] %v18854_v4  ;;  %v18861_v15 = vadd.f32 %v13795_v56, %v18673_v46  ;;  %13893 = vmatprep.mubr.msk.bf16.mxu0 %vm1224_vm2, %v18561_v18  ;;  %13925 = vmatprep.mubr.msk.bf16.mxu1 %vm1224_vm2, %v21592_v38  ;;  %v14528_v38 = vld [vmem:[%s20587_s3 + $0x140] sm:$0xff]  }
 0x57e   :  { %v18867_v14 = vpop.f32.mrf.mxu1  ;;  %v6829_v41 = vpop.f32.mrf.mxu0  ;;  %14051 = vmatprep.subr.bf16.mxu0 %v14528_v38 }
 0x57f   :  { %21593 = vst [vmem:[#allocation132_spill] sm:$0xff] %v18867_v14  ;;  %v18870_v51 = vadd.f32 %v6829_v41, %v18684_v43  ;;  %v21597_v41 = vld [vmem:[#allocation68_spill] sm:$0xff]  ;;  %14052 = vmatpush3.bf16.msra.mxu0 %v14528_v38  ;;  %v21604_v38 = vld [vmem:[#allocation87_spill] sm:$0xff] }
 0x580   :  { %v18872_v4 = vpop.f32.mrf.mxu1  ;;  %v13796_v61 = vpop.f32.mrf.mxu0 }
 0x581   :  { %21594 = vst [vmem:[#allocation123_spill] sm:$0xff] %v18872_v4  ;;  %v18875_v1 = vadd.f32 %v13796_v61, %v18688_v27  ;;  %v21598_v27 = vld [vmem:[#allocation83_spill] sm:$0xff] }
 0x582   :  { %v18877_v46 = vpop.f32.mrf.mxu1  ;;  %v6832_v56 = vpop.f32.mrf.mxu0 }
 0x583   :  { %21595 = vst [vmem:[#allocation135_spill] sm:$0xff] %v18877_v46  ;;  %v18880_v29 = vadd.f32 %v6832_v56, %v18695_v6 }
 0x584   :  { %v18885_v14 = vpop.f32.mrf.mxu1  ;;  %v18887_v43 = vpop.f32.mrf.mxu0  ;;  %13894 = vmatmul.mubr.msk.bf16.gmra.mxu0 %vm1224_vm2, %v18557_v47  ;;  %13926 = vmatmul.mubr.msk.bf16.gmra.mxu1 %vm1224_vm2, %v21597_v41 }
 0x585   :  { %21596 = vst [vmem:[#allocation125_spill] sm:$0xff] %v18885_v14  ;;  %13897 = vmatprep.mubr.msk.bf16.mxu0 %vm1224_vm2, %v18593_v52  ;;  %13929 = vmatprep.mubr.msk.bf16.mxu1 %vm1224_vm2, %v21598_v27  ;;  %v21603_v27 = vld [vmem:[#allocation69_spill] sm:$0xff] }
 0x586   :  { %v18897_v6 = vpop.f32.mrf.mxu1  ;;  %v18899_v61 = vpop.f32.mrf.mxu0 }
 0x587   :  { %21599 = vst [vmem:[#allocation138_spill] sm:$0xff] %v18897_v6 }
 0x588   :  { %v18901_v56 = vpop.f32.mrf.mxu1  ;;  %v18903_v14 = vpop.f32.mrf.mxu0 }
 0x589   :  { %21600 = vst [vmem:[#allocation128_spill] sm:$0xff] %v18901_v56 }
 0x58a   :  { %v18905_v46 = vpop.f32.mrf.mxu1  ;;  %v18907_v4 = vpop.f32.mrf.mxu0 }
 0x58b   :  { %21601 = vst [vmem:[#allocation141_spill] sm:$0xff] %v18905_v46 }
 0x58c   :  { %v18909_v41 = vpop.f32.mrf.mxu1  ;;  %v18911_v54 = vpop.f32.mrf.mxu0  ;;  %13898 = vmatmul.mubr.msk.bf16.gmra.mxu0 %vm1224_vm2, %v18587_v42  ;;  %13930 = vmatmul.mubr.msk.bf16.gmra.mxu1 %vm1224_vm2, %v21603_v27 }
 0x58d   :  { %21602 = vst [vmem:[#allocation131_spill] sm:$0xff] %v18909_v41  ;;  %13901 = vmatprep.mubr.msk.bf16.mxu0 %vm1224_vm2, %v18625_v23  ;;  %13933 = vmatprep.mubr.msk.bf16.mxu1 %vm1224_vm2, %v21604_v38  ;;  %v21612_v38 = vld [vmem:[#allocation70_spill] sm:$0xff] }
 0x58e   :  { %v18921_v56 = vpop.f32.mrf.mxu1  ;;  %v18923_v46 = vpop.f32.mrf.mxu0 }
 0x58f   :  { %21605 = vst [vmem:[#allocation144_spill] sm:$0xff] %v18921_v56 }
 0x590   :  { %v18925_v6 = vpop.f32.mrf.mxu1  ;;  %v18927_v41 = vpop.f32.mrf.mxu0 }
 0x591   :  { %21606 = vst [vmem:[#allocation80_spill] sm:$0xff] %v18925_v6  ;;  %21607 = vst [vmem:[#allocation94_spill] sm:$0xff] %v18927_v41  ;;  %v21613_v6 = vld [vmem:[#allocation90_spill] sm:$0xff] }
 0x592   :  { %v18929_v33 = vpop.f32.mrf.mxu1  ;;  %v18931_v26 = vpop.f32.mrf.mxu0 }
 0x593   :  { %21608 = vst [vmem:[#allocation136_spill] sm:$0xff] %v18929_v33  ;;  %21609 = vst [vmem:[#allocation14_spill] sm:$0xff] %v18931_v26 }
 0x594   :  { %v18933_v7 = vpop.f32.mrf.mxu1  ;;  %v18935_v27 = vpop.f32.mrf.mxu0  ;;  %13902 = vmatmul.mubr.msk.bf16.gmra.mxu0 %vm1224_vm2, %v18619_v24  ;;  %13934 = vmatmul.mubr.msk.bf16.gmra.mxu1 %vm1224_vm2, %v21612_v38 }
 0x595   :  { %21610 = vst [vmem:[#allocation140_spill] sm:$0xff] %v18933_v7  ;;  %21611 = vst [vmem:[#allocation95_spill] sm:$0xff] %v18935_v27  ;;  %13905 = vmatprep.mubr.msk.bf16.mxu0 %vm1224_vm2, %v18660_v25  ;;  %13937 = vmatprep.mubr.msk.bf16.mxu1 %vm1224_vm2, %v21613_v6  ;;  %v21622_v6 = vld [vmem:[#allocation71_spill] sm:$0xff] }
 0x596   :  { %v18945_v56 = vpop.f32.mrf.mxu1  ;;  %v18947_v33 = vpop.f32.mrf.mxu0 }
 0x597   :  { %21614 = vst [vmem:[#allocation145_spill] sm:$0xff] %v18945_v56  ;;  %21615 = vst [vmem:[#allocation97_spill] sm:$0xff] %v18947_v33  ;;  %v21623_v56 = vld [vmem:[#allocation91_spill] sm:$0xff] }
 0x598   :  { %v18949_v2 = vpop.f32.mrf.mxu1  ;;  %v18951_v7 = vpop.f32.mrf.mxu0 }
 0x599   :  { %21616 = vst [vmem:[#allocation147_spill] sm:$0xff] %v18949_v2  ;;  %21617 = vst [vmem:[#allocation154_spill] sm:$0xff] %v18951_v7 }
 0x59a   :  { %v18953_v27 = vpop.f32.mrf.mxu1  ;;  %v18955_v26 = vpop.f32.mrf.mxu0 }
 0x59b   :  { %21618 = vst [vmem:[#allocation32_spill] sm:$0xff] %v18953_v27  ;;  %21619 = vst [vmem:[#allocation30_spill] sm:$0xff] %v18955_v26 }
 0x59c   :  { %v18957_v5 = vpop.f32.mrf.mxu1  ;;  %v18959_v38 = vpop.f32.mrf.mxu0  ;;  %13906 = vmatmul.mubr.msk.bf16.gmra.mxu0 %vm1224_vm2, %v18654_v40  ;;  %13938 = vmatmul.mubr.msk.bf16.gmra.mxu1 %vm1224_vm2, %v21622_v6  ;;  %v21632_v6 = vld [vmem:[#allocation73_spill] sm:$0xff] }
 0x59d   :  { %21620 = vst [vmem:[#allocation101_spill] sm:$0xff] %v18957_v5  ;;  %21621 = vst [vmem:[#allocation18_spill] sm:$0xff] %v18959_v38  ;;  %13941 = vmatprep.mubr.msk.bf16.mxu1 %vm1224_vm2, %v21623_v56  ;;  %v21633_v56 = vld [vmem:[#allocation17_spill] sm:$0xff] }
 0x59e   :  { %v18967_v2 = vpop.f32.mrf.mxu1  ;;  %v18969_v7 = vpop.f32.mrf.mxu0 }
 0x59f   :  { %21624 = vst [vmem:[#allocation105_spill] sm:$0xff] %v18967_v2  ;;  %21625 = vst [vmem:[#allocation20_spill] sm:$0xff] %v18969_v7 }
 0x5a0   :  { %v18971_v27 = vpop.f32.mrf.mxu1  ;;  %v18973_v26 = vpop.f32.mrf.mxu0 }
 0x5a1   :  { %21626 = vst [vmem:[#allocation109_spill] sm:$0xff] %v18971_v27  ;;  %21627 = vst [vmem:[#allocation22_spill] sm:$0xff] %v18973_v26 }
 0x5a2   :  { %v18975_v5 = vpop.f32.mrf.mxu1  ;;  %v18977_v38 = vpop.f32.mrf.mxu0 }
 0x5a3   :  { %21628 = vst [vmem:[#allocation113_spill] sm:$0xff] %v18975_v5  ;;  %21629 = vst [vmem:[#allocation24_spill] sm:$0xff] %v18977_v38 }
 0x5a4   :  { %v18979_v33 = vpop.f32.mrf.mxu1  ;;  %v18981_v41 = vpop.f32.mrf.mxu0  ;;  %13942 = vmatmul.mubr.msk.bf16.gmra.mxu1 %vm1224_vm2, %v21632_v6  ;;  %v21642_v6 = vld [vmem:[#allocation74_spill] sm:$0xff] }
 0x5a5   :  { %21630 = vst [vmem:[#allocation117_spill] sm:$0xff] %v18979_v33  ;;  %21631 = vst [vmem:[#allocation55_spill] sm:$0xff] %v18981_v41  ;;  %13945 = vmatprep.mubr.msk.bf16.mxu1 %vm1224_vm2, %v21633_v56  ;;  %v21643_v56 = vld [vmem:[#allocation104_spill] sm:$0xff] }
 0x5a6   :  { %v18987_v2 = vpop.f32.mrf.mxu1  ;;  %v18989_v7 = vpop.f32.mrf.mxu0 }
 0x5a7   :  { %21634 = vst [vmem:[#allocation118_spill] sm:$0xff] %v18987_v2  ;;  %21635 = vst [vmem:[#allocation72_spill] sm:$0xff] %v18989_v7 }
 0x5a8   :  { %v18991_v27 = vpop.f32.mrf.mxu1  ;;  %v18993_v26 = vpop.f32.mrf.mxu0 }
 0x5a9   :  { %21636 = vst [vmem:[#allocation46_spill] sm:$0xff] %v18991_v27  ;;  %21637 = vst [vmem:[#allocation60_spill] sm:$0xff] %v18993_v26 }
 0x5aa   :  { %v18995_v5 = vpop.f32.mrf.mxu1  ;;  %v18997_v38 = vpop.f32.mrf.mxu0 }
 0x5ab   :  { %21638 = vst [vmem:[#allocation26_spill] sm:$0xff] %v18995_v5  ;;  %21639 = vst [vmem:[#allocation62_spill] sm:$0xff] %v18997_v38 }
 0x5ac   :  { %v18999_v33 = vpop.f32.mrf.mxu1  ;;  %v19001_v41 = vpop.f32.mrf.mxu0  ;;  %13946 = vmatmul.mubr.msk.bf16.gmra.mxu1 %vm1224_vm2, %v21642_v6  ;;  %v21652_v6 = vld [vmem:[#allocation148_spill] sm:$0xff] }
 0x5ad   :  { %21640 = vst [vmem:[#allocation120_spill] sm:$0xff] %v18999_v33  ;;  %21641 = vst [vmem:[#allocation7_spill] sm:$0xff] %v19001_v41  ;;  %13949 = vmatprep.mubr.msk.bf16.mxu1 %vm1224_vm2, %v21643_v56  ;;  %v21653_v56 = vld [vmem:[#allocation98_spill] sm:$0xff] }
 0x5ae   :  { %v19007_v2 = vpop.f32.mrf.mxu1  ;;  %v19009_v7 = vpop.f32.mrf.mxu0 }
 0x5af   :  { %21644 = vst [vmem:[#allocation57_spill] sm:$0xff] %v19007_v2  ;;  %21645 = vst [vmem:[#allocation50_spill] sm:$0xff] %v19009_v7 }
 0x5b0   :  { %v19011_v27 = vpop.f32.mrf.mxu1  ;;  %v19013_v26 = vpop.f32.mrf.mxu0 }
 0x5b1   :  { %21646 = vst [vmem:[#allocation27_spill] sm:$0xff] %v19011_v27  ;;  %21647 = vst [vmem:[#allocation122_spill] sm:$0xff] %v19013_v26 }
 0x5b2   :  { %v19015_v5 = vpop.f32.mrf.mxu1  ;;  %v19017_v38 = vpop.f32.mrf.mxu0 }
 0x5b3   :  { %21648 = vst [vmem:[#allocation64_spill] sm:$0xff] %v19015_v5  ;;  %21649 = vst [vmem:[#allocation124_spill] sm:$0xff] %v19017_v38 }
 0x5b4   :  { %v19019_v33 = vpop.f32.mrf.mxu1  ;;  %v19021_v41 = vpop.f32.mrf.mxu0  ;;  %13950 = vmatmul.mubr.msk.bf16.gmra.mxu1 %vm1224_vm2, %v21652_v6  ;;  %v21662_v6 = vld [vmem:[#allocation19_spill] sm:$0xff] }
 0x5b5   :  { %21650 = vst [vmem:[#allocation54_spill] sm:$0xff] %v19019_v33  ;;  %21651 = vst [vmem:[#allocation126_spill] sm:$0xff] %v19021_v41  ;;  %13953 = vmatprep.mubr.msk.bf16.mxu1 %vm1224_vm2, %v21653_v56  ;;  %v21663_v56 = vld [vmem:[#allocation77_spill] sm:$0xff] }
 0x5b6   :  { %v19027_v2 = vpop.f32.mrf.mxu1  ;;  %v19029_v7 = vpop.f32.mrf.mxu0 }
 0x5b7   :  { %21654 = vst [vmem:[#allocation127_spill] sm:$0xff] %v19027_v2  ;;  %21655 = vst [vmem:[#allocation130_spill] sm:$0xff] %v19029_v7 }
 0x5b8   :  { %v19031_v27 = vpop.f32.mrf.mxu1  ;;  %v19033_v26 = vpop.f32.mrf.mxu0 }
 0x5b9   :  { %21656 = vst [vmem:[#allocation84_spill] sm:$0xff] %v19031_v27  ;;  %21657 = vst [vmem:[#allocation76_spill] sm:$0xff] %v19033_v26 }
 0x5ba   :  { %v19035_v5 = vpop.f32.mrf.mxu1  ;;  %v19037_v38 = vpop.f32.mrf.mxu0 }
 0x5bb   :  { %21658 = vst [vmem:[#allocation65_spill] sm:$0xff] %v19035_v5  ;;  %21659 = vst [vmem:[#allocation59_spill] sm:$0xff] %v19037_v38 }
 0x5bc   :  { %v19039_v33 = vpop.f32.mrf.mxu1  ;;  %v19041_v41 = vpop.f32.mrf.mxu0  ;;  %13954 = vmatmul.mubr.msk.bf16.gmra.mxu1 %vm1224_vm2, %v21662_v6  ;;  %v21671_v6 = vld [vmem:[#allocation108_spill] sm:$0xff] }
 0x5bd   :  { %21660 = vst [vmem:[#allocation66_spill] sm:$0xff] %v19039_v33  ;;  %21661 = vst [vmem:[#allocation133_spill] sm:$0xff] %v19041_v41  ;;  %13957 = vmatprep.mubr.msk.bf16.mxu1 %vm1224_vm2, %v21663_v56  ;;  %v21686_v41 = vld [vmem:[#allocation99_spill] sm:$0xff] }
 0x5be   :  { %v19047_v2 = vpop.f32.mrf.mxu1  ;;  %v19049_v7 = vpop.f32.mrf.mxu0 }
 0x5bf   :  { %21664 = vst [vmem:[#allocation11_spill] sm:$0xff] %v19047_v2  ;;  %21665 = vst [vmem:[#allocation134_spill] sm:$0xff] %v19049_v7 }
 0x5c0   :  { %v19051_v27 = vpop.f32.mrf.mxu1  ;;  %v19053_v26 = vpop.f32.mrf.mxu0 }
 0x5c1   :  { %21666 = vst [vmem:[#allocation92_spill] sm:$0xff] %v19051_v27  ;;  %21667 = vst [vmem:[#allocation61_spill] sm:$0xff] %v19053_v26  ;;  %v14529_v27 = vld [vmem:[%s20587_s3 + $0x138] sm:$0xff]  }
 0x5c2   :  { %v19055_v5 = vpop.f32.mrf.mxu1  ;;  %v19057_v38 = vpop.f32.mrf.mxu0  ;;  %14181 = vmatprep.subr.bf16.mxu1 %v14529_v27 }
 0x5c3   :  { %21668 = vst [vmem:[#allocation8_spill] sm:$0xff] %v19055_v5  ;;  %21669 = vst [vmem:[#allocation137_spill] sm:$0xff] %v19057_v38  ;;  %14182 = vmatpush3.bf16.msra.mxu1 %v14529_v27 }
 0x5c4   :  { %v19059_v33 = vpop.f32.mrf.mxu1  ;;  %13958 = vmatmul.mubr.msk.bf16.gmra.mxu1 %vm1224_vm2, %v18269_v50  ;;  %v19065_v56 = vpop.f32.mrf.mxu0 }
 0x5c5   :  { %21670 = vst [vmem:[#allocation13_spill] sm:$0xff] %v19059_v33  ;;  %13961 = vmatprep.mubr.msk.bf16.mxu1 %vm1224_vm2, %v21671_v6  ;;  %21672 = vst [vmem:[#allocation139_spill] sm:$0xff] %v19065_v56  ;;  %v19077_v33 = vld [vmem:[%s20587_s3 + $0x178] sm:$0xff]   ;;  %v21679_v56 = vld [vmem:[#allocation78_spill] sm:$0xff] }
 0x5c6   :  { %v19067_v2 = vpop.f32.mrf.mxu1  ;;  %v19079_v50 = vpop.f32.mrf.mxu0  ;;  %14317 = vmatprep.subr.bf16.mxu0 %v19077_v33 }
 0x5c7   :  { %21673 = vst [vmem:[#allocation86_spill] sm:$0xff] %v19067_v2  ;;  %21675 = vst [vmem:[#allocation96_spill] sm:$0xff] %v19079_v50  ;;  %v21678_v2 = vld [vmem:[#allocation16_spill] sm:$0xff] }
 0x5c8   :  { %v19072_v26 = vpop.f32.mrf.mxu1 }
 0x5c9   :  { %21674 = vst [vmem:[#allocation142_spill] sm:$0xff] %v19072_v26  ;;  %v19090_v26 = vpop.f32.mrf.mxu0 }
 0x5ca   :  { %v19081_v5 = vpop.f32.mrf.mxu1  ;;  %21680 = vst [vmem:[#allocation146_spill] sm:$0xff] %v19090_v26 }
 0x5cb   :  { %21676 = vst [vmem:[#allocation143_spill] sm:$0xff] %v19081_v5  ;;  %v19096_v50 = vpop.f32.mrf.mxu0 }
 0x5cc   :  { %v19084_v6 = vpop.f32.mrf.mxu1  ;;  %13962 = vmatmul.mubr.msk.bf16.gmra.mxu1 %vm1224_vm2, %v21678_v2  ;;  %21683 = vst [vmem:[#allocation12_spill] sm:$0xff] %v19096_v50 }
 0x5cd   :  { %21677 = vst [vmem:[#allocation89_spill] sm:$0xff] %v19084_v6  ;;  %13965 = vmatprep.mubr.msk.bf16.mxu1 %vm1224_vm2, %v21679_v56  ;;  %v21687_v6 = vld [vmem:[#allocation21_spill] sm:$0xff]  ;;  %v19106_v2 = vpop.f32.mrf.mxu0 }
 0x5ce   :  { %v19092_v38 = vpop.f32.mrf.mxu1  ;;  %21688 = vst [vmem:[#allocation150_spill] sm:$0xff] %v19106_v2 }
 0x5cf   :  { %21681 = vst [vmem:[#allocation15_spill] sm:$0xff] %v19092_v38  ;;  %v19112_v38 = vpop.f32.mrf.mxu0 }
 0x5d0   :  { %v19094_v7 = vpop.f32.mrf.mxu1  ;;  %21691 = vst [vmem:[#allocation28_spill] sm:$0xff] %v19112_v38 }
 0x5d1   :  { %21682 = vst [vmem:[#allocation29_spill] sm:$0xff] %v19094_v7 }
 0x5d2   :  { %v19098_v5 = vpop.f32.mrf.mxu1 }
 0x5d3   :  { %21684 = vst [vmem:[#allocation149_spill] sm:$0xff] %v19098_v5  ;;  %v21694_v5 = vld [vmem:[#allocation102_spill] sm:$0xff] }
 0x5d4   :  { %v19100_v27 = vpop.f32.mrf.mxu1  ;;  %13966 = vmatmul.mubr.msk.bf16.gmra.mxu1 %vm1224_vm2, %v21686_v41  ;;  %v19122_v41 = vpop.f32.mrf.mxu0 }
 0x5d5   :  { %21685 = vst [vmem:[#allocation100_spill] sm:$0xff] %v19100_v27  ;;  %13969 = vmatprep.mubr.msk.bf16.mxu1 %vm1224_vm2, %v21687_v6  ;;  %v21695_v27 = vld [vmem:[#allocation103_spill] sm:$0xff] }
 0x5d6   :  { %v19108_v56 = vpop.f32.mrf.mxu1 }
 0x5d7   :  { %21689 = vst [vmem:[#allocation93_spill] sm:$0xff] %v19108_v56  ;;  %v19128_v56 = vpop.f32.mrf.mxu0 }
 0x5d8   :  { %v19110_v26 = vpop.f32.mrf.mxu1 }
 0x5d9   :  { %21690 = vst [vmem:[#allocation152_spill] sm:$0xff] %v19110_v26 }
 0x5da   :  { %v19114_v7 = vpop.f32.mrf.mxu1 }
 0x5db   :  { %21692 = vst [vmem:[#allocation153_spill] sm:$0xff] %v19114_v7 }
 0x5dc   :  { %v19116_v50 = vpop.f32.mrf.mxu1  ;;  %13970 = vmatmul.mubr.msk.bf16.gmra.mxu1 %vm1224_vm2, %v21694_v5  ;;  %v19138_v5 = vpop.f32.mrf.mxu0 }
 0x5dd   :  { %21693 = vst [vmem:[#allocation4_spill] sm:$0xff] %v19116_v50  ;;  %13973 = vmatprep.mubr.msk.bf16.mxu1 %vm1224_vm2, %v21695_v27 }
 0x5de   :  { %v19124_v6 = vpop.f32.mrf.mxu1 }
 0x5df   :  { %21696 = vst [vmem:[#allocation155_spill] sm:$0xff] %v19124_v6 }
 0x5e0   :  { %v19126_v2 = vpop.f32.mrf.mxu1 }
 0x5e1   :  { %21697 = vst [vmem:[#allocation151_spill] sm:$0xff] %v19126_v2  ;;  %v14531_v2 = vld [vmem:[%s20587_s3 + $0x130] sm:$0xff]  }
 0x5e2   :  { %v19130_v26 = vpop.f32.mrf.mxu1  ;;  %14183 = vmatprep.subr.bf16.mxu1 %v14531_v2 }
 0x5e3   :  { %21698 = vst [vmem:[#allocation33_spill] sm:$0xff] %v19130_v26  ;;  %v19147_v26 = vpop.f32.mrf.mxu0  ;;  %14184 = vmatpush3.bf16.msra.mxu1 %v14531_v2  ;;  %v14533_v2 = vld [vmem:[%s20587_s3 + $0x120] sm:$0xff]  }
 0x5e4   :  { %v19132_v38 = vpop.f32.mrf.mxu1  ;;  %13974 = vmatmul.mubr.msk.bf16.gmra.mxu1 %vm1224_vm2, %v18386_v58  ;;  %v14532_v58 = vld [vmem:[%s20587_s3 + $0x128] sm:$0xff]  }
 0x5e5   :  { %21699 = vst [vmem:[#allocation75_spill] sm:$0xff] %v19132_v38  ;;  %13977 = vmatprep.mubr.msk.bf16.mxu1 %vm1224_vm2, %v18421_v17  ;;  %14185 = vmatprep.subr.bf16.mxu1 %v14532_v58 }
 0x5e6   :  { %v19140_v27 = vpop.f32.mrf.mxu1 }
 0x5e7   :  { %21700 = vst [vmem:[#allocation31_spill] sm:$0xff] %v19140_v27  ;;  %14186 = vmatpush3.bf16.msra.mxu1 %v14532_v58 }
 0x5e8   :  { %v19145_v6 = vpop.f32.mrf.mxu1  ;;  %14187 = vmatprep.subr.bf16.mxu1 %v14533_v2 }
 0x5e9   :  { %21701 = vst [vmem:[#allocation35_spill] sm:$0xff] %v19145_v6  ;;  %v19160_v6 = vpop.f32.mrf.mxu0 }
 0x5ea   :  { %v19149_v38 = vpop.f32.mrf.mxu1 }
 0x5eb   :  { %21702 = vst [vmem:[#allocation34_spill] sm:$0xff] %v19149_v38  ;;  %14188 = vmatpush3.bf16.msra.mxu1 %v14533_v2 }
 0x5ec   :  { %v19154_v17 = vpop.f32.mrf.mxu1  ;;  %13978 = vmatmul.mubr.msk.bf16.gmra.mxu1 %vm1224_vm2, %v18417_v13 }
 0x5ed   :  { %21703 = vst [vmem:[#allocation37_spill] sm:$0xff] %v19154_v17  ;;  %13981 = vmatprep.mubr.msk.bf16.mxu1 %vm1224_vm2, %v18449_v31  ;;  %v19169_v17 = vpop.f32.mrf.mxu0 }
 0x5ee   :  { %v19162_v27 = vpop.f32.mrf.mxu1 }
 0x5ef   :  { %21704 = vst [vmem:[#allocation36_spill] sm:$0xff] %v19162_v27  ;;  %v19179_v31 = vpop.f32.mrf.mxu0 }
 0x5f0   :  { %v19167_v38 = vpop.f32.mrf.mxu1 }
 0x5f1   :  { %21705 = vst [vmem:[#allocation41_spill] sm:$0xff] %v19167_v38  ;;  %v19185_v38 = vpop.f32.mrf.mxu0 }
 0x5f2   :  { %v19171_v50 = vpop.f32.mrf.mxu1 }
 0x5f3   :  { %21706 = vst [vmem:[#allocation38_spill] sm:$0xff] %v19171_v50 }
 0x5f4   :  { %v19173_v13 = vpop.f32.mrf.mxu1  ;;  %13982 = vmatmul.mubr.msk.bf16.gmra.mxu1 %vm1224_vm2, %v18445_v53  ;;  %v19195_v53 = vpop.f32.mrf.mxu0 }
 0x5f5   :  { %21707 = vst [vmem:[#allocation40_spill] sm:$0xff] %v19173_v13  ;;  %13985 = vmatprep.mubr.msk.bf16.mxu1 %vm1224_vm2, %v18477_v60 }
 0x5f6   :  { %v19181_v58 = vpop.f32.mrf.mxu1 }
 0x5f7   :  { %21708 = vst [vmem:[#allocation39_spill] sm:$0xff] %v19181_v58  ;;  %v19201_v58 = vpop.f32.mrf.mxu0 }
 0x5f8   :  { %v19183_v27 = vpop.f32.mrf.mxu1 }
 0x5f9   :  { %21709 = vst [vmem:[#allocation43_spill] sm:$0xff] %v19183_v27 }
 0x5fa   :  { %v19187_v7 = vpop.f32.mrf.mxu1 }
 0x5fb   :  { %21710 = vst [vmem:[#allocation42_spill] sm:$0xff] %v19187_v7 }
 0x5fc   :  { %v19189_v50 = vpop.f32.mrf.mxu1  ;;  %13986 = vmatmul.mubr.msk.bf16.gmra.mxu1 %vm1224_vm2, %v18473_v32  ;;  %v19211_v32 = vpop.f32.mrf.mxu0 }
 0x5fd   :  { %21711 = vst [vmem:[#allocation45_spill] sm:$0xff] %v19189_v50  ;;  %13989 = vmatprep.mubr.msk.bf16.mxu1 %vm1224_vm2, %v18505_v28 }
 0x5fe   :  { %v19197_v60 = vpop.f32.mrf.mxu1 }
 0x5ff   :  { %21712 = vst [vmem:[#allocation44_spill] sm:$0xff] %v19197_v60  ;;  %v19217_v60 = vpop.f32.mrf.mxu0 }
 0x600   :  { %v19199_v2 = vpop.f32.mrf.mxu1 }
 0x601   :  { %21713 = vst [vmem:[#allocation49_spill] sm:$0xff] %v19199_v2 }
 0x602   :  { %v19203_v27 = vpop.f32.mrf.mxu1 }
 0x603   :  { %21714 = vst [vmem:[#allocation48_spill] sm:$0xff] %v19203_v27 }
 0x604   :  { %v19205_v13 = vpop.f32.mrf.mxu1  ;;  %13990 = vmatmul.mubr.msk.bf16.gmra.mxu1 %vm1224_vm2, %v21582_v3  ;;  %v19227_v3 = vpop.f32.mrf.mxu0 }
 0x605   :  { %21715 = vst [vmem:[#allocation51_spill] sm:$0xff] %v19205_v13  ;;  %13993 = vmatprep.mubr.msk.bf16.mxu1 %vm1224_vm2, %v21584_v62 }
 0x606   :  { %v19213_v28 = vpop.f32.mrf.mxu1 }
 0x607   :  { %21716 = vst [vmem:[#allocation67_spill] sm:$0xff] %v19213_v28  ;;  %v19233_v28 = vpop.f32.mrf.mxu0 }
 0x608   :  { %v19215_v50 = vpop.f32.mrf.mxu1 }
 0x609   :  { %21717 = vst [vmem:[#allocation53_spill] sm:$0xff] %v19215_v50 }
 0x60a   :  { %v19219_v2 = vpop.f32.mrf.mxu1 }
 0x60b   :  { %21718 = vst [vmem:[#allocation2_spill] sm:$0xff] %v19219_v2 }
 0x60c   :  { %v19221_v7 = vpop.f32.mrf.mxu1  ;;  %13994 = vmatmul.mubr.msk.bf16.gmra.mxu1 %vm1224_vm2, %v21590_v36  ;;  %v19243_v36 = vpop.f32.mrf.mxu0 }
 0x60d   :  { %21719 = vst [vmem:[#allocation56_spill] sm:$0xff] %v19221_v7  ;;  %13997 = vmatprep.mubr.msk.bf16.mxu1 %vm1224_vm2, %v18561_v18 }
 0x60e   :  { %v19229_v62 = vpop.f32.mrf.mxu1 }
 0x60f   :  { %21720 = vst [vmem:[#allocation58_spill] sm:$0xff] %v19229_v62  ;;  %v19249_v62 = vpop.f32.mrf.mxu0 }
 0x610   :  { %v19231_v13 = vpop.f32.mrf.mxu1 }
 0x611   :  { %21721 = vst [vmem:[#allocation3_spill] sm:$0xff] %v19231_v13 }
 0x612   :  { %v19235_v50 = vpop.f32.mrf.mxu1 }
 0x613   :  { %21722 = vst [vmem:[#allocation5_spill] sm:$0xff] %v19235_v50 }
 0x614   :  { %v19237_v27 = vpop.f32.mrf.mxu1  ;;  %13998 = vmatmul.mubr.msk.bf16.gmra.mxu1 %vm1224_vm2, %v18557_v47  ;;  %v19259_v47 = vpop.f32.mrf.mxu0 }
 0x615   :  { %21723 = vst [vmem:[#allocation6_spill] sm:$0xff] %v19237_v27  ;;  %14001 = vmatprep.mubr.msk.bf16.mxu1 %vm1224_vm2, %v18593_v52 }
 0x616   :  { %v19245_v18 = vpop.f32.mrf.mxu1 }
 0x617   :  { %21724 = vst [vmem:[#allocation63_spill] sm:$0xff] %v19245_v18  ;;  %v19265_v18 = vpop.f32.mrf.mxu0 }
 0x618   :  { %v19247_v7 = vpop.f32.mrf.mxu1 }
 0x619   :  { %21725 = vst [vmem:[#allocation112_spill] sm:$0xff] %v19247_v7 }
 0x61a   :  { %v19251_v13 = vpop.f32.mrf.mxu1 }
 0x61b   :  { %21726 = vst [vmem:[#allocation88_spill] sm:$0xff] %v19251_v13 }
 0x61c   :  { %v19253_v2 = vpop.f32.mrf.mxu1  ;;  %14002 = vmatmul.mubr.msk.bf16.gmra.mxu1 %vm1224_vm2, %v18587_v42  ;;  %v19275_v42 = vpop.f32.mrf.mxu0 }
 0x61d   :  { %21727 = vst [vmem:[#allocation106_spill] sm:$0xff] %v19253_v2  ;;  %14005 = vmatprep.mubr.msk.bf16.mxu1 %vm1224_vm2, %v18625_v23 }
 0x61e   :  { %v19261_v52 = vpop.f32.mrf.mxu1 }
 0x61f   :  { %21728 = vst [vmem:[#allocation9_spill] sm:$0xff] %v19261_v52  ;;  %v19281_v52 = vpop.f32.mrf.mxu0 }
 0x620   :  { %v19263_v27 = vpop.f32.mrf.mxu1  ;;  %21734 = vst [vmem:[#allocation70_spill] sm:$0xff] %v19281_v52 }
 0x621   :  { %21729 = vst [vmem:[#allocation116_spill] sm:$0xff] %v19263_v27 }
 0x622   :  { %v19267_v7 = vpop.f32.mrf.mxu1 }
 0x623   :  { %21730 = vst [vmem:[#allocation68_spill] sm:$0xff] %v19267_v7 }
 0x624   :  { %v19269_v50 = vpop.f32.mrf.mxu1  ;;  %14006 = vmatmul.mubr.msk.bf16.gmra.mxu1 %vm1224_vm2, %v18619_v24  ;;  %v19291_v24 = vpop.f32.mrf.mxu0 }
 0x625   :  { %21731 = vst [vmem:[#allocation83_spill] sm:$0xff] %v19269_v50  ;;  %14009 = vmatprep.mubr.msk.bf16.mxu1 %vm1224_vm2, %v18660_v25  ;;  %21737 = vst [vmem:[#allocation91_spill] sm:$0xff] %v19291_v24 }
 0x626   :  { %v19277_v23 = vpop.f32.mrf.mxu1 }
 0x627   :  { %21732 = vst [vmem:[#allocation69_spill] sm:$0xff] %v19277_v23  ;;  %v19297_v23 = vpop.f32.mrf.mxu0 }
 0x628   :  { %v19279_v2 = vpop.f32.mrf.mxu1  ;;  %21740 = vst [vmem:[#allocation74_spill] sm:$0xff] %v19297_v23 }
 0x629   :  { %21733 = vst [vmem:[#allocation87_spill] sm:$0xff] %v19279_v2 }
 0x62a   :  { %v19283_v27 = vpop.f32.mrf.mxu1 }
 0x62b   :  { %21735 = vst [vmem:[#allocation90_spill] sm:$0xff] %v19283_v27 }
 0x62c   :  { %v19285_v13 = vpop.f32.mrf.mxu1  ;;  %14010 = vmatmul.mubr.msk.bf16.gmra.mxu1 %vm1224_vm2, %v18654_v40  ;;  %v19306_v40 = vpop.f32.mrf.mxu0 }
 0x62d   :  { %21736 = vst [vmem:[#allocation71_spill] sm:$0xff] %v19285_v13  ;;  %14013 = vmatprep.mubr.msk.bf16.mxu1 %vm1224_vm2, %v18692_v34  ;;  %21742 = vst [vmem:[#allocation148_spill] sm:$0xff] %v19306_v40  ;;  %v19311_v34 = vld [vmem:[%s20588_s4 + $0x3] ss:$0 sm:$0xff] }
 0x62e   :  { %v19293_v25 = vpop.f32.mrf.mxu1  ;;  %v19316_v23 = vpop.f32.mrf.mxu0 }
 0x62f   :  { %21738 = vst [vmem:[#allocation73_spill] sm:$0xff] %v19293_v25  ;;  %21743 = vst [vmem:[#allocation98_spill] sm:$0xff] %v19316_v23 }
 0x630   :  { %v19295_v50 = vpop.f32.mrf.mxu1 }
 0x631   :  { %21739 = vst [vmem:[#allocation17_spill] sm:$0xff] %v19295_v50 }
 0x632   :  { %v19299_v2 = vpop.f32.mrf.mxu1 }
 0x633   :  { %21741 = vst [vmem:[#allocation104_spill] sm:$0xff] %v19299_v2 }
 0x634   :  { %v13919_v7 = vpop.f32.mrf.mxu1  ;;  %14014 = vmatmul.mubr.msk.bf16.gmra.mxu1 %vm1224_vm2, %v18686_v49 }
 0x635   :  { %v7863_v13 = vadd.f32 %v13919_v7, %v18773_v0  ;;  %14017 = vmatprep.mubr.msk.bf16.mxu1 %vm1224_vm2, %v18724_v19 }
 0x636   :  { %v7350_v50 = vpop.f32.mrf.mxu1 }
 0x637   :  { %v7861_v25 = vadd.f32 %v7350_v50, %v18782_v12  ;;  %v7996_v27 = vadd.f32 %v19311_v34, %v7863_v13 }
 0x638   :  { %v13920_v2 = vpop.f32.mrf.mxu1 }
 0x639   :  { %v7864_v49 = vadd.f32 %v13920_v2, %v18789_v10  ;;  %v7994_v19 = vadd.f32 %v19311_v34, %v7861_v25  ;;  %v8124_v52 = vmax.f32 %v7996_v27, 0.0  ;;  %v19327_v10 = vpop.f32.mrf.mxu0 }
 0x63a   :  { %v7353_v0 = vpop.f32.mrf.mxu1 }
 0x63b   :  { %v7997_v7 = vadd.f32 %v19311_v34, %v7864_v49  ;;  %v7862_v40 = vadd.f32 %v7353_v0, %v18794_v37  ;;  %v8122_v25 = vmax.f32 %v7994_v19, 0.0 }
 0x63c   :  { %v13923_v24 = vpop.f32.mrf.mxu1  ;;  %14018 = vmatmul.mubr.msk.bf16.gmra.mxu1 %vm1224_vm2, %v18718_v57 }
 0x63d   :  { %v8125_v12 = vmax.f32 %v7997_v7, 0.0  ;;  %v7995_v50 = vadd.f32 %v19311_v34, %v7862_v40  ;;  %v7867_v13 = vadd.f32 %v13923_v24, %v18805_v48  ;;  %14021 = vmatprep.mubr.msk.bf16.mxu1 %vm1224_vm2, %v18756_v63  ;;  %v19336_v48 = vpop.f32.mrf.mxu0  ;;  %v14534_v63 = vld [vmem:[%s20587_s3 + $0x170] sm:$0xff]  }
 0x63e   :  { %v7366_v2 = vpop.f32.mrf.mxu1 }
 0x63f   :  { %v19329_v49 = vpack.c.bf16 %v8125_v12, %v8124_v52  ;;  %v8123_v37 = vmax.f32 %v7995_v50, 0.0  ;;  %v7865_v0 = vadd.f32 %v7366_v2, %v18814_v9  ;;  %v8000_v27 = vadd.f32 %v19311_v34, %v7867_v13 }
 0x640   :  { %v13924_v23 = vpop.f32.mrf.mxu1 }
 0x641   :  { %v19332_v57 = vpack.c.bf16 %v8123_v37, %v8122_v25  ;;  %v7868_v40 = vadd.f32 %v13924_v23, %v18819_v11  ;;  %v7998_v52 = vadd.f32 %v19311_v34, %v7865_v0  ;;  %v8128_v11 = vmax.f32 %v8000_v27, 0.0 }
 0x642   :  { %v7369_v24 = vpop.f32.mrf.mxu1 }
 0x643   :  { %v8001_v19 = vadd.f32 %v19311_v34, %v7868_v40  ;;  %v7866_v9 = vadd.f32 %v7369_v24, %v18824_v20  ;;  %14053 = vmatprep.mubr.msk.bf16.mxu0 %vm1224_vm2, %v19332_v57  ;;  %v19355_v20 = vpop.f32.mrf.mxu0  ;;  %v8126_v2 = vmax.f32 %v7998_v52, 0.0 }
 0x644   :  { %v13927_v7 = vpop.f32.mrf.mxu1  ;;  %14022 = vmatmul.mubr.msk.bf16.gmra.mxu1 %vm1224_vm2, %v18750_v39  ;;  %14054 = vmatmul.mubr.msk.bf16.vlgmr.msra.gmra.mxu0 %vm1224_vm2, %v19329_v49 }
 0x645   :  { %v8129_v23 = vmax.f32 %v8001_v19, 0.0  ;;  %v7999_v12 = vadd.f32 %v19311_v34, %v7866_v9  ;;  %v7871_v50 = vadd.f32 %v13927_v7, %v18833_v55  ;;  %14318 = vmatpush3.bf16.msra.mxu0 %v19077_v33  ;;  %14025 = vmatprep.mubr.msk.bf16.mxu1 %vm1224_vm2, %v18786_v16  ;;  %v14535_v16 = vld [vmem:[%s20587_s3 + $0x168] sm:$0xff]   ;;  %v19367_v40 = vpop.f32.mrf.mxu0 }
 0x646   :  { %v7382_v13 = vpop.f32.mrf.mxu1  ;;  %14319 = vmatprep.subr.bf16.mxu0 %v14534_v63 }
 0x647   :  { %v19357_v39 = vpack.c.bf16 %v8129_v23, %v8128_v11  ;;  %v8127_v25 = vmax.f32 %v7999_v12, 0.0  ;;  %v7869_v37 = vadd.f32 %v7382_v13, %v18842_v21  ;;  %v8004_v55 = vadd.f32 %v19311_v34, %v7871_v50 }
 0x648   :  { %v13928_v0 = vpop.f32.mrf.mxu1  ;;  %v21744_v23 = vmov 0  }
 0x649   :  { %v19360_v27 = vpack.c.bf16 %v8127_v25, %v8126_v2  ;;  %v7872_v33 = vadd.f32 %v13928_v0, %v18847_v59  ;;  %14320 = vmatpush3.bf16.msra.mxu0 %v14534_v63  ;;  %v8002_v52 = vadd.f32 %v19311_v34, %v7869_v37  ;;  %v8132_v59 = vmax.f32 %v8004_v55, 0.0 }
 0x64a   :  { %v7385_v24 = vpop.f32.mrf.mxu1  ;;  %14321 = vmatprep.subr.bf16.mxu0 %v14535_v16 }
 0x64b   :  { %v8005_v19 = vadd.f32 %v19311_v34, %v7872_v33  ;;  %v7870_v21 = vadd.f32 %v7385_v24, %v18852_v8  ;;  %14057 = vmatprep.mubr.msk.bf16.mxu0 %vm1224_vm2, %v19360_v27  ;;  %v19381_v8 = vpop.f32.mrf.mxu0  ;;  %v8130_v50 = vmax.f32 %v8002_v52, 0.0 }
 0x64c   :  { %v13931_v9 = vpop.f32.mrf.mxu1  ;;  %14026 = vmatmul.mubr.msk.bf16.gmra.mxu1 %vm1224_vm2, %v18779_v30  ;;  %14058 = vmatmul.mubr.msk.bf16.gmra.mxu0 %vm1224_vm2, %v19357_v39 }
 0x64d   :  { %v8133_v63 = vmax.f32 %v8005_v19, 0.0  ;;  %v8003_v7 = vadd.f32 %v19311_v34, %v7870_v21  ;;  %v7875_v11 = vadd.f32 %v13931_v9, %v18861_v15  ;;  %14029 = vmatprep.mubr.bf16.mxu1 %v21744_v23  ;;  %14322 = vmatpush3.bf16.msra.mxu0 %v14535_v16  ;;  %v19390_v15 = vpop.f32.mrf.mxu0  ;;  %v21745_v16 = vld [vmem:[#allocation107_spill] sm:$0xff] }
 0x64e   :  { %v7398_v12 = vpop.f32.mrf.mxu1  ;;  %v6854_v24 = vadd.f32 %v18887_v43, %v21745_v16 }
 0x64f   :  { %v19383_v13 = vpack.c.bf16 %v8133_v63, %v8132_v59  ;;  %v8131_v2 = vmax.f32 %v8003_v7, 0.0  ;;  %v7873_v30 = vadd.f32 %v7398_v12, %v18870_v51  ;;  %v8008_v0 = vadd.f32 %v19311_v34, %v7875_v11  ;;  %v21746_v63 = vld [vmem:[#allocation79_spill] sm:$0xff] }
 0x650   :  { %v13932_v25 = vpop.f32.mrf.mxu1  ;;  %v6846_v7 = vadd.f32 %v18899_v61, %v21746_v63  ;;  %v6857_v12 = vadd.f32 %v18903_v14, %v18720_v22 }
 0x651   :  { %v19386_v37 = vpack.c.bf16 %v8131_v2, %v8130_v50  ;;  %v7876_v55 = vadd.f32 %v13932_v25, %v18875_v1  ;;  %v8006_v52 = vadd.f32 %v19311_v34, %v7873_v30  ;;  %v8136_v1 = vmax.f32 %v8008_v0, 0.0 }
 0x652   :  { %v7401_v33 = vpop.f32.mrf.mxu1 }
 0x653   :  { %v8009_v19 = vadd.f32 %v19311_v34, %v7876_v55  ;;  %v7874_v21 = vadd.f32 %v7401_v33, %v18880_v29  ;;  %14061 = vmatprep.mubr.msk.bf16.mxu0 %vm1224_vm2, %v19386_v37  ;;  %v19406_v29 = vpop.f32.mrf.mxu0  ;;  %v8134_v50 = vmax.f32 %v8006_v52, 0.0  ;;  %v6849_v55 = vadd.f32 %v18907_v4, %v18727_v45 }
 0x654   :  { %v13935_v51 = vpop.f32.mrf.mxu1  ;;  %14030 = vmatmul.mubr.bf16.gmra.mxu1 %v21744_v23  ;;  %14062 = vmatmul.mubr.msk.bf16.gmra.mxu0 %vm1224_vm2, %v19383_v13 }
 0x655   :  { %v8137_v9 = vmax.f32 %v8009_v19, 0.0  ;;  %v8007_v59 = vadd.f32 %v19311_v34, %v7874_v21  ;;  %v7879_v43 = vadd.f32 %v13935_v51, %v6854_v24  ;;  %14033 = vmatprep.mubr.bf16.mxu1 %v21744_v23  ;;  %v19417_v24 = vpop.f32.mrf.mxu0  ;;  %v21747_v21 = vld [vmem:[#allocation110_spill] sm:$0xff] }
 0x656   :  { %v7414_v11 = vpop.f32.mrf.mxu1  ;;  %v6870_v22 = vadd.f32 %v18911_v54, %v21747_v21  ;;  %v6862_v54 = vadd.f32 %v18923_v46, %v18748_v44 }
 0x657   :  { %v19410_v2 = vpack.c.bf16 %v8137_v9, %v8136_v1  ;;  %v8135_v30 = vmax.f32 %v8007_v59, 0.0  ;;  %v7877_v25 = vadd.f32 %v7414_v11, %v6846_v7  ;;  %v8012_v16 = vadd.f32 %v19311_v34, %v7879_v43  ;;  %v19432_v43 = vpop.f32.mrf.mxu0  ;;  %v21749_v7 = vld [vmem:[#allocation94_spill] sm:$0xff] }
 0x658   :  { %v13936_v0 = vpop.f32.mrf.mxu1  ;;  %21748 = vst [vmem:[#allocation19_spill] sm:$0xff] %v19432_v43  ;;  %v6873_v11 = vadd.f32 %v21749_v7, %v18752_v35 }
 0x659   :  { %v19414_v33 = vpack.c.bf16 %v8135_v30, %v8134_v50  ;;  %v7880_v61 = vadd.f32 %v13936_v0, %v6857_v12  ;;  %v8010_v14 = vadd.f32 %v19311_v34, %v7877_v25  ;;  %v8140_v4 = vmax.f32 %v8012_v16, 0.0  ;;  %v21751_v16 = vld [vmem:[#allocation14_spill] sm:$0xff]  ;;  %v19443_v46 = vpop.f32.mrf.mxu0 }
 0x65a   :  { %v7417_v19 = vpop.f32.mrf.mxu1  ;;  %21752 = vst [vmem:[#allocation77_spill] sm:$0xff] %v19443_v46 }
 0x65b   :  { %v8013_v52 = vadd.f32 %v19311_v34, %v7880_v61  ;;  %v7878_v51 = vadd.f32 %v7417_v19, %v6849_v55  ;;  %14065 = vmatprep.mubr.msk.bf16.mxu0 %vm1224_vm2, %v19414_v33  ;;  %v8138_v12 = vmax.f32 %v8010_v14, 0.0  ;;  %v21750_v55 = vld [vmem:[#allocation23_spill] sm:$0xff] }
 0x65c   :  { %v13939_v45 = vpop.f32.mrf.mxu1  ;;  %14034 = vmatmul.mubr.bf16.gmra.mxu1 %v21744_v23  ;;  %14066 = vmatmul.mubr.msk.bf16.gmra.mxu0 %vm1224_vm2, %v19410_v2  ;;  %v6865_v61 = vadd.f32 %v21751_v16, %v21750_v55  ;;  %v19460_v55 = vpop.f32.mrf.mxu0 }
 0x65d   :  { %v8141_v1 = vmax.f32 %v8013_v52, 0.0  ;;  %v8011_v9 = vadd.f32 %v19311_v34, %v7878_v51  ;;  %v7883_v59 = vadd.f32 %v13939_v45, %v6870_v22  ;;  %14037 = vmatprep.mubr.bf16.mxu1 %v21744_v23  ;;  %v21753_v52 = vld [vmem:[#allocation111_spill] sm:$0xff]  ;;  %21759 = vst [vmem:[#allocation108_spill] sm:$0xff] %v19460_v55  ;;  %v21765_v55 = vld [vmem:[#allocation18_spill] sm:$0xff] }
 0x65e   :  { %v7430_v63 = vpop.f32.mrf.mxu1  ;;  %v21754_v51 = vld [vmem:[#allocation95_spill] sm:$0xff] }
 0x65f   :  { %v19436_v50 = vpack.c.bf16 %v8141_v1, %v8140_v4  ;;  %v8139_v30 = vmax.f32 %v8011_v9, 0.0  ;;  %v7881_v25 = vadd.f32 %v7430_v63, %v6862_v54  ;;  %v8016_v21 = vadd.f32 %v19311_v34, %v7883_v59  ;;  %v21755_v1 = vld [vmem:[#allocation81_spill] sm:$0xff] }
 0x660   :  { %v13940_v0 = vpop.f32.mrf.mxu1  ;;  %v6886_v35 = vadd.f32 %v21754_v51, %v21753_v52  ;;  %v21756_v9 = vld [vmem:[#allocation97_spill] sm:$0xff] }
 0x661   :  { %v19440_v19 = vpack.c.bf16 %v8139_v30, %v8138_v12  ;;  %v7884_v44 = vadd.f32 %v13940_v0, %v6873_v11  ;;  %v8014_v14 = vadd.f32 %v19311_v34, %v7881_v25  ;;  %v6878_v54 = vadd.f32 %v21756_v9, %v21755_v1  ;;  %v21757_v30 = vld [vmem:[#allocation114_spill] sm:$0xff] }
 0x662   :  { %v7433_v22 = vpop.f32.mrf.mxu1  ;;  %v8144_v59 = vmax.f32 %v8016_v21, 0.0  ;;  %v21758_v25 = vld [vmem:[#allocation154_spill] sm:$0xff] }
 0x663   :  { %v8017_v45 = vadd.f32 %v19311_v34, %v7884_v44  ;;  %v7882_v4 = vadd.f32 %v7433_v22, %v6865_v61  ;;  %14069 = vmatprep.mubr.msk.bf16.mxu0 %vm1224_vm2, %v19440_v19  ;;  %v6889_v0 = vadd.f32 %v21758_v25, %v21757_v30  ;;  %v8142_v61 = vmax.f32 %v8014_v14, 0.0  ;;  %v21761_v1 = vld [vmem:[#allocation82_spill] sm:$0xff]  ;;  %v21764_v25 = vld [vmem:[#allocation115_spill] sm:$0xff] }
 0x664   :  { %v13943_v63 = vpop.f32.mrf.mxu1  ;;  %14038 = vmatmul.mubr.bf16.gmra.mxu1 %v21744_v23  ;;  %14070 = vmatmul.mubr.msk.bf16.gmra.mxu0 %vm1224_vm2, %v19436_v50  ;;  %v21762_v21 = vld [vmem:[#allocation30_spill] sm:$0xff]  ;;  %v6902_v46 = vadd.f32 %v21765_v55, %v21764_v25 }
 0x665   :  { %v8145_v7 = vmax.f32 %v8017_v45, 0.0  ;;  %v8015_v11 = vadd.f32 %v19311_v34, %v7882_v4  ;;  %v7887_v12 = vadd.f32 %v13943_v63, %v6886_v35  ;;  %14041 = vmatprep.mubr.bf16.mxu1 %v21744_v23  ;;  %v6881_v45 = vadd.f32 %v21762_v21, %v21761_v1  ;;  %v19469_v63 = vpop.f32.mrf.mxu0 }
 0x666   :  { %v7446_v16 = vpop.f32.mrf.mxu1  ;;  %21763 = vst [vmem:[#allocation78_spill] sm:$0xff] %v19469_v63  ;;  %v21772_v63 = vld [vmem:[#allocation85_spill] sm:$0xff] }
 0x667   :  { %v19462_v44 = vpack.c.bf16 %v8145_v7, %v8144_v59  ;;  %v8143_v22 = vmax.f32 %v8015_v11, 0.0  ;;  %v7885_v52 = vadd.f32 %v7446_v16, %v6878_v54  ;;  %v8020_v35 = vadd.f32 %v19311_v34, %v7887_v12  ;;  %v21766_v7 = vld [vmem:[#allocation119_spill] sm:$0xff]  ;;  %v21767_v11 = vld [vmem:[#allocation20_spill] sm:$0xff]  ;;  %v19486_v21 = vpop.f32.mrf.mxu0 }
 0x668   :  { %v13944_v51 = vpop.f32.mrf.mxu1  ;;  %v6894_v16 = vadd.f32 %v21767_v11, %v21766_v7  ;;  %21770 = vst [vmem:[#allocation99_spill] sm:$0xff] %v19486_v21  ;;  %v21777_v21 = vld [vmem:[#allocation55_spill] sm:$0xff] }
 0x669   :  { %21760 = vst [vmem:[#allocation16_spill] sm:$0xff] %v19462_v44  ;;  %v19466_v9 = vpack.c.bf16 %v8143_v22, %v8142_v61  ;;  %v7888_v4 = vadd.f32 %v13944_v51, %v6889_v0  ;;  %v8018_v14 = vadd.f32 %v19311_v34, %v7885_v52  ;;  %v8148_v12 = vmax.f32 %v8020_v35, 0.0  ;;  %v21768_v52 = vld [vmem:[#allocation25_spill] sm:$0xff]  ;;  %v21769_v51 = vld [vmem:[#allocation22_spill] sm:$0xff]  ;;  %v21773_v35 = vld [vmem:[#allocation24_spill] sm:$0xff] }
 0x66a   :  { %v7449_v30 = vpop.f32.mrf.mxu1  ;;  %v6905_v1 = vadd.f32 %v21769_v51, %v21768_v52  ;;  %v21776_v51 = vld [vmem:[#allocation47_spill] sm:$0xff] }
 0x66b   :  { %v8021_v59 = vadd.f32 %v19311_v34, %v7888_v4  ;;  %v7886_v54 = vadd.f32 %v7449_v30, %v6881_v45  ;;  %14073 = vmatprep.mubr.msk.bf16.mxu0 %vm1224_vm2, %v19466_v9  ;;  %v8146_v4 = vmax.f32 %v8018_v14, 0.0 }
 0x66c   :  { %v13947_v61 = vpop.f32.mrf.mxu1  ;;  %14042 = vmatmul.mubr.bf16.gmra.mxu1 %v21744_v23  ;;  %14074 = vmatmul.mubr.msk.bf16.gmra.mxu0 %vm1224_vm2, %v19462_v44  ;;  %v6918_v44 = vadd.f32 %v21777_v21, %v21776_v51 }
 0x66d   :  { %v8149_v0 = vmax.f32 %v8021_v59, 0.0  ;;  %v8019_v55 = vadd.f32 %v19311_v34, %v7886_v54  ;;  %v7891_v22 = vadd.f32 %v13947_v61, %v6902_v46  ;;  %14189 = vmatprep.mubr.bf16.mxu1 %v21744_v23  ;;  %v6897_v59 = vadd.f32 %v21773_v35, %v21772_v63  ;;  %v19495_v61 = vpop.f32.mrf.mxu0  ;;  %v21778_v63 = vld [vmem:[#allocation10_spill] sm:$0xff] }
 0x66e   :  { %v7462_v45 = vpop.f32.mrf.mxu1  ;;  %21775 = vst [vmem:[#allocation103_spill] sm:$0xff] %v19495_v61  ;;  %v21784_v61 = vld [vmem:[#allocation129_spill] sm:$0xff] }
 0x66f   :  { %v19488_v30 = vpack.c.bf16 %v8149_v0, %v8148_v12  ;;  %v8147_v25 = vmax.f32 %v8019_v55, 0.0  ;;  %v7889_v7 = vadd.f32 %v7462_v45, %v6894_v16  ;;  %v8024_v46 = vadd.f32 %v19311_v34, %v7891_v22  ;;  %v21779_v0 = vld [vmem:[#allocation72_spill] sm:$0xff]  ;;  %v19512_v35 = vpop.f32.mrf.mxu0 }
 0x670   :  { %v13948_v11 = vpop.f32.mrf.mxu1  ;;  %v6910_v55 = vadd.f32 %v21779_v0, %v21778_v63  ;;  %21782 = vst [vmem:[#allocation107_spill] sm:$0xff] %v19512_v35  ;;  %v21789_v35 = vld [vmem:[#allocation7_spill] sm:$0xff] }
 0x671   :  { %21771 = vst [vmem:[#allocation21_spill] sm:$0xff] %v19488_v30  ;;  %v19492_v43 = vpack.c.bf16 %v8147_v25, %v8146_v4  ;;  %v7892_v54 = vadd.f32 %v13948_v11, %v6905_v1  ;;  %v8022_v14 = vadd.f32 %v19311_v34, %v7889_v7  ;;  %v8152_v22 = vmax.f32 %v8024_v46, 0.0  ;;  %v21780_v25 = vld [vmem:[#allocation121_spill] sm:$0xff]  ;;  %v21781_v7 = vld [vmem:[#allocation60_spill] sm:$0xff]  ;;  %v21785_v46 = vld [vmem:[#allocation62_spill] sm:$0xff] }
 0x672   :  { %v7465_v52 = vpop.f32.mrf.mxu1  ;;  %v6921_v11 = vadd.f32 %v21781_v7, %v21780_v25  ;;  %v21788_v7 = vld [vmem:[#allocation52_spill] sm:$0xff] }
 0x673   :  { %21774 = vst [vmem:[#allocation102_spill] sm:$0xff] %v19492_v43  ;;  %v8025_v12 = vadd.f32 %v19311_v34, %v7892_v54  ;;  %v7890_v16 = vadd.f32 %v7465_v52, %v6897_v59  ;;  %14077 = vmatprep.mubr.msk.bf16.mxu0 %vm1224_vm2, %v19492_v43  ;;  %v8150_v54 = vmax.f32 %v8022_v14, 0.0  ;;  %v6934_v43 = vadd.f32 %v21789_v35, %v21788_v7 }
 0x674   :  { %v13951_v45 = vpop.f32.mrf.mxu1  ;;  %14078 = vmatmul.mubr.msk.bf16.gmra.mxu0 %vm1224_vm2, %v19488_v30  ;;  %14190 = vmatmul.mubr.bf16.vlgmr.msra.gmra.mxu1 %v21744_v23 }
 0x675   :  { %v8153_v1 = vmax.f32 %v8025_v12, 0.0  ;;  %v8023_v21 = vadd.f32 %v19311_v34, %v7890_v16  ;;  %v7895_v4 = vadd.f32 %v13951_v45, %v6918_v44  ;;  %14193 = vmatprep.mubr.bf16.mxu1 %v21744_v23  ;;  %v6913_v12 = vadd.f32 %v21785_v46, %v21784_v61  ;;  %v19521_v45 = vpop.f32.mrf.mxu0  ;;  %v21790_v61 = vld [vmem:[#allocation132_spill] sm:$0xff] }
 0x676   :  { %v7478_v59 = vpop.f32.mrf.mxu1  ;;  %21787 = vst [vmem:[#allocation94_spill] sm:$0xff] %v19521_v45 }
 0x677   :  { %v19514_v52 = vpack.c.bf16 %v8153_v1, %v8152_v22  ;;  %v8151_v51 = vmax.f32 %v8023_v21, 0.0  ;;  %v7893_v63 = vadd.f32 %v7478_v59, %v6910_v55  ;;  %v8028_v44 = vadd.f32 %v19311_v34, %v7895_v4  ;;  %v21791_v1 = vld [vmem:[#allocation50_spill] sm:$0xff]  ;;  %v19538_v46 = vpop.f32.mrf.mxu0 }
 0x678   :  { %v13952_v0 = vpop.f32.mrf.mxu1  ;;  %v6926_v21 = vadd.f32 %v21791_v1, %v21790_v61  ;;  %21794 = vst [vmem:[#allocation23_spill] sm:$0xff] %v19538_v46  ;;  %v21801_v46 = vld [vmem:[#allocation126_spill] sm:$0xff] }
 0x679   :  { %21783 = vst [vmem:[#allocation79_spill] sm:$0xff] %v19514_v52  ;;  %v19518_v30 = vpack.c.bf16 %v8151_v51, %v8150_v54  ;;  %v7896_v16 = vadd.f32 %v13952_v0, %v6921_v11  ;;  %v8026_v14 = vadd.f32 %v19311_v34, %v7893_v63  ;;  %v8156_v4 = vmax.f32 %v8028_v44, 0.0  ;;  %v21792_v51 = vld [vmem:[#allocation123_spill] sm:$0xff]  ;;  %v21793_v63 = vld [vmem:[#allocation122_spill] sm:$0xff]  ;;  %v21797_v44 = vld [vmem:[#allocation124_spill] sm:$0xff] }
 0x67a   :  { %v7481_v25 = vpop.f32.mrf.mxu1  ;;  %v6937_v0 = vadd.f32 %v21793_v63, %v21792_v51  ;;  %v21800_v63 = vld [vmem:[#allocation125_spill] sm:$0xff] }
 0x67b   :  { %21786 = vst [vmem:[#allocation110_spill] sm:$0xff] %v19518_v30  ;;  %v8029_v22 = vadd.f32 %v19311_v34, %v7896_v16  ;;  %v7894_v55 = vadd.f32 %v7481_v25, %v6913_v12  ;;  %14081 = vmatprep.mubr.msk.bf16.mxu0 %vm1224_vm2, %v19518_v30  ;;  %v8154_v16 = vmax.f32 %v8026_v14, 0.0  ;;  %v6950_v30 = vadd.f32 %v21801_v46, %v21800_v63 }
 0x67c   :  { %v13955_v59 = vpop.f32.mrf.mxu1  ;;  %14082 = vmatmul.mubr.msk.bf16.gmra.mxu0 %vm1224_vm2, %v19514_v52  ;;  %14194 = vmatmul.mubr.bf16.gmra.mxu1 %v21744_v23  ;;  %v21796_v52 = vld [vmem:[#allocation135_spill] sm:$0xff] }
 0x67d   :  { %v8157_v11 = vmax.f32 %v8029_v22, 0.0  ;;  %v8027_v35 = vadd.f32 %v19311_v34, %v7894_v55  ;;  %v7899_v54 = vadd.f32 %v13955_v59, %v6934_v43  ;;  %14197 = vmatprep.mubr.bf16.mxu1 %v21744_v23  ;;  %v6929_v22 = vadd.f32 %v21797_v44, %v21796_v52  ;;  %v19547_v59 = vpop.f32.mrf.mxu0  ;;  %v21802_v52 = vld [vmem:[#allocation138_spill] sm:$0xff] }
 0x67e   :  { %v7494_v12 = vpop.f32.mrf.mxu1  ;;  %21799 = vst [vmem:[#allocation95_spill] sm:$0xff] %v19547_v59 }
 0x67f   :  { %v19540_v25 = vpack.c.bf16 %v8157_v11, %v8156_v4  ;;  %v8155_v7 = vmax.f32 %v8027_v35, 0.0  ;;  %v7897_v61 = vadd.f32 %v7494_v12, %v6926_v21  ;;  %v8032_v43 = vadd.f32 %v19311_v34, %v7899_v54  ;;  %v21803_v11 = vld [vmem:[#allocation130_spill] sm:$0xff]  ;;  %v19564_v44 = vpop.f32.mrf.mxu0 }
 0x680   :  { %v13956_v1 = vpop.f32.mrf.mxu1  ;;  %v6942_v35 = vadd.f32 %v21803_v11, %v21802_v52  ;;  %21806 = vst [vmem:[#allocation81_spill] sm:$0xff] %v19564_v44 }
 0x681   :  { %21795 = vst [vmem:[#allocation14_spill] sm:$0xff] %v19540_v25  ;;  %v19544_v45 = vpack.c.bf16 %v8155_v7, %v8154_v16  ;;  %v7900_v55 = vadd.f32 %v13956_v1, %v6937_v0  ;;  %v8030_v14 = vadd.f32 %v19311_v34, %v7897_v61  ;;  %v8160_v54 = vmax.f32 %v8032_v43, 0.0  ;;  %v21804_v7 = vld [vmem:[#allocation128_spill] sm:$0xff]  ;;  %v21809_v43 = vld [vmem:[#allocation59_spill] sm:$0xff] }
 0x682   :  { %v7497_v51 = vpop.f32.mrf.mxu1  ;;  %v21805_v61 = vld [vmem:[#allocation76_spill] sm:$0xff] }
 0x683   :  { %21798 = vst [vmem:[#allocation111_spill] sm:$0xff] %v19544_v45  ;;  %v8033_v4 = vadd.f32 %v19311_v34, %v7900_v55  ;;  %v7898_v21 = vadd.f32 %v7497_v51, %v6929_v22  ;;  %14085 = vmatprep.mubr.msk.bf16.mxu0 %vm1224_vm2, %v19544_v45  ;;  %v6953_v1 = vadd.f32 %v21805_v61, %v21804_v7  ;;  %v8158_v55 = vmax.f32 %v8030_v14, 0.0  ;;  %v21811_v7 = vld [vmem:[#allocation131_spill] sm:$0xff]  ;;  %v21812_v61 = vld [vmem:[#allocation133_spill] sm:$0xff] }
 0x684   :  { %v13959_v12 = vpop.f32.mrf.mxu1  ;;  %14086 = vmatmul.mubr.msk.bf16.gmra.mxu0 %vm1224_vm2, %v19540_v25  ;;  %14198 = vmatmul.mubr.bf16.gmra.mxu1 %v21744_v23  ;;  %v21808_v25 = vld [vmem:[#allocation141_spill] sm:$0xff]  ;;  %v6966_v14 = vadd.f32 %v21812_v61, %v21811_v7 }
 0x685   :  { %v8161_v0 = vmax.f32 %v8033_v4, 0.0  ;;  %v8031_v46 = vadd.f32 %v19311_v34, %v7898_v21  ;;  %v7903_v16 = vadd.f32 %v13959_v12, %v6950_v30  ;;  %14201 = vmatprep.mubr.bf16.mxu1 %v21744_v23  ;;  %v6945_v4 = vadd.f32 %v21809_v43, %v21808_v25  ;;  %v14536_v12 = vld [vmem:[%s20587_s3 + $0x160] sm:$0xff]  }
 0x686   :  { %v7510_v22 = vpop.f32.mrf.mxu1  ;;  %14323 = vmatprep.subr.bf16.mxu0 %v14536_v12 }
 0x687   :  { %v19566_v51 = vpack.c.bf16 %v8161_v0, %v8160_v54  ;;  %v8159_v63 = vmax.f32 %v8031_v46, 0.0  ;;  %v7901_v52 = vadd.f32 %v7510_v22, %v6942_v35  ;;  %v8036_v30 = vadd.f32 %v19311_v34, %v7903_v16  ;;  %v19578_v54 = vpop.f32.mrf.mxu0  ;;  %v21814_v16 = vld [vmem:[#allocation144_spill] sm:$0xff]  ;;  %14324 = vmatpush3.bf16.msra.mxu0 %v14536_v12 }
 0x688   :  { %v13960_v11 = vpop.f32.mrf.mxu1  ;;  %21813 = vst [vmem:[#allocation154_spill] sm:$0xff] %v19578_v54 }
 0x689   :  { %21807 = vst [vmem:[#allocation97_spill] sm:$0xff] %v19566_v51  ;;  %v19570_v59 = vpack.c.bf16 %v8159_v63, %v8158_v55  ;;  %v7904_v21 = vadd.f32 %v13960_v11, %v6953_v1  ;;  %v8034_v35 = vadd.f32 %v19311_v34, %v7901_v52  ;;  %v21815_v1 = vld [vmem:[#allocation134_spill] sm:$0xff]  ;;  %v8164_v63 = vmax.f32 %v8036_v30, 0.0  ;;  %v19593_v61 = vpop.f32.mrf.mxu0  ;;  %v21820_v30 = vld [vmem:[#allocation136_spill] sm:$0xff] }
 0x68a   :  { %v7513_v0 = vpop.f32.mrf.mxu1  ;;  %v6958_v22 = vadd.f32 %v21815_v1, %v21814_v16  ;;  %21818 = vst [vmem:[#allocation82_spill] sm:$0xff] %v19593_v61  ;;  %v21825_v61 = vld [vmem:[#allocation139_spill] sm:$0xff] }
 0x68b   :  { %21810 = vst [vmem:[#allocation114_spill] sm:$0xff] %v19570_v59  ;;  %v8037_v46 = vadd.f32 %v19311_v34, %v7904_v21  ;;  %v7902_v25 = vadd.f32 %v7513_v0, %v6945_v4  ;;  %14089 = vmatprep.mubr.msk.bf16.mxu0 %vm1224_vm2, %v19570_v59  ;;  %v21816_v4 = vld [vmem:[#allocation80_spill] sm:$0xff]  ;;  %v21817_v21 = vld [vmem:[#allocation61_spill] sm:$0xff]  ;;  %v8162_v16 = vmax.f32 %v8034_v35, 0.0 }
 0x68c   :  { %v13963_v55 = vpop.f32.mrf.mxu1  ;;  %14090 = vmatmul.mubr.msk.bf16.gmra.mxu0 %vm1224_vm2, %v19566_v51  ;;  %14202 = vmatmul.mubr.bf16.gmra.mxu1 %v21744_v23  ;;  %v6969_v7 = vadd.f32 %v21817_v21, %v21816_v4  ;;  %v21824_v21 = vld [vmem:[#allocation140_spill] sm:$0xff] }
 0x68d   :  { %v8165_v11 = vmax.f32 %v8037_v46, 0.0  ;;  %v8035_v52 = vadd.f32 %v19311_v34, %v7902_v25  ;;  %v7907_v43 = vadd.f32 %v13963_v55, %v6966_v14  ;;  %14205 = vmatprep.mubr.bf16.mxu1 %v21744_v23  ;;  %v21821_v46 = vld [vmem:[#allocation137_spill] sm:$0xff]  ;;  %v19602_v55 = vpop.f32.mrf.mxu0  ;;  %v6982_v45 = vadd.f32 %v21825_v61, %v21824_v21  ;;  %v21829_v61 = vld [vmem:[#allocation146_spill] sm:$0xff] }
 0x68e   :  { %v7526_v0 = vpop.f32.mrf.mxu1  ;;  %v6961_v44 = vadd.f32 %v21821_v46, %v21820_v30  ;;  %21823 = vst [vmem:[#allocation18_spill] sm:$0xff] %v19602_v55 }
 0x68f   :  { %v19595_v1 = vpack.c.bf16 %v8165_v11, %v8164_v63  ;;  %v8163_v51 = vmax.f32 %v8035_v52, 0.0  ;;  %v7905_v59 = vadd.f32 %v7526_v0, %v6958_v22  ;;  %v8040_v14 = vadd.f32 %v19311_v34, %v7907_v43  ;;  %v21826_v11 = vld [vmem:[#allocation145_spill] sm:$0xff]  ;;  %v19619_v30 = vpop.f32.mrf.mxu0 }
 0x690   :  { %v13964_v54 = vpop.f32.mrf.mxu1  ;;  %21830 = vst [vmem:[#allocation119_spill] sm:$0xff] %v19619_v30  ;;  %v21835_v30 = vld [vmem:[#allocation150_spill] sm:$0xff] }
 0x691   :  { %21819 = vst [vmem:[#allocation30_spill] sm:$0xff] %v19595_v1  ;;  %v19599_v25 = vpack.c.bf16 %v8163_v51, %v8162_v16  ;;  %v7908_v12 = vadd.f32 %v13964_v54, %v6969_v7  ;;  %v8038_v35 = vadd.f32 %v19311_v34, %v7905_v59  ;;  %v21827_v51 = vld [vmem:[#allocation96_spill] sm:$0xff]  ;;  %v8168_v54 = vmax.f32 %v8040_v14, 0.0 }
 0x692   :  { %v7529_v4 = vpop.f32.mrf.mxu1  ;;  %v6974_v52 = vadd.f32 %v21827_v51, %v21826_v11  ;;  %v21833_v14 = vld [vmem:[#allocation12_spill] sm:$0xff] }
 0x693   :  { %21822 = vst [vmem:[#allocation115_spill] sm:$0xff] %v19599_v25  ;;  %v8041_v63 = vadd.f32 %v19311_v34, %v7908_v12  ;;  %v7906_v22 = vadd.f32 %v7529_v4, %v6961_v44  ;;  %14093 = vmatprep.mubr.msk.bf16.mxu0 %vm1224_vm2, %v19599_v25  ;;  %v21828_v44 = vld [vmem:[#allocation147_spill] sm:$0xff]  ;;  %v8166_v12 = vmax.f32 %v8038_v35, 0.0 }
 0x694   :  { %v13967_v0 = vpop.f32.mrf.mxu1  ;;  %14094 = vmatmul.mubr.msk.bf16.gmra.mxu0 %vm1224_vm2, %v19595_v1  ;;  %14206 = vmatmul.mubr.bf16.gmra.mxu1 %v21744_v23  ;;  %v6985_v16 = vadd.f32 %v21829_v61, %v21828_v44  ;;  %v21832_v1 = vld [vmem:[#allocation32_spill] sm:$0xff]  ;;  %v21834_v61 = vld [vmem:[#allocation101_spill] sm:$0xff] }
 0x695   :  { %v8169_v43 = vmax.f32 %v8041_v63, 0.0  ;;  %v8039_v7 = vadd.f32 %v19311_v34, %v7906_v22  ;;  %v7911_v59 = vadd.f32 %v13967_v0, %v6982_v45  ;;  %14209 = vmatprep.mubr.bf16.mxu1 %v21744_v23  ;;  %v6977_v63 = vadd.f32 %v21833_v14, %v21832_v1  ;;  %v19628_v0 = vpop.f32.mrf.mxu0  ;;  %v21836_v1 = vld [vmem:[#allocation105_spill] sm:$0xff] }
 0x696   :  { %v7542_v46 = vpop.f32.mrf.mxu1  ;;  %v6998_v55 = vadd.f32 %v21835_v30, %v21834_v61 }
 0x697   :  { %v19621_v4 = vpack.c.bf16 %v8169_v43, %v8168_v54  ;;  %v8167_v21 = vmax.f32 %v8039_v7, 0.0  ;;  %v7909_v11 = vadd.f32 %v7542_v46, %v6974_v52  ;;  %v8044_v45 = vadd.f32 %v19311_v34, %v7911_v59  ;;  %v21837_v43 = vld [vmem:[#allocation28_spill] sm:$0xff] }
 0x698   :  { %v13968_v51 = vpop.f32.mrf.mxu1  ;;  %v6990_v7 = vadd.f32 %v21837_v43, %v21836_v1  ;;  %v21839_v43 = vld [vmem:[#allocation113_spill] sm:$0xff] }
 0x699   :  { %21831 = vst [vmem:[#allocation20_spill] sm:$0xff] %v19621_v4  ;;  %v19625_v25 = vpack.c.bf16 %v8167_v21, %v8166_v12  ;;  %v7912_v22 = vadd.f32 %v13968_v51, %v6985_v16  ;;  %v8042_v35 = vadd.f32 %v19311_v34, %v7909_v11  ;;  %v8172_v59 = vmax.f32 %v8044_v45, 0.0  ;;  %v21838_v21 = vld [vmem:[#allocation109_spill] sm:$0xff]  ;;  %v19645_v51 = vpop.f32.mrf.mxu0 }
 0x69a   :  { %v7545_v44 = vpop.f32.mrf.mxu1  ;;  %v7001_v11 = vadd.f32 %v19122_v41, %v21838_v21  ;;  %v6993_v45 = vadd.f32 %v19128_v56, %v21839_v43  ;;  %v21841_v21 = vld [vmem:[#allocation117_spill] sm:$0xff]  ;;  %v21842_v56 = vld [vmem:[#allocation118_spill] sm:$0xff] }
 0x69b   :  { %v8045_v54 = vadd.f32 %v19311_v34, %v7912_v22  ;;  %v7910_v52 = vadd.f32 %v7545_v44, %v6977_v63  ;;  %14097 = vmatprep.mubr.msk.bf16.mxu0 %vm1224_vm2, %v19625_v25  ;;  %v8170_v63 = vmax.f32 %v8042_v35, 0.0 }
 0x69c   :  { %v13971_v46 = vpop.f32.mrf.mxu1  ;;  %14098 = vmatmul.mubr.msk.bf16.gmra.mxu0 %vm1224_vm2, %v19621_v4  ;;  %14210 = vmatmul.mubr.bf16.gmra.mxu1 %v21744_v23  ;;  %v7014_v4 = vadd.f32 %v19138_v5, %v21841_v21  ;;  %v21844_v21 = vld [vmem:[#allocation26_spill] sm:$0xff] }
 0x69d   :  { %v8173_v16 = vmax.f32 %v8045_v54, 0.0  ;;  %v8043_v30 = vadd.f32 %v19311_v34, %v7910_v52  ;;  %v7915_v12 = vadd.f32 %v13971_v46, %v6998_v55  ;;  %14213 = vmatprep.mubr.bf16.mxu1 %v21744_v23  ;;  %v19654_v46 = vpop.f32.mrf.mxu0 }
 0x69e   :  { %v7558_v14 = vpop.f32.mrf.mxu1 }
 0x69f   :  { %v19647_v22 = vpack.c.bf16 %v8173_v16, %v8172_v59  ;;  %v8171_v44 = vmax.f32 %v8043_v30, 0.0  ;;  %v7913_v61 = vadd.f32 %v7558_v14, %v6990_v7  ;;  %v8048_v55 = vadd.f32 %v19311_v34, %v7915_v12 }
 0x6a0   :  { %v13972_v1 = vpop.f32.mrf.mxu1  ;;  %v7006_v16 = vadd.f32 %v19147_v26, %v21842_v56 }
 0x6a1   :  { %v19651_v54 = vpack.c.bf16 %v8171_v44, %v8170_v63  ;;  %v7916_v52 = vadd.f32 %v13972_v1, %v7001_v11  ;;  %v8046_v35 = vadd.f32 %v19311_v34, %v7913_v61  ;;  %v8176_v12 = vmax.f32 %v8048_v55, 0.0  ;;  %v21843_v63 = vld [vmem:[#allocation46_spill] sm:$0xff]  ;;  %v19671_v61 = vpop.f32.mrf.mxu0 }
 0x6a2   :  { %v7561_v41 = vpop.f32.mrf.mxu1  ;;  %v7017_v44 = vadd.f32 %v19160_v6, %v21843_v63  ;;  %v7009_v55 = vadd.f32 %v19169_v17, %v21844_v21  ;;  %v21846_v17 = vld [vmem:[#allocation57_spill] sm:$0xff] }
 0x6a3   :  { %21840 = vst [vmem:[#allocation25_spill] sm:$0xff] %v19651_v54  ;;  %v8049_v59 = vadd.f32 %v19311_v34, %v7916_v52  ;;  %v7914_v7 = vadd.f32 %v7561_v41, %v6993_v45  ;;  %14101 = vmatprep.mubr.msk.bf16.mxu0 %vm1224_vm2, %v19651_v54  ;;  %v8174_v26 = vmax.f32 %v8046_v35, 0.0  ;;  %v19680_v56 = vpop.f32.mrf.mxu0 }
 0x6a4   :  { %v13975_v30 = vpop.f32.mrf.mxu1  ;;  %14102 = vmatmul.mubr.msk.bf16.gmra.mxu0 %vm1224_vm2, %v19647_v22  ;;  %14214 = vmatmul.mubr.bf16.gmra.mxu1 %v21744_v23 }
 0x6a5   :  { %v8177_v11 = vmax.f32 %v8049_v59, 0.0  ;;  %v8047_v5 = vadd.f32 %v19311_v34, %v7914_v7  ;;  %v7919_v14 = vadd.f32 %v13975_v30, %v7014_v4  ;;  %14217 = vmatprep.mubr.bf16.mxu1 %v21744_v23  ;;  %v21845_v30 = vld [vmem:[#allocation120_spill] sm:$0xff] }
 0x6a6   :  { %v7574_v1 = vpop.f32.mrf.mxu1  ;;  %v7030_v63 = vadd.f32 %v19179_v31, %v21845_v30 }
 0x6a7   :  { %v19673_v43 = vpack.c.bf16 %v8177_v11, %v8176_v12  ;;  %v8175_v45 = vmax.f32 %v8047_v5, 0.0  ;;  %v7917_v52 = vadd.f32 %v7574_v1, %v7006_v16  ;;  %v8052_v4 = vadd.f32 %v19311_v34, %v7919_v14 }
 0x6a8   :  { %v13976_v41 = vpop.f32.mrf.mxu1  ;;  %v7022_v11 = vadd.f32 %v19185_v38, %v21846_v17  ;;  %v21849_v17 = vld [vmem:[#allocation54_spill] sm:$0xff] }
 0x6a9   :  { %v19677_v59 = vpack.c.bf16 %v8175_v45, %v8174_v26  ;;  %v7920_v7 = vadd.f32 %v13976_v41, %v7017_v44  ;;  %v8050_v35 = vadd.f32 %v19311_v34, %v7917_v52  ;;  %v8180_v14 = vmax.f32 %v8052_v4, 0.0  ;;  %v21847_v26 = vld [vmem:[#allocation27_spill] sm:$0xff]  ;;  %v19698_v52 = vpop.f32.mrf.mxu0  ;;  %v21848_v4 = vld [vmem:[#allocation64_spill] sm:$0xff] }
 0x6aa   :  { %v7577_v6 = vpop.f32.mrf.mxu1  ;;  %v7033_v45 = vadd.f32 %v19195_v53, %v21847_v26  ;;  %v7025_v30 = vadd.f32 %v19201_v58, %v21848_v4  ;;  %v21850_v58 = vld [vmem:[#allocation127_spill] sm:$0xff] }
 0x6ab   :  { %v8053_v12 = vadd.f32 %v19311_v34, %v7920_v7  ;;  %v7918_v16 = vadd.f32 %v7577_v6, %v7009_v55  ;;  %14105 = vmatprep.mubr.msk.bf16.mxu0 %vm1224_vm2, %v19677_v59  ;;  %v8178_v41 = vmax.f32 %v8050_v35, 0.0 }
 0x6ac   :  { %v13979_v5 = vpop.f32.mrf.mxu1  ;;  %14106 = vmatmul.mubr.msk.bf16.gmra.mxu0 %vm1224_vm2, %v19673_v43  ;;  %14218 = vmatmul.mubr.bf16.gmra.mxu1 %v21744_v23 }
 0x6ad   :  { %v8181_v44 = vmax.f32 %v8053_v12, 0.0  ;;  %v8051_v31 = vadd.f32 %v19311_v34, %v7918_v16  ;;  %v7923_v1 = vadd.f32 %v13979_v5, %v7030_v63  ;;  %14221 = vmatprep.mubr.msk.bf16.mxu1 %vm1224_vm2, %v19332_v57  ;;  %v19707_v16 = vpop.f32.mrf.mxu0  ;;  %v7046_v5 = vadd.f32 %v19211_v32, %v21849_v17 }
 0x6ae   :  { %v7590_v38 = vpop.f32.mrf.mxu1 }
 0x6af   :  { %v19700_v21 = vpack.c.bf16 %v8181_v44, %v8180_v14  ;;  %v8179_v55 = vmax.f32 %v8051_v31, 0.0  ;;  %v7921_v7 = vadd.f32 %v7590_v38, %v7022_v11  ;;  %v8056_v63 = vadd.f32 %v19311_v34, %v7923_v1  ;;  %v21851_v38 = vld [vmem:[#allocation84_spill] sm:$0xff] }
 0x6b0   :  { %v13980_v6 = vpop.f32.mrf.mxu1  ;;  %v7038_v44 = vadd.f32 %v19217_v60, %v21850_v58 }
 0x6b1   :  { %v19704_v12 = vpack.c.bf16 %v8179_v55, %v8178_v41  ;;  %v7924_v57 = vadd.f32 %v13980_v6, %v7033_v45  ;;  %v8054_v35 = vadd.f32 %v19311_v34, %v7921_v7  ;;  %v8184_v1 = vmax.f32 %v8056_v63, 0.0  ;;  %v19726_v55 = vpop.f32.mrf.mxu0  ;;  %v21852_v63 = vld [vmem:[#allocation65_spill] sm:$0xff] }
 0x6b2   :  { %v7593_v53 = vpop.f32.mrf.mxu1  ;;  %v7049_v41 = vadd.f32 %v19227_v3, %v21851_v38  ;;  %v21855_v38 = vld [vmem:[#allocation92_spill] sm:$0xff] }
 0x6b3   :  { %v8057_v14 = vadd.f32 %v19311_v34, %v7924_v57  ;;  %v7922_v11 = vadd.f32 %v7593_v53, %v7025_v30  ;;  %14109 = vmatprep.mubr.msk.bf16.mxu0 %vm1224_vm2, %v19704_v12  ;;  %v8182_v7 = vmax.f32 %v8054_v35, 0.0  ;;  %v7041_v57 = vadd.f32 %v19233_v28, %v21852_v63  ;;  %v21854_v28 = vld [vmem:[#allocation11_spill] sm:$0xff]  ;;  %v21856_v63 = vld [vmem:[#allocation8_spill] sm:$0xff] }
 0x6b4   :  { %v13983_v31 = vpop.f32.mrf.mxu1  ;;  %14110 = vmatmul.mubr.msk.bf16.gmra.mxu0 %vm1224_vm2, %v19700_v21  ;;  %14222 = vmatmul.mubr.msk.bf16.gmra.mxu1 %vm1224_vm2, %v19329_v49 }
 0x6b5   :  { %v8185_v32 = vmax.f32 %v8057_v14, 0.0  ;;  %v8055_v26 = vadd.f32 %v19311_v34, %v7922_v11  ;;  %v7927_v45 = vadd.f32 %v13983_v31, %v7046_v5  ;;  %14225 = vmatprep.mubr.msk.bf16.mxu1 %vm1224_vm2, %v19360_v27  ;;  %v19735_v5 = vpop.f32.mrf.mxu0  ;;  %v21853_v14 = vld [vmem:[#allocation66_spill] sm:$0xff]  ;;  %v7054_v31 = vadd.f32 %v19249_v62, %v21854_v28 }
 0x6b6   :  { %v7606_v60 = vpop.f32.mrf.mxu1  ;;  %v7062_v11 = vadd.f32 %v19243_v36, %v21853_v14  ;;  %v21857_v14 = vld [vmem:[#allocation13_spill] sm:$0xff]  ;;  %v21859_v28 = vld [vmem:[#allocation70_spill] sm:$0xff] }
 0x6b7   :  { %v19728_v6 = vpack.c.bf16 %v8185_v32, %v8184_v1  ;;  %v8183_v4 = vmax.f32 %v8055_v26, 0.0  ;;  %v7925_v30 = vadd.f32 %v7606_v60, %v7038_v44  ;;  %v8060_v17 = vadd.f32 %v19311_v34, %v7927_v45  ;;  %v19754_v60 = vpop.f32.mrf.mxu0 }
 0x6b8   :  { %v13984_v49 = vpop.f32.mrf.mxu1 }
 0x6b9   :  { %v19732_v53 = vpack.c.bf16 %v8183_v4, %v8182_v7  ;;  %v7928_v27 = vadd.f32 %v13984_v49, %v7049_v41  ;;  %v8058_v35 = vadd.f32 %v19311_v34, %v7925_v30  ;;  %v8188_v32 = vmax.f32 %v8060_v17, 0.0 }
 0x6ba   :  { %v7609_v3 = vpop.f32.mrf.mxu1  ;;  %v7065_v41 = vadd.f32 %v19259_v47, %v21855_v38  ;;  %v21861_v38 = vld [vmem:[#allocation91_spill] sm:$0xff] }
 0x6bb   :  { %v8061_v58 = vadd.f32 %v19311_v34, %v7928_v27  ;;  %v7926_v44 = vadd.f32 %v7609_v3, %v7041_v57  ;;  %14113 = vmatprep.mubr.msk.bf16.mxu0 %vm1224_vm2, %v19732_v53  ;;  %v8186_v7 = vmax.f32 %v8058_v35, 0.0  ;;  %v7057_v57 = vadd.f32 %v19265_v18, %v21856_v63  ;;  %v19763_v3 = vpop.f32.mrf.mxu0  ;;  %v21858_v18 = vld [vmem:[#allocation86_spill] sm:$0xff] }
 0x6bc   :  { %v13987_v1 = vpop.f32.mrf.mxu1  ;;  %14114 = vmatmul.mubr.msk.bf16.gmra.mxu0 %vm1224_vm2, %v19728_v6  ;;  %14226 = vmatmul.mubr.msk.bf16.gmra.mxu1 %vm1224_vm2, %v19357_v39 }
 0x6bd   :  { %v8189_v36 = vmax.f32 %v8061_v58, 0.0  ;;  %v8059_v26 = vadd.f32 %v19311_v34, %v7926_v44  ;;  %v7931_v45 = vadd.f32 %v13987_v1, %v7062_v11  ;;  %14229 = vmatprep.mubr.msk.bf16.mxu1 %vm1224_vm2, %v19386_v37  ;;  %v7078_v11 = vadd.f32 %v19275_v42, %v21857_v14 }
 0x6be   :  { %v7622_v62 = vpop.f32.mrf.mxu1 }
 0x6bf   :  { %v19756_v4 = vpack.c.bf16 %v8189_v36, %v8188_v32  ;;  %v8187_v30 = vmax.f32 %v8059_v26, 0.0  ;;  %v7929_v49 = vadd.f32 %v7622_v62, %v7054_v31  ;;  %v8064_v27 = vadd.f32 %v19311_v34, %v7931_v45  ;;  %v21860_v45 = vld [vmem:[#allocation142_spill] sm:$0xff]  ;;  %v19782_v62 = vpop.f32.mrf.mxu0 }
 0x6c0   :  { %v13988_v39 = vpop.f32.mrf.mxu1  ;;  %v7070_v31 = vadd.f32 %v21859_v28, %v21858_v18  ;;  %v21865_v18 = vld [vmem:[#allocation148_spill] sm:$0xff] }
 0x6c1   :  { %v19760_v17 = vpack.c.bf16 %v8187_v30, %v8186_v7  ;;  %v7932_v37 = vadd.f32 %v13988_v39, %v7065_v41  ;;  %v8062_v35 = vadd.f32 %v19311_v34, %v7929_v49  ;;  %v8192_v32 = vmax.f32 %v8064_v27, 0.0  ;;  %v21863_v27 = vld [vmem:[#allocation74_spill] sm:$0xff] }
 0x6c2   :  { %v7625_v47 = vpop.f32.mrf.mxu1  ;;  %v7081_v41 = vadd.f32 %v21861_v38, %v21860_v45 }
 0x6c3   :  { %v8065_v58 = vadd.f32 %v19311_v34, %v7932_v37  ;;  %v7930_v44 = vadd.f32 %v7625_v47, %v7057_v57  ;;  %14117 = vmatprep.mubr.msk.bf16.mxu0 %vm1224_vm2, %v19760_v17  ;;  %v8190_v30 = vmax.f32 %v8062_v35, 0.0  ;;  %v21862_v57 = vld [vmem:[#allocation143_spill] sm:$0xff] }
 0x6c4   :  { %v13991_v1 = vpop.f32.mrf.mxu1  ;;  %14118 = vmatmul.mubr.msk.bf16.gmra.mxu0 %vm1224_vm2, %v19756_v4  ;;  %14230 = vmatmul.mubr.msk.bf16.gmra.mxu1 %vm1224_vm2, %v19383_v13  ;;  %v7073_v37 = vadd.f32 %v21863_v27, %v21862_v57 }
 0x6c5   :  { %v8193_v42 = vmax.f32 %v8065_v58, 0.0  ;;  %v8063_v36 = vadd.f32 %v19311_v34, %v7930_v44  ;;  %v7935_v26 = vadd.f32 %v13991_v1, %v7078_v11  ;;  %14233 = vmatprep.mubr.msk.bf16.mxu1 %vm1224_vm2, %v19414_v33  ;;  %v19791_v11 = vpop.f32.mrf.mxu0  ;;  %v21864_v44 = vld [vmem:[#allocation89_spill] sm:$0xff] }
 0x6c6   :  { %v7638_v7 = vpop.f32.mrf.mxu1  ;;  %v7094_v28 = vadd.f32 %v21865_v18, %v21864_v44 }
 0x6c7   :  { %v19784_v49 = vpack.c.bf16 %v8193_v42, %v8192_v32  ;;  %v8191_v39 = vmax.f32 %v8063_v36, 0.0  ;;  %v7933_v63 = vadd.f32 %v7638_v7, %v7070_v31  ;;  %v8068_v14 = vadd.f32 %v19311_v34, %v7935_v26  ;;  %v21866_v32 = vld [vmem:[#allocation15_spill] sm:$0xff]  ;;  %v21867_v42 = vld [vmem:[#allocation98_spill] sm:$0xff] }
 0x6c8   :  { %v13992_v13 = vpop.f32.mrf.mxu1  ;;  %v7086_v36 = vadd.f32 %v21867_v42, %v21866_v32 }
 0x6c9   :  { %v19788_v47 = vpack.c.bf16 %v8191_v39, %v8190_v30  ;;  %v7936_v33 = vadd.f32 %v13992_v13, %v7081_v41  ;;  %v8066_v35 = vadd.f32 %v19311_v34, %v7933_v63  ;;  %v8196_v26 = vmax.f32 %v8068_v14, 0.0  ;;  %v21868_v30 = vld [vmem:[#allocation29_spill] sm:$0xff]  ;;  %v19815_v63 = vpop.f32.mrf.mxu0 }
 0x6ca   :  { %v7641_v58 = vpop.f32.mrf.mxu1  ;;  %v7097_v39 = vadd.f32 %v19327_v10, %v21868_v30 }
 0x6cb   :  { %v8069_v1 = vadd.f32 %v19311_v34, %v7936_v33  ;;  %v7934_v31 = vadd.f32 %v7641_v58, %v7073_v37  ;;  %14121 = vmatprep.mubr.msk.bf16.mxu0 %vm1224_vm2, %v19788_v47  ;;  %v19808_v34 = vld [vmem:[%s20588_s4 + $0x3] ss:$0 sm:$0xff]  ;;  %v21870_v33 = vld [vmem:[#allocation149_spill] sm:$0xff] }
 0x6cc   :  { %v13995_v45 = vpop.f32.mrf.mxu1  ;;  %14122 = vmatmul.mubr.msk.bf16.gmra.mxu0 %vm1224_vm2, %v19784_v49  ;;  %14234 = vmatmul.mubr.msk.bf16.gmra.mxu1 %vm1224_vm2, %v19410_v2  ;;  %v8194_v2 = vmax.f32 %v8066_v35, 0.0  ;;  %v7089_v58 = vadd.f32 %v19336_v48, %v21870_v33  ;;  %v21872_v48 = vld [vmem:[#allocation93_spill] sm:$0xff] }
 0x6cd   :  { %v8197_v38 = vmax.f32 %v8069_v1, 0.0  ;;  %v8067_v41 = vadd.f32 %v19808_v34, %v7934_v31  ;;  %v7939_v7 = vadd.f32 %v13995_v45, %v7094_v28  ;;  %14237 = vmatprep.mubr.msk.bf16.mxu1 %vm1224_vm2, %v19440_v19  ;;  %v19824_v28 = vpop.f32.mrf.mxu0  ;;  %v21871_v1 = vld [vmem:[#allocation100_spill] sm:$0xff] }
 0x6ce   :  { %v7654_v13 = vpop.f32.mrf.mxu1  ;;  %v7110_v31 = vadd.f32 %v19355_v20, %v21871_v1 }
 0x6cf   :  { %v19817_v57 = vpack.c.bf16 %v8197_v38, %v8196_v26  ;;  %v8195_v27 = vmax.f32 %v8067_v41, 0.0  ;;  %v7937_v37 = vadd.f32 %v7654_v13, %v7086_v36  ;;  %v8072_v18 = vadd.f32 %v19808_v34, %v7939_v7  ;;  %v21873_v7 = vld [vmem:[#allocation152_spill] sm:$0xff] }
 0x6d0   :  { %v13996_v14 = vpop.f32.mrf.mxu1  ;;  %v7102_v36 = vadd.f32 %v19367_v40, %v21872_v48  ;;  %v7113_v30 = vadd.f32 %v19381_v8, %v21873_v7  ;;  %v21882_v7 = vld [vmem:[#allocation19_spill] sm:$0xff] }
 0x6d1   :  { %21869 = vst [vmem:[#allocation22_spill] sm:$0xff] %v19817_v57  ;;  %v19821_v44 = vpack.c.bf16 %v8195_v27, %v8194_v2  ;;  %v7940_v19 = vadd.f32 %v13996_v14, %v7097_v39  ;;  %v8070_v35 = vadd.f32 %v19808_v34, %v7937_v37  ;;  %v8200_v26 = vmax.f32 %v8072_v18, 0.0  ;;  %v19843_v39 = vpop.f32.mrf.mxu0  ;;  %v21875_v14 = vld [vmem:[#allocation153_spill] sm:$0xff] }
 0x6d2   :  { %v7657_v10 = vpop.f32.mrf.mxu1  ;;  %v7105_v33 = vadd.f32 %v19390_v15, %v21875_v14  ;;  %v21878_v15 = vld [vmem:[#allocation155_spill] sm:$0xff] }
 0x6d3   :  { %v8073_v32 = vadd.f32 %v19808_v34, %v7940_v19  ;;  %v7938_v42 = vadd.f32 %v7657_v10, %v7089_v58  ;;  %14125 = vmatprep.mubr.msk.bf16.mxu0 %vm1224_vm2, %v19821_v44  ;;  %v8198_v13 = vmax.f32 %v8070_v35, 0.0  ;;  %v19852_v19 = vpop.f32.mrf.mxu0  ;;  %v21877_v10 = vld [vmem:[#allocation4_spill] sm:$0xff] }
 0x6d4   :  { %v13999_v45 = vpop.f32.mrf.mxu1  ;;  %14126 = vmatmul.mubr.msk.bf16.gmra.mxu0 %vm1224_vm2, %v19817_v57  ;;  %14238 = vmatmul.mubr.msk.bf16.gmra.mxu1 %vm1224_vm2, %v19436_v50  ;;  %v7126_v1 = vadd.f32 %v19406_v29, %v21877_v10 }
 0x6d5   :  { %v8201_v20 = vmax.f32 %v8073_v32, 0.0  ;;  %v8071_v38 = vadd.f32 %v19808_v34, %v7938_v42  ;;  %v7943_v41 = vadd.f32 %v13999_v45, %v7110_v31  ;;  %14241 = vmatprep.mubr.msk.bf16.mxu1 %vm1224_vm2, %v19466_v9  ;;  %v7118_v42 = vadd.f32 %v19417_v24, %v21878_v15  ;;  %v21887_v15 = vld [vmem:[#allocation75_spill] sm:$0xff] }
 0x6d6   :  { %v7670_v40 = vpop.f32.mrf.mxu1 }
 0x6d7   :  { %v19845_v2 = vpack.c.bf16 %v8201_v20, %v8200_v26  ;;  %v8199_v27 = vmax.f32 %v8071_v38, 0.0  ;;  %v7941_v37 = vadd.f32 %v7670_v40, %v7102_v36  ;;  %v8076_v18 = vadd.f32 %v19808_v34, %v7943_v41  ;;  %v21879_v36 = vld [vmem:[#allocation16_spill] sm:$0xff]  ;;  %v21880_v38 = vld [vmem:[#allocation102_spill] sm:$0xff]  ;;  %v21881_v41 = vld [vmem:[#allocation151_spill] sm:$0xff]  ;;  %v19871_v40 = vpop.f32.mrf.mxu0 }
 0x6d8   :  { %v14000_v50 = vpop.f32.mrf.mxu1 }
 0x6d9   :  { %21874 = vst [vmem:[#allocation85_spill] sm:$0xff] %v19845_v2  ;;  %v19849_v58 = vpack.c.bf16 %v8199_v27, %v8198_v13  ;;  %v7944_v9 = vadd.f32 %v14000_v50, %v7113_v30  ;;  %v8074_v31 = vadd.f32 %v19808_v34, %v7941_v37  ;;  %v8204_v45 = vmax.f32 %v8076_v18, 0.0  ;;  %v21885_v18 = vld [vmem:[#allocation77_spill] sm:$0xff] }
 0x6da   :  { %v7673_v8 = vpop.f32.mrf.mxu1  ;;  %v7129_v30 = vadd.f32 %v21882_v7, %v21881_v41 }
 0x6db   :  { %21876 = vst [vmem:[#allocation24_spill] sm:$0xff] %v19849_v58  ;;  %v8077_v35 = vadd.f32 %v19808_v34, %v7944_v9  ;;  %v7942_v32 = vadd.f32 %v7673_v8, %v7105_v33  ;;  %14129 = vmatprep.mubr.msk.bf16.mxu0 %vm1224_vm2, %v19849_v58  ;;  %v8202_v13 = vmax.f32 %v8074_v31, 0.0  ;;  %v21884_v33 = vld [vmem:[#allocation33_spill] sm:$0xff] }
 0x6dc   :  { %v14003_v48 = vpop.f32.mrf.mxu1  ;;  %14130 = vmatmul.mubr.msk.bf16.gmra.mxu0 %vm1224_vm2, %v19845_v2  ;;  %14242 = vmatmul.mubr.msk.bf16.gmra.mxu1 %vm1224_vm2, %v21879_v36  ;;  %v7121_v9 = vadd.f32 %v21885_v18, %v21884_v33 }
 0x6dd   :  { %v8205_v29 = vmax.f32 %v8077_v35, 0.0  ;;  %v8075_v26 = vadd.f32 %v19808_v34, %v7942_v32  ;;  %v7947_v20 = vadd.f32 %v14003_v48, %v7126_v1  ;;  %14245 = vmatprep.mubr.msk.bf16.mxu1 %vm1224_vm2, %v21880_v38  ;;  %v19880_v35 = vpop.f32.mrf.mxu0  ;;  %v21888_v48 = vld [vmem:[#allocation108_spill] sm:$0xff] }
 0x6de   :  { %v7686_v24 = vpop.f32.mrf.mxu1  ;;  %v7142_v36 = vadd.f32 %v21888_v48, %v21887_v15 }
 0x6df   :  { %v19873_v27 = vpack.c.bf16 %v8205_v29, %v8204_v45  ;;  %v8203_v37 = vmax.f32 %v8075_v26, 0.0  ;;  %v7945_v50 = vadd.f32 %v7686_v24, %v7118_v42  ;;  %v8080_v10 = vadd.f32 %v19808_v34, %v7947_v20  ;;  %v21889_v29 = vld [vmem:[#allocation31_spill] sm:$0xff]  ;;  %v21890_v26 = vld [vmem:[#allocation78_spill] sm:$0xff]  ;;  %v21891_v20 = vld [vmem:[#allocation21_spill] sm:$0xff]  ;;  %v19899_v18 = vpop.f32.mrf.mxu0 }
 0x6e0   :  { %v14004_v14 = vpop.f32.mrf.mxu1  ;;  %v7134_v38 = vadd.f32 %v21890_v26, %v21889_v29 }
 0x6e1   :  { %21883 = vst [vmem:[#allocation47_spill] sm:$0xff] %v19873_v27  ;;  %v19877_v8 = vpack.c.bf16 %v8203_v37, %v8202_v13  ;;  %v7948_v1 = vadd.f32 %v14004_v14, %v7129_v30  ;;  %v8078_v31 = vadd.f32 %v19808_v34, %v7945_v50  ;;  %v8208_v7 = vmax.f32 %v8080_v10, 0.0  ;;  %v21892_v37 = vld [vmem:[#allocation110_spill] sm:$0xff]  ;;  %v21893_v50 = vld [vmem:[#allocation35_spill] sm:$0xff] }
 0x6e2   :  { %v7689_v32 = vpop.f32.mrf.mxu1  ;;  %v21894_v14 = vld [vmem:[#allocation99_spill] sm:$0xff]  ;;  %v21896_v10 = vld [vmem:[#allocation34_spill] sm:$0xff] }
 0x6e3   :  { %21886 = vst [vmem:[#allocation55_spill] sm:$0xff] %v19877_v8  ;;  %v8081_v45 = vadd.f32 %v19808_v34, %v7948_v1  ;;  %v7946_v42 = vadd.f32 %v7689_v32, %v7121_v9  ;;  %14133 = vmatprep.mubr.msk.bf16.mxu0 %vm1224_vm2, %v19877_v8  ;;  %v7145_v33 = vadd.f32 %v21894_v14, %v21893_v50  ;;  %v8206_v1 = vmax.f32 %v8078_v31, 0.0  ;;  %v21899_v50 = vld [vmem:[#allocation37_spill] sm:$0xff]  ;;  %v21900_v14 = vld [vmem:[#allocation107_spill] sm:$0xff] }
 0x6e4   :  { %v14007_v41 = vpop.f32.mrf.mxu1  ;;  %14134 = vmatmul.mubr.msk.bf16.gmra.mxu0 %vm1224_vm2, %v19873_v27  ;;  %14246 = vmatmul.mubr.msk.bf16.gmra.mxu1 %vm1224_vm2, %v21891_v20  ;;  %v19908_v20 = vpop.f32.mrf.mxu0  ;;  %v7158_v23 = vadd.f32 %v21900_v14, %v21899_v50  ;;  %v21912_v8 = vld [vmem:[#allocation81_spill] sm:$0xff] }
 0x6e5   :  { %v8209_v30 = vmax.f32 %v8081_v45, 0.0  ;;  %v8079_v24 = vadd.f32 %v19808_v34, %v7946_v42  ;;  %v7951_v13 = vadd.f32 %v14007_v41, %v7142_v36  ;;  %14249 = vmatprep.mubr.msk.bf16.mxu1 %vm1224_vm2, %v21892_v37  ;;  %v21897_v45 = vld [vmem:[#allocation103_spill] sm:$0xff] }
 0x6e6   :  { %v7702_v9 = vpop.f32.mrf.mxu1  ;;  %v7137_v26 = vadd.f32 %v21897_v45, %v21896_v10  ;;  %v21904_v10 = vld [vmem:[#allocation111_spill] sm:$0xff]  ;;  %v21905_v45 = vld [vmem:[#allocation41_spill] sm:$0xff] }
 0x6e7   :  { %v19901_v32 = vpack.c.bf16 %v8209_v30, %v8208_v7  ;;  %v8207_v15 = vmax.f32 %v8079_v24, 0.0  ;;  %v7949_v48 = vadd.f32 %v7702_v9, %v7134_v38  ;;  %v8084_v36 = vadd.f32 %v19808_v34, %v7951_v13  ;;  %v21901_v30 = vld [vmem:[#allocation36_spill] sm:$0xff]  ;;  %v21902_v24 = vld [vmem:[#allocation94_spill] sm:$0xff]  ;;  %v21903_v13 = vld [vmem:[#allocation79_spill] sm:$0xff] }
 0x6e8   :  { %v14008_v29 = vpop.f32.mrf.mxu1  ;;  %v7150_v9 = vadd.f32 %v21902_v24, %v21901_v30 }
 0x6e9   :  { %21895 = vst [vmem:[#allocation10_spill] sm:$0xff] %v19901_v32  ;;  %v19905_v42 = vpack.c.bf16 %v8207_v15, %v8206_v1  ;;  %v7952_v41 = vadd.f32 %v14008_v29, %v7145_v33  ;;  %v8082_v31 = vadd.f32 %v19808_v34, %v7949_v48  ;;  %v8212_v33 = vmax.f32 %v8084_v36, 0.0  ;;  %v21908_v36 = vld [vmem:[#allocation38_spill] sm:$0xff] }
 0x6ea   :  { %v7705_v37 = vpop.f32.mrf.mxu1 }
 0x6eb   :  { %21898 = vst [vmem:[#allocation72_spill] sm:$0xff] %v19905_v42  ;;  %v8085_v7 = vadd.f32 %v19808_v34, %v7952_v41  ;;  %v7950_v38 = vadd.f32 %v7705_v37, %v7137_v26  ;;  %14137 = vmatprep.mubr.msk.bf16.mxu0 %vm1224_vm2, %v19905_v42  ;;  %v21906_v26 = vld [vmem:[#allocation23_spill] sm:$0xff]  ;;  %v19927_v37 = vpop.f32.mrf.mxu0  ;;  %v8210_v14 = vmax.f32 %v8082_v31, 0.0 }
 0x6ec   :  { %v14011_v1 = vpop.f32.mrf.mxu1  ;;  %14138 = vmatmul.mubr.msk.bf16.gmra.mxu0 %vm1224_vm2, %v19901_v32  ;;  %14250 = vmatmul.mubr.msk.bf16.gmra.mxu1 %vm1224_vm2, %v21903_v13  ;;  %v7161_v41 = vadd.f32 %v21906_v26, %v21905_v45  ;;  %v21911_v26 = vld [vmem:[#allocation40_spill] sm:$0xff] }
 0x6ed   :  { %v8213_v15 = vmax.f32 %v8085_v7, 0.0  ;;  %v8083_v48 = vadd.f32 %v19808_v34, %v7950_v38  ;;  %v7955_v29 = vadd.f32 %v14011_v1, %v7158_v23  ;;  %14253 = vmatprep.mubr.msk.bf16.mxu1 %vm1224_vm2, %v21904_v10  ;;  %v21909_v7 = vld [vmem:[#allocation95_spill] sm:$0xff]  ;;  %v19936_v27 = vpop.f32.mrf.mxu0  ;;  %v7174_v2 = vadd.f32 %v21912_v8, %v21911_v26 }
 0x6ee   :  { %v7718_v50 = vpop.f32.mrf.mxu1  ;;  %v7153_v42 = vadd.f32 %v21909_v7, %v21908_v36  ;;  %v21918_v36 = vld [vmem:[#allocation82_spill] sm:$0xff] }
 0x6ef   :  { %v19929_v30 = vpack.c.bf16 %v8213_v15, %v8212_v33  ;;  %v8211_v24 = vmax.f32 %v8083_v48, 0.0  ;;  %v7953_v32 = vadd.f32 %v7718_v50, %v7150_v9  ;;  %v8088_v23 = vadd.f32 %v19808_v34, %v7955_v29  ;;  %v21913_v15 = vld [vmem:[#allocation39_spill] sm:$0xff]  ;;  %v21914_v48 = vld [vmem:[#allocation154_spill] sm:$0xff] }
 0x6f0   :  { %v14012_v13 = vpop.f32.mrf.mxu1  ;;  %v7166_v50 = vadd.f32 %v21914_v48, %v21913_v15  ;;  %v21915_v29 = vld [vmem:[#allocation14_spill] sm:$0xff] }
 0x6f1   :  { %21907 = vst [vmem:[#allocation121_spill] sm:$0xff] %v19929_v30  ;;  %v19933_v38 = vpack.c.bf16 %v8211_v24, %v8210_v14  ;;  %v7956_v1 = vadd.f32 %v14012_v13, %v7161_v41  ;;  %v8086_v31 = vadd.f32 %v19808_v34, %v7953_v32  ;;  %v8216_v41 = vmax.f32 %v8088_v23, 0.0  ;;  %v21916_v13 = vld [vmem:[#allocation114_spill] sm:$0xff] }
 0x6f2   :  { %v7721_v45 = vpop.f32.mrf.mxu1  ;;  %v21920_v23 = vld [vmem:[#allocation42_spill] sm:$0xff] }
 0x6f3   :  { %21910 = vst [vmem:[#allocation60_spill] sm:$0xff] %v19933_v38  ;;  %v8089_v33 = vadd.f32 %v19808_v34, %v7956_v1  ;;  %v7954_v9 = vadd.f32 %v7721_v45, %v7153_v42  ;;  %14141 = vmatprep.mubr.msk.bf16.mxu0 %vm1224_vm2, %v19933_v38  ;;  %v21917_v42 = vld [vmem:[#allocation43_spill] sm:$0xff]  ;;  %v19955_v1 = vpop.f32.mrf.mxu0  ;;  %v8214_v26 = vmax.f32 %v8086_v31, 0.0 }
 0x6f4   :  { %v14015_v14 = vpop.f32.mrf.mxu1  ;;  %14142 = vmatmul.mubr.msk.bf16.gmra.mxu0 %vm1224_vm2, %v19929_v30  ;;  %14254 = vmatmul.mubr.msk.bf16.gmra.mxu1 %vm1224_vm2, %v21915_v29  ;;  %v7177_v7 = vadd.f32 %v21918_v36, %v21917_v42  ;;  %v21923_v36 = vld [vmem:[#allocation45_spill] sm:$0xff]  ;;  %v21924_v29 = vld [vmem:[#allocation119_spill] sm:$0xff] }
 0x6f5   :  { %v8217_v8 = vmax.f32 %v8089_v33, 0.0  ;;  %v8087_v32 = vadd.f32 %v19808_v34, %v7954_v9  ;;  %v7959_v24 = vadd.f32 %v14015_v14, %v7174_v2  ;;  %14257 = vmatprep.mubr.msk.bf16.mxu1 %vm1224_vm2, %v21916_v13  ;;  %v21921_v33 = vld [vmem:[#allocation18_spill] sm:$0xff]  ;;  %v19964_v13 = vpop.f32.mrf.mxu0  ;;  %v7190_v57 = vadd.f32 %v21924_v29, %v21923_v36 }
 0x6f6   :  { %v7734_v45 = vpop.f32.mrf.mxu1  ;;  %v7169_v58 = vadd.f32 %v21921_v33, %v21920_v23 }
 0x6f7   :  { %v19957_v15 = vpack.c.bf16 %v8217_v8, %v8216_v41  ;;  %v8215_v48 = vmax.f32 %v8087_v32, 0.0  ;;  %v7957_v30 = vadd.f32 %v7734_v45, %v7166_v50  ;;  %v8092_v2 = vadd.f32 %v19808_v34, %v7959_v24  ;;  %v21925_v8 = vld [vmem:[#allocation44_spill] sm:$0xff]  ;;  %v19983_v23 = vpop.f32.mrf.mxu0 }
 0x6f8   :  { %v14016_v38 = vpop.f32.mrf.mxu1  ;;  %v7182_v32 = vadd.f32 %v19628_v0, %v21925_v8 }
 0x6f9   :  { %21919 = vst [vmem:[#allocation129_spill] sm:$0xff] %v19957_v15  ;;  %v19961_v9 = vpack.c.bf16 %v8215_v48, %v8214_v26  ;;  %v7960_v14 = vadd.f32 %v14016_v38, %v7177_v7  ;;  %v8090_v31 = vadd.f32 %v19808_v34, %v7957_v30  ;;  %v21926_v38 = vld [vmem:[#allocation97_spill] sm:$0xff]  ;;  %v8220_v24 = vmax.f32 %v8092_v2, 0.0  ;;  %v21927_v26 = vld [vmem:[#allocation115_spill] sm:$0xff]  ;;  %v21930_v2 = vld [vmem:[#allocation48_spill] sm:$0xff] }
 0x6fa   :  { %v7737_v42 = vpop.f32.mrf.mxu1 }
 0x6fb   :  { %21922 = vst [vmem:[#allocation62_spill] sm:$0xff] %v19961_v9  ;;  %v8093_v41 = vadd.f32 %v19808_v34, %v7960_v14  ;;  %v7958_v50 = vadd.f32 %v7737_v42, %v7169_v58  ;;  %14145 = vmatprep.mubr.msk.bf16.mxu0 %vm1224_vm2, %v19961_v9  ;;  %v21928_v58 = vld [vmem:[#allocation49_spill] sm:$0xff]  ;;  %v8218_v33 = vmax.f32 %v8090_v31, 0.0 }
 0x6fc   :  { %v14019_v45 = vpop.f32.mrf.mxu1  ;;  %14146 = vmatmul.mubr.msk.bf16.gmra.mxu0 %vm1224_vm2, %v19957_v15  ;;  %14258 = vmatmul.mubr.msk.bf16.gmra.mxu1 %vm1224_vm2, %v21926_v38  ;;  %v7193_v48 = vadd.f32 %v19645_v51, %v21928_v58  ;;  %v19992_v15 = vpop.f32.mrf.mxu0  ;;  %v21932_v58 = vld [vmem:[#allocation51_spill] sm:$0xff] }
 0x6fd   :  { %v8221_v29 = vmax.f32 %v8093_v41, 0.0  ;;  %v8091_v30 = vadd.f32 %v19808_v34, %v7958_v50  ;;  %v7963_v7 = vadd.f32 %v14019_v45, %v7190_v57  ;;  %14261 = vmatprep.mubr.msk.bf16.mxu1 %vm1224_vm2, %v21927_v26  ;;  %v7185_v41 = vadd.f32 %v19654_v46, %v21930_v2  ;;  %v9925_v46 = vld [vmem:[%s20589_s6] sm:$0x3f] }
 0x6fe   :  { %v7750_v0 = vpop.f32.mrf.mxu1  ;;  %v7206_v31 = vadd.f32 %v19671_v61, %v21932_v58  ;;  %v21934_v61 = vld [vmem:[#allocation30_spill] sm:$0xff]  ;;  %14453 = vmatprep.subr.msk.mxu1 %vm9938_vm3, %v9925_v46 }
 0x6ff   :  { %v19985_v14 = vpack.c.bf16 %v8221_v29, %v8220_v24  ;;  %v8219_v42 = vmax.f32 %v8091_v30, 0.0  ;;  %v7961_v36 = vadd.f32 %v7750_v0, %v7182_v32  ;;  %v8096_v57 = vadd.f32 %v19808_v34, %v7963_v7  ;;  %v21933_v30 = vld [vmem:[#allocation67_spill] sm:$0xff]  ;;  %14454 = vmatpush3.msk.msra.mxu1 %vm9938_vm3, %v9925_v46  ;;  %v21939_v46 = vld [vmem:[#allocation56_spill] sm:$0xff] }
 0x700   :  { %v14020_v8 = vpop.f32.mrf.mxu1  ;;  %v7198_v7 = vadd.f32 %v19680_v56, %v21933_v30  ;;  %v21935_v56 = vld [vmem:[#allocation53_spill] sm:$0xff]  ;;  %v21937_v30 = vld [vmem:[#allocation2_spill] sm:$0xff] }
 0x701   :  { %21929 = vst [vmem:[#allocation52_spill] sm:$0xff] %v19985_v14  ;;  %v19989_v50 = vpack.c.bf16 %v8219_v42, %v8218_v33  ;;  %v7964_v45 = vadd.f32 %v14020_v8, %v7193_v48  ;;  %v8094_v24 = vadd.f32 %v19808_v34, %v7961_v36  ;;  %v8224_v33 = vmax.f32 %v8096_v57, 0.0 }
 0x702   :  { %v7753_v51 = vpop.f32.mrf.mxu1  ;;  %v7209_v2 = vadd.f32 %v19698_v52, %v21935_v56 }
 0x703   :  { %21931 = vst [vmem:[#allocation7_spill] sm:$0xff] %v19989_v50  ;;  %v8097_v32 = vadd.f32 %v19808_v34, %v7964_v45  ;;  %v7962_v29 = vadd.f32 %v7753_v51, %v7185_v41  ;;  %14149 = vmatprep.mubr.msk.bf16.mxu0 %vm1224_vm2, %v19989_v50  ;;  %v8222_v51 = vmax.f32 %v8094_v24, 0.0  ;;  %v7222_v24 = vadd.f32 %v19726_v55, %v21939_v46 }
 0x704   :  { %v14023_v48 = vpop.f32.mrf.mxu1  ;;  %v20005_v0 = vpop.f32.mrf.mxu0  ;;  %14150 = vmatmul.mubr.msk.bf16.gmra.mxu0 %vm1224_vm2, %v19985_v14  ;;  %14262 = vmatmul.mubr.msk.bf16.gmra.mxu1 %vm1224_vm2, %v21934_v61 }
 0x705   :  { %v8225_v42 = vmax.f32 %v8097_v32, 0.0  ;;  %v8095_v36 = vadd.f32 %v19808_v34, %v7962_v29  ;;  %v7967_v8 = vadd.f32 %v14023_v48, %v7206_v31  ;;  %14265 = vmatprep.mubr.msk.bf16.mxu1 %vm1224_vm2, %v19625_v25  ;;  %v7201_v48 = vadd.f32 %v19707_v16, %v21937_v30  ;;  %v21940_v16 = vld [vmem:[#allocation58_spill] sm:$0xff] }
 0x706   :  { %v7766_v41 = vpop.f32.mrf.mxu1  ;;  %v20017_v45 = vpop.f32.mrf.mxu0 }
 0x707   :  { %v20020_v58 = vpack.c.bf16 %v8225_v42, %v8224_v33  ;;  %v8223_v57 = vmax.f32 %v8095_v36, 0.0  ;;  %v7965_v32 = vadd.f32 %v7766_v41, %v7198_v7  ;;  %v8100_v52 = vadd.f32 %v19808_v34, %v7967_v8 }
 0x708   :  { %v14024_v29 = vpop.f32.mrf.mxu1  ;;  %v20022_v31 = vpop.f32.mrf.mxu0  ;;  %v7214_v36 = vadd.f32 %v19735_v5, %v21940_v16 }
 0x709   :  { %21936 = vst [vmem:[#allocation132_spill] sm:$0xff] %v20020_v58  ;;  %v20026_v14 = vpack.c.bf16 %v8223_v57, %v8222_v51  ;;  %v7968_v56 = vadd.f32 %v14024_v29, %v7209_v2  ;;  %v8098_v33 = vadd.f32 %v19808_v34, %v7965_v32  ;;  %v21941_v2 = vld [vmem:[#allocation20_spill] sm:$0xff]  ;;  %v8228_v55 = vmax.f32 %v8100_v52, 0.0  ;;  %v21943_v52 = vld [vmem:[#allocation5_spill] sm:$0xff] }
 0x70a   :  { %v7769_v50 = vpop.f32.mrf.mxu1  ;;  %v20029_v9 = vpop.f32.mrf.mxu0 }
 0x70b   :  { %21938 = vst [vmem:[#allocation50_spill] sm:$0xff] %v20026_v14  ;;  %v8101_v7 = vadd.f32 %v19808_v34, %v7968_v56  ;;  %v7966_v42 = vadd.f32 %v7769_v50, %v7201_v48  ;;  %14153 = vmatprep.mubr.msk.bf16.mxu0 %vm1224_vm2, %v20026_v14  ;;  %v21942_v50 = vld [vmem:[#allocation3_spill] sm:$0xff]  ;;  %v8226_v48 = vmax.f32 %v8098_v33, 0.0 }
 0x70c   :  { %v14027_v41 = vpop.f32.mrf.mxu1  ;;  %v14059_v8 = vpop.f32.mrf.mxu0  ;;  %14154 = vmatmul.mubr.msk.bf16.gmra.mxu0 %vm1224_vm2, %v20020_v58  ;;  %14266 = vmatmul.mubr.msk.bf16.gmra.mxu1 %vm1224_vm2, %v21941_v2  ;;  %v7225_v29 = vadd.f32 %v19754_v60, %v21942_v50  ;;  %v21944_v60 = vld [vmem:[#allocation6_spill] sm:$0xff] }
 0x70d   :  { %v8229_v51 = vmax.f32 %v8101_v7, 0.0  ;;  %v8099_v57 = vadd.f32 %v19808_v34, %v7966_v42  ;;  %v7971_v32 = vadd.f32 %v14027_v41, %v7222_v24  ;;  %14269 = vmatprep.mubr.msk.bf16.mxu1 %vm1224_vm2, %v19651_v54  ;;  %v7217_v7 = vadd.f32 %v19763_v3, %v21943_v52 }
 0x70e   :  { %v7782_v5 = vpop.f32.mrf.mxu1  ;;  %v8607_v30 = vpop.f32.mrf.mxu0  ;;  %v7238_v50 = vadd.f32 %v19782_v62, %v21944_v60 }
 0x70f   :  { %v20048_v56 = vpack.c.bf16 %v8229_v51, %v8228_v55  ;;  %v8227_v46 = vmax.f32 %v8099_v57, 0.0  ;;  %v7969_v16 = vadd.f32 %v7782_v5, %v7214_v36  ;;  %v8104_v24 = vadd.f32 %v19808_v34, %v7971_v32 }
 0x710   :  { %v14028_v8 = vpop.f32.mrf.mxu1  ;;  %v14060_v58 = vpop.f32.mrf.mxu0 }
 0x711   :  { %v20052_v42 = vpack.c.bf16 %v8227_v46, %v8226_v48  ;;  %v7972_v41 = vadd.f32 %v14028_v8, %v7225_v29  ;;  %v8102_v33 = vadd.f32 %v19808_v34, %v7969_v16  ;;  %v21945_v58 = vld [vmem:[#allocation63_spill] sm:$0xff] }
 0x712   :  { %v7785_v14 = vpop.f32.mrf.mxu1  ;;  %v8609_v54 = vpop.f32.mrf.mxu0  ;;  %v7230_v3 = vadd.f32 %v19791_v11, %v21945_v58 }
 0x713   :  { %v8105_v55 = vadd.f32 %v19808_v34, %v7972_v41  ;;  %v7970_v36 = vadd.f32 %v7785_v14, %v7217_v7  ;;  %14157 = vmatprep.mubr.msk.bf16.mxu0 %vm1224_vm2, %v20052_v42  ;;  %v8232_v54 = vmax.f32 %v8104_v24, 0.0  ;;  %v21946_v14 = vld [vmem:[#allocation112_spill] sm:$0xff]  ;;  %v8230_v48 = vmax.f32 %v8102_v33, 0.0 }
 0x714   :  { %v14031_v51 = vpop.f32.mrf.mxu1  ;;  %v14063_v57 = vpop.f32.mrf.mxu0  ;;  %14158 = vmatmul.mubr.msk.bf16.gmra.mxu0 %vm1224_vm2, %v20048_v56  ;;  %14270 = vmatmul.mubr.msk.bf16.gmra.mxu1 %vm1224_vm2, %v19647_v22  ;;  %v7241_v5 = vadd.f32 %v19815_v63, %v21946_v14  ;;  %v21947_v24 = vld [vmem:[#allocation88_spill] sm:$0xff]  ;;  %v21948_v63 = vld [vmem:[#allocation106_spill] sm:$0xff] }
 0x715   :  { %v8233_v62 = vmax.f32 %v8105_v55, 0.0  ;;  %v8103_v32 = vadd.f32 %v19808_v34, %v7970_v36  ;;  %v7975_v29 = vadd.f32 %v14031_v51, %v7238_v50  ;;  %14273 = vmatprep.mubr.msk.bf16.mxu1 %vm1224_vm2, %v19677_v59  ;;  %v7233_v41 = vadd.f32 %v19824_v28, %v21947_v24 }
 0x716   :  { %v7798_v11 = vpop.f32.mrf.mxu1  ;;  %v8619_v30 = vpop.f32.mrf.mxu0  ;;  %v7254_v51 = vadd.f32 %v19843_v39, %v21948_v63 }
 0x717   :  { %v20072_v46 = vpack.c.bf16 %v8233_v62, %v8232_v54  ;;  %v8231_v16 = vmax.f32 %v8103_v32, 0.0  ;;  %v7973_v8 = vadd.f32 %v7798_v11, %v7230_v3  ;;  %v8108_v50 = vadd.f32 %v19808_v34, %v7975_v29  ;;  %v21949_v54 = vld [vmem:[#allocation9_spill] sm:$0xff]  ;;  %v21950_v11 = vld [vmem:[#allocation116_spill] sm:$0xff] }
 0x718   :  { %v14032_v52 = vpop.f32.mrf.mxu1  ;;  %v14064_v7 = vpop.f32.mrf.mxu0  ;;  %v7246_v28 = vadd.f32 %v19852_v19, %v21949_v54  ;;  %v7257_v30 = vadd.f32 %v19871_v40, %v21950_v11  ;;  %v21952_v40 = vld [vmem:[#allocation83_spill] sm:$0xff] }
 0x719   :  { %v20076_v60 = vpack.c.bf16 %v8231_v16, %v8230_v48  ;;  %v7976_v55 = vadd.f32 %v14032_v52, %v7241_v5  ;;  %v8106_v33 = vadd.f32 %v19808_v34, %v7973_v8  ;;  %v8236_v39 = vmax.f32 %v8108_v50, 0.0  ;;  %v21951_v50 = vld [vmem:[#allocation68_spill] sm:$0xff]  ;;  %v21954_v11 = vld [vmem:[#allocation87_spill] sm:$0xff] }
 0x71a   :  { %v7801_v36 = vpop.f32.mrf.mxu1  ;;  %v8621_v58 = vpop.f32.mrf.mxu0 }
 0x71b   :  { %v8109_v57 = vadd.f32 %v19808_v34, %v7976_v55  ;;  %v7974_v3 = vadd.f32 %v7801_v36, %v7233_v41  ;;  %14161 = vmatprep.mubr.msk.bf16.mxu0 %vm1224_vm2, %v20076_v60  ;;  %v8234_v16 = vmax.f32 %v8106_v33, 0.0  ;;  %v7249_v55 = vadd.f32 %v19880_v35, %v21951_v50  ;;  %v21955_v50 = vld [vmem:[#allocation90_spill] sm:$0xff] }
 0x71c   :  { %v14035_v62 = vpop.f32.mrf.mxu1  ;;  %v14067_v32 = vpop.f32.mrf.mxu0  ;;  %14162 = vmatmul.mubr.msk.bf16.gmra.mxu0 %vm1224_vm2, %v20072_v46  ;;  %14274 = vmatmul.mubr.msk.bf16.gmra.mxu1 %vm1224_vm2, %v19673_v43 }
 0x71d   :  { %v8237_v29 = vmax.f32 %v8109_v57, 0.0  ;;  %v8107_v14 = vadd.f32 %v19808_v34, %v7974_v3  ;;  %v7979_v5 = vadd.f32 %v14035_v62, %v7254_v51  ;;  %14277 = vmatprep.mubr.msk.bf16.mxu1 %vm1224_vm2, %v19704_v12  ;;  %v7270_v3 = vadd.f32 %v19899_v18, %v21952_v40  ;;  %v21953_v62 = vld [vmem:[#allocation69_spill] sm:$0xff] }
 0x71e   :  { %v7814_v19 = vpop.f32.mrf.mxu1  ;;  %v8631_v48 = vpop.f32.mrf.mxu0  ;;  %v7262_v35 = vadd.f32 %v19908_v20, %v21953_v62  ;;  %v21957_v62 = vld [vmem:[#allocation73_spill] sm:$0xff] }
 0x71f   :  { %v20096_v8 = vpack.c.bf16 %v8237_v29, %v8236_v39  ;;  %v8235_v52 = vmax.f32 %v8107_v14, 0.0  ;;  %v7977_v7 = vadd.f32 %v7814_v19, %v7246_v28  ;;  %v8112_v58 = vadd.f32 %v19808_v34, %v7979_v5 }
 0x720   :  { %v14036_v24 = vpop.f32.mrf.mxu1  ;;  %v14068_v41 = vpop.f32.mrf.mxu0 }
 0x721   :  { %v20100_v36 = vpack.c.bf16 %v8235_v52, %v8234_v16  ;;  %v7980_v63 = vadd.f32 %v14036_v24, %v7257_v30  ;;  %v8110_v33 = vadd.f32 %v19808_v34, %v7977_v7  ;;  %v8240_v18 = vmax.f32 %v8112_v58, 0.0 }
 0x722   :  { %v7817_v51 = vpop.f32.mrf.mxu1  ;;  %v8633_v57 = vpop.f32.mrf.mxu0  ;;  %v7273_v30 = vadd.f32 %v19927_v37, %v21954_v11  ;;  %v21956_v37 = vld [vmem:[#allocation71_spill] sm:$0xff] }
 0x723   :  { %v8113_v54 = vadd.f32 %v19808_v34, %v7980_v63  ;;  %v7978_v28 = vadd.f32 %v7817_v51, %v7249_v55  ;;  %14165 = vmatprep.mubr.msk.bf16.mxu0 %vm1224_vm2, %v20100_v36  ;;  %v8238_v48 = vmax.f32 %v8110_v33, 0.0  ;;  %v7265_v55 = vadd.f32 %v19936_v27, %v21955_v50 }
 0x724   :  { %v14039_v32 = vpop.f32.mrf.mxu1  ;;  %v14071_v39 = vpop.f32.mrf.mxu0  ;;  %14166 = vmatmul.mubr.msk.bf16.gmra.mxu0 %vm1224_vm2, %v20096_v8  ;;  %14278 = vmatmul.mubr.msk.bf16.gmra.mxu1 %vm1224_vm2, %v19700_v21  ;;  %v7278_v27 = vadd.f32 %v19964_v13, %v21957_v62 }
 0x725   :  { %v8241_v29 = vmax.f32 %v8113_v54, 0.0  ;;  %v8111_v14 = vadd.f32 %v19808_v34, %v7978_v28  ;;  %v7983_v5 = vadd.f32 %v14039_v32, %v7270_v3  ;;  %14281 = vmatprep.mubr.msk.bf16.mxu1 %vm1224_vm2, %v19732_v53  ;;  %v7286_v3 = vadd.f32 %v19955_v1, %v21956_v37 }
 0x726   :  { %v7830_v20 = vpop.f32.mrf.mxu1  ;;  %v8643_v19 = vpop.f32.mrf.mxu0 }
 0x727   :  { %v20120_v16 = vpack.c.bf16 %v8241_v29, %v8240_v18  ;;  %v8239_v52 = vmax.f32 %v8111_v14, 0.0  ;;  %v7981_v7 = vadd.f32 %v7830_v20, %v7262_v35  ;;  %v8116_v63 = vadd.f32 %v19808_v34, %v7983_v5  ;;  %v21958_v14 = vld [vmem:[#allocation17_spill] sm:$0xff] }
 0x728   :  { %v14040_v24 = vpop.f32.mrf.mxu1  ;;  %v14072_v41 = vpop.f32.mrf.mxu0  ;;  %v7289_v5 = vadd.f32 %v19983_v23, %v21958_v14 }
 0x729   :  { %v20124_v58 = vpack.c.bf16 %v8239_v52, %v8238_v48  ;;  %v7984_v51 = vadd.f32 %v14040_v24, %v7273_v30  ;;  %v8114_v33 = vadd.f32 %v19808_v34, %v7981_v7  ;;  %v8244_v1 = vmax.f32 %v8116_v63, 0.0  ;;  %v21959_v24 = vld [vmem:[#allocation104_spill] sm:$0xff] }
 0x72a   :  { %v7833_v57 = vpop.f32.mrf.mxu1  ;;  %v8645_v40 = vpop.f32.mrf.mxu0  ;;  %v7281_v41 = vadd.f32 %v19992_v15, %v21959_v24 }
 0x72b   :  { %v8117_v54 = vadd.f32 %v19808_v34, %v7984_v51  ;;  %v7982_v28 = vadd.f32 %v7833_v57, %v7265_v55  ;;  %14169 = vmatprep.mubr.msk.bf16.mxu0 %vm1224_vm2, %v20124_v58  ;;  %v8242_v30 = vmax.f32 %v8114_v33, 0.0 }
 0x72c   :  { %v14043_v35 = vpop.f32.mrf.mxu1  ;;  %v14075_v32 = vpop.f32.mrf.mxu0  ;;  %14170 = vmatmul.mubr.msk.bf16.gmra.mxu0 %vm1224_vm2, %v20120_v16  ;;  %14282 = vmatmul.mubr.msk.bf16.gmra.mxu1 %vm1224_vm2, %v19728_v6 }
 0x72d   :  { %v8245_v39 = vmax.f32 %v8117_v54, 0.0  ;;  %v8115_v18 = vadd.f32 %v19808_v34, %v7982_v28  ;;  %v7987_v29 = vadd.f32 %v14043_v35, %v7286_v3  ;;  %14285 = vmatprep.mubr.msk.bf16.mxu1 %vm1224_vm2, %v19760_v17 }
 0x72e   :  { %v7846_v13 = vpop.f32.mrf.mxu1  ;;  %v8655_v11 = vpop.f32.mrf.mxu0 }
 0x72f   :  { %v20144_v20 = vpack.c.bf16 %v8245_v39, %v8244_v1  ;;  %v8243_v19 = vmax.f32 %v8115_v18, 0.0  ;;  %v7985_v48 = vadd.f32 %v7846_v13, %v7278_v27  ;;  %v8120_v55 = vadd.f32 %v19808_v34, %v7987_v29 }
 0x730   :  { %v14044_v52 = vpop.f32.mrf.mxu1  ;;  %v14076_v7 = vpop.f32.mrf.mxu0 }
 0x731   :  { %v20148_v50 = vpack.c.bf16 %v8243_v19, %v8242_v30  ;;  %v7988_v63 = vadd.f32 %v14044_v52, %v7289_v5  ;;  %v8118_v23 = vadd.f32 %v19808_v34, %v7985_v48  ;;  %v8248_v33 = vmax.f32 %v8120_v55, 0.0  ;;  %v21960_v55 = vld [vmem:[#allocation22_spill] sm:$0xff] }
 0x732   :  { %v7849_v51 = vpop.f32.mrf.mxu1  ;;  %v8657_v57 = vpop.f32.mrf.mxu0 }
 0x733   :  { %v8121_v40 = vadd.f32 %v19808_v34, %v7988_v63  ;;  %v7986_v37 = vadd.f32 %v7849_v51, %v7281_v41  ;;  %14173 = vmatprep.mubr.msk.bf16.mxu0 %vm1224_vm2, %v20148_v50  ;;  %v8246_v32 = vmax.f32 %v8118_v23, 0.0  ;;  %v21961_v63 = vld [vmem:[#allocation14_spill] sm:$0xff]  ;;  %v21962_v51 = vld [vmem:[#allocation24_spill] sm:$0xff] }
 0x734   :  { %v14079_v3 = vpop.f32.mrf.mxu0  ;;  %14174 = vmatmul.mubr.msk.bf16.gmra.mxu0 %vm1224_vm2, %v20144_v20  ;;  %v14191_v15 = vpop.f32.mrf.mxu1  ;;  %14286 = vmatmul.mubr.msk.bf16.gmra.mxu1 %vm1224_vm2, %v19756_v4  ;;  %v21963_v57 = vld [vmem:[#allocation114_spill] sm:$0xff] }
 0x735   :  { %v8249_v54 = vmax.f32 %v8121_v40, 0.0  ;;  %v8119_v28 = vadd.f32 %v19808_v34, %v7986_v37  ;;  %v20161_v62 = vadd.f32 %v14191_v15, %v20005_v0  ;;  %14289 = vmatprep.mubr.msk.bf16.mxu1 %vm1224_vm2, %v19788_v47 }
 0x736   :  { %v8667_v27 = vpop.f32.mrf.mxu0  ;;  %v9040_v35 = vpop.f32.mrf.mxu1 }
 0x737   :  { %v20165_v1 = vpack.c.bf16 %v8249_v54, %v8248_v33  ;;  %v8247_v39 = vmax.f32 %v8119_v28, 0.0  ;;  %v20168_v18 = vadd.f32 %v9040_v35, %v20017_v45  ;;  %v21964_v28 = vld [vmem:[#allocation85_spill] sm:$0xff]  ;;  %v21965_v27 = vld [vmem:[#allocation55_spill] sm:$0xff] }
 0x738   :  { %v14080_v29 = vpop.f32.mrf.mxu0  ;;  %v14192_v14 = vpop.f32.mrf.mxu1 }
 0x739   :  { %v20170_v5 = vpack.c.bf16 %v8247_v39, %v8246_v32  ;;  %v20173_v34 = vadd.f32 %v14192_v14, %v20022_v31 }
 0x73a   :  { %v8669_v0 = vpop.f32.mrf.mxu0  ;;  %v9043_v13 = vpop.f32.mrf.mxu1 }
 0x73b   :  { %v20176_v11 = vadd.f32 %v9043_v13, %v20029_v9  ;;  %14177 = vmatprep.mubr.msk.bf16.mxu0 %vm1224_vm2, %v20170_v5 }
 0x73c   :  { %v14083_v30 = vpop.f32.mrf.mxu0  ;;  %14178 = vmatmul.mubr.msk.bf16.gmra.mxu0 %vm1224_vm2, %v20165_v1  ;;  %v14195_v45 = vpop.f32.mrf.mxu1  ;;  %14290 = vmatmul.mubr.msk.bf16.gmra.mxu1 %vm1224_vm2, %v19784_v49 }
 0x73d   :  { %14293 = vmatprep.mubr.msk.bf16.mxu1 %vm1224_vm2, %v19821_v44  ;;  %14325 = vmatprep.mubr.msk.bf16.mxu0 %vm1224_vm2, %v21904_v10  ;;  %v21966_v45 = vld [vmem:[#allocation47_spill] sm:$0xff] }
 0x73e   :  { %v8679_v31 = vpop.f32.mrf.mxu0  ;;  %v9056_v9 = vpop.f32.mrf.mxu1 }
 0x740   :  { %v14084_v19 = vpop.f32.mrf.mxu0  ;;  %v14196_v48 = vpop.f32.mrf.mxu1 }
 0x742   :  { %v8681_v52 = vpop.f32.mrf.mxu0  ;;  %v9058_v7 = vpop.f32.mrf.mxu1 }
 0x744   :  { %v14087_v24 = vpop.f32.mrf.mxu0  ;;  %v14199_v41 = vpop.f32.mrf.mxu1  ;;  %14294 = vmatmul.mubr.msk.bf16.gmra.mxu1 %vm1224_vm2, %v21960_v55  ;;  %14326 = vmatmul.mubr.msk.bf16.vlgmr.msra.gmra.mxu0 %vm1224_vm2, %v21961_v63  ;;  %v21970_v63 = vld [vmem:[#allocation25_spill] sm:$0xff] }
 0x745   :  { %14297 = vmatprep.mubr.msk.bf16.mxu1 %vm1224_vm2, %v21962_v51  ;;  %14329 = vmatprep.mubr.msk.bf16.mxu0 %vm1224_vm2, %v21963_v57  ;;  %v21968_v41 = vld [vmem:[#allocation10_spill] sm:$0xff] }
 0x746   :  { %v8691_v10 = vpop.f32.mrf.mxu0  ;;  %v9068_v23 = vpop.f32.mrf.mxu1 }
 0x748   :  { %v14088_v40 = vpop.f32.mrf.mxu0  ;;  %v14200_v37 = vpop.f32.mrf.mxu1 }
 0x74a   :  { %v8693_v3 = vpop.f32.mrf.mxu0  ;;  %v9070_v15 = vpop.f32.mrf.mxu1 }
 0x74c   :  { %v14091_v33 = vpop.f32.mrf.mxu0  ;;  %v14203_v54 = vpop.f32.mrf.mxu1  ;;  %14298 = vmatmul.mubr.msk.bf16.gmra.mxu1 %vm1224_vm2, %v21964_v28  ;;  %14330 = vmatmul.mubr.msk.bf16.gmra.mxu0 %vm1224_vm2, %v21926_v38  ;;  %v21967_v38 = vld [vmem:[#allocation72_spill] sm:$0xff] }
 0x74d   :  { %14301 = vmatprep.mubr.msk.bf16.mxu1 %vm1224_vm2, %v21965_v27  ;;  %14333 = vmatprep.mubr.msk.bf16.mxu0 %vm1224_vm2, %v21927_v26  ;;  %v21971_v33 = vld [vmem:[#allocation121_spill] sm:$0xff] }
 0x74e   :  { %v8703_v35 = vpop.f32.mrf.mxu0  ;;  %v9080_v32 = vpop.f32.mrf.mxu1 }
 0x750   :  { %v14092_v39 = vpop.f32.mrf.mxu0  ;;  %v14204_v29 = vpop.f32.mrf.mxu1 }
 0x752   :  { %v8705_v14 = vpop.f32.mrf.mxu0  ;;  %v9082_v0 = vpop.f32.mrf.mxu1 }
 0x754   :  { %v14095_v13 = vpop.f32.mrf.mxu0  ;;  %v14207_v30 = vpop.f32.mrf.mxu1  ;;  %14302 = vmatmul.mubr.msk.bf16.gmra.mxu1 %vm1224_vm2, %v21966_v45  ;;  %14334 = vmatmul.mubr.msk.bf16.gmra.mxu0 %vm1224_vm2, %v21934_v61  ;;  %v21969_v61 = vld [vmem:[#allocation60_spill] sm:$0xff] }
 0x755   :  { %14305 = vmatprep.mubr.msk.bf16.mxu1 %vm1224_vm2, %v21967_v38  ;;  %14337 = vmatprep.mubr.msk.bf16.mxu0 %vm1224_vm2, %v19625_v25  ;;  %v21973_v30 = vld [vmem:[#allocation129_spill] sm:$0xff] }
 0x756   :  { %v8715_v26 = vpop.f32.mrf.mxu0  ;;  %v9092_v31 = vpop.f32.mrf.mxu1 }
 0x758   :  { %v14096_v9 = vpop.f32.mrf.mxu0  ;;  %v14208_v19 = vpop.f32.mrf.mxu1 }
 0x75a   :  { %v8717_v48 = vpop.f32.mrf.mxu0  ;;  %v9094_v52 = vpop.f32.mrf.mxu1 }
 0x75c   :  { %v14099_v7 = vpop.f32.mrf.mxu0  ;;  %v14211_v24 = vpop.f32.mrf.mxu1  ;;  %14306 = vmatmul.mubr.msk.bf16.gmra.mxu1 %vm1224_vm2, %v21968_v41  ;;  %14338 = vmatmul.mubr.msk.bf16.gmra.mxu0 %vm1224_vm2, %v21941_v2  ;;  %v21972_v2 = vld [vmem:[#allocation62_spill] sm:$0xff] }
 0x75d   :  { %14309 = vmatprep.mubr.msk.bf16.mxu1 %vm1224_vm2, %v21969_v61  ;;  %14341 = vmatprep.mubr.msk.bf16.mxu0 %vm1224_vm2, %v21970_v63 }
 0x75e   :  { %v8727_v25 = vpop.f32.mrf.mxu0  ;;  %v9104_v57 = vpop.f32.mrf.mxu1 }
 0x760   :  { %v14100_v10 = vpop.f32.mrf.mxu0  ;;  %v14212_v23 = vpop.f32.mrf.mxu1 }
 0x762   :  { %v8729_v40 = vpop.f32.mrf.mxu0  ;;  %v9106_v37 = vpop.f32.mrf.mxu1 }
 0x764   :  { %v14103_v3 = vpop.f32.mrf.mxu0  ;;  %v14215_v15 = vpop.f32.mrf.mxu1  ;;  %14310 = vmatmul.mubr.msk.bf16.gmra.mxu1 %vm1224_vm2, %v21971_v33  ;;  %14342 = vmatmul.mubr.msk.bf16.gmra.mxu0 %vm1224_vm2, %v19647_v22 }
 0x765   :  { %14313 = vmatprep.mubr.msk.bf16.mxu1 %vm1224_vm2, %v21972_v2  ;;  %14345 = vmatprep.mubr.msk.bf16.mxu0 %vm1224_vm2, %v19677_v59 }
 0x766   :  { %v8739_v54 = vpop.f32.mrf.mxu0  ;;  %v9116_v35 = vpop.f32.mrf.mxu1 }
 0x768   :  { %v14104_v32 = vpop.f32.mrf.mxu0  ;;  %v14216_v39 = vpop.f32.mrf.mxu1 }
 0x76a   :  { %v8741_v29 = vpop.f32.mrf.mxu0  ;;  %v9118_v14 = vpop.f32.mrf.mxu1 }
 0x76c   :  { %v14107_v0 = vpop.f32.mrf.mxu0  ;;  %v14219_v13 = vpop.f32.mrf.mxu1  ;;  %14314 = vmatmul.mubr.msk.bf16.gmra.mxu1 %vm1224_vm2, %v21973_v30  ;;  %14346 = vmatmul.mubr.msk.bf16.gmra.mxu0 %vm1224_vm2, %v19673_v43 }
 0x76d   :  { %14349 = vmatprep.mubr.msk.bf16.mxu0 %vm1224_vm2, %v19704_v12 }
 0x76e   :  { %v8751_v22 = vpop.f32.mrf.mxu0  ;;  %v9128_v26 = vpop.f32.mrf.mxu1 }
 0x770   :  { %v14108_v59 = vpop.f32.mrf.mxu0  ;;  %v14220_v31 = vpop.f32.mrf.mxu1 }
 0x772   :  { %v8753_v9 = vpop.f32.mrf.mxu0  ;;  %v9130_v19 = vpop.f32.mrf.mxu1 }
 0x774   :  { %v14111_v48 = vpop.f32.mrf.mxu0  ;;  %v14223_v52 = vpop.f32.mrf.mxu1  ;;  %14350 = vmatmul.mubr.msk.bf16.gmra.mxu0 %vm1224_vm2, %v19700_v21 }
 0x775   :  { %14353 = vmatprep.mubr.msk.bf16.mxu0 %vm1224_vm2, %v19732_v53 }
 0x776   :  { %v8763_v7 = vpop.f32.mrf.mxu0  ;;  %v9140_v24 = vpop.f32.mrf.mxu1 }
 0x778   :  { %v14112_v43 = vpop.f32.mrf.mxu0  ;;  %v14224_v63 = vpop.f32.mrf.mxu1 }
 0x77a   :  { %v8765_v25 = vpop.f32.mrf.mxu0  ;;  %v9142_v12 = vpop.f32.mrf.mxu1 }
 0x77c   :  { %v14115_v57 = vpop.f32.mrf.mxu0  ;;  %v14227_v10 = vpop.f32.mrf.mxu1  ;;  %14354 = vmatmul.mubr.msk.bf16.gmra.mxu0 %vm1224_vm2, %v19728_v6 }
 0x77d   :  { %14357 = vmatprep.mubr.msk.bf16.mxu0 %vm1224_vm2, %v19760_v17 }
 0x77e   :  { %v8775_v23 = vpop.f32.mrf.mxu0  ;;  %v9152_v40 = vpop.f32.mrf.mxu1 }
 0x780   :  { %v14116_v21 = vpop.f32.mrf.mxu0  ;;  %v14228_v37 = vpop.f32.mrf.mxu1 }
 0x782   :  { %v8777_v3 = vpop.f32.mrf.mxu0  ;;  %v9154_v53 = vpop.f32.mrf.mxu1 }
 0x784   :  { %v20242_v15 = vpop.f32.mrf.mxu0  ;;  %v14231_v54 = vpop.f32.mrf.mxu1  ;;  %14358 = vmatmul.mubr.msk.bf16.gmra.mxu0 %vm1224_vm2, %v19756_v4 }
 0x785   :  { %14361 = vmatprep.mubr.msk.bf16.mxu0 %vm1224_vm2, %v19788_v47 }
 0x786   :  { %v20248_v35 = vpop.f32.mrf.mxu0  ;;  %v9164_v6 = vpop.f32.mrf.mxu1 }
 0x788   :  { %v20250_v32 = vpop.f32.mrf.mxu0  ;;  %v14232_v17 = vpop.f32.mrf.mxu1 }
 0x78a   :  { %v20252_v39 = vpop.f32.mrf.mxu0  ;;  %v9166_v29 = vpop.f32.mrf.mxu1 }
 0x78c   :  { %v14123_v14 = vpop.f32.mrf.mxu0  ;;  %v14235_v0 = vpop.f32.mrf.mxu1  ;;  %14362 = vmatmul.mubr.msk.bf16.gmra.mxu0 %vm1224_vm2, %v19784_v49 }
 0x78d   :  { %14365 = vmatprep.mubr.msk.bf16.mxu0 %vm1224_vm2, %v19821_v44 }
 0x78e   :  { %v8803_v4 = vpop.f32.mrf.mxu0  ;;  %v9176_v13 = vpop.f32.mrf.mxu1 }
 0x790   :  { %v14124_v47 = vpop.f32.mrf.mxu0  ;;  %v14236_v22 = vpop.f32.mrf.mxu1 }
 0x792   :  { %v8805_v26 = vpop.f32.mrf.mxu0  ;;  %v9178_v59 = vpop.f32.mrf.mxu1 }
 0x794   :  { %v14127_v31 = vpop.f32.mrf.mxu0  ;;  %v14239_v9 = vpop.f32.mrf.mxu1  ;;  %14366 = vmatmul.mubr.msk.bf16.gmra.mxu0 %vm1224_vm2, %v21960_v55 }
 0x795   :  { %14369 = vmatprep.mubr.msk.bf16.mxu0 %vm1224_vm2, %v21962_v51 }
 0x796   :  { %v8815_v19 = vpop.f32.mrf.mxu0  ;;  %v9188_v48 = vpop.f32.mrf.mxu1 }
 0x798   :  { %v14128_v49 = vpop.f32.mrf.mxu0  ;;  %v14240_v52 = vpop.f32.mrf.mxu1 }
 0x79a   :  { %v8817_v7 = vpop.f32.mrf.mxu0  ;;  %v9190_v44 = vpop.f32.mrf.mxu1 }
 0x79c   :  { %v14131_v24 = vpop.f32.mrf.mxu0  ;;  %v14243_v43 = vpop.f32.mrf.mxu1  ;;  %14370 = vmatmul.mubr.msk.bf16.gmra.mxu0 %vm1224_vm2, %v21964_v28 }
 0x79d   :  { %14373 = vmatprep.mubr.msk.bf16.mxu0 %vm1224_vm2, %v21965_v27  ;;  %v21975_v43 = vld [vmem:[#allocation52_spill] sm:$0xff] }
 0x79e   :  { %v8827_v63 = vpop.f32.mrf.mxu0  ;;  %v9200_v25 = vpop.f32.mrf.mxu1 }
 0x7a0   :  { %v14132_v55 = vpop.f32.mrf.mxu0  ;;  %v14244_v12 = vpop.f32.mrf.mxu1 }
 0x7a2   :  { %v8829_v57 = vpop.f32.mrf.mxu0  ;;  %v9202_v51 = vpop.f32.mrf.mxu1 }
 0x7a4   :  { %v14135_v10 = vpop.f32.mrf.mxu0  ;;  %v14247_v23 = vpop.f32.mrf.mxu1  ;;  %14374 = vmatmul.mubr.msk.bf16.gmra.mxu0 %vm1224_vm2, %v21966_v45 }
 0x7a5   :  { %14377 = vmatprep.mubr.msk.bf16.mxu0 %vm1224_vm2, %v21967_v38  ;;  %v21977_v23 = vld [vmem:[#allocation132_spill] sm:$0xff] }
 0x7a6   :  { %v8839_v40 = vpop.f32.mrf.mxu0  ;;  %v9212_v21 = vpop.f32.mrf.mxu1 }
 0x7a8   :  { %v14136_v28 = vpop.f32.mrf.mxu0  ;;  %v14248_v37 = vpop.f32.mrf.mxu1 }
 0x7aa   :  { %v8841_v3 = vpop.f32.mrf.mxu0  ;;  %v9214_v27 = vpop.f32.mrf.mxu1 }
 0x7ac   :  { %v14139_v53 = vpop.f32.mrf.mxu0  ;;  %v14251_v54 = vpop.f32.mrf.mxu1  ;;  %14378 = vmatmul.mubr.msk.bf16.gmra.mxu0 %vm1224_vm2, %v21968_v41 }
 0x7ad   :  { %14381 = vmatprep.mubr.msk.bf16.mxu0 %vm1224_vm2, %v21969_v61 }
 0x7ae   :  { %v8851_v6 = vpop.f32.mrf.mxu0  ;;  %v9224_v17 = vpop.f32.mrf.mxu1 }
 0x7b0   :  { %v14140_v45 = vpop.f32.mrf.mxu0  ;;  %v14252_v29 = vpop.f32.mrf.mxu1 }
 0x7b2   :  { %v8853_v14 = vpop.f32.mrf.mxu0  ;;  %v9226_v38 = vpop.f32.mrf.mxu1 }
 0x7b4   :  { %v14143_v0 = vpop.f32.mrf.mxu0  ;;  %v14255_v4 = vpop.f32.mrf.mxu1  ;;  %14382 = vmatmul.mubr.msk.bf16.gmra.mxu0 %vm1224_vm2, %v21971_v33 }
 0x7b5   :  { %v20277_v13 = vadd.f32 %v14255_v4, %v20242_v15  ;;  %14385 = vmatprep.mubr.msk.bf16.mxu0 %vm1224_vm2, %v21972_v2  ;;  %v21974_v2 = vld [vmem:[#allocation7_spill] sm:$0xff] }
 0x7b6   :  { %v8863_v41 = vpop.f32.mrf.mxu0  ;;  %v9236_v47 = vpop.f32.mrf.mxu1 }
 0x7b7   :  { %v20282_v61 = vadd.f32 %v9236_v47, %v20248_v35 }
 0x7b8   :  { %v14144_v22 = vpop.f32.mrf.mxu0  ;;  %v14256_v26 = vpop.f32.mrf.mxu1 }
 0x7b9   :  { %v20285_v59 = vadd.f32 %v14256_v26, %v20250_v32 }
 0x7ba   :  { %v8865_v31 = vpop.f32.mrf.mxu0  ;;  %v9239_v9 = vpop.f32.mrf.mxu1 }
 0x7bb   :  { %v20288_v33 = vadd.f32 %v9239_v9, %v20252_v39  ;;  %v21976_v39 = vld [vmem:[#allocation50_spill] sm:$0xff] }
 0x7bc   :  { %v14147_v15 = vpop.f32.mrf.mxu0  ;;  %v14259_v19 = vpop.f32.mrf.mxu1  ;;  %14386 = vmatmul.mubr.msk.bf16.gmra.mxu0 %vm1224_vm2, %v21973_v30 }
 0x7bd   :  { %14389 = vmatprep.mubr.msk.bf16.mxu0 %vm1224_vm2, %v21974_v2 }
 0x7be   :  { %v8875_v35 = vpop.f32.mrf.mxu0  ;;  %v9252_v48 = vpop.f32.mrf.mxu1 }
 0x7c0   :  { %v14148_v49 = vpop.f32.mrf.mxu0  ;;  %v14260_v52 = vpop.f32.mrf.mxu1 }
 0x7c2   :  { %v8877_v7 = vpop.f32.mrf.mxu0  ;;  %v9254_v32 = vpop.f32.mrf.mxu1 }
 0x7c4   :  { %v14151_v44 = vpop.f32.mrf.mxu0  ;;  %v14263_v24 = vpop.f32.mrf.mxu1  ;;  %14390 = vmatmul.mubr.msk.bf16.gmra.mxu0 %vm1224_vm2, %v21975_v43 }
 0x7c5   :  { %14393 = vmatprep.mubr.msk.bf16.mxu0 %vm1224_vm2, %v21976_v39 }
 0x7c6   :  { %v8887_v63 = vpop.f32.mrf.mxu0  ;;  %v9264_v25 = vpop.f32.mrf.mxu1 }
 0x7c8   :  { %v14152_v30 = vpop.f32.mrf.mxu0  ;;  %v14264_v55 = vpop.f32.mrf.mxu1 }
 0x7ca   :  { %v8889_v12 = vpop.f32.mrf.mxu0  ;;  %v9266_v57 = vpop.f32.mrf.mxu1 }
 0x7cb   :  { %v21978_v12 = vmov 0  }
 0x7cc   :  { %v14155_v51 = vpop.f32.mrf.mxu0  ;;  %v14267_v10 = vpop.f32.mrf.mxu1  ;;  %14394 = vmatmul.mubr.msk.bf16.gmra.mxu0 %vm1224_vm2, %v21977_v23  ;;  %v9922_v23 = vld [vmem:[%s20590_s1 + $0x8] sm:$0xff] }
 0x7cd   :  { %14397 = vmatprep.mubr.msk.bf16.mxu0 %vm1224_vm2, %v20052_v42 }
 0x7ce   :  { %v8899_v40 = vpop.f32.mrf.mxu0  ;;  %v9276_v21 = vpop.f32.mrf.mxu1 }
 0x7d0   :  { %v14156_v28 = vpop.f32.mrf.mxu0  ;;  %v14268_v37 = vpop.f32.mrf.mxu1 }
 0x7d2   :  { %v8901_v3 = vpop.f32.mrf.mxu0  ;;  %v9278_v27 = vpop.f32.mrf.mxu1 }
 0x7d3   :  { %v9919_v27 = vld [vmem:[%s20591_s5 + $0x30] sm:$0xff] }
 0x7d4   :  { %v14159_v53 = vpop.f32.mrf.mxu0  ;;  %v14271_v54 = vpop.f32.mrf.mxu1  ;;  %14398 = vmatmul.mubr.msk.bf16.gmra.mxu0 %vm1224_vm2, %v20048_v56 }
 0x7d5   :  { %14401 = vmatprep.mubr.msk.bf16.mxu0 %vm1224_vm2, %v20076_v60 }
 0x7d6   :  { %v8911_v6 = vpop.f32.mrf.mxu0  ;;  %v9288_v17 = vpop.f32.mrf.mxu1 }
 0x7d7   :  { %v9918_v17 = vld [vmem:[%s20591_s5 + $0x28] sm:$0xff] }
 0x7d8   :  { %v14160_v45 = vpop.f32.mrf.mxu0  ;;  %v14272_v29 = vpop.f32.mrf.mxu1 }
 0x7da   :  { %v8913_v14 = vpop.f32.mrf.mxu0  ;;  %v9290_v42 = vpop.f32.mrf.mxu1 }
 0x7db   :  { %v9917_v14 = vld [vmem:[%s20591_s5 + $0x20] sm:$0xff] }
 0x7dc   :  { %v14163_v38 = vpop.f32.mrf.mxu0  ;;  %v14275_v0 = vpop.f32.mrf.mxu1  ;;  %14402 = vmatmul.mubr.msk.bf16.gmra.mxu0 %vm1224_vm2, %v20072_v46 }
 0x7dd   :  { %14405 = vmatprep.mubr.msk.bf16.mxu0 %vm1224_vm2, %v20100_v36  ;;  %v9916_v0 = vld [vmem:[%s20591_s5 + $0x18] sm:$0xff] }
 0x7de   :  { %v8923_v4 = vpop.f32.mrf.mxu0  ;;  %v9300_v41 = vpop.f32.mrf.mxu1 }
 0x7e0   :  { %v14164_v56 = vpop.f32.mrf.mxu0  ;;  %v14276_v47 = vpop.f32.mrf.mxu1 }
 0x7e1   :  { %v9915_v56 = vld [vmem:[%s20591_s5 + $0x10] sm:$0xff] }
 0x7e2   :  { %v8925_v22 = vpop.f32.mrf.mxu0  ;;  %v9302_v60 = vpop.f32.mrf.mxu1 }
 0x7e3   :  { %v9914_v60 = vld [vmem:[%s20591_s5 + $0x8] sm:$0xff] }
 0x7e4   :  { %v14167_v26 = vpop.f32.mrf.mxu0  ;;  %v14279_v31 = vpop.f32.mrf.mxu1  ;;  %14406 = vmatmul.mubr.msk.bf16.gmra.mxu0 %vm1224_vm2, %v20096_v8 }
 0x7e5   :  { %14409 = vmatprep.mubr.msk.bf16.mxu0 %vm1224_vm2, %v20124_v58 }
 0x7e6   :  { %v8935_v9 = vpop.f32.mrf.mxu0  ;;  %v9312_v15 = vpop.f32.mrf.mxu1 }
 0x7e7   :  { %v9913_v9 = vld [vmem:[%s20591_s5] sm:$0xff] }
 0x7e8   :  { %v14168_v46 = vpop.f32.mrf.mxu0  ;;  %v14280_v19 = vpop.f32.mrf.mxu1 }
 0x7ea   :  { %v8937_v2 = vpop.f32.mrf.mxu0  ;;  %v9314_v36 = vpop.f32.mrf.mxu1 }
 0x7ec   :  { %v14171_v35 = vpop.f32.mrf.mxu0  ;;  %v14283_v48 = vpop.f32.mrf.mxu1  ;;  %14410 = vmatmul.mubr.msk.bf16.gmra.mxu0 %vm1224_vm2, %v20120_v16 }
 0x7ed   :  { %14413 = vmatprep.mubr.msk.bf16.mxu0 %vm1224_vm2, %v20148_v50 }
 0x7ee   :  { %v8947_v49 = vpop.f32.mrf.mxu0  ;;  %v9324_v52 = vpop.f32.mrf.mxu1 }
 0x7f0   :  { %v14172_v8 = vpop.f32.mrf.mxu0  ;;  %v14284_v7 = vpop.f32.mrf.mxu1 }
 0x7f2   :  { %v8949_v32 = vpop.f32.mrf.mxu0  ;;  %v9326_v58 = vpop.f32.mrf.mxu1 }
 0x7f4   :  { %v14175_v44 = vpop.f32.mrf.mxu0  ;;  %v14287_v24 = vpop.f32.mrf.mxu1  ;;  %14414 = vmatmul.mubr.msk.bf16.gmra.mxu0 %vm1224_vm2, %v20144_v20 }
 0x7f5   :  { %14417 = vmatprep.mubr.msk.bf16.mxu0 %vm1224_vm2, %v20170_v5  ;;  %v9921_v5 = vld [vmem:[%s20590_s1] sm:$0xff] }
 0x7f6   :  { %v8959_v43 = vpop.f32.mrf.mxu0  ;;  %v9336_v39 = vpop.f32.mrf.mxu1  ;;  %14455 = vmatprep.mubr.msk.f32.mxu1 %vm240_vm1, %v9921_v5 }
 0x7f7   :  { %14456 = vmatmul.mubr.msk.f32.vlgmr.msra.gmra.mxu1 %vm240_vm1, %v9922_v23 }
 0x7f8   :  { %v14176_v16 = vpop.f32.mrf.mxu0  ;;  %v14288_v63 = vpop.f32.mrf.mxu1 }
 0x7fa   :  { %v8961_v25 = vpop.f32.mrf.mxu0  ;;  %v9338_v50 = vpop.f32.mrf.mxu1 }
 0x7fc   :  { %v14179_v30 = vpop.f32.mrf.mxu0  ;;  %v14291_v55 = vpop.f32.mrf.mxu1  ;;  %14418 = vmatmul.mubr.msk.bf16.gmra.mxu0 %vm1224_vm2, %v20165_v1  ;;  %v9920_v1 = vld [vmem:[%s20591_s5 + $0x38] sm:$0xff] }
 0x7fd   :  { %14421 = vmatprep.mubr.bf16.mxu0 %v21978_v12  ;;  %14461 = vmatprep.subr.mxu1 %v9920_v1 }
 0x7fe   :  { %v8971_v57 = vpop.f32.mrf.mxu0  ;;  %v9348_v51 = vpop.f32.mrf.mxu1  ;;  %14462 = vmatpush3.msra.mxu1 %v9920_v1 }
 0x7ff   :  { %14463 = vmatprep.subr.mxu1 %v9919_v27 }
 0x800   :  { %v14180_v10 = vpop.f32.mrf.mxu0  ;;  %v14292_v20 = vpop.f32.mrf.mxu1  ;;  %14464 = vmatpush3.msra.mxu1 %v9919_v27 }
 0x801   :  { %14465 = vmatprep.subr.mxu1 %v9918_v17 }
 0x802   :  { %v8973_v40 = vpop.f32.mrf.mxu0  ;;  %v9350_v21 = vpop.f32.mrf.mxu1  ;;  %14466 = vmatpush3.msra.mxu1 %v9918_v17 }
 0x803   :  { %14467 = vmatprep.subr.mxu1 %v9917_v14 }
 0x804   :  { %v14295_v28 = vpop.f32.mrf.mxu1  ;;  %v14327_v37 = vpop.f32.mrf.mxu0  ;;  %14422 = vmatmul.mubr.bf16.gmra.mxu0 %v21978_v12  ;;  %14468 = vmatpush3.msra.mxu1 %v9917_v14 }
 0x805   :  { %v20338_v3 = vadd.f32 %v14327_v37, %v20161_v62  ;;  %14425 = vmatprep.mubr.bf16.mxu0 %v21978_v12  ;;  %14469 = vmatprep.subr.mxu1 %v9916_v0 }
 0x806   :  { %v9360_v53 = vpop.f32.mrf.mxu1  ;;  %v9489_v54 = vpop.f32.mrf.mxu0  ;;  %14470 = vmatpush3.msra.mxu1 %v9916_v0 }
 0x807   :  { %v20345_v6 = vadd.f32 %v9489_v54, %v20168_v18  ;;  %14471 = vmatprep.subr.mxu1 %v9915_v56 }
 0x808   :  { %v14296_v62 = vpop.f32.mrf.mxu1  ;;  %v14328_v45 = vpop.f32.mrf.mxu0  ;;  %14472 = vmatpush3.msra.mxu1 %v9915_v56 }
 0x809   :  { %v20351_v29 = vadd.f32 %v14328_v45, %v20173_v34  ;;  %v9923_v34 = vld [vmem:[%s20590_s1 + $0x10] sm:$0xff]  ;;  %14473 = vmatprep.subr.mxu1 %v9914_v60 }
 0x80a   :  { %v9362_v42 = vpop.f32.mrf.mxu1  ;;  %v9492_v38 = vpop.f32.mrf.mxu0  ;;  %14458 = vmatprep.mubr.msk.f32.mxu1 %vm240_vm1, %v9923_v34  ;;  %14474 = vmatpush3.msra.mxu1 %v9914_v60 }
 0x80b   :  { %v20357_v18 = vadd.f32 %v9492_v38, %v20176_v11  ;;  %v9924_v11 = vld [vmem:[%s20590_s1 + $0x18] sm:$0xff]  ;;  %14475 = vmatprep.subr.mxu1 %v9913_v9 }
 0x80c   :  { %v14299_v4 = vpop.f32.mrf.mxu1  ;;  %v14331_v41 = vpop.f32.mrf.mxu0  ;;  %14426 = vmatmul.mubr.bf16.gmra.mxu0 %v21978_v12  ;;  %14459 = vmatmul.mubr.msk.f32.gmra.mxu1 %vm240_vm1, %v9924_v11 }
 0x80d   :  { %14429 = vmatprep.mubr.bf16.mxu0 %v21978_v12  ;;  %14476 = vmatpush3.msra.mxu1 %v9913_v9 }
 0x80e   :  { %v9372_v47 = vpop.f32.mrf.mxu1  ;;  %v9505_v22 = vpop.f32.mrf.mxu0 }
 0x810   :  { %v14300_v26 = vpop.f32.mrf.mxu1  ;;  %v14332_v31 = vpop.f32.mrf.mxu0 }
 0x812   :  { %v9374_v15 = vpop.f32.mrf.mxu1  ;;  %v9507_v46 = vpop.f32.mrf.mxu0 }
 0x814   :  { %v14303_v19 = vpop.f32.mrf.mxu1  ;;  %v14335_v2 = vpop.f32.mrf.mxu0  ;;  %14430 = vmatmul.mubr.bf16.gmra.mxu0 %v21978_v12 }
 0x815   :  { %14433 = vmatprep.mubr.bf16.mxu0 %v21978_v12 }
 0x816   :  { %v9384_v36 = vpop.f32.mrf.mxu1  ;;  %v9517_v35 = vpop.f32.mrf.mxu0 }
 0x818   :  { %v14304_v48 = vpop.f32.mrf.mxu1  ;;  %v14336_v49 = vpop.f32.mrf.mxu0 }
 0x81a   :  { %v9386_v52 = vpop.f32.mrf.mxu1  ;;  %v9519_v8 = vpop.f32.mrf.mxu0 }
 0x81c   :  { %v14307_v7 = vpop.f32.mrf.mxu1  ;;  %v14339_v32 = vpop.f32.mrf.mxu0  ;;  %14434 = vmatmul.mubr.bf16.gmra.mxu0 %v21978_v12 }
 0x81d   :  { %14437 = vmatprep.mubr.bf16.mxu0 %v21978_v12 }
 0x81e   :  { %v9396_v58 = vpop.f32.mrf.mxu1  ;;  %v9529_v44 = vpop.f32.mrf.mxu0 }
 0x820   :  { %v14308_v24 = vpop.f32.mrf.mxu1  ;;  %v14340_v43 = vpop.f32.mrf.mxu0 }
 0x822   :  { %v9398_v39 = vpop.f32.mrf.mxu1  ;;  %v9531_v16 = vpop.f32.mrf.mxu0 }
 0x823   :  { %v11741_v16 = vld [vmem:[%s20588_s4 + $0x4] ss:$0 sm:$0xff] }
 0x824   :  { %v14311_v63 = vpop.f32.mrf.mxu1  ;;  %v14343_v25 = vpop.f32.mrf.mxu0  ;;  %14438 = vmatmul.mubr.bf16.gmra.mxu0 %v21978_v12 }
 0x825   :  { %14441 = vmatprep.mubr.bf16.mxu0 %v21978_v12  ;;  %v9895_v25 = vadd.f32 %v11741_v16, %v20338_v3  ;;  %v9894_v3 = vadd.f32 %v11741_v16, %v20357_v18 }
 0x826   :  { %v9408_v50 = vpop.f32.mrf.mxu1  ;;  %v9541_v30 = vpop.f32.mrf.mxu0 }
 0x828   :  { %v14312_v55 = vpop.f32.mrf.mxu1  ;;  %v14344_v57 = vpop.f32.mrf.mxu0 }
 0x829   :  { %v9893_v55 = vadd.f32 %v11741_v16, %v20345_v6 }
 0x82a   :  { %v9410_v51 = vpop.f32.mrf.mxu1  ;;  %v9543_v10 = vpop.f32.mrf.mxu0 }
 0x82c   :  { %v14315_v20 = vpop.f32.mrf.mxu1  ;;  %v14347_v5 = vpop.f32.mrf.mxu0  ;;  %14442 = vmatmul.mubr.bf16.gmra.mxu0 %v21978_v12 }
 0x82d   :  { %14445 = vmatprep.mubr.bf16.mxu0 %v21978_v12  ;;  %v9903_v20 = vmax.f32 %v9895_v25, 0.0 }
 0x82e   :  { %v9420_v23 = vpop.f32.mrf.mxu1  ;;  %v9553_v40 = vpop.f32.mrf.mxu0 }
 0x82f   :  { %v9896_v23 = vadd.f32 %v11741_v16, %v20351_v29  ;;  %v9902_v29 = vmax.f32 %v9894_v3, 0.0 }
 0x830   :  { %v14316_v21 = vpop.f32.mrf.mxu1  ;;  %v14348_v1 = vpop.f32.mrf.mxu0 }
 0x832   :  { %v9422_v28 = vpop.f32.mrf.mxu1  ;;  %v9555_v37 = vpop.f32.mrf.mxu0 }
 0x833   :  { %v9901_v28 = vmax.f32 %v9893_v55, 0.0 }
 0x834   :  { %v14351_v27 = vpop.f32.mrf.mxu0  ;;  %14446 = vmatmul.mubr.bf16.gmra.mxu0 %v21978_v12 }
 0x835   :  { %14449 = vmatprep.mubr.bf16.mxu0 %v21978_v12 }
 0x836   :  { %v9565_v53 = vpop.f32.mrf.mxu0 }
 0x838   :  { %v14352_v54 = vpop.f32.mrf.mxu0 }
 0x83a   :  { %v9567_v17 = vpop.f32.mrf.mxu0 }
 0x83b   :  { %v9904_v17 = vmax.f32 %v9896_v23, 0.0 }
 0x83c   :  { %v14355_v62 = vpop.f32.mrf.mxu0  ;;  %14450 = vmatmul.mubr.bf16.gmra.mxu0 %v21978_v12 }
 0x83e   :  { %v9577_v45 = vpop.f32.mrf.mxu0 }
 0x840   :  { %v14356_v14 = vpop.f32.mrf.mxu0 }
 0x842   :  { %v9579_v42 = vpop.f32.mrf.mxu0 }
 0x844   :  { %v14359_v38 = vpop.f32.mrf.mxu0 }
 0x846   :  { %v9589_v0 = vpop.f32.mrf.mxu0 }
 0x848   :  { %v14360_v4 = vpop.f32.mrf.mxu0 }
 0x84a   :  { %v9591_v41 = vpop.f32.mrf.mxu0 }
 0x84c   :  { %v14363_v34 = vpop.f32.mrf.mxu0 }
 0x84e   :  { %v9601_v11 = vpop.f32.mrf.mxu0 }
 0x850   :  { %v14364_v56 = vpop.f32.mrf.mxu0 }
 0x852   :  { %v9603_v47 = vpop.f32.mrf.mxu0 }
 0x854   :  { %v14367_v22 = vpop.f32.mrf.mxu0 }
 0x856   :  { %v9613_v60 = vpop.f32.mrf.mxu0 }
 0x858   :  { %v14368_v26 = vpop.f32.mrf.mxu0 }
 0x85a   :  { %v9615_v31 = vpop.f32.mrf.mxu0 }
 0x85c   :  { %v14371_v9 = vpop.f32.mrf.mxu0 }
 0x85e   :  { %v9625_v15 = vpop.f32.mrf.mxu0 }
 0x860   :  { %v14372_v46 = vpop.f32.mrf.mxu0 }
 0x862   :  { %v9627_v19 = vpop.f32.mrf.mxu0 }
 0x864   :  { %v14375_v12 = vpop.f32.mrf.mxu0 }
 0x866   :  { %v9637_v2 = vpop.f32.mrf.mxu0 }
 0x868   :  { %v14376_v36 = vpop.f32.mrf.mxu0 }
 0x86a   :  { %v9639_v35 = vpop.f32.mrf.mxu0 }
 0x86c   :  { %v14379_v48 = vpop.f32.mrf.mxu0 }
 0x86e   :  { %v9649_v49 = vpop.f32.mrf.mxu0 }
 0x870   :  { %v14380_v52 = vpop.f32.mrf.mxu0 }
 0x872   :  { %v9651_v8 = vpop.f32.mrf.mxu0 }
 0x874   :  { %v14383_v7 = vpop.f32.mrf.mxu0 }
 0x876   :  { %v9661_v32 = vpop.f32.mrf.mxu0 }
 0x878   :  { %v14384_v58 = vpop.f32.mrf.mxu0 }
 0x87a   :  { %v9663_v44 = vpop.f32.mrf.mxu0 }
 0x87c   :  { %v14387_v24 = vpop.f32.mrf.mxu0 }
 0x87e   :  { %v9673_v43 = vpop.f32.mrf.mxu0 }
 0x880   :  { %v14388_v39 = vpop.f32.mrf.mxu0 }
 0x882   :  { %v9675_v63 = vpop.f32.mrf.mxu0 }
 0x884   :  { %v14391_v50 = vpop.f32.mrf.mxu0 }
 0x885   :  { %v9886_v30 = vadd.f32 %v14391_v50, %v20277_v13 }
 0x886   :  { %v9685_v57 = vpop.f32.mrf.mxu0 }
 0x887   :  { %v9899_v51 = vadd.f32 %v11741_v16, %v9886_v30  ;;  %v9884_v10 = vadd.f32 %v9685_v57, %v20282_v61 }
 0x888   :  { %v14392_v5 = vpop.f32.mrf.mxu0 }
 0x889   :  { %v9907_v40 = vmax.f32 %v9899_v51, 0.0  ;;  %v9897_v21 = vadd.f32 %v11741_v16, %v9884_v10  ;;  %v9887_v1 = vadd.f32 %v14392_v5, %v20285_v59 }
 0x88a   :  { %v9688_v37 = vpop.f32.mrf.mxu0 }
 0x88b   :  { %v9911_v27 = vadd.f32 %v9907_v40, %v9903_v20  ;;  %v9905_v13 = vmax.f32 %v9897_v21, 0.0  ;;  %v9900_v53 = vadd.f32 %v11741_v16, %v9887_v1  ;;  %v9885_v6 = vadd.f32 %v9688_v37, %v20288_v33 }
 0x88c   :  { %v14395_v54 = vpop.f32.mrf.mxu0 }
 0x88d   :  { %v9909_v61 = vadd.f32 %v9905_v13, %v9901_v28  ;;  %v9908_v62 = vmax.f32 %v9900_v53, 0.0  ;;  %v9898_v45 = vadd.f32 %v11741_v16, %v9885_v6  ;;  %v10168_v53 = vld [vmem:[%s20592_s8 + $0x28] sm:$0x3]  ;;  %v10167_v54 = vld [vmem:[%s20592_s8 + $0x20] sm:$0x3] }
 0x88e   :  { %v9701_v14 = vpop.f32.mrf.mxu0  ;;  %11756 = vmatprep.subr.msk.mxu1 %vm10206_vm4, %v10168_v53 }
 0x88f   :  { %v9912_v42 = vadd.f32 %v9908_v62, %v9904_v17  ;;  %v9906_v38 = vmax.f32 %v9898_v45, 0.0  ;;  %14477 = vmatprep.mubr.msk.f32.mxu1 %vm1224_vm2, %v9909_v61  ;;  %v10164_v17 = vld [vmem:[%s20592_s8 + $0x8] sm:$0xff]  ;;  %v10163_v62 = vld [vmem:[%s20592_s8] sm:$0xff]  ;;  %v14686_v45 = vmov 0.0  }
 0x890   :  { %v14396_v59 = vpop.f32.mrf.mxu0 }
 0x891   :  { %v9910_v0 = vadd.f32 %v9906_v38, %v9902_v29  ;;  %v10170_v29 = vld [vmem:[%s20592_s8 + $0x38] sm:$0x3] }
 0x892   :  { %v9703_v18 = vpop.f32.mrf.mxu0 }
 0x893   :  { %14478 = vmatmul.mubr.msk.f32.vlgmr.msra.gmra.mxu1 %vm1224_vm2, %v9910_v0 }
 0x894   :  { %v14399_v4 = vpop.f32.mrf.mxu0  ;;  %14480 = vmatprep.mubr.msk.f32.mxu1 %vm1224_vm2, %v9911_v27  ;;  %11757 = vmatpush1.msk.msra.mxu1 %vm10206_vm4, %v10167_v54 }
 0x895   :  { %10249 = vmatprep.subr.mxu1 %v10164_v17 }
 0x896   :  { %v9713_v33 = vpop.f32.mrf.mxu0  ;;  %10250 = vmatpush1.msra.mxu1 %v10163_v62 }
 0x897   :  { %14481 = vmatmul.mubr.msk.f32.gmra.mxu1 %vm1224_vm2, %v9912_v42  ;;  %11762 = vmatprep.subr.msk.mxu1 %vm10206_vm4, %v10170_v29 }
 0x898   :  { %v14400_v41 = vpop.f32.mrf.mxu0  ;;  %10283 = vmatprep.mubr.f32.mxu1 %v14686_v45 }
 0x89a   :  { %v9715_v34 = vpop.f32.mrf.mxu0 }
 0x89b   :  { %v11751_v34 = vld [vmem:[%s20593_s7] ss:$0 sm:$0xff] }
 0x89c   :  { %v14403_v11 = vpop.f32.mrf.mxu0 }
 0x89e   :  { %v9725_v56 = vpop.f32.mrf.mxu0 }
 0x8a0   :  { %v14404_v47 = vpop.f32.mrf.mxu0 }
 0x8a2   :  { %v9727_v22 = vpop.f32.mrf.mxu0 }
 0x8a4   :  { %v14407_v60 = vpop.f32.mrf.mxu0 }
 0x8a6   :  { %v9737_v26 = vpop.f32.mrf.mxu0 }
 0x8a8   :  { %v14408_v31 = vpop.f32.mrf.mxu0 }
 0x8aa   :  { %v9739_v9 = vpop.f32.mrf.mxu0 }
 0x8ac   :  { %v14411_v15 = vpop.f32.mrf.mxu0 }
 0x8ae   :  { %v9749_v46 = vpop.f32.mrf.mxu0 }
 0x8b0   :  { %v14412_v19 = vpop.f32.mrf.mxu0 }
 0x8b2   :  { %v9751_v12 = vpop.f32.mrf.mxu0 }
 0x8b4   :  { %v14415_v2 = vpop.f32.mrf.mxu0 }
 0x8b6   :  { %v9761_v36 = vpop.f32.mrf.mxu0 }
 0x8b7   :  { %v14457_v0 = vpop.f32.mrf.mxu1 }
 0x8b8   :  { %v14416_v35 = vpop.f32.mrf.mxu0 }
 0x8b9   :  { %v10008_v18 = vpop.f32.mrf.mxu1 }
 0x8ba   :  { %v9763_v48 = vpop.f32.mrf.mxu0 }
 0x8bc   :  { %v14419_v49 = vpop.f32.mrf.mxu0 }
 0x8be   :  { %v9773_v52 = vpop.f32.mrf.mxu0 }
 0x8c0   :  { %v14420_v8 = vpop.f32.mrf.mxu0 }
 0x8c2   :  { %v9775_v7 = vpop.f32.mrf.mxu0 }
 0x8c4   :  { %v14423_v32 = vpop.f32.mrf.mxu0 }
 0x8c6   :  { %v9785_v58 = vpop.f32.mrf.mxu0 }
 0x8c8   :  { %v14424_v44 = vpop.f32.mrf.mxu0 }
 0x8ca   :  { %v9787_v24 = vpop.f32.mrf.mxu0 }
 0x8cc   :  { %v14427_v43 = vpop.f32.mrf.mxu0  ;;  %v14460_v4 = vpop.f32.mrf.mxu1 }
 0x8ce   :  { %v9797_v39 = vpop.f32.mrf.mxu0  ;;  %v10018_v33 = vpop.f32.mrf.mxu1 }
 0x8cf   :  { %v10169_v39 = vld [vmem:[%s20592_s8 + $0x30] sm:$0x3] }
 0x8d0   :  { %v14428_v16 = vpop.f32.mrf.mxu0 }
 0x8d2   :  { %v9799_v63 = vpop.f32.mrf.mxu0 }
 0x8d3   :  { %v10166_v63 = vld [vmem:[%s20592_s8 + $0x18] sm:$0xff] }
 0x8d4   :  { %v14431_v25 = vpop.f32.mrf.mxu0 }
 0x8d5   :  { %v10165_v25 = vld [vmem:[%s20592_s8 + $0x10] sm:$0xff] }
 0x8d6   :  { %v9809_v50 = vpop.f32.mrf.mxu0 }
 0x8d8   :  { %v14432_v30 = vpop.f32.mrf.mxu0 }
 0x8da   :  { %v9811_v55 = vpop.f32.mrf.mxu0 }
 0x8dc   :  { %v14435_v57 = vpop.f32.mrf.mxu0 }
 0x8de   :  { %v9821_v51 = vpop.f32.mrf.mxu0 }
 0x8e0   :  { %v14436_v10 = vpop.f32.mrf.mxu0 }
 0x8e1   :  { %v10173_v10 = vlaneseq }
 0x8e2   :  { %v9823_v20 = vpop.f32.mrf.mxu0 }
 0x8e3   :  { %v10174_v20 = vshrl.u32 %v10173_v10, 7 }
 0x8e4   :  { %v14439_v5 = vpop.f32.mrf.mxu0 }
 0x8e5   :  { %v10175_v5 = vsub.s32 0, %v10174_v20 }
 0x8e6   :  { %v9833_v23 = vpop.f32.mrf.mxu0 }
 0x8e7   :  { %v10397_v23 = vld [vmem:[%s20594_s10] sm:$0xf] }
 0x8e8   :  { %v14440_v40 = vpop.f32.mrf.mxu0 }
 0x8e9   :  { %v10179_v40 = vsub.s32 1, %v10174_v20 }
 0x8ea   :  { %v9835_v21 = vpop.f32.mrf.mxu0 }
 0x8eb   :  { %v10171_v21 = vld [vmem:[%s20595_s9] sm:$0xf] }
 0x8ec   :  { %v14443_v1 = vpop.f32.mrf.mxu0 }
 0x8ed   :  { %v20460_v1 = vrot.slane %v10397_v23, %v10175_v5 }
 0x8ee   :  { %v9845_v28 = vpop.f32.mrf.mxu0 }
 0x8ef   :  { %v10176_v28 = vrot.slane %v10171_v21, %v10175_v5 }
 0x8f0   :  { %v14444_v3 = vpop.f32.mrf.mxu0 }
 0x8f1   :  { %v20462_v3 = vrot.slane %v10397_v23, %v10179_v40 }
 0x8f2   :  { %v9847_v37 = vpop.f32.mrf.mxu0 }
 0x8f3   :  { %v10403_v37 = vmul.f32 0.0, %v20460_v1 }
 0x8f4   :  { %v14447_v27 = vpop.f32.mrf.mxu0 }
 0x8f5   :  { %v10180_v27 = vrot.slane %v10171_v21, %v10179_v40 }
 0x8f6   :  { %v9857_v13 = vpop.f32.mrf.mxu0 }
 0x8f8   :  { %v14448_v6 = vpop.f32.mrf.mxu0 }
 0x8f9   :  { %v10415_v6 = vmul.f32 0.0, %v20462_v3 }
 0x8fa   :  { %v9859_v61 = vpop.f32.mrf.mxu0 }
 0x8fc   :  { %v14451_v14 = vpop.f32.mrf.mxu0 }
 0x8fe   :  { %v9869_v42 = vpop.f32.mrf.mxu0 }
 0x900   :  { %v14452_v38 = vpop.f32.mrf.mxu0 }
 0x902   :  { %v9871_v59 = vpop.f32.mrf.mxu0 }
 0x953   :  { %v14479_v41 = vpop.f32.mrf.mxu1 }
 0x954   :  { %v10111_v11 = vadd.f32 %v14479_v41, %v14457_v0 }
 0x955   :  { %v10105_v56 = vpop.f32.mrf.mxu1 }
 0x956   :  { %v10132_v47 = vadd.f32 %v11751_v34, %v10111_v11  ;;  %v10106_v22 = vadd.f32 %v10105_v56, %v10008_v18  ;;  %v10183_v18 = vsub.s32 2, %v10174_v20 }
 0x957   :  { %v14482_v60 = vpop.f32.mrf.mxu1 }
 0x958   :  { %v11753_v26 = vmul.f32 -1.442695, %v10132_v47  ;;  %v10131_v31 = vadd.f32 %v11751_v34, %v10106_v22  ;;  %v10121_v9 = vadd.f32 %v14482_v60, %v14460_v4  ;;  %v20480_v56 = vrot.slane %v10397_v23, %v10183_v18 }
 0x959   :  { %v10115_v15 = vpop.f32.mrf.mxu1  ;;  %v20484_v22 = vrot.slane %v10171_v21, %v10183_v18 }
 0x95a   :  { %14537 = vpow2.f32 %v11753_v26  ;;  %v11752_v46 = vmul.f32 -1.442695, %v10131_v31  ;;  %v10134_v19 = vadd.f32 %v11751_v34, %v10121_v9  ;;  %v10116_v12 = vadd.f32 %v10115_v15, %v10018_v33 }
 0x95b   :  { %v10187_v33 = vsub.s32 3, %v10174_v20 }
 0x95c   :  { %14539 = vpow2.f32 %v11752_v46  ;;  %v10133_v2 = vadd.f32 %v11751_v34, %v10116_v12  ;;  %v11755_v36 = vmul.f32 -1.442695, %v10134_v19  ;;  %v10427_v46 = vmul.f32 0.0, %v20480_v56 }
 0x95d   :  { %v20486_v60 = vrot.slane %v10397_v23, %v10187_v33  ;;  %v20490_v9 = vrot.slane %v10171_v21, %v10187_v33 }
 0x95e   :  { %v11754_v35 = vmul.f32 -1.442695, %v10133_v2 }
 0x95f   :  { %v10434_v12 = vmul.f32 0.0, %v20486_v60 }
 0x960   :  { %14541 = vpow2.f32 %v11754_v35 }
 0x961   :  { %14543 = vpow2.f32 %v11755_v36 }
 0x967   :  { %v14538_v48 = vpop.eup %14537 }
 0x968   :  { %v10148_v52 = vadd.f32 1.0, %v14538_v48 }
 0x969   :  { %v14540_v49 = vpop.eup %14539 }
 0x96a   :  { %v10147_v8 = vadd.f32 1.0, %v14540_v49 }
 0x96c   :  { %14545 = vrcp.f32 %v10147_v8 }
 0x96d   :  { %v14542_v7 = vpop.eup %14541  ;;  %14547 = vrcp.f32 %v10148_v52 }
 0x96e   :  { %v10149_v32 = vadd.f32 1.0, %v14542_v7  ;;  %v14544_v58 = vpop.eup %14543 }
 0x96f   :  { %v10150_v44 = vadd.f32 1.0, %v14544_v58 }
 0x970   :  { %14549 = vrcp.f32 %v10149_v32 }
 0x971   :  { %14551 = vrcp.f32 %v10150_v44 }
 0x979   :  { %v14546_v24 = vpop.eup %14545 }
 0x97a   :  { %v10159_v43 = vmul.f32 %v14546_v24, %v10131_v31  ;;  %v14548_v16 = vpop.eup %14547 }
 0x97b   :  { %v10160_v50 = vmul.f32 %v14548_v16, %v10132_v47 }
 0x97c   :  { %11758 = vmatmul.mubr.msk.f32.vlgmr.msra.gmra.mxu1 %vm10193_vm5, %v10159_v43 }
 0x97d   :  { %11763 = vmatpush1.msk.msra.mxu1 %vm10206_vm4, %v10169_v39  ;;  %10289 = vmatprep.mubr.f32.mxu1 %v14686_v45  ;;  %v14550_v30 = vpop.eup %14549 }
 0x97e   :  { %10338 = vmatprep.subr.mxu1 %v10166_v63  ;;  %v10161_v55 = vmul.f32 %v14550_v30, %v10133_v2  ;;  %v14552_v57 = vpop.eup %14551 }
 0x97f   :  { %10339 = vmatpush1.msra.mxu1 %v10165_v25  ;;  %v10162_v51 = vmul.f32 %v14552_v57, %v10134_v19 }
 0x980   :  { %11759 = vmatmul.mubr.msk.f32.gmra.mxu1 %vm10193_vm5, %v10160_v50 }
 0x981   :  { %10295 = vmatprep.mubr.f32.mxu1 %v14686_v45 }
 0x984   :  { %11760 = vmatmul.mubr.msk.f32.gmra.mxu1 %vm10193_vm5, %v10161_v55 }
 0x985   :  { %10301 = vmatprep.mubr.f32.mxu1 %v14686_v45 }
 0x988   :  { %11761 = vmatmul.mubr.msk.f32.gmra.mxu1 %vm10193_vm5, %v10162_v51 }
 0x989   :  { %10372 = vmatprep.mubr.f32.mxu1 %v14686_v45 }
 0x98c   :  { %11764 = vmatmul.mubr.msk.f32.vlgmr.msra.gmra.mxu1 %vm10193_vm5, %v10159_v43 }
 0x98d   :  { %10378 = vmatprep.mubr.f32.mxu1 %v14686_v45 }
 0x990   :  { %11765 = vmatmul.mubr.msk.f32.gmra.mxu1 %vm10193_vm5, %v10160_v50 }
 0x991   :  { %10384 = vmatprep.mubr.f32.mxu1 %v14686_v45 }
 0x994   :  { %11766 = vmatmul.mubr.msk.f32.gmra.mxu1 %vm10193_vm5, %v10161_v55  ;;  %v20499_v55 = vld [vmem:[%s20596_s11] ss:$0 sm:$0xff] }
 0x995   :  { %10390 = vmatprep.mubr.f32.mxu1 %v14686_v45 }
 0x998   :  { %11767 = vmatmul.mubr.msk.f32.gmra.mxu1 %vm10193_vm5, %v10162_v51 }
 0xa3c   :  { %v10285_v13 = vpop.f32.mrf.mxu1 }
 0xa3d   :  { %v20465_v53 = vadd.f32 %v10285_v13, %v10176_v28 }
 0xa3e   :  { %v10287_v54 = vpop.f32.mrf.mxu1 }
 0xa3f   :  { %v10404_v17 = vadd.f32 %v10403_v37, %v20465_v53  ;;  %v20469_v61 = vadd.f32 %v10287_v54, %v10180_v27 }
 0xa40   :  { %v10291_v62 = vpop.f32.mrf.mxu1 }
 0xa41   :  { %v11768_v45 = vmul.f32 -1.442695, %v10404_v17  ;;  %v10416_v14 = vadd.f32 %v10415_v6, %v20469_v61  ;;  %v20472_v29 = vadd.f32 %v10291_v62, %v10176_v28 }
 0xa42   :  { %v10293_v42 = vpop.f32.mrf.mxu1 }
 0xa43   :  { %14553 = vpow2.f32 %v11768_v45  ;;  %v11769_v38 = vmul.f32 -1.442695, %v10416_v14  ;;  %v20474_v59 = vadd.f32 %v10293_v42, %v10180_v27 }
 0xa44   :  { %v10297_v0 = vpop.f32.mrf.mxu1 }
 0xa45   :  { %14555 = vpow2.f32 %v11769_v38  ;;  %v20476_v4 = vadd.f32 %v10297_v0, %v10176_v28 }
 0xa46   :  { %v10299_v41 = vpop.f32.mrf.mxu1 }
 0xa47   :  { %v20478_v34 = vadd.f32 %v10299_v41, %v10180_v27 }
 0xa48   :  { %v10303_v11 = vpop.f32.mrf.mxu1 }
 0xa49   :  { %v20482_v47 = vadd.f32 %v10303_v11, %v10176_v28 }
 0xa4a   :  { %v10305_v26 = vpop.f32.mrf.mxu1 }
 0xa4b   :  { %v20488_v31 = vadd.f32 %v10305_v26, %v10180_v27 }
 0xa4c   :  { %v10374_v15 = vpop.f32.mrf.mxu1 }
 0xa4d   :  { %v10375_v19 = vadd.f32 %v10374_v15, %v20484_v22 }
 0xa4e   :  { %v10376_v2 = vpop.f32.mrf.mxu1 }
 0xa4f   :  { %v10377_v36 = vadd.f32 %v10376_v2, %v20490_v9  ;;  %v10428_v48 = vadd.f32 %v10427_v46, %v10375_v19 }
 0xa50   :  { %v14554_v35 = vpop.eup %14553 }
 0xa51   :  { %v10408_v49 = vadd.f32 1.0, %v14554_v35  ;;  %v10435_v52 = vadd.f32 %v10434_v12, %v10377_v36 }
 0xa52   :  { %v14556_v8 = vpop.eup %14555 }
 0xa53   :  { %14557 = vrcp.f32 %v10408_v49  ;;  %v10420_v7 = vadd.f32 1.0, %v14556_v8  ;;  %v11770_v32 = vmul.f32 -1.442695, %v10435_v52 }
 0xa54   :  { %14559 = vtanh.f32 %v10428_v48 }
 0xa55   :  { %14561 = vrcp.f32 %v10420_v7 }
 0xa56   :  { %14563 = vpow2.f32 %v11770_v32 }
 0xa60   :  { %v14558_v58 = vpop.eup %14557 }
 0xa61   :  { %v14560_v44 = vpop.eup %14559 }
 0xa62   :  { %v14562_v24 = vpop.eup %14561  ;;  %v10443_v16 = vmul.f32 %v14560_v44, %v14558_v58 }
 0xa63   :  { %v14564_v43 = vpop.eup %14563  ;;  %v10442_v39 = vmul.f32 0.0, %v14562_v24 }
 0xa64   :  { %v10439_v63 = vadd.f32 1.0, %v14564_v43 }
 0xa65   :  { %v10444_v25 = vadd.f32 %v10443_v16, %v10442_v39  ;;  %v10380_v39 = vpop.f32.mrf.mxu1 }
 0xa66   :  { %14565 = vrcp.f32 %v10439_v63 }
 0xa67   :  { %14567 = vtanh.f32 %v10444_v25  ;;  %v10498_v11 = vrot.slane %v10444_v25, 4 }
 0xa73   :  { %v14566_v50 = vpop.eup %14565 }
 0xa74   :  { %v14568_v30 = vpop.eup %14567 }
 0xa75   :  { %v10446_v57 = vmul.f32 %v14568_v30, %v14566_v50  ;;  %v10382_v50 = vpop.f32.mrf.mxu1 }
 0xa77   :  { %v10453_v51 = vmul.f32 %v20499_v55, %v10446_v57 }
 0xa79   :  { %v10455_v10 = vsel %vm10454_vm6, %v10453_v51, 0.0  ;;  %v10383_v51 = vadd.f32 %v10382_v50, %v20490_v9 }
 0xa7a   :  { %10456 = vadd.xlane.f32.xlu0 %v10455_v10 }
 0xb03   :  { %v10457_v20 = vpop.xlane.xlu0 %10456 }
 0xb04   :  { %v10458_v5 = vmul.f32 %v10457_v20, %v20460_v1  ;;  %v10469_v23 = vmul.f32 %v10457_v20, %v20462_v3  ;;  %v10486_v6 = vmul.f32 %v10457_v20, %v20486_v60  ;;  %v10480_v17 = vmul.f32 %v10457_v20, %v20480_v56 }
 0xb06   :  { %v10460_v40 = vrot.slane %v10458_v5, 4  ;;  %v10471_v21 = vrot.slane %v10469_v23, 4  ;;  %v10488_v54 = vrot.slane %v10486_v6, 4  ;;  %v10482_v45 = vrot.slane %v10480_v17, 4 }
 0xb07   :  { %v10381_v5 = vadd.f32 %v10380_v39, %v20484_v22 }
 0xb08   :  { %v10462_v28 = vadd.f32 %v10460_v40, %v20465_v53  ;;  %v10473_v37 = vadd.f32 %v10471_v21, %v20469_v61  ;;  %v10490_v62 = vadd.f32 %v10488_v54, %v10377_v36  ;;  %v10484_v42 = vadd.f32 %v10482_v45, %v10375_v19 }
 0xb0a   :  { %v11772_v27 = vmul.f32 -1.442695, %v10462_v28  ;;  %v11773_v13 = vmul.f32 -1.442695, %v10473_v37  ;;  %v11774_v14 = vmul.f32 -1.442695, %v10490_v62 }
 0xb0c   :  { %14569 = vpow2.f32 %v11772_v27 }
 0xb0d   :  { %14571 = vpow2.f32 %v11773_v13 }
 0xb0e   :  { %14573 = vpow2.f32 %v11774_v14 }
 0xb0f   :  { %14575 = vtanh.f32 %v10484_v42 }
 0xb19   :  { %v14570_v38 = vpop.eup %14569 }
 0xb1a   :  { %v14572_v0 = vpop.eup %14571  ;;  %v10466_v18 = vadd.f32 1.0, %v14570_v38 }
 0xb1b   :  { %v10477_v53 = vadd.f32 1.0, %v14572_v0  ;;  %v14574_v61 = vpop.eup %14573 }
 0xb1c   :  { %14577 = vrcp.f32 %v10466_v18  ;;  %v14576_v33 = vpop.eup %14575  ;;  %v10494_v15 = vadd.f32 1.0, %v14574_v61 }
 0xb1d   :  { %14579 = vrcp.f32 %v10477_v53 }
 0xb1e   :  { %14581 = vrcp.f32 %v10494_v15 }
 0xb29   :  { %v14578_v41 = vpop.eup %14577 }
 0xb2a   :  { %v14580_v26 = vpop.eup %14579  ;;  %v10501_v46 = vmul.f32 %v14578_v41, %v14576_v33 }
 0xb2b   :  { %v10500_v12 = vmul.f32 %v14580_v26, %v10498_v11  ;;  %v14582_v19 = vpop.eup %14581 }
 0xb2d   :  { %v10502_v2 = vadd.f32 %v10501_v46, %v10500_v12 }
 0xb2f   :  { %14583 = vtanh.f32 %v10502_v2  ;;  %v10550_v17 = vrot.slane %v10502_v2, 4 }
 0xb3c   :  { %v14584_v36 = vpop.eup %14583 }
 0xb3d   :  { %v10504_v35 = vmul.f32 %v14584_v36, %v14582_v19 }
 0xb3f   :  { %v10505_v48 = vmul.f32 %v20499_v55, %v10504_v35 }
 0xb41   :  { %v10507_v49 = vsel %vm10506_vm7, %v10505_v48, 0.0 }
 0xb42   :  { %10508 = vadd.xlane.f32.xlu0 %v10507_v49 }
 0xbcb   :  { %v10509_v52 = vpop.xlane.xlu0 %10508 }
 0xbcc   :  { %v10510_v8 = vmul.f32 %v10509_v52, %v20460_v1  ;;  %v10521_v7 = vmul.f32 %v10509_v52, %v20462_v3  ;;  %v10816_v32 = vsel %vm10454_vm6, %v10457_v20, %v10509_v52  ;;  %v10538_v25 = vmul.f32 %v10509_v52, %v20486_v60 }
 0xbcd   :  { %10821 = vst.msk [vmem:[%s20597_s12] sm:$0xff] %vm10820_vm8, %v10816_v32  ;;  %v10532_v57 = vmul.f32 %v10509_v52, %v20480_v56 }
 0xbce   :  { %v10512_v58 = vrot.slane %v10510_v8, 4  ;;  %v10523_v44 = vrot.slane %v10521_v7, 4  ;;  %v10540_v30 = vrot.slane %v10538_v25, 4 }
 0xbcf   :  { %v10534_v20 = vrot.slane %v10532_v57, 4 }
 0xbd0   :  { %v10514_v24 = vadd.f32 %v10512_v58, %v20472_v29  ;;  %v10525_v43 = vadd.f32 %v10523_v44, %v20474_v59  ;;  %v10542_v10 = vadd.f32 %v10540_v30, %v10383_v51 }
 0xbd1   :  { %v10536_v40 = vadd.f32 %v10534_v20, %v10381_v5 }
 0xbd2   :  { %v11775_v16 = vmul.f32 -1.442695, %v10514_v24  ;;  %v11776_v63 = vmul.f32 -1.442695, %v10525_v43  ;;  %v11777_v23 = vmul.f32 -1.442695, %v10542_v10 }
 0xbd4   :  { %14585 = vpow2.f32 %v11775_v16 }
 0xbd5   :  { %14587 = vpow2.f32 %v11776_v63 }
 0xbd6   :  { %14589 = vpow2.f32 %v11777_v23 }
 0xbd7   :  { %14591 = vtanh.f32 %v10536_v40 }
 0xbe1   :  { %v14586_v21 = vpop.eup %14585 }
 0xbe2   :  { %v14588_v28 = vpop.eup %14587  ;;  %v10518_v37 = vadd.f32 1.0, %v14586_v21 }
 0xbe3   :  { %v10529_v27 = vadd.f32 1.0, %v14588_v28  ;;  %v14590_v13 = vpop.eup %14589 }
 0xbe4   :  { %14593 = vrcp.f32 %v10518_v37  ;;  %v14592_v6 = vpop.eup %14591  ;;  %v10546_v45 = vadd.f32 1.0, %v14590_v13 }
 0xbe5   :  { %14595 = vrcp.f32 %v10529_v27 }
 0xbe6   :  { %14597 = vrcp.f32 %v10546_v45 }
 0xbf1   :  { %v14594_v54 = vpop.eup %14593 }
 0xbf2   :  { %v14596_v62 = vpop.eup %14595  ;;  %v10553_v14 = vmul.f32 %v14594_v54, %v14592_v6 }
 0xbf3   :  { %v10552_v42 = vmul.f32 %v14596_v62, %v10550_v17  ;;  %v14598_v0 = vpop.eup %14597  ;;  %v10386_v17 = vpop.f32.mrf.mxu1 }
 0xbf5   :  { %v10554_v38 = vadd.f32 %v10553_v14, %v10552_v42  ;;  %v10388_v42 = vpop.f32.mrf.mxu1 }
 0xbf7   :  { %14599 = vtanh.f32 %v10554_v38  ;;  %v10601_v16 = vrot.slane %v10554_v38, 4 }
 0xc04   :  { %v14600_v18 = vpop.eup %14599 }
 0xc05   :  { %v10556_v53 = vmul.f32 %v14600_v18, %v14598_v0  ;;  %v10389_v18 = vadd.f32 %v10388_v42, %v20490_v9 }
 0xc07   :  { %v10557_v61 = vmul.f32 %v20499_v55, %v10556_v53 }
 0xc09   :  { %v10558_v33 = vsel %vm10454_vm6, %v10557_v61, 0.0 }
 0xc0a   :  { %10559 = vadd.xlane.f32.xlu1 %v10558_v33  ;;  %v10387_v33 = vadd.f32 %v10386_v17, %v20484_v22 }
 0xc93   :  { %v10560_v41 = vpop.xlane.xlu1 %10559 }
 0xc94   :  { %v10561_v11 = vmul.f32 %v10560_v41, %v20460_v1  ;;  %v10572_v26 = vmul.f32 %v10560_v41, %v20462_v3  ;;  %v10589_v35 = vmul.f32 %v10560_v41, %v20486_v60  ;;  %v10583_v49 = vmul.f32 %v10560_v41, %v20480_v56 }
 0xc96   :  { %v10563_v15 = vrot.slane %v10561_v11, 4  ;;  %v10574_v46 = vrot.slane %v10572_v26, 4  ;;  %v10591_v48 = vrot.slane %v10589_v35, 4  ;;  %v10585_v8 = vrot.slane %v10583_v49, 4 }
 0xc98   :  { %v10565_v12 = vadd.f32 %v10563_v15, %v20472_v29  ;;  %v10576_v2 = vadd.f32 %v10574_v46, %v20474_v59  ;;  %v10593_v52 = vadd.f32 %v10591_v48, %v10383_v51  ;;  %v10587_v32 = vadd.f32 %v10585_v8, %v10381_v5 }
 0xc9a   :  { %v11778_v19 = vmul.f32 -1.442695, %v10565_v12  ;;  %v11779_v36 = vmul.f32 -1.442695, %v10576_v2  ;;  %v11780_v7 = vmul.f32 -1.442695, %v10593_v52 }
 0xc9c   :  { %14601 = vpow2.f32 %v11778_v19 }
 0xc9d   :  { %14603 = vpow2.f32 %v11779_v36 }
 0xc9e   :  { %14605 = vpow2.f32 %v11780_v7 }
 0xc9f   :  { %14607 = vtanh.f32 %v10587_v32 }
 0xca9   :  { %v14602_v58 = vpop.eup %14601 }
 0xcaa   :  { %v14604_v44 = vpop.eup %14603  ;;  %v10569_v24 = vadd.f32 1.0, %v14602_v58 }
 0xcab   :  { %v10580_v29 = vadd.f32 1.0, %v14604_v44  ;;  %v14606_v59 = vpop.eup %14605 }
 0xcac   :  { %14609 = vrcp.f32 %v10569_v24  ;;  %v14608_v43 = vpop.eup %14607  ;;  %v10597_v25 = vadd.f32 1.0, %v14606_v59 }
 0xcad   :  { %14611 = vrcp.f32 %v10580_v29 }
 0xcae   :  { %14613 = vrcp.f32 %v10597_v25 }
 0xcb9   :  { %v14610_v39 = vpop.eup %14609 }
 0xcba   :  { %v14612_v63 = vpop.eup %14611  ;;  %v10604_v50 = vmul.f32 %v14610_v39, %v14608_v43 }
 0xcbb   :  { %v10603_v30 = vmul.f32 %v14612_v63, %v10601_v16  ;;  %v14614_v51 = vpop.eup %14613 }
 0xcbd   :  { %v10605_v57 = vadd.f32 %v10604_v50, %v10603_v30 }
 0xcbf   :  { %14615 = vtanh.f32 %v10605_v57  ;;  %v10652_v35 = vrot.slane %v10605_v57, 4 }
 0xccc   :  { %v14616_v10 = vpop.eup %14615 }
 0xccd   :  { %v10607_v20 = vmul.f32 %v14616_v10, %v14614_v51 }
 0xccf   :  { %v10608_v5 = vmul.f32 %v20499_v55, %v10607_v20 }
 0xcd1   :  { %v10609_v23 = vsel %vm10506_vm7, %v10608_v5, 0.0 }
 0xcd2   :  { %10610 = vadd.xlane.f32.xlu1 %v10609_v23 }
 0xd5b   :  { %v10611_v40 = vpop.xlane.xlu1 %10610 }
 0xd5c   :  { %v10612_v21 = vmul.f32 %v10611_v40, %v20460_v1  ;;  %v10623_v28 = vmul.f32 %v10611_v40, %v20462_v3  ;;  %v10817_v37 = vsel %vm10454_vm6, %v10560_v41, %v10611_v40  ;;  %v10640_v14 = vmul.f32 %v10611_v40, %v20486_v60 }
 0xd5d   :  { %10822 = vst.msk [vmem:[%s20597_s12 + $0x8] sm:$0xff] %vm10820_vm8, %v10817_v37  ;;  %v10634_v0 = vmul.f32 %v10611_v40, %v20480_v56 }
 0xd5e   :  { %v10614_v27 = vrot.slane %v10612_v21, 4  ;;  %v10625_v13 = vrot.slane %v10623_v28, 4  ;;  %v10642_v38 = vrot.slane %v10640_v14, 4 }
 0xd5f   :  { %v10636_v61 = vrot.slane %v10634_v0, 4 }
 0xd60   :  { %v10616_v6 = vadd.f32 %v10614_v27, %v20476_v4  ;;  %v10627_v54 = vadd.f32 %v10625_v13, %v20478_v34  ;;  %v10644_v53 = vadd.f32 %v10642_v38, %v10389_v18 }
 0xd61   :  { %v10638_v11 = vadd.f32 %v10636_v61, %v10387_v33 }
 0xd62   :  { %v11781_v62 = vmul.f32 -1.442695, %v10616_v6  ;;  %v11782_v45 = vmul.f32 -1.442695, %v10627_v54  ;;  %v11783_v41 = vmul.f32 -1.442695, %v10644_v53 }
 0xd64   :  { %14617 = vpow2.f32 %v11781_v62 }
 0xd65   :  { %14619 = vpow2.f32 %v11782_v45 }
 0xd66   :  { %14621 = vpow2.f32 %v11783_v41 }
 0xd67   :  { %14623 = vtanh.f32 %v10638_v11 }
 0xd71   :  { %v14618_v26 = vpop.eup %14617 }
 0xd72   :  { %v14620_v15 = vpop.eup %14619  ;;  %v10620_v46 = vadd.f32 1.0, %v14618_v26 }
 0xd73   :  { %v10631_v12 = vadd.f32 1.0, %v14620_v15  ;;  %v14622_v2 = vpop.eup %14621 }
 0xd74   :  { %14625 = vrcp.f32 %v10620_v46  ;;  %v14624_v19 = vpop.eup %14623  ;;  %v10648_v49 = vadd.f32 1.0, %v14622_v2 }
 0xd75   :  { %14627 = vrcp.f32 %v10631_v12 }
 0xd76   :  { %14629 = vrcp.f32 %v10648_v49 }
 0xd81   :  { %v14626_v36 = vpop.eup %14625 }
 0xd82   :  { %v14628_v48 = vpop.eup %14627  ;;  %v10655_v52 = vmul.f32 %v14626_v36, %v14624_v19  ;;  %v10392_v19 = vpop.f32.mrf.mxu1 }
 0xd83   :  { %v10654_v8 = vmul.f32 %v14628_v48, %v10652_v35  ;;  %v14630_v32 = vpop.eup %14629 }
 0xd84   :  { %v10394_v49 = vpop.f32.mrf.mxu1 }
 0xd85   :  { %v10656_v7 = vadd.f32 %v10655_v52, %v10654_v8 }
 0xd87   :  { %14631 = vtanh.f32 %v10656_v7  ;;  %v10703_v54 = vrot.slane %v10656_v7, 4  ;;  %v10395_v7 = vadd.f32 %v10394_v49, %v20490_v9 }
 0xd94   :  { %v14632_v58 = vpop.eup %14631 }
 0xd95   :  { %v10658_v44 = vmul.f32 %v14632_v58, %v14630_v32 }
 0xd97   :  { %v10659_v24 = vmul.f32 %v20499_v55, %v10658_v44  ;;  %v10393_v44 = vadd.f32 %v10392_v19, %v20484_v22 }
 0xd99   :  { %v10660_v29 = vsel %vm10454_vm6, %v10659_v24, 0.0 }
 0xd9a   :  { %10661 = vadd.xlane.f32.xlu0 %v10660_v29 }
 0xe23   :  { %v10662_v59 = vpop.xlane.xlu0 %10661 }
 0xe24   :  { %v10663_v43 = vmul.f32 %v10662_v59, %v20460_v1  ;;  %v10674_v39 = vmul.f32 %v10662_v59, %v20462_v3  ;;  %v10691_v51 = vmul.f32 %v10662_v59, %v20486_v60  ;;  %v10685_v20 = vmul.f32 %v10662_v59, %v20480_v56 }
 0xe26   :  { %v10665_v16 = vrot.slane %v10663_v43, 4  ;;  %v10676_v63 = vrot.slane %v10674_v39, 4  ;;  %v10693_v10 = vrot.slane %v10691_v51, 4  ;;  %v10687_v23 = vrot.slane %v10685_v20, 4 }
 0xe28   :  { %v10667_v25 = vadd.f32 %v10665_v16, %v20476_v4  ;;  %v10678_v50 = vadd.f32 %v10676_v63, %v20478_v34  ;;  %v10695_v5 = vadd.f32 %v10693_v10, %v10389_v18  ;;  %v10689_v21 = vadd.f32 %v10687_v23, %v10387_v33 }
 0xe2a   :  { %v11784_v30 = vmul.f32 -1.442695, %v10667_v25  ;;  %v11785_v57 = vmul.f32 -1.442695, %v10678_v50  ;;  %v11786_v40 = vmul.f32 -1.442695, %v10695_v5 }
 0xe2c   :  { %14633 = vpow2.f32 %v11784_v30 }
 0xe2d   :  { %14635 = vpow2.f32 %v11785_v57 }
 0xe2e   :  { %14637 = vpow2.f32 %v11786_v40 }
 0xe2f   :  { %14639 = vtanh.f32 %v10689_v21 }
 0xe39   :  { %v14634_v28 = vpop.eup %14633 }
 0xe3a   :  { %v14636_v37 = vpop.eup %14635  ;;  %v10671_v27 = vadd.f32 1.0, %v14634_v28 }
 0xe3b   :  { %v10682_v4 = vadd.f32 1.0, %v14636_v37  ;;  %v14638_v34 = vpop.eup %14637 }
 0xe3c   :  { %14641 = vrcp.f32 %v10671_v27  ;;  %v14640_v13 = vpop.eup %14639  ;;  %v10699_v62 = vadd.f32 1.0, %v14638_v34 }
 0xe3d   :  { %14643 = vrcp.f32 %v10682_v4 }
 0xe3e   :  { %14645 = vrcp.f32 %v10699_v62 }
 0xe49   :  { %v14642_v6 = vpop.eup %14641 }
 0xe4a   :  { %v14644_v17 = vpop.eup %14643  ;;  %v10706_v45 = vmul.f32 %v14642_v6, %v14640_v13 }
 0xe4b   :  { %v10705_v14 = vmul.f32 %v14644_v17, %v10703_v54  ;;  %v14646_v38 = vpop.eup %14645 }
 0xe4d   :  { %v10707_v42 = vadd.f32 %v10706_v45, %v10705_v14 }
 0xe4f   :  { %14647 = vtanh.f32 %v10707_v42  ;;  %v10754_v30 = vrot.slane %v10707_v42, 4 }
 0xe5c   :  { %v14648_v0 = vpop.eup %14647 }
 0xe5d   :  { %v10709_v18 = vmul.f32 %v14648_v0, %v14646_v38 }
 0xe5f   :  { %v10710_v53 = vmul.f32 %v20499_v55, %v10709_v18 }
 0xe61   :  { %v10711_v61 = vsel %vm10506_vm7, %v10710_v53, 0.0 }
 0xe62   :  { %10712 = vadd.xlane.f32.xlu1 %v10711_v61 }
 0xeeb   :  { %v10713_v33 = vpop.xlane.xlu1 %10712 }
 0xeec   :  { %v10714_v41 = vmul.f32 %v10713_v33, %v20460_v1  ;;  %v10725_v11 = vmul.f32 %v10713_v33, %v20462_v3  ;;  %v10818_v26 = vsel %vm10454_vm6, %v10662_v59, %v10713_v33  ;;  %v10742_v48 = vmul.f32 %v10713_v33, %v20486_v60 }
 0xeed   :  { %10823 = vst.msk [vmem:[%s20597_s12 + $0x10] sm:$0xff] %vm10820_vm8, %v10818_v26  ;;  %v10736_v8 = vmul.f32 %v10713_v33, %v20480_v56 }
 0xeee   :  { %v10716_v15 = vrot.slane %v10714_v41, 4  ;;  %v10727_v46 = vrot.slane %v10725_v11, 4  ;;  %v10744_v52 = vrot.slane %v10742_v48, 4 }
 0xeef   :  { %v10738_v58 = vrot.slane %v10736_v8, 4 }
 0xef0   :  { %v10718_v12 = vadd.f32 %v10716_v15, %v20482_v47  ;;  %v10729_v2 = vadd.f32 %v10727_v46, %v20488_v31  ;;  %v10746_v32 = vadd.f32 %v10744_v52, %v10395_v7 }
 0xef1   :  { %v10740_v29 = vadd.f32 %v10738_v58, %v10393_v44 }
 0xef2   :  { %v11787_v36 = vmul.f32 -1.442695, %v10718_v12  ;;  %v11788_v35 = vmul.f32 -1.442695, %v10729_v2  ;;  %v11789_v24 = vmul.f32 -1.442695, %v10746_v32 }
 0xef4   :  { %14649 = vpow2.f32 %v11787_v36 }
 0xef5   :  { %14651 = vpow2.f32 %v11788_v35 }
 0xef6   :  { %14653 = vpow2.f32 %v11789_v24 }
 0xef7   :  { %14655 = vtanh.f32 %v10740_v29 }
 0xf01   :  { %v14650_v59 = vpop.eup %14649 }
 0xf02   :  { %v14652_v43 = vpop.eup %14651  ;;  %v10722_v39 = vadd.f32 1.0, %v14650_v59 }
 0xf03   :  { %v10733_v16 = vadd.f32 1.0, %v14652_v43  ;;  %v14654_v63 = vpop.eup %14653 }
 0xf04   :  { %14657 = vrcp.f32 %v10722_v39  ;;  %v14656_v25 = vpop.eup %14655  ;;  %v10750_v9 = vadd.f32 1.0, %v14654_v63 }
 0xf05   :  { %14659 = vrcp.f32 %v10733_v16 }
 0xf06   :  { %14661 = vrcp.f32 %v10750_v9 }
 0xf11   :  { %v14658_v50 = vpop.eup %14657 }
 0xf12   :  { %v14660_v57 = vpop.eup %14659  ;;  %v10757_v51 = vmul.f32 %v14658_v50, %v14656_v25 }
 0xf13   :  { %v10756_v10 = vmul.f32 %v14660_v57, %v10754_v30  ;;  %v14662_v22 = vpop.eup %14661 }
 0xf15   :  { %v10758_v20 = vadd.f32 %v10757_v51, %v10756_v10 }
 0xf17   :  { %14663 = vtanh.f32 %v10758_v20  ;;  %v10805_v33 = vrot.slane %v10758_v20, 4 }
 0xf24   :  { %v14664_v5 = vpop.eup %14663 }
 0xf25   :  { %v10760_v23 = vmul.f32 %v14664_v5, %v14662_v22 }
 0xf27   :  { %v10761_v40 = vmul.f32 %v20499_v55, %v10760_v23 }
 0xf29   :  { %v10762_v21 = vsel %vm10454_vm6, %v10761_v40, 0.0 }
 0xf2a   :  { %10763 = vadd.xlane.f32.xlu0 %v10762_v21 }
 0xfb3   :  { %v10764_v28 = vpop.xlane.xlu0 %10763 }
 0xfb4   :  { %v10765_v37 = vmul.f32 %v10764_v28, %v20460_v1  ;;  %v10776_v27 = vmul.f32 %v10764_v28, %v20462_v3  ;;  %v10793_v62 = vmul.f32 %v10764_v28, %v20486_v60  ;;  %v10787_v14 = vmul.f32 %v10764_v28, %v20480_v56 }
 0xfb6   :  { %v10767_v4 = vrot.slane %v10765_v37, 4  ;;  %v10778_v34 = vrot.slane %v10776_v27, 4  ;;  %v10795_v45 = vrot.slane %v10793_v62, 4  ;;  %v10789_v38 = vrot.slane %v10787_v14, 4 }
 0xfb8   :  { %v10769_v13 = vadd.f32 %v10767_v4, %v20482_v47  ;;  %v10780_v6 = vadd.f32 %v10778_v34, %v20488_v31  ;;  %v10797_v42 = vadd.f32 %v10795_v45, %v10395_v7  ;;  %v10791_v0 = vadd.f32 %v10789_v38, %v10393_v44 }
 0xfba   :  { %v11790_v54 = vmul.f32 -1.442695, %v10769_v13  ;;  %v11791_v17 = vmul.f32 -1.442695, %v10780_v6  ;;  %v11792_v1 = vmul.f32 -1.442695, %v10797_v42 }
 0xfbc   :  { %14665 = vpow2.f32 %v11790_v54 }
 0xfbd   :  { %14667 = vpow2.f32 %v11791_v17 }
 0xfbe   :  { %14669 = vpow2.f32 %v11792_v1 }
 0xfbf   :  { %14671 = vtanh.f32 %v10791_v0 }
 0xfc9   :  { %v14666_v3 = vpop.eup %14665 }
 0xfca   :  { %v14668_v18 = vpop.eup %14667  ;;  %v10773_v53 = vadd.f32 1.0, %v14666_v3 }
 0xfcb   :  { %v10784_v47 = vadd.f32 1.0, %v14668_v18  ;;  %v14670_v31 = vpop.eup %14669 }
 0xfcc   :  { %14673 = vrcp.f32 %v10773_v53  ;;  %v14672_v61 = vpop.eup %14671  ;;  %v10801_v11 = vadd.f32 1.0, %v14670_v31 }
 0xfcd   :  { %14675 = vrcp.f32 %v10784_v47 }
 0xfce   :  { %14677 = vrcp.f32 %v10801_v11 }
 0xfd9   :  { %v14674_v60 = vpop.eup %14673 }
 0xfda   :  { %v14676_v41 = vpop.eup %14675  ;;  %v10808_v26 = vmul.f32 %v14674_v60, %v14672_v61 }
 0xfdb   :  { %v10807_v56 = vmul.f32 %v14676_v41, %v10805_v33  ;;  %v14678_v46 = vpop.eup %14677 }
 0xfdd   :  { %v10809_v15 = vadd.f32 %v10808_v26, %v10807_v56 }
 0xfdf   :  { %14679 = vtanh.f32 %v10809_v15 }
 0xfec   :  { %v14680_v12 = vpop.eup %14679 }
 0xfed   :  { %v10811_v2 = vmul.f32 %v14680_v12, %v14678_v46 }
 0xfef   :  { %v10812_v19 = vmul.f32 %v20499_v55, %v10811_v2 }
 0xff1   :  { %v10813_v36 = vsel %vm10506_vm7, %v10812_v19, 0.0 }
 0xff2   :  { %10814 = vadd.xlane.f32.xlu1 %v10813_v36 }
0x107b   :  { %v10815_v35 = vpop.xlane.xlu1 %10814 }
0x107c   :  { %v10819_v48 = vsel %vm10454_vm6, %v10764_v28, %v10815_v35 }
0x107d   :  { %10824 = vst.msk [vmem:[%s20597_s12 + $0x18] sm:$0xff] %vm10820_vm8, %v10819_v48 }

</bundles_post_ra>
